<compile_context>
chip_gen: v7x
topology: tpu7x:2x2x1
jax: 0.10.0
libtpu: 0.0.40
codegen_flags: <defaults>
</compile_context>

<pallas_src>
import jax
import jax.numpy as jnp
from jax import lax
from jax.experimental import pallas as pl
from jax.experimental.pallas import tpu as pltpu

_HIGH = jax.lax.Precision.HIGHEST  # reference only


def _round_up(v, m):
    return ((v + m - 1) // m) * m


def _build_taps(rate):
    """25 distinct (dy, dx) offsets: shared center tap + 8 per dilated branch."""
    taps = [(0, 0)]
    for d in (6 * rate, 12 * rate, 18 * rate):
        for ky in range(3):
            for kx in range(3):
                if ky == 1 and kx == 1:
                    continue
                taps.append(((ky - 1) * d, (kx - 1) * d))
    return tuple(taps)


# ----------------------------------------------------------------------------
# Pallas kernel
# ----------------------------------------------------------------------------
def make_aspp_kernel(H, W, Cin, Cout, pada, taps):
    HW = H * W
    T = len(taps)
    Hs = H + 2 * pada
    Ws = W + 2 * pada

    def kernel(x_ref,
               wsp_ref, tsp_ref,              # fused spatial conv weight/shift
               ns_ref, nt_ref, nw_ref,        # NAM params, branches 1-4
               wcsp_ref,                      # conv_cat weight, branches 1-4
               w5_ref, t5_ref,                # global-pool branch 1x1 conv
               ns5_ref, nt5_ref, nw5_ref,     # NAM params, branch 5
               wc5_ref,                       # conv_cat weight, branch 5
               tc_ref,                        # conv_cat shift
               o_ref,
               xpad_ref):                     # zero-halo VMEM scratch

        # Zero the halo and copy the real image into the (sublane-aligned)
        # center.  Unconditional so it stays correct under megacore splits.
        xpad_ref[...] = jnp.zeros((Hs, Ws, Cin), jnp.float32)
        x = x_ref[0]                                              # (H, W, Cin)
        xpad_ref[pada:pada + H, pada:pada + W, :] = x

        # im2col over the 25 distinct dilated taps (static window loads), then
        # ONE MXU matmul computes branches 1-4 simultaneously.
        cols = [x] + [xpad_ref[pada + dy:pada + dy + H,
                               pada + dx:pada + dx + W, :]
                      for (dy, dx) in taps[1:]]
        xcol = jnp.concatenate(cols, axis=-1).reshape(HW, T * Cin)

        y = jnp.dot(xcol, wsp_ref[...], preferred_element_type=jnp.float32)
        y = jnp.maximum(y + tsp_ref[...], 0.0)                    # (HW, 4*Cout)

        # NAM channel attention on the fused activations (the (HW, 5*Cout)
        # concat is never materialized; per-branch params pre-sliced in wrapper).
        att = jax.nn.sigmoid((y * ns_ref[...] + nt_ref[...]) * nw_ref[...]) * y

        # conv_cat contribution of branches 1-4 (BN scale folded into weight).
        out = jnp.dot(att, wcsp_ref[...], preferred_element_type=jnp.float32)

        # Branch 5: global average pool -> 1x1 conv -> BN -> ReLU -> NAM gate
        # -> conv_cat.  Spatially constant => a single (1, Cout) vector.
        # TODO(synk): `StripPooling(x, (2, 3), ...)` is not defined in the
        # provided source; implemented as global average pooling over (H, W)
        # (the classical ASPP image-pooling branch).
        gsum = jnp.sum(jnp.sum(x, axis=0), axis=0, keepdims=True)  # (1, Cin)
        g = jnp.dot(gsum * (1.0 / HW), w5_ref[...],
                    preferred_element_type=jnp.float32) + t5_ref[...]
        g = jnp.maximum(g, 0.0)                                    # (1, Cout)
        att5 = jax.nn.sigmoid((g * ns5_ref[...] + nt5_ref[...]) * nw5_ref[...]) * g
        c5 = jnp.dot(att5, wc5_ref[...], preferred_element_type=jnp.float32)

        out = jnp.maximum(out + (c5 + tc_ref[...]), 0.0)           # (HW, Cout)
        o_ref[...] = out.reshape(1, H, W, Cout).astype(o_ref.dtype)

    return kernel


# ----------------------------------------------------------------------------
# wrapper: parameter folding / fusion + pallas_call
# ----------------------------------------------------------------------------
_FUSED_ORDER = ("w_sp", "t_sp", "nam_s_sp", "nam_t_sp", "nam_w_sp", "wc_sp",
                "w5", "t5", "nam_s5", "nam_t5", "nam_w5", "wc_5", "tc")


def _fuse_params(p):
    """Fold conv bias + BN into weights/shifts and fuse the four spatial
    branches into one (25*Cin, 4*Cout) weight matching the in-kernel im2col."""
    Cin, Cout = p["w1"].shape

    def fold(w, b, s, t):
        return w * s, b * s + t

    w1f, t1f = fold(p["w1"], p["b1"], p["s1"], p["t1"])
    w2f, t2f = fold(p["w2"], p["b2"], p["s2"], p["t2"])
    w3f, t3f = fold(p["w3"], p["b3"], p["s3"], p["t3"])
    w4f, t4f = fold(p["w4"], p["b4"], p["s4"], p["t4"])
    w5f, t5f = fold(p["w5"], p["b5"], p["s5"], p["t5"])

    # Fused spatial weight, rows ordered tap-major to match the kernel im2col.
    zeros = jnp.zeros((Cin, Cout), jnp.float32)
    blocks = [jnp.concatenate([w1f, w2f[1, 1], w3f[1, 1], w4f[1, 1]], axis=-1)]
    for bi, wbf in enumerate((w2f, w3f, w4f)):
        for ky in range(3):
            for kx in range(3):
                if ky == 1 and kx == 1:
                    continue
                row = [zeros, zeros, zeros, zeros]
                row[bi + 1] = wbf[ky, kx]
                blocks.append(jnp.concatenate(row, axis=-1))
    w_sp = jnp.concatenate(blocks, axis=0)                     # (25*Cin, 4*Cout)
    t_sp = jnp.concatenate([t1f, t2f, t3f, t4f], axis=-1)      # (1, 4*Cout)

    # conv_cat: fold BN scale into the 1x1 weight; split branch 1-4 / 5 parts.
    wcf = p["wc"] * p["sc"]
    tc = p["bc"] * p["sc"] + p["tc"]
    C4 = 4 * Cout

    return {
        "w_sp": w_sp, "t_sp": t_sp,
        "nam_s_sp": p["nam_s"][:, :C4], "nam_t_sp": p["nam_t"][:, :C4],
        "nam_w_sp": p["nam_w"][:, :C4],
        "wc_sp": wcf[:C4, :],
        "w5": w5f, "t5": t5f,
        "nam_s5": p["nam_s"][:, C4:], "nam_t5": p["nam_t"][:, C4:],
        "nam_w5": p["nam_w"][:, C4:],
        "wc_5": wcf[C4:, :],
        "tc": tc,
    }


def aspp_pallas(x_nchw, params, rate=1):
    B, Cin, H, W = x_nchw.shape
    Cout = params["w1"].shape[1]
    taps = _build_taps(rate)
    # sublane-aligned halo (>= 18*rate) so the in-kernel center store is aligned
    pada = _round_up(18 * rate, 8)
    Hs, Ws = H + 2 * pada, W + 2 * pada

    x = jnp.transpose(x_nchw, (0, 2, 3, 1))                    # NCHW -> NHWC
    fused = _fuse_params(params)
    plist = [fused[k] for k in _FUSED_ORDER]

    def rep_spec(shape):
        nd = len(shape)
        return pl.BlockSpec(shape, lambda b, nd=nd: (0,) * nd)

    in_specs = ([pl.BlockSpec((1, H, W, Cin), lambda b: (b, 0, 0, 0))]
                + [rep_spec(p.shape) for p in plist])
    out_specs = pl.BlockSpec((1, H, W, Cout), lambda b: (b, 0, 0, 0))

    kernel = make_aspp_kernel(H, W, Cin, Cout, pada, taps)

    # TODO(synk): at production scale (large H*W*Cin on v7x's 64 MiB VMEM) add a
    # spatial row-tile grid axis with a halo window (manual DMA) and precompute
    # the global-pool mean in the wrapper; unnecessary at these shapes.
    out_nhwc = pl.pallas_call(
        kernel,
        out_shape=jax.ShapeDtypeStruct((B, H, W, Cout), jnp.float32),
        grid_spec=pltpu.PrefetchScalarGridSpec(
            num_scalar_prefetch=0,
            grid=(B,),
            in_specs=in_specs,
            out_specs=out_specs,
            scratch_shapes=[pltpu.VMEM((Hs, Ws, Cin), jnp.float32)]),
        compiler_params=pltpu.CompilerParams(
            dimension_semantics=("parallel",),
            vmem_limit_bytes=32 * 1024 * 1024),
    )(x, *plist)

    return jnp.transpose(out_nhwc, (0, 3, 1, 2))               # NHWC -> NCHW


# ----------------------------------------------------------------------------
# deterministic synthetic parameters (BatchNorms folded to scale/shift)
# ----------------------------------------------------------------------------
def init_params(key, Cin, Cout):
    C5 = 5 * Cout
    keys = iter(jax.random.split(key, 64))

    def conv_w(shape, scale=0.2):
        return scale * jax.random.normal(next(keys), shape, jnp.float32)

    def bias(C, scale=0.1):
        return scale * jax.random.normal(next(keys), (1, C), jnp.float32)

    def bn_fold(C):
        gamma = 1.0 + 0.1 * jax.random.normal(next(keys), (1, C), jnp.float32)
        beta = 0.1 * jax.random.normal(next(keys), (1, C), jnp.float32)
        mean = 0.1 * jax.random.normal(next(keys), (1, C), jnp.float32)
        var = 1.0 + 0.1 * jax.random.uniform(next(keys), (1, C), jnp.float32)
        eps = 1e-5
        s = gamma / jnp.sqrt(var + eps)
        t = beta - mean * s
        return s, t, gamma

    p = {}
    p["w1"] = conv_w((Cin, Cout)); p["b1"] = bias(Cout)
    p["s1"], p["t1"], _ = bn_fold(Cout)
    for name in ("2", "3", "4"):
        p["w" + name] = conv_w((3, 3, Cin, Cout)); p["b" + name] = bias(Cout)
        p["s" + name], p["t" + name], _ = bn_fold(Cout)
    p["w5"] = conv_w((Cin, Cout)); p["b5"] = bias(Cout)
    p["s5"], p["t5"], _ = bn_fold(Cout)

    nam_s, nam_t, nam_gamma = bn_fold(C5)
    p["nam_s"], p["nam_t"] = nam_s, nam_t
    p["nam_w"] = jnp.abs(nam_gamma) / jnp.sum(jnp.abs(nam_gamma))

    p["wc"] = conv_w((C5, Cout)); p["bc"] = bias(Cout)
    p["sc"], p["tc"], _ = bn_fold(Cout)
    return p


# ----------------------------------------------------------------------------
# pure-JAX reference (raw, unfolded params; HIGHEST precision as gold standard)
# ----------------------------------------------------------------------------
def aspp_reference(x_nchw, p, rate=1):
    B, Cin, H, W = x_nchw.shape
    Cout = p["w1"].shape[1]
    x = jnp.transpose(x_nchw, (0, 2, 3, 1))                    # NHWC

    def bnrelu(y, b, s, t):
        return jnp.maximum((y + b) * s + t, 0.0)

    def dot_c(a, w):
        return jnp.einsum("bhwc,co->bhwo", a, w, precision=_HIGH)

    y1 = bnrelu(dot_c(x, p["w1"]), p["b1"], p["s1"], p["t1"])

    def br3(w, b, s, t, d):
        y = lax.conv_general_dilated(
            x, w, window_strides=(1, 1), padding=[(d, d), (d, d)],
            rhs_dilation=(d, d),
            dimension_numbers=("NHWC", "HWIO", "NHWC"), precision=_HIGH)
        return bnrelu(y, b, s, t)

    y2 = br3(p["w2"], p["b2"], p["s2"], p["t2"], 6 * rate)
    y3 = br3(p["w3"], p["b3"], p["s3"], p["t3"], 12 * rate)
    y4 = br3(p["w4"], p["b4"], p["s4"], p["t4"], 18 * rate)

    g = jnp.mean(x, axis=(1, 2), keepdims=True)
    g = bnrelu(dot_c(g, p["w5"]), p["b5"], p["s5"], p["t5"])
    y5 = jnp.broadcast_to(g, (B, H, W, Cout))

    cat = jnp.concatenate([y1, y2, y3, y4, y5], axis=-1)
    bn = cat * p["nam_s"] + p["nam_t"]
    att = jax.nn.sigmoid(bn * p["nam_w"]) * cat

    out = bnrelu(dot_c(att, p["wc"]), p["bc"], p["sc"], p["tc"])
    return jnp.transpose(out, (0, 3, 1, 2))


# ----------------------------------------------------------------------------
if __name__ == "__main__":
    B, Cin, Cout, H, W = 2, 4, 8, 16, 16
    rate = 1

    key = jax.random.PRNGKey(0)
    kx_, kp_ = jax.random.split(key)
    x = jax.random.normal(kx_, (B, Cin, H, W), jnp.float32)
    params = init_params(kp_, Cin, Cout)

    out = jax.block_until_ready(aspp_pallas(x, params, rate=rate))
    ref = jax.block_until_ready(aspp_reference(x, params, rate=rate))

    assert out.shape == (B, Cout, H, W), out.shape
    max_err = float(jnp.max(jnp.abs(out - ref)))
    # Kernel matmuls use DEFAULT (bf16-input, f32-accumulate) MXU precision,
    # while the reference is HIGHEST precision -> allow bf16-level abs error.
    assert max_err < 3e-2, f"max abs err = {max_err}"
    print("KERNEL_OK")
</pallas_src>

<mosaic_0001>
module attributes {stable_mosaic.version = 11 : i64} {
  func.func @kernel(%arg0: i32, %arg1: memref<1x16x16x4xf32, #tpu.memory_space<vmem>>, %arg2: memref<100x32xf32, #tpu.memory_space<vmem>>, %arg3: memref<1x32xf32, #tpu.memory_space<vmem>>, %arg4: memref<1x32xf32, #tpu.memory_space<vmem>>, %arg5: memref<1x32xf32, #tpu.memory_space<vmem>>, %arg6: memref<1x32xf32, #tpu.memory_space<vmem>>, %arg7: memref<32x8xf32, #tpu.memory_space<vmem>>, %arg8: memref<4x8xf32, #tpu.memory_space<vmem>>, %arg9: memref<1x8xf32, #tpu.memory_space<vmem>>, %arg10: memref<1x8xf32, #tpu.memory_space<vmem>>, %arg11: memref<1x8xf32, #tpu.memory_space<vmem>>, %arg12: memref<1x8xf32, #tpu.memory_space<vmem>>, %arg13: memref<8x8xf32, #tpu.memory_space<vmem>>, %arg14: memref<1x8xf32, #tpu.memory_space<vmem>>, %arg15: memref<1x16x16x8xf32, #tpu.memory_space<vmem>>, %arg16: memref<64x64x4xf32, #tpu.memory_space<vmem>>) attributes {dimension_semantics = [#tpu.dimension_semantics<parallel>], iteration_bounds = array<i64: 2>, scalar_prefetch = 0 : i64, scratch_operands = 1 : i64, tpu.core_type = #tpu.core_type<tc>, window_params = [{transform_indices = @transform_0, window_bounds = array<i64: 1, 16, 16, 4>}, {pipeline_mode = #tpu.pipeline_mode<synchronous>, transform_indices = @transform_1, window_bounds = array<i64: 100, 32>}, {pipeline_mode = #tpu.pipeline_mode<synchronous>, transform_indices = @transform_2, window_bounds = array<i64: 1, 32>}, {pipeline_mode = #tpu.pipeline_mode<synchronous>, transform_indices = @transform_3, window_bounds = array<i64: 1, 32>}, {pipeline_mode = #tpu.pipeline_mode<synchronous>, transform_indices = @transform_4, window_bounds = array<i64: 1, 32>}, {pipeline_mode = #tpu.pipeline_mode<synchronous>, transform_indices = @transform_5, window_bounds = array<i64: 1, 32>}, {pipeline_mode = #tpu.pipeline_mode<synchronous>, transform_indices = @transform_6, window_bounds = array<i64: 32, 8>}, {pipeline_mode = #tpu.pipeline_mode<synchronous>, transform_indices = @transform_7, window_bounds = array<i64: 4, 8>}, {pipeline_mode = #tpu.pipeline_mode<synchronous>, transform_indices = @transform_8, window_bounds = array<i64: 1, 8>}, {pipeline_mode = #tpu.pipeline_mode<synchronous>, transform_indices = @transform_9, window_bounds = array<i64: 1, 8>}, {pipeline_mode = #tpu.pipeline_mode<synchronous>, transform_indices = @transform_10, window_bounds = array<i64: 1, 8>}, {pipeline_mode = #tpu.pipeline_mode<synchronous>, transform_indices = @transform_11, window_bounds = array<i64: 1, 8>}, {pipeline_mode = #tpu.pipeline_mode<synchronous>, transform_indices = @transform_12, window_bounds = array<i64: 8, 8>}, {pipeline_mode = #tpu.pipeline_mode<synchronous>, transform_indices = @transform_13, window_bounds = array<i64: 1, 8>}, {transform_indices = @transform_14, window_bounds = array<i64: 1, 16, 16, 8>}]} {
    %cst = arith.constant 0.000000e+00 : f32
    %0 = vector.broadcast %cst : f32 to vector<64x64x4xf32>
    %c0 = arith.constant 0 : index
    %c0_0 = arith.constant 0 : index
    %c0_1 = arith.constant 0 : index
    %1 = vector.load %arg16[%c0, %c0_0, %c0_1] : memref<64x64x4xf32, #tpu.memory_space<vmem>>, vector<64x64x4xf32>
    tpu.vector_store %arg16[%c0, %c0_0, %c0_1], %0 {strides = array<i32>} : memref<64x64x4xf32, #tpu.memory_space<vmem>>, vector<64x64x4xf32>,
    %c0_2 = arith.constant 0 : index
    %c0_3 = arith.constant 0 : index
    %c0_4 = arith.constant 0 : index
    %c0_5 = arith.constant 0 : index
    %2 = vector.load %arg1[%c0_2, %c0_3, %c0_4, %c0_5] : memref<1x16x16x4xf32, #tpu.memory_space<vmem>>, vector<1x16x16x4xf32>
    %3 = vector.shape_cast %2 : vector<1x16x16x4xf32> to vector<16x16x4xf32>
    %c24 = arith.constant 24 : index
    %c24_6 = arith.constant 24 : index
    %c0_7 = arith.constant 0 : index
    %4 = vector.load %arg16[%c24, %c24_6, %c0_7] : memref<64x64x4xf32, #tpu.memory_space<vmem>>, vector<16x16x4xf32>
    tpu.vector_store %arg16[%c24, %c24_6, %c0_7], %3 {strides = array<i32>} : memref<64x64x4xf32, #tpu.memory_space<vmem>>, vector<16x16x4xf32>,
    %c18 = arith.constant 18 : index
    %c18_8 = arith.constant 18 : index
    %c0_9 = arith.constant 0 : index
    %5 = vector.load %arg16[%c18, %c18_8, %c0_9] : memref<64x64x4xf32, #tpu.memory_space<vmem>>, vector<16x16x4xf32>
    %c18_10 = arith.constant 18 : index
    %c24_11 = arith.constant 24 : index
    %c0_12 = arith.constant 0 : index
    %6 = vector.load %arg16[%c18_10, %c24_11, %c0_12] : memref<64x64x4xf32, #tpu.memory_space<vmem>>, vector<16x16x4xf32>
    %c18_13 = arith.constant 18 : index
    %c30 = arith.constant 30 : index
    %c0_14 = arith.constant 0 : index
    %7 = vector.load %arg16[%c18_13, %c30, %c0_14] : memref<64x64x4xf32, #tpu.memory_space<vmem>>, vector<16x16x4xf32>
    %c24_15 = arith.constant 24 : index
    %c18_16 = arith.constant 18 : index
    %c0_17 = arith.constant 0 : index
    %8 = vector.load %arg16[%c24_15, %c18_16, %c0_17] : memref<64x64x4xf32, #tpu.memory_space<vmem>>, vector<16x16x4xf32>
    %c24_18 = arith.constant 24 : index
    %c30_19 = arith.constant 30 : index
    %c0_20 = arith.constant 0 : index
    %9 = vector.load %arg16[%c24_18, %c30_19, %c0_20] : memref<64x64x4xf32, #tpu.memory_space<vmem>>, vector<16x16x4xf32>
    %c30_21 = arith.constant 30 : index
    %c18_22 = arith.constant 18 : index
    %c0_23 = arith.constant 0 : index
    %10 = vector.load %arg16[%c30_21, %c18_22, %c0_23] : memref<64x64x4xf32, #tpu.memory_space<vmem>>, vector<16x16x4xf32>
    %c30_24 = arith.constant 30 : index
    %c24_25 = arith.constant 24 : index
    %c0_26 = arith.constant 0 : index
    %11 = vector.load %arg16[%c30_24, %c24_25, %c0_26] : memref<64x64x4xf32, #tpu.memory_space<vmem>>, vector<16x16x4xf32>
    %c30_27 = arith.constant 30 : index
    %c30_28 = arith.constant 30 : index
    %c0_29 = arith.constant 0 : index
    %12 = vector.load %arg16[%c30_27, %c30_28, %c0_29] : memref<64x64x4xf32, #tpu.memory_space<vmem>>, vector<16x16x4xf32>
    %c12 = arith.constant 12 : index
    %c12_30 = arith.constant 12 : index
    %c0_31 = arith.constant 0 : index
    %13 = vector.load %arg16[%c12, %c12_30, %c0_31] : memref<64x64x4xf32, #tpu.memory_space<vmem>>, vector<16x16x4xf32>
    %c12_32 = arith.constant 12 : index
    %c24_33 = arith.constant 24 : index
    %c0_34 = arith.constant 0 : index
    %14 = vector.load %arg16[%c12_32, %c24_33, %c0_34] : memref<64x64x4xf32, #tpu.memory_space<vmem>>, vector<16x16x4xf32>
    %c12_35 = arith.constant 12 : index
    %c36 = arith.constant 36 : index
    %c0_36 = arith.constant 0 : index
    %15 = vector.load %arg16[%c12_35, %c36, %c0_36] : memref<64x64x4xf32, #tpu.memory_space<vmem>>, vector<16x16x4xf32>
    %c24_37 = arith.constant 24 : index
    %c12_38 = arith.constant 12 : index
    %c0_39 = arith.constant 0 : index
    %16 = vector.load %arg16[%c24_37, %c12_38, %c0_39] : memref<64x64x4xf32, #tpu.memory_space<vmem>>, vector<16x16x4xf32>
    %c24_40 = arith.constant 24 : index
    %c36_41 = arith.constant 36 : index
    %c0_42 = arith.constant 0 : index
    %17 = vector.load %arg16[%c24_40, %c36_41, %c0_42] : memref<64x64x4xf32, #tpu.memory_space<vmem>>, vector<16x16x4xf32>
    %c36_43 = arith.constant 36 : index
    %c12_44 = arith.constant 12 : index
    %c0_45 = arith.constant 0 : index
    %18 = vector.load %arg16[%c36_43, %c12_44, %c0_45] : memref<64x64x4xf32, #tpu.memory_space<vmem>>, vector<16x16x4xf32>
    %c36_46 = arith.constant 36 : index
    %c24_47 = arith.constant 24 : index
    %c0_48 = arith.constant 0 : index
    %19 = vector.load %arg16[%c36_46, %c24_47, %c0_48] : memref<64x64x4xf32, #tpu.memory_space<vmem>>, vector<16x16x4xf32>
    %c36_49 = arith.constant 36 : index
    %c36_50 = arith.constant 36 : index
    %c0_51 = arith.constant 0 : index
    %20 = vector.load %arg16[%c36_49, %c36_50, %c0_51] : memref<64x64x4xf32, #tpu.memory_space<vmem>>, vector<16x16x4xf32>
    %c6 = arith.constant 6 : index
    %c6_52 = arith.constant 6 : index
    %c0_53 = arith.constant 0 : index
    %21 = vector.load %arg16[%c6, %c6_52, %c0_53] : memref<64x64x4xf32, #tpu.memory_space<vmem>>, vector<16x16x4xf32>
    %c6_54 = arith.constant 6 : index
    %c24_55 = arith.constant 24 : index
    %c0_56 = arith.constant 0 : index
    %22 = vector.load %arg16[%c6_54, %c24_55, %c0_56] : memref<64x64x4xf32, #tpu.memory_space<vmem>>, vector<16x16x4xf32>
    %c6_57 = arith.constant 6 : index
    %c42 = arith.constant 42 : index
    %c0_58 = arith.constant 0 : index
    %23 = vector.load %arg16[%c6_57, %c42, %c0_58] : memref<64x64x4xf32, #tpu.memory_space<vmem>>, vector<16x16x4xf32>
    %c24_59 = arith.constant 24 : index
    %c6_60 = arith.constant 6 : index
    %c0_61 = arith.constant 0 : index
    %24 = vector.load %arg16[%c24_59, %c6_60, %c0_61] : memref<64x64x4xf32, #tpu.memory_space<vmem>>, vector<16x16x4xf32>
    %c24_62 = arith.constant 24 : index
    %c42_63 = arith.constant 42 : index
    %c0_64 = arith.constant 0 : index
    %25 = vector.load %arg16[%c24_62, %c42_63, %c0_64] : memref<64x64x4xf32, #tpu.memory_space<vmem>>, vector<16x16x4xf32>
    %c42_65 = arith.constant 42 : index
    %c6_66 = arith.constant 6 : index
    %c0_67 = arith.constant 0 : index
    %26 = vector.load %arg16[%c42_65, %c6_66, %c0_67] : memref<64x64x4xf32, #tpu.memory_space<vmem>>, vector<16x16x4xf32>
    %c42_68 = arith.constant 42 : index
    %c24_69 = arith.constant 24 : index
    %c0_70 = arith.constant 0 : index
    %27 = vector.load %arg16[%c42_68, %c24_69, %c0_70] : memref<64x64x4xf32, #tpu.memory_space<vmem>>, vector<16x16x4xf32>
    %c42_71 = arith.constant 42 : index
    %c42_72 = arith.constant 42 : index
    %c0_73 = arith.constant 0 : index
    %28 = vector.load %arg16[%c42_71, %c42_72, %c0_73] : memref<64x64x4xf32, #tpu.memory_space<vmem>>, vector<16x16x4xf32>
    %29 = tpu.concatenate %3, %5, %6, %7, %8, %9, %10, %11, %12, %13, %14, %15, %16, %17, %18, %19 in 2 : vector<16x16x4xf32>, vector<16x16x4xf32>, vector<16x16x4xf32>, vector<16x16x4xf32>, vector<16x16x4xf32>, vector<16x16x4xf32>, vector<16x16x4xf32>, vector<16x16x4xf32>, vector<16x16x4xf32>, vector<16x16x4xf32>, vector<16x16x4xf32>, vector<16x16x4xf32>, vector<16x16x4xf32>, vector<16x16x4xf32>, vector<16x16x4xf32>, vector<16x16x4xf32> -> vector<16x16x64xf32>
    %30 = tpu.concatenate %20, %21, %22, %23, %24, %25, %26, %27, %28 in 2 : vector<16x16x4xf32>, vector<16x16x4xf32>, vector<16x16x4xf32>, vector<16x16x4xf32>, vector<16x16x4xf32>, vector<16x16x4xf32>, vector<16x16x4xf32>, vector<16x16x4xf32>, vector<16x16x4xf32> -> vector<16x16x36xf32>
    %31 = tpu.concatenate %29, %30 in 2 : vector<16x16x64xf32>, vector<16x16x36xf32> -> vector<16x16x100xf32>
    %32 = vector.shape_cast %31 : vector<16x16x100xf32> to vector<256x100xf32>
    %c0_74 = arith.constant 0 : index
    %c0_75 = arith.constant 0 : index
    %33 = vector.load %arg2[%c0_74, %c0_75] : memref<100x32xf32, #tpu.memory_space<vmem>>, vector<100x32xf32>
    %cst_76 = arith.constant dense<0.000000e+00> : vector<256x32xf32>
    %34 = tpu.matmul %32, %33, %cst_76 {dimension_numbers = #tpu.dot_dimension_numbers<[1], [0], [0], [1], [0, 0, 1, 1], [], []>} : vector<256x100xf32>, vector<100x32xf32>, vector<256x32xf32> -> vector<256x32xf32>
    %c0_77 = arith.constant 0 : index
    %c0_78 = arith.constant 0 : index
    %35 = vector.load %arg3[%c0_77, %c0_78] : memref<1x32xf32, #tpu.memory_space<vmem>>, vector<1x32xf32>
    %36 = vector.broadcast %35 : vector<1x32xf32> to vector<256x32xf32>
    %37 = arith.addf %34, %36 : vector<256x32xf32>
    %cst_79 = arith.constant 0.000000e+00 : f32
    %38 = vector.broadcast %cst_79 : f32 to vector<256x32xf32>
    %39 = arith.maximumf %37, %38 : vector<256x32xf32>
    %c0_80 = arith.constant 0 : index
    %c0_81 = arith.constant 0 : index
    %40 = vector.load %arg4[%c0_80, %c0_81] : memref<1x32xf32, #tpu.memory_space<vmem>>, vector<1x32xf32>
    %41 = vector.broadcast %40 : vector<1x32xf32> to vector<256x32xf32>
    %42 = arith.mulf %39, %41 : vector<256x32xf32>
    %c0_82 = arith.constant 0 : index
    %c0_83 = arith.constant 0 : index
    %43 = vector.load %arg5[%c0_82, %c0_83] : memref<1x32xf32, #tpu.memory_space<vmem>>, vector<1x32xf32>
    %44 = vector.broadcast %43 : vector<1x32xf32> to vector<256x32xf32>
    %45 = arith.addf %42, %44 : vector<256x32xf32>
    %c0_84 = arith.constant 0 : index
    %c0_85 = arith.constant 0 : index
    %46 = vector.load %arg6[%c0_84, %c0_85] : memref<1x32xf32, #tpu.memory_space<vmem>>, vector<1x32xf32>
    %47 = vector.broadcast %46 : vector<1x32xf32> to vector<256x32xf32>
    %48 = arith.mulf %45, %47 : vector<256x32xf32>
    %49 = arith.negf %48 : vector<256x32xf32>
    %50 = math.exp %49 : vector<256x32xf32>
    %cst_86 = arith.constant 1.000000e+00 : f32
    %51 = vector.broadcast %cst_86 : f32 to vector<256x32xf32>
    %52 = arith.addf %51, %50 : vector<256x32xf32>
    %53 = arith.divf %51, %52 : vector<256x32xf32>
    %54 = arith.mulf %53, %39 : vector<256x32xf32>
    %c0_87 = arith.constant 0 : index
    %c0_88 = arith.constant 0 : index
    %55 = vector.load %arg7[%c0_87, %c0_88] : memref<32x8xf32, #tpu.memory_space<vmem>>, vector<32x8xf32>
    %cst_89 = arith.constant dense<0.000000e+00> : vector<256x8xf32>
    %56 = tpu.matmul %54, %55, %cst_89 {dimension_numbers = #tpu.dot_dimension_numbers<[1], [0], [0], [1], [0, 0, 1, 1], [], []>} : vector<256x32xf32>, vector<32x8xf32>, vector<256x8xf32> -> vector<256x8xf32>
    %cst_90 = arith.constant dense<0.000000e+00> : vector<16x4xf32>
    %57 = vector.multi_reduction <add>, %3, %cst_90 [0] : vector<16x16x4xf32> to vector<16x4xf32>
    %cst_91 = arith.constant dense<0.000000e+00> : vector<4xf32>
    %58 = vector.multi_reduction <add>, %57, %cst_91 [0] : vector<16x4xf32> to vector<4xf32>
    %59 = vector.shape_cast %58 : vector<4xf32> to vector<1x4xf32>
    %cst_92 = arith.constant 3.906250e-03 : f32
    %60 = vector.broadcast %cst_92 : f32 to vector<1x4xf32>
    %61 = arith.mulf %59, %60 : vector<1x4xf32>
    %c0_93 = arith.constant 0 : index
    %c0_94 = arith.constant 0 : index
    %62 = vector.load %arg8[%c0_93, %c0_94] : memref<4x8xf32, #tpu.memory_space<vmem>>, vector<4x8xf32>
    %cst_95 = arith.constant dense<0.000000e+00> : vector<1x8xf32>
    %63 = tpu.matmul %61, %62, %cst_95 {dimension_numbers = #tpu.dot_dimension_numbers<[1], [0], [0], [1], [0, 0, 1, 1], [], []>} : vector<1x4xf32>, vector<4x8xf32>, vector<1x8xf32> -> vector<1x8xf32>
    %c0_96 = arith.constant 0 : index
    %c0_97 = arith.constant 0 : index
    %64 = vector.load %arg9[%c0_96, %c0_97] : memref<1x8xf32, #tpu.memory_space<vmem>>, vector<1x8xf32>
    %65 = arith.addf %63, %64 : vector<1x8xf32>
    %cst_98 = arith.constant 0.000000e+00 : f32
    %66 = vector.broadcast %cst_98 : f32 to vector<1x8xf32>
    %67 = arith.maximumf %65, %66 : vector<1x8xf32>
    %c0_99 = arith.constant 0 : index
    %c0_100 = arith.constant 0 : index
    %68 = vector.load %arg10[%c0_99, %c0_100] : memref<1x8xf32, #tpu.memory_space<vmem>>, vector<1x8xf32>
    %69 = arith.mulf %67, %68 : vector<1x8xf32>
    %c0_101 = arith.constant 0 : index
    %c0_102 = arith.constant 0 : index
    %70 = vector.load %arg11[%c0_101, %c0_102] : memref<1x8xf32, #tpu.memory_space<vmem>>, vector<1x8xf32>
    %71 = arith.addf %69, %70 : vector<1x8xf32>
    %c0_103 = arith.constant 0 : index
    %c0_104 = arith.constant 0 : index
    %72 = vector.load %arg12[%c0_103, %c0_104] : memref<1x8xf32, #tpu.memory_space<vmem>>, vector<1x8xf32>
    %73 = arith.mulf %71, %72 : vector<1x8xf32>
    %74 = arith.negf %73 : vector<1x8xf32>
    %75 = math.exp %74 : vector<1x8xf32>
    %cst_105 = arith.constant 1.000000e+00 : f32
    %76 = vector.broadcast %cst_105 : f32 to vector<1x8xf32>
    %77 = arith.addf %76, %75 : vector<1x8xf32>
    %78 = arith.divf %76, %77 : vector<1x8xf32>
    %79 = arith.mulf %78, %67 : vector<1x8xf32>
    %c0_106 = arith.constant 0 : index
    %c0_107 = arith.constant 0 : index
    %80 = vector.load %arg13[%c0_106, %c0_107] : memref<8x8xf32, #tpu.memory_space<vmem>>, vector<8x8xf32>
    %cst_108 = arith.constant dense<0.000000e+00> : vector<1x8xf32>
    %81 = tpu.matmul %79, %80, %cst_108 {dimension_numbers = #tpu.dot_dimension_numbers<[1], [0], [0], [1], [0, 0, 1, 1], [], []>} : vector<1x8xf32>, vector<8x8xf32>, vector<1x8xf32> -> vector<1x8xf32>
    %c0_109 = arith.constant 0 : index
    %c0_110 = arith.constant 0 : index
    %82 = vector.load %arg14[%c0_109, %c0_110] : memref<1x8xf32, #tpu.memory_space<vmem>>, vector<1x8xf32>
    %83 = arith.addf %81, %82 : vector<1x8xf32>
    %84 = vector.broadcast %83 : vector<1x8xf32> to vector<256x8xf32>
    %85 = arith.addf %56, %84 : vector<256x8xf32>
    %cst_111 = arith.constant 0.000000e+00 : f32
    %86 = vector.broadcast %cst_111 : f32 to vector<256x8xf32>
    %87 = arith.maximumf %85, %86 : vector<256x8xf32>
    %88 = vector.shape_cast %87 : vector<256x8xf32> to vector<1x16x16x8xf32>
    %c0_112 = arith.constant 0 : index
    %c0_113 = arith.constant 0 : index
    %c0_114 = arith.constant 0 : index
    %c0_115 = arith.constant 0 : index
    %89 = vector.load %arg15[%c0_112, %c0_113, %c0_114, %c0_115] : memref<1x16x16x8xf32, #tpu.memory_space<vmem>>, vector<1x16x16x8xf32>
    tpu.vector_store %arg15[%c0_112, %c0_113, %c0_114, %c0_115], %88 {strides = array<i32>} : memref<1x16x16x8xf32, #tpu.memory_space<vmem>>, vector<1x16x16x8xf32>,
    return
  }
  func.func @transform_0(%arg0: i32) -> (i32, i32, i32, i32) {
    %c0_i32 = arith.constant 0 : i32
    %c0_i32_0 = arith.constant 0 : i32
    %c0_i32_1 = arith.constant 0 : i32
    %c0_i32_2 = arith.constant 0 : i32
    return %arg0, %c0_i32, %c0_i32_0, %c0_i32_1 : i32, i32, i32, i32
  }
  func.func @transform_1(%arg0: i32) -> (i32, i32) {
    %c0_i32 = arith.constant 0 : i32
    %c0_i32_0 = arith.constant 0 : i32
    %c0_i32_1 = arith.constant 0 : i32
    return %c0_i32, %c0_i32_0 : i32, i32
  }
  func.func @transform_2(%arg0: i32) -> (i32, i32) {
    %c0_i32 = arith.constant 0 : i32
    %c0_i32_0 = arith.constant 0 : i32
    %c0_i32_1 = arith.constant 0 : i32
    return %c0_i32, %c0_i32_0 : i32, i32
  }
  func.func @transform_3(%arg0: i32) -> (i32, i32) {
    %c0_i32 = arith.constant 0 : i32
    %c0_i32_0 = arith.constant 0 : i32
    %c0_i32_1 = arith.constant 0 : i32
    return %c0_i32, %c0_i32_0 : i32, i32
  }
  func.func @transform_4(%arg0: i32) -> (i32, i32) {
    %c0_i32 = arith.constant 0 : i32
    %c0_i32_0 = arith.constant 0 : i32
    %c0_i32_1 = arith.constant 0 : i32
    return %c0_i32, %c0_i32_0 : i32, i32
  }
  func.func @transform_5(%arg0: i32) -> (i32, i32) {
    %c0_i32 = arith.constant 0 : i32
    %c0_i32_0 = arith.constant 0 : i32
    %c0_i32_1 = arith.constant 0 : i32
    return %c0_i32, %c0_i32_0 : i32, i32
  }
  func.func @transform_6(%arg0: i32) -> (i32, i32) {
    %c0_i32 = arith.constant 0 : i32
    %c0_i32_0 = arith.constant 0 : i32
    %c0_i32_1 = arith.constant 0 : i32
    return %c0_i32, %c0_i32_0 : i32, i32
  }
  func.func @transform_7(%arg0: i32) -> (i32, i32) {
    %c0_i32 = arith.constant 0 : i32
    %c0_i32_0 = arith.constant 0 : i32
    %c0_i32_1 = arith.constant 0 : i32
    return %c0_i32, %c0_i32_0 : i32, i32
  }
  func.func @transform_8(%arg0: i32) -> (i32, i32) {
    %c0_i32 = arith.constant 0 : i32
    %c0_i32_0 = arith.constant 0 : i32
    %c0_i32_1 = arith.constant 0 : i32
    return %c0_i32, %c0_i32_0 : i32, i32
  }
  func.func @transform_9(%arg0: i32) -> (i32, i32) {
    %c0_i32 = arith.constant 0 : i32
    %c0_i32_0 = arith.constant 0 : i32
    %c0_i32_1 = arith.constant 0 : i32
    return %c0_i32, %c0_i32_0 : i32, i32
  }
  func.func @transform_10(%arg0: i32) -> (i32, i32) {
    %c0_i32 = arith.constant 0 : i32
    %c0_i32_0 = arith.constant 0 : i32
    %c0_i32_1 = arith.constant 0 : i32
    return %c0_i32, %c0_i32_0 : i32, i32
  }
  func.func @transform_11(%arg0: i32) -> (i32, i32) {
    %c0_i32 = arith.constant 0 : i32
    %c0_i32_0 = arith.constant 0 : i32
    %c0_i32_1 = arith.constant 0 : i32
    return %c0_i32, %c0_i32_0 : i32, i32
  }
  func.func @transform_12(%arg0: i32) -> (i32, i32) {
    %c0_i32 = arith.constant 0 : i32
    %c0_i32_0 = arith.constant 0 : i32
    %c0_i32_1 = arith.constant 0 : i32
    return %c0_i32, %c0_i32_0 : i32, i32
  }
  func.func @transform_13(%arg0: i32) -> (i32, i32) {
    %c0_i32 = arith.constant 0 : i32
    %c0_i32_0 = arith.constant 0 : i32
    %c0_i32_1 = arith.constant 0 : i32
    return %c0_i32, %c0_i32_0 : i32, i32
  }
  func.func @transform_14(%arg0: i32) -> (i32, i32, i32, i32) {
    %c0_i32 = arith.constant 0 : i32
    %c0_i32_0 = arith.constant 0 : i32
    %c0_i32_1 = arith.constant 0 : i32
    %c0_i32_2 = arith.constant 0 : i32
    return %arg0, %c0_i32, %c0_i32_0, %c0_i32_1 : i32, i32, i32, i32
  }
}

</mosaic_0001>

<bundles_post_ra>
// kernel: tpu_custom_call.1
= control target key start
LH: loop header
LB: loop body
LE: loop exit
PB: predicated region body
PF: predicated region fallthrough
CT: control target
= control target key end

     0   :  { %s7723_s29 = smov 0   ;;  %s13453_s0 = inlined_call_operand.vmem [shape: f32[2,16,16,4], index: 0, kind: input, shape index: {}]   ;;  %s13454_s1 = inlined_call_operand.vmem [shape: f32[100,32], index: 1, kind: input, shape index: {}]   ;;  %s13455_s2 = inlined_call_operand.vmem [shape: f32[1,32], index: 2, kind: input, shape index: {}]   ;;  %s13456_s3 = inlined_call_operand.vmem [shape: f32[1,32], index: 3, kind: input, shape index: {}]   ;;  %s13457_s4 = inlined_call_operand.vmem [shape: f32[1,32], index: 4, kind: input, shape index: {}]   ;;  %s13458_s5 = inlined_call_operand.vmem [shape: f32[1,32], index: 5, kind: input, shape index: {}]   ;;  %s13459_s6 = inlined_call_operand.vmem [shape: f32[32,8], index: 6, kind: input, shape index: {}]   ;;  %s13460_s7 = inlined_call_operand.vmem [shape: f32[4,8], index: 7, kind: input, shape index: {}]   ;;  %s13461_s8 = inlined_call_operand.vmem [shape: f32[1,8], index: 8, kind: input, shape index: {}]   ;;  %s13462_s9 = inlined_call_operand.vmem [shape: f32[1,8], index: 9, kind: input, shape index: {}]   ;;  %s13463_s10 = inlined_call_operand.vmem [shape: f32[1,8], index: 10, kind: input, shape index: {}]   ;;  %s13464_s11 = inlined_call_operand.vmem [shape: f32[1,8], index: 11, kind: input, shape index: {}]   ;;  %s13465_s12 = inlined_call_operand.vmem [shape: f32[8,8], index: 12, kind: input, shape index: {}]   ;;  %s13466_s13 = inlined_call_operand.vmem [shape: f32[1,8], index: 13, kind: input, shape index: {}]   ;;  %s13467_s14 = inlined_call_operand.vmem [shape: f32[2,16,16,8], index: 14, kind: output, shape index: {}]  }
   0x1 LB: > { %s7081_s30 = sadd.s32 4294967295, %s7628_s29   ;;  %p7085_p0 = scmp.ge.s32.totalorder %s7628_s29, 1  ;;  %s7628_s29 = sphi %s7723_s29, %s24_s29  }
   0x2   : > { %p412_p1 = scmp.lt.s32.totalorder %s7628_s29, 3 }
   0x4   : > { %p413_p2 = pnand %p7085_p0, %p412_p1 }
   0x6   : > { %416 = sbr.rel (%p413_p2) target bundleno = 2328 (0x918), region = 76 }
   0xd   : > { %vm13530_vm0 = vcmask 31744   ;;  %p7733_p3 = scmp.lt.s32.totalorder %s7081_s30, 1  ;;  %v13468_v0 = vmov 0.0   ;;  %s7631_s20 = smov 4   ;;  %vm13529_vm1 = vcmask 64512   ;;  %vm13528_vm2 = vcmask 97280  }
   0xe   : > { %623 = vst.msk [vmem:[#allocation2 + $0x4d0] sm:$0xff] %vm13530_vm0, %v13468_v0  ;;  %624 = vst.msk [vmem:[#allocation2 + $0x4d8] sm:$0xff] %vm13530_vm0, %v13468_v0  ;;  %7358 = vmatprep.subr.mxu1 %v13468_v0  ;;  %s7632_s21 = smov 8   ;;  %s7633_s22 = smov 12   ;;  %vm3838_vm3 = vcmask 130048   ;;  %vm13527_vm4 = vcmask 162816  }
   0xf   : > { %517 = vst.msk [vmem:[#allocation2 + $0x180] sm:$0xff] %vm13530_vm0, %v13468_v0  ;;  %518 = vst.msk [vmem:[#allocation2 + $0x188] sm:$0xff] %vm13530_vm0, %v13468_v0  ;;  %s14720_s30 = smov (!%p7733_p3, %s7081_s30), 1  ;;  %s7634_s23 = smov 16   ;;  %vm3904_vm5 = vcmask 195584   ;;  %vm3937_vm6 = vcmask 228352  }
  0x10   : > { %519 = vst.msk [vmem:[#allocation2 + $0x190] sm:$0xff] %vm13530_vm0, %v13468_v0  ;;  %520 = vst.msk [vmem:[#allocation2 + $0x198] sm:$0xff] %vm13530_vm0, %v13468_v0  ;;  %s7197_s16 = sshll.u32 %s14720_s30, 8  ;;  %s7635_s24 = smov 20   ;;  %vm3970_vm7 = vcmask 261120   ;;  %vm13531_vm8 = vcmask 293888  }
  0x11   : > { %521 = vst.msk [vmem:[#allocation2 + $0x1a0] sm:$0xff] %vm13530_vm0, %v13468_v0  ;;  %522 = vst.msk [vmem:[#allocation2 + $0x1a8] sm:$0xff] %vm13530_vm0, %v13468_v0  ;;  %s8566_s19 = scalar_lea.vmem %s13453_s0, %s7197_s16  ;;  %s7636_s25 = smov 24   ;;  %vm4036_vm9 = vcmask 326656   ;;  %vm4069_vm10 = vcmask 359424   ;;  %vm4102_vm11 = vcmask 392192  }
  0x12   : > { %523 = vst.msk [vmem:[#allocation2 + $0x1b0] sm:$0xff] %vm13530_vm0, %v13468_v0  ;;  %524 = vst.msk [vmem:[#allocation2 + $0x1b8] sm:$0xff] %vm13530_vm0, %v13468_v0  ;;  %v8569_v1 = vld [vmem:[%s8566_s19] sm:$0xff]  ;;  %v8572_v2 = vld [vmem:[%s8566_s19 + $0x8] sm:$0xff]  ;;  %s7637_s26 = smov 28   ;;  %s7638_s27 = smov 32  }
  0x13   : > { %525 = vst.msk [vmem:[#allocation2 + $0x1c0] sm:$0xff] %vm13530_vm0, %v13468_v0  ;;  %526 = vst.msk [vmem:[#allocation2 + $0x1c8] sm:$0xff] %vm13530_vm0, %v13468_v0  ;;  %v8575_v3 = vld [vmem:[%s8566_s19 + $0x10] sm:$0xff]  ;;  %v8582_v4 = vld [vmem:[%s8566_s19 + $0x18] sm:$0xff]  ;;  %s7639_s28 = smov 36   ;;  %s7640_s15 = smov 40  }
  0x14   : > { %527 = vst.msk [vmem:[#allocation2 + $0x1d0] sm:$0xff] %vm13530_vm0, %v13468_v0  ;;  %528 = vst.msk [vmem:[#allocation2 + $0x1d8] sm:$0xff] %vm13530_vm0, %v13468_v0  ;;  %v8587_v5 = vld [vmem:[%s8566_s19 + $0x20] sm:$0xff]  ;;  %v8590_v6 = vld [vmem:[%s8566_s19 + $0x28] sm:$0xff]  ;;  %s7641_s17 = smov 44   ;;  %s7642_s18 = smov 48  }
  0x15   : > { %529 = vst.msk [vmem:[#allocation2 + $0x1e0] sm:$0xff] %vm13530_vm0, %v13468_v0  ;;  %530 = vst.msk [vmem:[#allocation2 + $0x1e8] sm:$0xff] %vm13530_vm0, %v13468_v0  ;;  %v1049_v7 = vld [vmem:[#allocation2 + $0x4d2] sm:$0xff]  ;;  %v8607_v13 = vld [vmem:[%s8566_s19 + $0x40] sm:$0xff]  ;;  %vm4135_vm12 = vcmask 424960   ;;  %vm5792_vm13 = vcmask 1043456  }
  0x16   : > { %531 = vst.msk [vmem:[#allocation2 + $0x1f0] sm:$0xff] %vm13530_vm0, %v13468_v0  ;;  %532 = vst.msk [vmem:[#allocation2 + $0x1f8] sm:$0xff] %vm13530_vm0, %v13468_v0  ;;  %1856 = vrot.lane.b32.xlu1 %v1049_v7, %s7631_s20  ;;  %v8601_v11 = vld [vmem:[%s8566_s19 + $0x30] sm:$0xff]  ;;  %v8604_v12 = vld [vmem:[%s8566_s19 + $0x38] sm:$0xff]  ;;  %vm7645_vm14 = vmmov 0   ;;  %vm4168_vm15 = vcmask 457728  }
  0x17   : > { %533 = vst.msk [vmem:[#allocation2 + $0x200] sm:$0xff] %vm13530_vm0, %v13468_v0  ;;  %534 = vst.msk [vmem:[#allocation2 + $0x208] sm:$0xff] %vm13530_vm0, %v13468_v0  ;;  %v8616_v14 = vld [vmem:[%s8566_s19 + $0x48] sm:$0xff]  ;;  %v8621_v15 = vld [vmem:[%s8566_s19 + $0x50] sm:$0xff] }
  0x18   : > { %535 = vst.msk [vmem:[#allocation2 + $0x210] sm:$0xff] %vm13530_vm0, %v13468_v0  ;;  %536 = vst.msk [vmem:[#allocation2 + $0x218] sm:$0xff] %vm13530_vm0, %v13468_v0  ;;  %v8628_v19 = vld [vmem:[%s8566_s19 + $0x58] sm:$0xff]  ;;  %v8631_v20 = vld [vmem:[%s8566_s19 + $0x60] sm:$0xff] }
  0x19   : > { %537 = vst.msk [vmem:[#allocation2 + $0x220] sm:$0xff] %vm13530_vm0, %v13468_v0  ;;  %538 = vst.msk [vmem:[#allocation2 + $0x228] sm:$0xff] %vm13530_vm0, %v13468_v0  ;;  %v8634_v21 = vld [vmem:[%s8566_s19 + $0x68] sm:$0xff]  ;;  %v8645_v23 = vld [vmem:[%s8566_s19 + $0x70] sm:$0xff] }
  0x1a   : > { %539 = vst.msk [vmem:[#allocation2 + $0x230] sm:$0xff] %vm13530_vm0, %v13468_v0  ;;  %540 = vst.msk [vmem:[#allocation2 + $0x238] sm:$0xff] %vm13530_vm0, %v13468_v0  ;;  %v8648_v24 = vld [vmem:[%s8566_s19 + $0x78] sm:$0xff]  ;;  %v8655_v25 = vld [vmem:[%s8566_s19 + $0x80] sm:$0xff] }
  0x1b   : > { %541 = vst.msk [vmem:[#allocation2 + $0x240] sm:$0xff] %vm13530_vm0, %v13468_v0  ;;  %542 = vst.msk [vmem:[#allocation2 + $0x248] sm:$0xff] %vm13530_vm0, %v13468_v0  ;;  %v8658_v26 = vld [vmem:[%s8566_s19 + $0x88] sm:$0xff]  ;;  %v8661_v27 = vld [vmem:[%s8566_s19 + $0x90] sm:$0xff] }
  0x1c   : > { %543 = vst.msk [vmem:[#allocation2 + $0x250] sm:$0xff] %vm13530_vm0, %v13468_v0  ;;  %544 = vst.msk [vmem:[#allocation2 + $0x258] sm:$0xff] %vm13530_vm0, %v13468_v0  ;;  %v8668_v28 = vld [vmem:[%s8566_s19 + $0x98] sm:$0xff]  ;;  %v8701_v39 = vld [vmem:[%s8566_s19 + $0xa8] sm:$0xff] }
  0x1d   : > { %545 = vst.msk [vmem:[#allocation2 + $0x260] sm:$0xff] %vm13530_vm0, %v13468_v0  ;;  %546 = vst.msk [vmem:[#allocation2 + $0x268] sm:$0xff] %vm13530_vm0, %v13468_v0  ;;  %v8706_v40 = vld [vmem:[%s8566_s19 + $0xa0] sm:$0xff]  ;;  %v8711_v41 = vld [vmem:[%s8566_s19 + $0xb8] sm:$0xff] }
  0x1e   : > { %547 = vst.msk [vmem:[#allocation2 + $0x270] sm:$0xff] %vm13530_vm0, %v13468_v0  ;;  %548 = vst.msk [vmem:[#allocation2 + $0x278] sm:$0xff] %vm13530_vm0, %v13468_v0  ;;  %v8714_v42 = vld [vmem:[%s8566_s19 + $0xb0] sm:$0xff]  ;;  %v8725_v43 = vld [vmem:[%s8566_s19 + $0xc8] sm:$0xff] }
  0x1f   : > { %549 = vst.msk [vmem:[#allocation2 + $0x280] sm:$0xff] %vm13530_vm0, %v13468_v0  ;;  %550 = vst.msk [vmem:[#allocation2 + $0x288] sm:$0xff] %vm13530_vm0, %v13468_v0  ;;  %v8734_v46 = vld [vmem:[%s8566_s19 + $0xc0] sm:$0xff]  ;;  %v8743_v47 = vld [vmem:[%s8566_s19 + $0xd8] sm:$0xff] }
  0x20   : > { %551 = vst.msk [vmem:[#allocation2 + $0x290] sm:$0xff] %vm13530_vm0, %v13468_v0  ;;  %552 = vst.msk [vmem:[#allocation2 + $0x298] sm:$0xff] %vm13530_vm0, %v13468_v0  ;;  %v8752_v50 = vld [vmem:[%s8566_s19 + $0xd0] sm:$0xff]  ;;  %v8761_v51 = vld [vmem:[%s8566_s19 + $0xe8] sm:$0xff] }
  0x21   : > { %553 = vst.msk [vmem:[#allocation2 + $0x2a0] sm:$0xff] %vm13530_vm0, %v13468_v0  ;;  %554 = vst.msk [vmem:[#allocation2 + $0x2a8] sm:$0xff] %vm13530_vm0, %v13468_v0  ;;  %v8770_v54 = vld [vmem:[%s8566_s19 + $0xe0] sm:$0xff]  ;;  %v8779_v55 = vld [vmem:[%s8566_s19 + $0xf8] sm:$0xff] }
  0x22   : > { %555 = vst.msk [vmem:[#allocation2 + $0x2b0] sm:$0xff] %vm13530_vm0, %v13468_v0  ;;  %556 = vst.msk [vmem:[#allocation2 + $0x2b8] sm:$0xff] %vm13530_vm0, %v13468_v0  ;;  %v8788_v58 = vld [vmem:[%s8566_s19 + $0xf0] sm:$0xff]  ;;  %s7643_s19 = smov 52  }
  0x23   : > { %557 = vst.msk [vmem:[#allocation2 + $0x2c0] sm:$0xff] %vm13530_vm0, %v13468_v0  ;;  %558 = vst.msk [vmem:[#allocation2 + $0x2c8] sm:$0xff] %vm13530_vm0, %v13468_v0 }
  0x24   : > { %559 = vst.msk [vmem:[#allocation2 + $0x2d0] sm:$0xff] %vm13530_vm0, %v13468_v0  ;;  %560 = vst.msk [vmem:[#allocation2 + $0x2d8] sm:$0xff] %vm13530_vm0, %v13468_v0 }
  0x25   : > { %561 = vst.msk [vmem:[#allocation2 + $0x2e0] sm:$0xff] %vm13530_vm0, %v13468_v0  ;;  %562 = vst.msk [vmem:[#allocation2 + $0x2e8] sm:$0xff] %vm13530_vm0, %v13468_v0 }
  0x26   : > { %563 = vst.msk [vmem:[#allocation2 + $0x2f0] sm:$0xff] %vm13530_vm0, %v13468_v0  ;;  %564 = vst.msk [vmem:[#allocation2 + $0x2f8] sm:$0xff] %vm13530_vm0, %v13468_v0 }
  0x27   : > { %565 = vst.msk [vmem:[#allocation2 + $0x300] sm:$0xff] %vm13530_vm0, %v13468_v0  ;;  %566 = vst.msk [vmem:[#allocation2 + $0x308] sm:$0xff] %vm13530_vm0, %v13468_v0 }
  0x28   : > { %567 = vst.msk [vmem:[#allocation2 + $0x310] sm:$0xff] %vm13530_vm0, %v13468_v0  ;;  %568 = vst.msk [vmem:[#allocation2 + $0x318] sm:$0xff] %vm13530_vm0, %v13468_v0 }
  0x29   : > { %569 = vst.msk [vmem:[#allocation2 + $0x320] sm:$0xff] %vm13530_vm0, %v13468_v0  ;;  %570 = vst.msk [vmem:[#allocation2 + $0x328] sm:$0xff] %vm13530_vm0, %v13468_v0 }
  0x2a   : > { %571 = vst.msk [vmem:[#allocation2 + $0x330] sm:$0xff] %vm13530_vm0, %v13468_v0  ;;  %572 = vst.msk [vmem:[#allocation2 + $0x338] sm:$0xff] %vm13530_vm0, %v13468_v0 }
  0x2b   : > { %573 = vst.msk [vmem:[#allocation2 + $0x340] sm:$0xff] %vm13530_vm0, %v13468_v0  ;;  %574 = vst.msk [vmem:[#allocation2 + $0x348] sm:$0xff] %vm13530_vm0, %v13468_v0 }
  0x2c   : > { %575 = vst.msk [vmem:[#allocation2 + $0x350] sm:$0xff] %vm13530_vm0, %v13468_v0  ;;  %576 = vst.msk [vmem:[#allocation2 + $0x358] sm:$0xff] %vm13530_vm0, %v13468_v0 }
  0x2d   : > { %577 = vst.msk [vmem:[#allocation2 + $0x360] sm:$0xff] %vm13530_vm0, %v13468_v0  ;;  %578 = vst.msk [vmem:[#allocation2 + $0x368] sm:$0xff] %vm13530_vm0, %v13468_v0 }
  0x2e   : > { %579 = vst.msk [vmem:[#allocation2 + $0x370] sm:$0xff] %vm13530_vm0, %v13468_v0  ;;  %580 = vst.msk [vmem:[#allocation2 + $0x378] sm:$0xff] %vm13530_vm0, %v13468_v0 }
  0x2f   : > { %581 = vst.msk [vmem:[#allocation2 + $0x380] sm:$0xff] %vm13530_vm0, %v13468_v0  ;;  %582 = vst.msk [vmem:[#allocation2 + $0x388] sm:$0xff] %vm13530_vm0, %v13468_v0 }
  0x30   : > { %583 = vst.msk [vmem:[#allocation2 + $0x390] sm:$0xff] %vm13530_vm0, %v13468_v0  ;;  %584 = vst.msk [vmem:[#allocation2 + $0x398] sm:$0xff] %vm13530_vm0, %v13468_v0 }
  0x31   : > { %585 = vst.msk [vmem:[#allocation2 + $0x3a0] sm:$0xff] %vm13530_vm0, %v13468_v0  ;;  %586 = vst.msk [vmem:[#allocation2 + $0x3a8] sm:$0xff] %vm13530_vm0, %v13468_v0 }
  0x32   : > { %587 = vst.msk [vmem:[#allocation2 + $0x3b0] sm:$0xff] %vm13530_vm0, %v13468_v0  ;;  %588 = vst.msk [vmem:[#allocation2 + $0x3b8] sm:$0xff] %vm13530_vm0, %v13468_v0 }
  0x33   : > { %589 = vst.msk [vmem:[#allocation2 + $0x3c0] sm:$0xff] %vm13530_vm0, %v13468_v0  ;;  %590 = vst.msk [vmem:[#allocation2 + $0x3c8] sm:$0xff] %vm13530_vm0, %v13468_v0 }
  0x34   : > { %591 = vst.msk [vmem:[#allocation2 + $0x3d0] sm:$0xff] %vm13530_vm0, %v13468_v0  ;;  %592 = vst.msk [vmem:[#allocation2 + $0x3d8] sm:$0xff] %vm13530_vm0, %v13468_v0 }
  0x35   : > { %593 = vst.msk [vmem:[#allocation2 + $0x3e0] sm:$0xff] %vm13530_vm0, %v13468_v0  ;;  %594 = vst.msk [vmem:[#allocation2 + $0x3e8] sm:$0xff] %vm13530_vm0, %v13468_v0 }
  0x36   : > { %595 = vst.msk [vmem:[#allocation2 + $0x3f0] sm:$0xff] %vm13530_vm0, %v13468_v0  ;;  %596 = vst.msk [vmem:[#allocation2 + $0x3f8] sm:$0xff] %vm13530_vm0, %v13468_v0 }
  0x37   : > { %597 = vst.msk [vmem:[#allocation2 + $0x400] sm:$0xff] %vm13530_vm0, %v13468_v0  ;;  %598 = vst.msk [vmem:[#allocation2 + $0x408] sm:$0xff] %vm13530_vm0, %v13468_v0 }
  0x38   : > { %599 = vst.msk [vmem:[#allocation2 + $0x410] sm:$0xff] %vm13530_vm0, %v13468_v0  ;;  %600 = vst.msk [vmem:[#allocation2 + $0x418] sm:$0xff] %vm13530_vm0, %v13468_v0 }
  0x39   : > { %601 = vst.msk [vmem:[#allocation2 + $0x420] sm:$0xff] %vm13530_vm0, %v13468_v0  ;;  %602 = vst.msk [vmem:[#allocation2 + $0x428] sm:$0xff] %vm13530_vm0, %v13468_v0 }
  0x3a   : > { %603 = vst.msk [vmem:[#allocation2 + $0x430] sm:$0xff] %vm13530_vm0, %v13468_v0  ;;  %604 = vst.msk [vmem:[#allocation2 + $0x438] sm:$0xff] %vm13530_vm0, %v13468_v0 }
  0x3b   : > { %605 = vst.msk [vmem:[#allocation2 + $0x440] sm:$0xff] %vm13530_vm0, %v13468_v0  ;;  %606 = vst.msk [vmem:[#allocation2 + $0x448] sm:$0xff] %vm13530_vm0, %v13468_v0 }
  0x3c   : > { %607 = vst.msk [vmem:[#allocation2 + $0x450] sm:$0xff] %vm13530_vm0, %v13468_v0  ;;  %608 = vst.msk [vmem:[#allocation2 + $0x458] sm:$0xff] %vm13530_vm0, %v13468_v0 }
  0x3d   : > { %609 = vst.msk [vmem:[#allocation2 + $0x460] sm:$0xff] %vm13530_vm0, %v13468_v0  ;;  %610 = vst.msk [vmem:[#allocation2 + $0x468] sm:$0xff] %vm13530_vm0, %v13468_v0 }
  0x3e   : > { %611 = vst.msk [vmem:[#allocation2 + $0x470] sm:$0xff] %vm13530_vm0, %v13468_v0  ;;  %612 = vst.msk [vmem:[#allocation2 + $0x478] sm:$0xff] %vm13530_vm0, %v13468_v0 }
  0x3f   : > { %613 = vst.msk [vmem:[#allocation2 + $0x480] sm:$0xff] %vm13530_vm0, %v13468_v0  ;;  %614 = vst.msk [vmem:[#allocation2 + $0x488] sm:$0xff] %vm13530_vm0, %v13468_v0 }
  0x40   : > { %615 = vst.msk [vmem:[#allocation2 + $0x490] sm:$0xff] %vm13530_vm0, %v13468_v0  ;;  %616 = vst.msk [vmem:[#allocation2 + $0x498] sm:$0xff] %vm13530_vm0, %v13468_v0 }
  0x41   : > { %617 = vst.msk [vmem:[#allocation2 + $0x4a0] sm:$0xff] %vm13530_vm0, %v13468_v0  ;;  %618 = vst.msk [vmem:[#allocation2 + $0x4a8] sm:$0xff] %vm13530_vm0, %v13468_v0 }
  0x42   : > { %619 = vst.msk [vmem:[#allocation2 + $0x4b0] sm:$0xff] %vm13530_vm0, %v13468_v0  ;;  %620 = vst.msk [vmem:[#allocation2 + $0x4b8] sm:$0xff] %vm13530_vm0, %v13468_v0 }
  0x43   : > { %621 = vst.msk [vmem:[#allocation2 + $0x4c0] sm:$0xff] %vm13530_vm0, %v13468_v0  ;;  %622 = vst.msk [vmem:[#allocation2 + $0x4c8] sm:$0xff] %vm13530_vm0, %v13468_v0 }
  0x44   : > { %625 = vst.msk [vmem:[#allocation2 + $0x4e0] sm:$0xff] %vm13530_vm0, %v13468_v0  ;;  %626 = vst.msk [vmem:[#allocation2 + $0x4e8] sm:$0xff] %vm13530_vm0, %v13468_v0 }
  0x45   : > { %627 = vst.msk [vmem:[#allocation2 + $0x4f0] sm:$0xff] %vm13530_vm0, %v13468_v0  ;;  %628 = vst.msk [vmem:[#allocation2 + $0x4f8] sm:$0xff] %vm13530_vm0, %v13468_v0 }
  0x46   : > { %629 = vst.msk [vmem:[#allocation2 + $0x500] sm:$0xff] %vm13530_vm0, %v13468_v0  ;;  %630 = vst.msk [vmem:[#allocation2 + $0x508] sm:$0xff] %vm13530_vm0, %v13468_v0 }
  0x47   : > { %631 = vst.msk [vmem:[#allocation2 + $0x510] sm:$0xff] %vm13530_vm0, %v13468_v0  ;;  %632 = vst.msk [vmem:[#allocation2 + $0x518] sm:$0xff] %vm13530_vm0, %v13468_v0  ;;  %v1047_v8 = vld [vmem:[#allocation2 + $0x492] sm:$0xff] }
  0x48   : > { %633 = vst.msk [vmem:[#allocation2 + $0x520] sm:$0xff] %vm13530_vm0, %v13468_v0  ;;  %634 = vst.msk [vmem:[#allocation2 + $0x528] sm:$0xff] %vm13530_vm0, %v13468_v0  ;;  %1852 = vrot.lane.b32.xlu0 %v1047_v8, %s7631_s20  ;;  %v1048_v10 = vld [vmem:[#allocation2 + $0x49a] sm:$0xff] }
  0x49   : > { %635 = vst.msk [vmem:[#allocation2 + $0x530] sm:$0xff] %vm13530_vm0, %v13468_v0  ;;  %636 = vst.msk [vmem:[#allocation2 + $0x538] sm:$0xff] %vm13530_vm0, %v13468_v0  ;;  %v1080_v8 = vld [vmem:[#allocation2 + $0x4a0] sm:$0xff] }
  0x4a   : > { %637 = vst.msk [vmem:[#allocation2 + $0x540] sm:$0xff] %vm13530_vm0, %v13468_v0  ;;  %638 = vst.msk [vmem:[#allocation2 + $0x548] sm:$0xff] %vm13530_vm0, %v13468_v0 }
  0x4b   : > { %639 = vst.msk [vmem:[#allocation2 + $0x550] sm:$0xff] %vm13530_vm0, %v13468_v0  ;;  %640 = vst.msk [vmem:[#allocation2 + $0x558] sm:$0xff] %vm13530_vm0, %v13468_v0  ;;  %v1050_v9 = vld [vmem:[#allocation2 + $0x4da] sm:$0xff] }
  0x4c   : > { %641 = vst.msk [vmem:[#allocation2 + $0x560] sm:$0xff] %vm13530_vm0, %v13468_v0  ;;  %642 = vst.msk [vmem:[#allocation2 + $0x568] sm:$0xff] %vm13530_vm0, %v13468_v0  ;;  %1858 = vrot.lane.b32.xlu1 %v1050_v9, %s7631_s20  ;;  %1854 = vrot.lane.b32.xlu0 %v1048_v10, %s7631_s20  ;;  %v1079_v9 = vld [vmem:[#allocation2 + $0x498] sm:$0xff]  ;;  %v1082_v10 = vld [vmem:[#allocation2 + $0x4e0] sm:$0xff] }
  0x4d   : > { %643 = vst.msk [vmem:[#allocation2 + $0x570] sm:$0xff] %vm13530_vm0, %v13468_v0  ;;  %644 = vst.msk [vmem:[#allocation2 + $0x578] sm:$0xff] %vm13530_vm0, %v13468_v0 }
  0x4e   : > { %646 = vst.msk [vmem:[#allocation2 + $0x588] sm:$0xff] %vm13530_vm0, %v13468_v0  ;;  %647 = vst.msk [vmem:[#allocation2 + $0x590] sm:$0xff] %vm13530_vm0, %v13468_v0  ;;  %v1051_v17 = vld [vmem:[#allocation2 + $0x512] sm:$0xff] }
  0x4f   : > { %648 = vst.msk [vmem:[#allocation2 + $0x598] sm:$0xff] %vm13530_vm0, %v13468_v0  ;;  %649 = vst.msk [vmem:[#allocation2 + $0x5a0] sm:$0xff] %vm13530_vm0, %v13468_v0  ;;  %v1052_v16 = vld [vmem:[#allocation2 + $0x51a] sm:$0xff] }
  0x50   : > { %650 = vst.msk [vmem:[#allocation2 + $0x5a8] sm:$0xff] %vm13530_vm0, %v13468_v0  ;;  %651 = vst.msk [vmem:[#allocation2 + $0x5b0] sm:$0xff] %vm13530_vm0, %v13468_v0  ;;  %1862 = vrot.lane.b32.xlu1 %v1052_v16, %s7631_s20  ;;  %1860 = vrot.lane.b32.xlu0 %v1051_v17, %s7631_s20  ;;  %v1081_v16 = vld [vmem:[#allocation2 + $0x4d8] sm:$0xff]  ;;  %v1084_v17 = vld [vmem:[#allocation2 + $0x520] sm:$0xff] }
  0x51   : > { %654 = vst.msk [vmem:[#allocation2 + $0x5c8] sm:$0xff] %vm13530_vm0, %v13468_v0  ;;  %655 = vst.msk [vmem:[#allocation2 + $0x5d0] sm:$0xff] %vm13530_vm0, %v13468_v0 }
  0x52   : > { %656 = vst.msk [vmem:[#allocation2 + $0x5d8] sm:$0xff] %vm13530_vm0, %v13468_v0  ;;  %657 = vst.msk [vmem:[#allocation2 + $0x5e0] sm:$0xff] %vm13530_vm0, %v13468_v0  ;;  %v1053_v22 = vld [vmem:[#allocation2 + $0x552] sm:$0xff] }
  0x53   : > { %658 = vst.msk [vmem:[#allocation2 + $0x5e8] sm:$0xff] %vm13530_vm0, %v13468_v0  ;;  %659 = vst.msk [vmem:[#allocation2 + $0x5f0] sm:$0xff] %vm13530_vm0, %v13468_v0  ;;  %v1054_v18 = vld [vmem:[#allocation2 + $0x55a] sm:$0xff] }
  0x54   : > { %661 = vst.msk [vmem:[#allocation2 + $0x600] sm:$0xff] %vm13530_vm0, %v13468_v0  ;;  %662 = vst.msk [vmem:[#allocation2 + $0x608] sm:$0xff] %vm13530_vm0, %v13468_v0  ;;  %1866 = vrot.lane.b32.xlu1 %v1054_v18, %s7631_s20  ;;  %1864 = vrot.lane.b32.xlu0 %v1053_v22, %s7631_s20  ;;  %v1083_v18 = vld [vmem:[#allocation2 + $0x518] sm:$0xff]  ;;  %v1086_v22 = vld [vmem:[#allocation2 + $0x560] sm:$0xff] }
  0x55   : > { %663 = vst.msk [vmem:[#allocation2 + $0x610] sm:$0xff] %vm13530_vm0, %v13468_v0  ;;  %664 = vst.msk [vmem:[#allocation2 + $0x618] sm:$0xff] %vm13530_vm0, %v13468_v0 }
  0x56   : > { %665 = vst.msk [vmem:[#allocation2 + $0x620] sm:$0xff] %vm13530_vm0, %v13468_v0  ;;  %666 = vst.msk [vmem:[#allocation2 + $0x628] sm:$0xff] %vm13530_vm0, %v13468_v0  ;;  %v1056_v29 = vld [vmem:[#allocation2 + $0x59a] sm:$0xff]  ;;  %v1055_v30 = vld [vmem:[#allocation2 + $0x592] sm:$0xff] }
  0x57   : > { %667 = vst.msk [vmem:[#allocation2 + $0x630] sm:$0xff] %vm13530_vm0, %v13468_v0  ;;  %668 = vst.msk [vmem:[#allocation2 + $0x638] sm:$0xff] %vm13530_vm0, %v13468_v0 }
  0x58   : > { %669 = vst.msk [vmem:[#allocation2 + $0x640] sm:$0xff] %vm13530_vm0, %v13468_v0  ;;  %670 = vst.msk [vmem:[#allocation2 + $0x648] sm:$0xff] %vm13530_vm0, %v13468_v0  ;;  %1870 = vrot.lane.b32.xlu1 %v1056_v29, %s7631_s20  ;;  %1868 = vrot.lane.b32.xlu0 %v1055_v30, %s7631_s20  ;;  %v1085_v29 = vld [vmem:[#allocation2 + $0x558] sm:$0xff]  ;;  %v1088_v30 = vld [vmem:[#allocation2 + $0x5a0] sm:$0xff] }
  0x59   : > { %671 = vst.msk [vmem:[#allocation2 + $0x650] sm:$0xff] %vm13530_vm0, %v13468_v0  ;;  %672 = vst.msk [vmem:[#allocation2 + $0x658] sm:$0xff] %vm13530_vm0, %v13468_v0  ;;  %v1058_v31 = vld [vmem:[#allocation2 + $0x5da] sm:$0xff]  ;;  %v1057_v32 = vld [vmem:[#allocation2 + $0x5d2] sm:$0xff] }
  0x5a   : > { %673 = vst.msk [vmem:[#allocation2 + $0x660] sm:$0xff] %vm13530_vm0, %v13468_v0  ;;  %674 = vst.msk [vmem:[#allocation2 + $0x668] sm:$0xff] %vm13530_vm0, %v13468_v0 }
  0x5b   : > { %675 = vst.msk [vmem:[#allocation2 + $0x670] sm:$0xff] %vm13530_vm0, %v13468_v0  ;;  %676 = vst.msk [vmem:[#allocation2 + $0x678] sm:$0xff] %vm13530_vm0, %v13468_v0 }
  0x5c   : > { %677 = vst.msk [vmem:[#allocation2 + $0x680] sm:$0xff] %vm13530_vm0, %v13468_v0  ;;  %678 = vst.msk [vmem:[#allocation2 + $0x688] sm:$0xff] %vm13530_vm0, %v13468_v0  ;;  %1874 = vrot.lane.b32.xlu1 %v1058_v31, %s7631_s20  ;;  %1872 = vrot.lane.b32.xlu0 %v1057_v32, %s7631_s20  ;;  %v1087_v31 = vld [vmem:[#allocation2 + $0x598] sm:$0xff]  ;;  %v1090_v32 = vld [vmem:[#allocation2 + $0x5e0] sm:$0xff] }
  0x5d   : > { %679 = vst.msk [vmem:[#allocation2 + $0x690] sm:$0xff] %vm13530_vm0, %v13468_v0  ;;  %680 = vst.msk [vmem:[#allocation2 + $0x698] sm:$0xff] %vm13530_vm0, %v13468_v0 }
  0x5e   : > { %681 = vst.msk [vmem:[#allocation2 + $0x6a0] sm:$0xff] %vm13530_vm0, %v13468_v0  ;;  %682 = vst.msk [vmem:[#allocation2 + $0x6a8] sm:$0xff] %vm13530_vm0, %v13468_v0 }
  0x5f   : > { %683 = vst.msk [vmem:[#allocation2 + $0x6b0] sm:$0xff] %vm13530_vm0, %v13468_v0  ;;  %684 = vst.msk [vmem:[#allocation2 + $0x6b8] sm:$0xff] %vm13530_vm0, %v13468_v0 }
  0x60   : > { %685 = vst.msk [vmem:[#allocation2 + $0x6c0] sm:$0xff] %vm13530_vm0, %v13468_v0  ;;  %686 = vst.msk [vmem:[#allocation2 + $0x6c8] sm:$0xff] %vm13530_vm0, %v13468_v0 }
  0x61   : > { %687 = vst.msk [vmem:[#allocation2 + $0x6d0] sm:$0xff] %vm13530_vm0, %v13468_v0  ;;  %688 = vst.msk [vmem:[#allocation2 + $0x6d8] sm:$0xff] %vm13530_vm0, %v13468_v0 }
  0x62   : > { %689 = vst.msk [vmem:[#allocation2 + $0x6e0] sm:$0xff] %vm13530_vm0, %v13468_v0  ;;  %690 = vst.msk [vmem:[#allocation2 + $0x6e8] sm:$0xff] %vm13530_vm0, %v13468_v0 }
  0x63   : > { %691 = vst.msk [vmem:[#allocation2 + $0x6f0] sm:$0xff] %vm13530_vm0, %v13468_v0  ;;  %692 = vst.msk [vmem:[#allocation2 + $0x6f8] sm:$0xff] %vm13530_vm0, %v13468_v0 }
  0x64   : > { %693 = vst.msk [vmem:[#allocation2 + $0x700] sm:$0xff] %vm13530_vm0, %v13468_v0  ;;  %694 = vst.msk [vmem:[#allocation2 + $0x708] sm:$0xff] %vm13530_vm0, %v13468_v0 }
  0x65   : > { %695 = vst.msk [vmem:[#allocation2 + $0x710] sm:$0xff] %vm13530_vm0, %v13468_v0  ;;  %696 = vst.msk [vmem:[#allocation2 + $0x718] sm:$0xff] %vm13530_vm0, %v13468_v0 }
  0x66   : > { %697 = vst.msk [vmem:[#allocation2 + $0x720] sm:$0xff] %vm13530_vm0, %v13468_v0  ;;  %698 = vst.msk [vmem:[#allocation2 + $0x728] sm:$0xff] %vm13530_vm0, %v13468_v0 }
  0x67   : > { %699 = vst.msk [vmem:[#allocation2 + $0x730] sm:$0xff] %vm13530_vm0, %v13468_v0  ;;  %700 = vst.msk [vmem:[#allocation2 + $0x738] sm:$0xff] %vm13530_vm0, %v13468_v0 }
  0x68   : > { %701 = vst.msk [vmem:[#allocation2 + $0x740] sm:$0xff] %vm13530_vm0, %v13468_v0  ;;  %702 = vst.msk [vmem:[#allocation2 + $0x748] sm:$0xff] %vm13530_vm0, %v13468_v0 }
  0x69   : > { %703 = vst.msk [vmem:[#allocation2 + $0x750] sm:$0xff] %vm13530_vm0, %v13468_v0  ;;  %704 = vst.msk [vmem:[#allocation2 + $0x758] sm:$0xff] %vm13530_vm0, %v13468_v0 }
  0x6a   : > { %705 = vst.msk [vmem:[#allocation2 + $0x760] sm:$0xff] %vm13530_vm0, %v13468_v0  ;;  %706 = vst.msk [vmem:[#allocation2 + $0x768] sm:$0xff] %vm13530_vm0, %v13468_v0 }
  0x6b   : > { %707 = vst.msk [vmem:[#allocation2 + $0x770] sm:$0xff] %vm13530_vm0, %v13468_v0  ;;  %708 = vst.msk [vmem:[#allocation2 + $0x778] sm:$0xff] %vm13530_vm0, %v13468_v0 }
  0x6c   : > { %709 = vst.msk [vmem:[#allocation2 + $0x780] sm:$0xff] %vm13530_vm0, %v13468_v0  ;;  %710 = vst.msk [vmem:[#allocation2 + $0x788] sm:$0xff] %vm13530_vm0, %v13468_v0 }
  0x6d   : > { %711 = vst.msk [vmem:[#allocation2 + $0x790] sm:$0xff] %vm13530_vm0, %v13468_v0  ;;  %712 = vst.msk [vmem:[#allocation2 + $0x798] sm:$0xff] %vm13530_vm0, %v13468_v0 }
  0x6e   : > { %713 = vst.msk [vmem:[#allocation2 + $0x7a0] sm:$0xff] %vm13530_vm0, %v13468_v0  ;;  %714 = vst.msk [vmem:[#allocation2 + $0x7a8] sm:$0xff] %vm13530_vm0, %v13468_v0 }
  0x6f   : > { %715 = vst.msk [vmem:[#allocation2 + $0x7b0] sm:$0xff] %vm13530_vm0, %v13468_v0  ;;  %716 = vst.msk [vmem:[#allocation2 + $0x7b8] sm:$0xff] %vm13530_vm0, %v13468_v0 }
  0x70   : > { %717 = vst.msk [vmem:[#allocation2 + $0x7c0] sm:$0xff] %vm13530_vm0, %v13468_v0  ;;  %718 = vst.msk [vmem:[#allocation2 + $0x7c8] sm:$0xff] %vm13530_vm0, %v13468_v0 }
  0x71   : > { %719 = vst.msk [vmem:[#allocation2 + $0x7d0] sm:$0xff] %vm13530_vm0, %v13468_v0  ;;  %720 = vst.msk [vmem:[#allocation2 + $0x7d8] sm:$0xff] %vm13530_vm0, %v13468_v0 }
  0x72   : > { %721 = vst.msk [vmem:[#allocation2 + $0x7e0] sm:$0xff] %vm13530_vm0, %v13468_v0  ;;  %722 = vst.msk [vmem:[#allocation2 + $0x7e8] sm:$0xff] %vm13530_vm0, %v13468_v0 }
  0x73   : > { %723 = vst.msk [vmem:[#allocation2 + $0x7f0] sm:$0xff] %vm13530_vm0, %v13468_v0  ;;  %724 = vst.msk [vmem:[#allocation2 + $0x7f8] sm:$0xff] %vm13530_vm0, %v13468_v0 }
  0x74   : > { %725 = vst.msk [vmem:[#allocation2 + $0x800] sm:$0xff] %vm13530_vm0, %v13468_v0  ;;  %726 = vst.msk [vmem:[#allocation2 + $0x808] sm:$0xff] %vm13530_vm0, %v13468_v0 }
  0x75   : > { %727 = vst.msk [vmem:[#allocation2 + $0x810] sm:$0xff] %vm13530_vm0, %v13468_v0  ;;  %728 = vst.msk [vmem:[#allocation2 + $0x818] sm:$0xff] %vm13530_vm0, %v13468_v0 }
  0x76   : > { %729 = vst.msk [vmem:[#allocation2 + $0x820] sm:$0xff] %vm13530_vm0, %v13468_v0  ;;  %730 = vst.msk [vmem:[#allocation2 + $0x828] sm:$0xff] %vm13530_vm0, %v13468_v0 }
  0x77   : > { %731 = vst.msk [vmem:[#allocation2 + $0x830] sm:$0xff] %vm13530_vm0, %v13468_v0  ;;  %732 = vst.msk [vmem:[#allocation2 + $0x838] sm:$0xff] %vm13530_vm0, %v13468_v0 }
  0x78   : > { %733 = vst.msk [vmem:[#allocation2 + $0x840] sm:$0xff] %vm13530_vm0, %v13468_v0  ;;  %734 = vst.msk [vmem:[#allocation2 + $0x848] sm:$0xff] %vm13530_vm0, %v13468_v0 }
  0x79   : > { %735 = vst.msk [vmem:[#allocation2 + $0x850] sm:$0xff] %vm13530_vm0, %v13468_v0  ;;  %736 = vst.msk [vmem:[#allocation2 + $0x858] sm:$0xff] %vm13530_vm0, %v13468_v0 }
  0x7a   : > { %737 = vst.msk [vmem:[#allocation2 + $0x860] sm:$0xff] %vm13530_vm0, %v13468_v0  ;;  %738 = vst.msk [vmem:[#allocation2 + $0x868] sm:$0xff] %vm13530_vm0, %v13468_v0 }
  0x7b   : > { %739 = vst.msk [vmem:[#allocation2 + $0x870] sm:$0xff] %vm13530_vm0, %v13468_v0  ;;  %740 = vst.msk [vmem:[#allocation2 + $0x878] sm:$0xff] %vm13530_vm0, %v13468_v0 }
  0x7c   : > { %741 = vst.msk [vmem:[#allocation2 + $0x880] sm:$0xff] %vm13530_vm0, %v13468_v0  ;;  %742 = vst.msk [vmem:[#allocation2 + $0x888] sm:$0xff] %vm13530_vm0, %v13468_v0 }
  0x7d   : > { %743 = vst.msk [vmem:[#allocation2 + $0x890] sm:$0xff] %vm13530_vm0, %v13468_v0  ;;  %744 = vst.msk [vmem:[#allocation2 + $0x898] sm:$0xff] %vm13530_vm0, %v13468_v0 }
  0x7e   : > { %745 = vst.msk [vmem:[#allocation2 + $0x8a0] sm:$0xff] %vm13530_vm0, %v13468_v0  ;;  %746 = vst.msk [vmem:[#allocation2 + $0x8a8] sm:$0xff] %vm13530_vm0, %v13468_v0 }
  0x7f   : > { %747 = vst.msk [vmem:[#allocation2 + $0x8b0] sm:$0xff] %vm13530_vm0, %v13468_v0  ;;  %748 = vst.msk [vmem:[#allocation2 + $0x8b8] sm:$0xff] %vm13530_vm0, %v13468_v0 }
  0x80   : > { %749 = vst.msk [vmem:[#allocation2 + $0x8c0] sm:$0xff] %vm13530_vm0, %v13468_v0  ;;  %750 = vst.msk [vmem:[#allocation2 + $0x8c8] sm:$0xff] %vm13530_vm0, %v13468_v0 }
  0x81   : > { %751 = vst.msk [vmem:[#allocation2 + $0x8d0] sm:$0xff] %vm13530_vm0, %v13468_v0  ;;  %752 = vst.msk [vmem:[#allocation2 + $0x8d8] sm:$0xff] %vm13530_vm0, %v13468_v0 }
  0x82   : > { %753 = vst.msk [vmem:[#allocation2 + $0x8e0] sm:$0xff] %vm13530_vm0, %v13468_v0  ;;  %754 = vst.msk [vmem:[#allocation2 + $0x8e8] sm:$0xff] %vm13530_vm0, %v13468_v0 }
  0x83   : > { %755 = vst.msk [vmem:[#allocation2 + $0x8f0] sm:$0xff] %vm13530_vm0, %v13468_v0  ;;  %756 = vst.msk [vmem:[#allocation2 + $0x8f8] sm:$0xff] %vm13530_vm0, %v13468_v0 }
  0x84   : > { %757 = vst.msk [vmem:[#allocation2 + $0x900] sm:$0xff] %vm13530_vm0, %v13468_v0  ;;  %758 = vst.msk [vmem:[#allocation2 + $0x908] sm:$0xff] %vm13530_vm0, %v13468_v0 }
  0x85   : > { %759 = vst.msk [vmem:[#allocation2 + $0x910] sm:$0xff] %vm13530_vm0, %v13468_v0  ;;  %760 = vst.msk [vmem:[#allocation2 + $0x918] sm:$0xff] %vm13530_vm0, %v13468_v0 }
  0x86   : > { %761 = vst.msk [vmem:[#allocation2 + $0x920] sm:$0xff] %vm13530_vm0, %v13468_v0  ;;  %762 = vst.msk [vmem:[#allocation2 + $0x928] sm:$0xff] %vm13530_vm0, %v13468_v0 }
  0x87   : > { %763 = vst.msk [vmem:[#allocation2 + $0x930] sm:$0xff] %vm13530_vm0, %v13468_v0  ;;  %764 = vst.msk [vmem:[#allocation2 + $0x938] sm:$0xff] %vm13530_vm0, %v13468_v0 }
  0x88   : > { %765 = vst.msk [vmem:[#allocation2 + $0x940] sm:$0xff] %vm13530_vm0, %v13468_v0  ;;  %766 = vst.msk [vmem:[#allocation2 + $0x948] sm:$0xff] %vm13530_vm0, %v13468_v0 }
  0x89   : > { %767 = vst.msk [vmem:[#allocation2 + $0x950] sm:$0xff] %vm13530_vm0, %v13468_v0  ;;  %768 = vst.msk [vmem:[#allocation2 + $0x958] sm:$0xff] %vm13530_vm0, %v13468_v0 }
  0x8a   : > { %769 = vst.msk [vmem:[#allocation2 + $0x960] sm:$0xff] %vm13530_vm0, %v13468_v0  ;;  %770 = vst.msk [vmem:[#allocation2 + $0x968] sm:$0xff] %vm13530_vm0, %v13468_v0 }
  0x8b   : > { %771 = vst.msk [vmem:[#allocation2 + $0x970] sm:$0xff] %vm13530_vm0, %v13468_v0  ;;  %772 = vst.msk [vmem:[#allocation2 + $0x978] sm:$0xff] %vm13530_vm0, %v13468_v0 }
  0x8c   : > { %773 = vst.msk [vmem:[#allocation2 + $0x980] sm:$0xff] %vm13530_vm0, %v13468_v0  ;;  %774 = vst.msk [vmem:[#allocation2 + $0x988] sm:$0xff] %vm13530_vm0, %v13468_v0 }
  0x8d   : > { %775 = vst.msk [vmem:[#allocation2 + $0x990] sm:$0xff] %vm13530_vm0, %v13468_v0  ;;  %776 = vst.msk [vmem:[#allocation2 + $0x998] sm:$0xff] %vm13530_vm0, %v13468_v0 }
  0x8e   : > { %777 = vst.msk [vmem:[#allocation2 + $0x9a0] sm:$0xff] %vm13530_vm0, %v13468_v0  ;;  %778 = vst.msk [vmem:[#allocation2 + $0x9a8] sm:$0xff] %vm13530_vm0, %v13468_v0 }
  0x8f   : > { %779 = vst.msk [vmem:[#allocation2 + $0x9b0] sm:$0xff] %vm13530_vm0, %v13468_v0  ;;  %780 = vst.msk [vmem:[#allocation2 + $0x9b8] sm:$0xff] %vm13530_vm0, %v13468_v0 }
  0x90   : > { %781 = vst.msk [vmem:[#allocation2 + $0x9c0] sm:$0xff] %vm13530_vm0, %v13468_v0  ;;  %782 = vst.msk [vmem:[#allocation2 + $0x9c8] sm:$0xff] %vm13530_vm0, %v13468_v0 }
  0x91   : > { %783 = vst.msk [vmem:[#allocation2 + $0x9d0] sm:$0xff] %vm13530_vm0, %v13468_v0  ;;  %784 = vst.msk [vmem:[#allocation2 + $0x9d8] sm:$0xff] %vm13530_vm0, %v13468_v0 }
  0x92   : > { %785 = vst.msk [vmem:[#allocation2 + $0x9e0] sm:$0xff] %vm13530_vm0, %v13468_v0  ;;  %786 = vst.msk [vmem:[#allocation2 + $0x9e8] sm:$0xff] %vm13530_vm0, %v13468_v0 }
  0x93   : > { %787 = vst.msk [vmem:[#allocation2 + $0x9f0] sm:$0xff] %vm13530_vm0, %v13468_v0  ;;  %788 = vst.msk [vmem:[#allocation2 + $0x9f8] sm:$0xff] %vm13530_vm0, %v13468_v0 }
  0x94   : > { %790 = vst.msk [vmem:[#allocation2 + $0xa08] sm:$0xff] %vm13530_vm0, %v13468_v0  ;;  %791 = vst.msk [vmem:[#allocation2 + $0xa10] sm:$0xff] %vm13530_vm0, %v13468_v0 }
  0x95   : > { %792 = vst.msk [vmem:[#allocation2 + $0xa18] sm:$0xff] %vm13530_vm0, %v13468_v0  ;;  %793 = vst.msk [vmem:[#allocation2 + $0xa20] sm:$0xff] %vm13530_vm0, %v13468_v0 }
  0x96   : > { %794 = vst.msk [vmem:[#allocation2 + $0xa28] sm:$0xff] %vm13530_vm0, %v13468_v0  ;;  %795 = vst.msk [vmem:[#allocation2 + $0xa30] sm:$0xff] %vm13530_vm0, %v13468_v0 }
  0x97   : > { %798 = vst.msk [vmem:[#allocation2 + $0xa48] sm:$0xff] %vm13530_vm0, %v13468_v0  ;;  %799 = vst.msk [vmem:[#allocation2 + $0xa50] sm:$0xff] %vm13530_vm0, %v13468_v0 }
  0x98   : > { %800 = vst.msk [vmem:[#allocation2 + $0xa58] sm:$0xff] %vm13530_vm0, %v13468_v0  ;;  %801 = vst.msk [vmem:[#allocation2 + $0xa60] sm:$0xff] %vm13530_vm0, %v13468_v0 }
  0x99   : > { %802 = vst.msk [vmem:[#allocation2 + $0xa68] sm:$0xff] %vm13530_vm0, %v13468_v0  ;;  %803 = vst.msk [vmem:[#allocation2 + $0xa70] sm:$0xff] %vm13530_vm0, %v13468_v0 }
  0x9a   : > { %805 = vst.msk [vmem:[#allocation2 + $0xa80] sm:$0xff] %vm13530_vm0, %v13468_v0  ;;  %806 = vst.msk [vmem:[#allocation2 + $0xa88] sm:$0xff] %vm13530_vm0, %v13468_v0 }
  0x9b   : > { %807 = vst.msk [vmem:[#allocation2 + $0xa90] sm:$0xff] %vm13530_vm0, %v13468_v0  ;;  %808 = vst.msk [vmem:[#allocation2 + $0xa98] sm:$0xff] %vm13530_vm0, %v13468_v0 }
  0x9c   : > { %809 = vst.msk [vmem:[#allocation2 + $0xaa0] sm:$0xff] %vm13530_vm0, %v13468_v0  ;;  %810 = vst.msk [vmem:[#allocation2 + $0xaa8] sm:$0xff] %vm13530_vm0, %v13468_v0 }
  0x9d   : > { %811 = vst.msk [vmem:[#allocation2 + $0xab0] sm:$0xff] %vm13530_vm0, %v13468_v0  ;;  %812 = vst.msk [vmem:[#allocation2 + $0xab8] sm:$0xff] %vm13530_vm0, %v13468_v0 }
  0x9e   : > { %813 = vst.msk [vmem:[#allocation2 + $0xac0] sm:$0xff] %vm13530_vm0, %v13468_v0  ;;  %814 = vst.msk [vmem:[#allocation2 + $0xac8] sm:$0xff] %vm13530_vm0, %v13468_v0 }
  0x9f   : > { %815 = vst.msk [vmem:[#allocation2 + $0xad0] sm:$0xff] %vm13530_vm0, %v13468_v0  ;;  %816 = vst.msk [vmem:[#allocation2 + $0xad8] sm:$0xff] %vm13530_vm0, %v13468_v0 }
  0xa0   : > { %817 = vst.msk [vmem:[#allocation2 + $0xae0] sm:$0xff] %vm13530_vm0, %v13468_v0  ;;  %818 = vst.msk [vmem:[#allocation2 + $0xae8] sm:$0xff] %vm13530_vm0, %v13468_v0 }
  0xa1   : > { %819 = vst.msk [vmem:[#allocation2 + $0xaf0] sm:$0xff] %vm13530_vm0, %v13468_v0  ;;  %820 = vst.msk [vmem:[#allocation2 + $0xaf8] sm:$0xff] %vm13530_vm0, %v13468_v0 }
  0xa2   : > { %821 = vst.msk [vmem:[#allocation2 + $0xb00] sm:$0xff] %vm13530_vm0, %v13468_v0  ;;  %822 = vst.msk [vmem:[#allocation2 + $0xb08] sm:$0xff] %vm13530_vm0, %v13468_v0 }
  0xa3   : > { %823 = vst.msk [vmem:[#allocation2 + $0xb10] sm:$0xff] %vm13530_vm0, %v13468_v0  ;;  %824 = vst.msk [vmem:[#allocation2 + $0xb18] sm:$0xff] %vm13530_vm0, %v13468_v0 }
  0xa4   : > { %825 = vst.msk [vmem:[#allocation2 + $0xb20] sm:$0xff] %vm13530_vm0, %v13468_v0  ;;  %826 = vst.msk [vmem:[#allocation2 + $0xb28] sm:$0xff] %vm13530_vm0, %v13468_v0 }
  0xa5   : > { %827 = vst.msk [vmem:[#allocation2 + $0xb30] sm:$0xff] %vm13530_vm0, %v13468_v0  ;;  %828 = vst.msk [vmem:[#allocation2 + $0xb38] sm:$0xff] %vm13530_vm0, %v13468_v0 }
  0xa6   : > { %829 = vst.msk [vmem:[#allocation2 + $0xb40] sm:$0xff] %vm13530_vm0, %v13468_v0  ;;  %830 = vst.msk [vmem:[#allocation2 + $0xb48] sm:$0xff] %vm13530_vm0, %v13468_v0 }
  0xa7   : > { %831 = vst.msk [vmem:[#allocation2 + $0xb50] sm:$0xff] %vm13530_vm0, %v13468_v0  ;;  %832 = vst.msk [vmem:[#allocation2 + $0xb58] sm:$0xff] %vm13530_vm0, %v13468_v0 }
  0xa8   : > { %833 = vst.msk [vmem:[#allocation2 + $0xb60] sm:$0xff] %vm13530_vm0, %v13468_v0  ;;  %834 = vst.msk [vmem:[#allocation2 + $0xb68] sm:$0xff] %vm13530_vm0, %v13468_v0 }
  0xa9   : > { %835 = vst.msk [vmem:[#allocation2 + $0xb70] sm:$0xff] %vm13530_vm0, %v13468_v0  ;;  %836 = vst.msk [vmem:[#allocation2 + $0xb78] sm:$0xff] %vm13530_vm0, %v13468_v0 }
  0xaa   : > { %837 = vst.msk [vmem:[#allocation2 + $0xb80] sm:$0xff] %vm13530_vm0, %v13468_v0  ;;  %838 = vst.msk [vmem:[#allocation2 + $0xb88] sm:$0xff] %vm13530_vm0, %v13468_v0 }
  0xab   : > { %839 = vst.msk [vmem:[#allocation2 + $0xb90] sm:$0xff] %vm13530_vm0, %v13468_v0  ;;  %840 = vst.msk [vmem:[#allocation2 + $0xb98] sm:$0xff] %vm13530_vm0, %v13468_v0 }
  0xac   : > { %841 = vst.msk [vmem:[#allocation2 + $0xba0] sm:$0xff] %vm13530_vm0, %v13468_v0  ;;  %842 = vst.msk [vmem:[#allocation2 + $0xba8] sm:$0xff] %vm13530_vm0, %v13468_v0 }
  0xad   : > { %843 = vst.msk [vmem:[#allocation2 + $0xbb0] sm:$0xff] %vm13530_vm0, %v13468_v0  ;;  %844 = vst.msk [vmem:[#allocation2 + $0xbb8] sm:$0xff] %vm13530_vm0, %v13468_v0 }
  0xae   : > { %845 = vst.msk [vmem:[#allocation2 + $0xbc0] sm:$0xff] %vm13530_vm0, %v13468_v0  ;;  %846 = vst.msk [vmem:[#allocation2 + $0xbc8] sm:$0xff] %vm13530_vm0, %v13468_v0 }
  0xaf   : > { %847 = vst.msk [vmem:[#allocation2 + $0xbd0] sm:$0xff] %vm13530_vm0, %v13468_v0  ;;  %848 = vst.msk [vmem:[#allocation2 + $0xbd8] sm:$0xff] %vm13530_vm0, %v13468_v0 }
  0xb0   : > { %849 = vst.msk [vmem:[#allocation2 + $0xbe0] sm:$0xff] %vm13530_vm0, %v13468_v0  ;;  %850 = vst.msk [vmem:[#allocation2 + $0xbe8] sm:$0xff] %vm13530_vm0, %v13468_v0 }
  0xb1   : > { %851 = vst.msk [vmem:[#allocation2 + $0xbf0] sm:$0xff] %vm13530_vm0, %v13468_v0  ;;  %852 = vst.msk [vmem:[#allocation2 + $0xbf8] sm:$0xff] %vm13530_vm0, %v13468_v0 }
  0xb2   : > { %853 = vst.msk [vmem:[#allocation2 + $0xc00] sm:$0xff] %vm13530_vm0, %v13468_v0  ;;  %854 = vst.msk [vmem:[#allocation2 + $0xc08] sm:$0xff] %vm13530_vm0, %v13468_v0 }
  0xb3   : > { %855 = vst.msk [vmem:[#allocation2 + $0xc10] sm:$0xff] %vm13530_vm0, %v13468_v0  ;;  %856 = vst.msk [vmem:[#allocation2 + $0xc18] sm:$0xff] %vm13530_vm0, %v13468_v0 }
  0xb4   : > { %857 = vst.msk [vmem:[#allocation2 + $0xc20] sm:$0xff] %vm13530_vm0, %v13468_v0  ;;  %858 = vst.msk [vmem:[#allocation2 + $0xc28] sm:$0xff] %vm13530_vm0, %v13468_v0 }
  0xb5   : > { %859 = vst.msk [vmem:[#allocation2 + $0xc30] sm:$0xff] %vm13530_vm0, %v13468_v0  ;;  %860 = vst.msk [vmem:[#allocation2 + $0xc38] sm:$0xff] %vm13530_vm0, %v13468_v0 }
  0xb6   : > { %861 = vst.msk [vmem:[#allocation2 + $0xc40] sm:$0xff] %vm13530_vm0, %v13468_v0  ;;  %862 = vst.msk [vmem:[#allocation2 + $0xc48] sm:$0xff] %vm13530_vm0, %v13468_v0 }
  0xb7   : > { %863 = vst.msk [vmem:[#allocation2 + $0xc50] sm:$0xff] %vm13530_vm0, %v13468_v0  ;;  %864 = vst.msk [vmem:[#allocation2 + $0xc58] sm:$0xff] %vm13530_vm0, %v13468_v0 }
  0xb8   : > { %865 = vst.msk [vmem:[#allocation2 + $0xc60] sm:$0xff] %vm13530_vm0, %v13468_v0  ;;  %866 = vst.msk [vmem:[#allocation2 + $0xc68] sm:$0xff] %vm13530_vm0, %v13468_v0 }
  0xb9   : > { %867 = vst.msk [vmem:[#allocation2 + $0xc70] sm:$0xff] %vm13530_vm0, %v13468_v0  ;;  %868 = vst.msk [vmem:[#allocation2 + $0xc78] sm:$0xff] %vm13530_vm0, %v13468_v0 }
  0xba   : > { %869 = vst.msk [vmem:[#allocation2 + $0xc80] sm:$0xff] %vm13530_vm0, %v13468_v0  ;;  %870 = vst.msk [vmem:[#allocation2 + $0xc88] sm:$0xff] %vm13530_vm0, %v13468_v0 }
  0xbb   : > { %871 = vst.msk [vmem:[#allocation2 + $0xc90] sm:$0xff] %vm13530_vm0, %v13468_v0  ;;  %872 = vst.msk [vmem:[#allocation2 + $0xc98] sm:$0xff] %vm13530_vm0, %v13468_v0 }
  0xbc   : > { %873 = vst.msk [vmem:[#allocation2 + $0xca0] sm:$0xff] %vm13530_vm0, %v13468_v0  ;;  %874 = vst.msk [vmem:[#allocation2 + $0xca8] sm:$0xff] %vm13530_vm0, %v13468_v0 }
  0xbd   : > { %875 = vst.msk [vmem:[#allocation2 + $0xcb0] sm:$0xff] %vm13530_vm0, %v13468_v0  ;;  %876 = vst.msk [vmem:[#allocation2 + $0xcb8] sm:$0xff] %vm13530_vm0, %v13468_v0 }
  0xbe   : > { %877 = vst.msk [vmem:[#allocation2 + $0xcc0] sm:$0xff] %vm13530_vm0, %v13468_v0  ;;  %878 = vst.msk [vmem:[#allocation2 + $0xcc8] sm:$0xff] %vm13530_vm0, %v13468_v0 }
  0xbf   : > { %879 = vst.msk [vmem:[#allocation2 + $0xcd0] sm:$0xff] %vm13530_vm0, %v13468_v0  ;;  %880 = vst.msk [vmem:[#allocation2 + $0xcd8] sm:$0xff] %vm13530_vm0, %v13468_v0 }
  0xc0   : > { %881 = vst.msk [vmem:[#allocation2 + $0xce0] sm:$0xff] %vm13530_vm0, %v13468_v0  ;;  %882 = vst.msk [vmem:[#allocation2 + $0xce8] sm:$0xff] %vm13530_vm0, %v13468_v0 }
  0xc1   : > { %883 = vst.msk [vmem:[#allocation2 + $0xcf0] sm:$0xff] %vm13530_vm0, %v13468_v0  ;;  %884 = vst.msk [vmem:[#allocation2 + $0xcf8] sm:$0xff] %vm13530_vm0, %v13468_v0 }
  0xc2   : > { %885 = vst.msk [vmem:[#allocation2 + $0xd00] sm:$0xff] %vm13530_vm0, %v13468_v0  ;;  %886 = vst.msk [vmem:[#allocation2 + $0xd08] sm:$0xff] %vm13530_vm0, %v13468_v0 }
  0xc3   : > { %887 = vst.msk [vmem:[#allocation2 + $0xd10] sm:$0xff] %vm13530_vm0, %v13468_v0  ;;  %888 = vst.msk [vmem:[#allocation2 + $0xd18] sm:$0xff] %vm13530_vm0, %v13468_v0 }
  0xc4   : > { %889 = vst.msk [vmem:[#allocation2 + $0xd20] sm:$0xff] %vm13530_vm0, %v13468_v0  ;;  %890 = vst.msk [vmem:[#allocation2 + $0xd28] sm:$0xff] %vm13530_vm0, %v13468_v0 }
  0xc5   : > { %891 = vst.msk [vmem:[#allocation2 + $0xd30] sm:$0xff] %vm13530_vm0, %v13468_v0  ;;  %892 = vst.msk [vmem:[#allocation2 + $0xd38] sm:$0xff] %vm13530_vm0, %v13468_v0 }
  0xc6   : > { %893 = vst.msk [vmem:[#allocation2 + $0xd40] sm:$0xff] %vm13530_vm0, %v13468_v0  ;;  %894 = vst.msk [vmem:[#allocation2 + $0xd48] sm:$0xff] %vm13530_vm0, %v13468_v0 }
  0xc7   : > { %895 = vst.msk [vmem:[#allocation2 + $0xd50] sm:$0xff] %vm13530_vm0, %v13468_v0  ;;  %896 = vst.msk [vmem:[#allocation2 + $0xd58] sm:$0xff] %vm13530_vm0, %v13468_v0 }
  0xc8   : > { %897 = vst.msk [vmem:[#allocation2 + $0xd60] sm:$0xff] %vm13530_vm0, %v13468_v0  ;;  %898 = vst.msk [vmem:[#allocation2 + $0xd68] sm:$0xff] %vm13530_vm0, %v13468_v0 }
  0xc9   : > { %899 = vst.msk [vmem:[#allocation2 + $0xd70] sm:$0xff] %vm13530_vm0, %v13468_v0  ;;  %900 = vst.msk [vmem:[#allocation2 + $0xd78] sm:$0xff] %vm13530_vm0, %v13468_v0 }
  0xca   : > { %901 = vst.msk [vmem:[#allocation2 + $0xd80] sm:$0xff] %vm13530_vm0, %v13468_v0  ;;  %902 = vst.msk [vmem:[#allocation2 + $0xd88] sm:$0xff] %vm13530_vm0, %v13468_v0 }
  0xcb   : > { %903 = vst.msk [vmem:[#allocation2 + $0xd90] sm:$0xff] %vm13530_vm0, %v13468_v0  ;;  %904 = vst.msk [vmem:[#allocation2 + $0xd98] sm:$0xff] %vm13530_vm0, %v13468_v0 }
  0xcc   : > { %905 = vst.msk [vmem:[#allocation2 + $0xda0] sm:$0xff] %vm13530_vm0, %v13468_v0  ;;  %906 = vst.msk [vmem:[#allocation2 + $0xda8] sm:$0xff] %vm13530_vm0, %v13468_v0 }
  0xcd   : > { %907 = vst.msk [vmem:[#allocation2 + $0xdb0] sm:$0xff] %vm13530_vm0, %v13468_v0  ;;  %908 = vst.msk [vmem:[#allocation2 + $0xdb8] sm:$0xff] %vm13530_vm0, %v13468_v0 }
  0xce   : > { %909 = vst.msk [vmem:[#allocation2 + $0xdc0] sm:$0xff] %vm13530_vm0, %v13468_v0  ;;  %910 = vst.msk [vmem:[#allocation2 + $0xdc8] sm:$0xff] %vm13530_vm0, %v13468_v0 }
  0xcf   : > { %911 = vst.msk [vmem:[#allocation2 + $0xdd0] sm:$0xff] %vm13530_vm0, %v13468_v0  ;;  %912 = vst.msk [vmem:[#allocation2 + $0xdd8] sm:$0xff] %vm13530_vm0, %v13468_v0 }
  0xd0   : > { %913 = vst.msk [vmem:[#allocation2 + $0xde0] sm:$0xff] %vm13530_vm0, %v13468_v0  ;;  %914 = vst.msk [vmem:[#allocation2 + $0xde8] sm:$0xff] %vm13530_vm0, %v13468_v0 }
  0xd1   : > { %915 = vst.msk [vmem:[#allocation2 + $0xdf0] sm:$0xff] %vm13530_vm0, %v13468_v0  ;;  %916 = vst.msk [vmem:[#allocation2 + $0xdf8] sm:$0xff] %vm13530_vm0, %v13468_v0 }
  0xd2   : > { %917 = vst.msk [vmem:[#allocation2 + $0xe00] sm:$0xff] %vm13530_vm0, %v13468_v0  ;;  %918 = vst.msk [vmem:[#allocation2 + $0xe08] sm:$0xff] %vm13530_vm0, %v13468_v0 }
  0xd3   : > { %919 = vst.msk [vmem:[#allocation2 + $0xe10] sm:$0xff] %vm13530_vm0, %v13468_v0  ;;  %920 = vst.msk [vmem:[#allocation2 + $0xe18] sm:$0xff] %vm13530_vm0, %v13468_v0 }
  0xd4   : > { %921 = vst.msk [vmem:[#allocation2 + $0xe20] sm:$0xff] %vm13530_vm0, %v13468_v0  ;;  %922 = vst.msk [vmem:[#allocation2 + $0xe28] sm:$0xff] %vm13530_vm0, %v13468_v0 }
  0xd5   : > { %923 = vst.msk [vmem:[#allocation2 + $0xe30] sm:$0xff] %vm13530_vm0, %v13468_v0  ;;  %924 = vst.msk [vmem:[#allocation2 + $0xe38] sm:$0xff] %vm13530_vm0, %v13468_v0 }
  0xd6   : > { %925 = vst.msk [vmem:[#allocation2 + $0xe40] sm:$0xff] %vm13530_vm0, %v13468_v0  ;;  %926 = vst.msk [vmem:[#allocation2 + $0xe48] sm:$0xff] %vm13530_vm0, %v13468_v0 }
  0xd7   : > { %927 = vst.msk [vmem:[#allocation2 + $0xe50] sm:$0xff] %vm13530_vm0, %v13468_v0  ;;  %928 = vst.msk [vmem:[#allocation2 + $0xe58] sm:$0xff] %vm13530_vm0, %v13468_v0 }
  0xd8   : > { %929 = vst.msk [vmem:[#allocation2 + $0xe60] sm:$0xff] %vm13530_vm0, %v13468_v0  ;;  %930 = vst.msk [vmem:[#allocation2 + $0xe68] sm:$0xff] %vm13530_vm0, %v13468_v0 }
  0xd9   : > { %931 = vst.msk [vmem:[#allocation2 + $0xe70] sm:$0xff] %vm13530_vm0, %v13468_v0  ;;  %932 = vst.msk [vmem:[#allocation2 + $0xe78] sm:$0xff] %vm13530_vm0, %v13468_v0 }
  0xda   : > { %13533 = vst [vmem:[#allocation3_spill] sm:$0xff] %v8569_v1  ;;  %13534 = vst [vmem:[#allocation4_spill] sm:$0xff] %v8572_v2 }
  0xdb   : > { %13535 = vst [vmem:[#allocation5_spill] sm:$0xff] %v8575_v3  ;;  %1014 = vst.msk [vmem:[#allocation2 + $0x618] sm:$0xff] %vm13530_vm0, %v8569_v1 }
  0xdc   : > { %1015 = vst.msk [vmem:[#allocation2 + $0x620] sm:$0xff] %vm13530_vm0, %v8572_v2  ;;  %13536 = vst [vmem:[#allocation6_spill] sm:$0xff] %v8582_v4 }
  0xdd   : > { %1016 = vst.msk [vmem:[#allocation2 + $0x658] sm:$0xff] %vm13530_vm0, %v8575_v3  ;;  %13537 = vst [vmem:[#allocation7_spill] sm:$0xff] %v8587_v5 }
  0xde   : > { %13538 = vst [vmem:[#allocation8_spill] sm:$0xff] %v8590_v6  ;;  %1017 = vst.msk [vmem:[#allocation2 + $0x660] sm:$0xff] %vm13530_vm0, %v8582_v4 }
  0xdf   : > { %1018 = vst.msk [vmem:[#allocation2 + $0x698] sm:$0xff] %vm13530_vm0, %v8587_v5  ;;  %1019 = vst.msk [vmem:[#allocation2 + $0x6a0] sm:$0xff] %vm13530_vm0, %v8590_v6 }
  0xe0   : > { %13539 = vst [vmem:[#allocation9_spill] sm:$0xff] %v8601_v11  ;;  %13540 = vst [vmem:[#allocation10_spill] sm:$0xff] %v8604_v12 }
  0xe1   : > { %13541 = vst [vmem:[#allocation11_spill] sm:$0xff] %v8607_v13  ;;  %1020 = vst.msk [vmem:[#allocation2 + $0x6d8] sm:$0xff] %vm13530_vm0, %v8601_v11 }
  0xe2   : > { %1021 = vst.msk [vmem:[#allocation2 + $0x6e0] sm:$0xff] %vm13530_vm0, %v8604_v12  ;;  %13542 = vst [vmem:[#allocation12_spill] sm:$0xff] %v8616_v14  ;;  %v8682_v34 = vld [vmem:[#allocation2 + $0x612] sm:$0xff] }
  0xe3   : > { %1022 = vst.msk [vmem:[#allocation2 + $0x718] sm:$0xff] %vm13530_vm0, %v8607_v13  ;;  %13543 = vst [vmem:[#allocation13_spill] sm:$0xff] %v8621_v15  ;;  %v8680_v33 = vld [vmem:[#allocation2 + $0x61a] sm:$0xff]  ;;  %1876 = vrot.lane.b32.xlu0 %v8682_v34, %s7631_s20 }
  0xe4   : > { %1023 = vst.msk [vmem:[#allocation2 + $0x720] sm:$0xff] %vm13530_vm0, %v8616_v14  ;;  %1024 = vst.msk [vmem:[#allocation2 + $0x758] sm:$0xff] %vm13530_vm0, %v8621_v15  ;;  %1878 = vrot.lane.b32.xlu1 %v8680_v33, %s7631_s20  ;;  %v8690_v36 = vld [vmem:[#allocation2 + $0x652] sm:$0xff] }
  0xe5   : > { %13544 = vst [vmem:[#allocation14_spill] sm:$0xff] %v8628_v19  ;;  %13545 = vst [vmem:[#allocation15_spill] sm:$0xff] %v8631_v20  ;;  %v8688_v35 = vld [vmem:[#allocation2 + $0x65a] sm:$0xff] }
  0xe6   : > { %13546 = vst [vmem:[#allocation16_spill] sm:$0xff] %v8634_v21  ;;  %1025 = vst.msk [vmem:[#allocation2 + $0x760] sm:$0xff] %vm13530_vm0, %v8628_v19  ;;  %v8696_v37 = vld [vmem:[#allocation2 + $0x69a] sm:$0xff]  ;;  %v8698_v38 = vld [vmem:[#allocation2 + $0x692] sm:$0xff] }
  0xe7   : > { %1026 = vst.msk [vmem:[#allocation2 + $0x798] sm:$0xff] %vm13530_vm0, %v8631_v20  ;;  %1027 = vst.msk [vmem:[#allocation2 + $0x7a0] sm:$0xff] %vm13530_vm0, %v8634_v21  ;;  %1880 = vrot.lane.b32.xlu0 %v8690_v36, %s7631_s20 }
  0xe8   : > { %13547 = vst [vmem:[#allocation17_spill] sm:$0xff] %v8645_v23  ;;  %13548 = vst [vmem:[#allocation18_spill] sm:$0xff] %v8648_v24  ;;  %1882 = vrot.lane.b32.xlu1 %v8688_v35, %s7631_s20  ;;  %v8729_v45 = vld [vmem:[#allocation2 + $0x6d2] sm:$0xff] }
  0xe9   : > { %1028 = vst.msk [vmem:[#allocation2 + $0x7d8] sm:$0xff] %vm13530_vm0, %v8645_v23  ;;  %1029 = vst.msk [vmem:[#allocation2 + $0x7e0] sm:$0xff] %vm13530_vm0, %v8648_v24  ;;  %v8727_v44 = vld [vmem:[#allocation2 + $0x6da] sm:$0xff]  ;;  %v8936_v20 = vld [vmem:[#allocation2 + $0x6e6] sm:$0xff] }
  0xea   : > { %13549 = vst [vmem:[#allocation19_spill] sm:$0xff] %v8661_v27  ;;  %1030 = vst.msk [vmem:[#allocation2 + $0x818] sm:$0xff] %vm13530_vm0, %v8655_v25  ;;  %v8747_v49 = vld [vmem:[#allocation2 + $0x712] sm:$0xff]  ;;  %v8938_v21 = vld [vmem:[#allocation2 + $0x6de] sm:$0xff] }
  0xeb   : > { %1031 = vst.msk [vmem:[#allocation2 + $0x820] sm:$0xff] %vm13530_vm0, %v8658_v26  ;;  %13550 = vst [vmem:[#allocation20_spill] sm:$0xff] %v8668_v28  ;;  %1884 = vrot.lane.b32.xlu0 %v8698_v38, %s7631_s20  ;;  %v8745_v48 = vld [vmem:[#allocation2 + $0x71a] sm:$0xff]  ;;  %v8765_v53 = vld [vmem:[#allocation2 + $0x752] sm:$0xff] }
  0xec   : > { %1032 = vst.msk [vmem:[#allocation2 + $0x858] sm:$0xff] %vm13530_vm0, %v8661_v27  ;;  %1033 = vst.msk [vmem:[#allocation2 + $0x860] sm:$0xff] %vm13530_vm0, %v8668_v28  ;;  %1886 = vrot.lane.b32.xlu1 %v8696_v37, %s7631_s20  ;;  %v8948_v13 = vld [vmem:[#allocation2 + $0x726] sm:$0xff]  ;;  %v8950_v14 = vld [vmem:[#allocation2 + $0x71e] sm:$0xff] }
  0xed   : > { %13551 = vst [vmem:[#allocation21_spill] sm:$0xff] %v8701_v39  ;;  %1035 = vst.msk [vmem:[#allocation2 + $0x8a0] sm:$0xff] %vm13530_vm0, %v8701_v39  ;;  %v8763_v52 = vld [vmem:[#allocation2 + $0x75a] sm:$0xff]  ;;  %v8960_v5 = vld [vmem:[#allocation2 + $0x766] sm:$0xff] }
  0xee   : > { %13552 = vst [vmem:[#allocation22_spill] sm:$0xff] %v8706_v40  ;;  %1034 = vst.msk [vmem:[#allocation2 + $0x898] sm:$0xff] %vm13530_vm0, %v8706_v40  ;;  %v8781_v56 = vld [vmem:[#allocation2 + $0x79a] sm:$0xff]  ;;  %v8783_v57 = vld [vmem:[#allocation2 + $0x792] sm:$0xff] }
  0xef   : > { %13553 = vst [vmem:[#allocation23_spill] sm:$0xff] %v8711_v41  ;;  %13554 = vst [vmem:[#allocation24_spill] sm:$0xff] %v8714_v42  ;;  %1888 = vrot.lane.b32.xlu0 %v8729_v45, %s7631_s20  ;;  %v8962_v6 = vld [vmem:[#allocation2 + $0x75e] sm:$0xff]  ;;  %v8972_v4 = vld [vmem:[#allocation2 + $0x7a6] sm:$0xff] }
  0xf0   : > { %1037 = vst.msk [vmem:[#allocation2 + $0x8e0] sm:$0xff] %vm13530_vm0, %v8711_v41  ;;  %1036 = vst.msk [vmem:[#allocation2 + $0x8d8] sm:$0xff] %vm13530_vm0, %v8714_v42  ;;  %1890 = vrot.lane.b32.xlu1 %v8727_v44, %s7631_s20  ;;  %v8796_v59 = vld [vmem:[#allocation2 + $0x7da] sm:$0xff]  ;;  %v8798_v60 = vld [vmem:[#allocation2 + $0x7d2] sm:$0xff] }
  0xf1   : > { %13555 = vst [vmem:[#allocation25_spill] sm:$0xff] %v8725_v43  ;;  %1039 = vst.msk [vmem:[#allocation2 + $0x920] sm:$0xff] %vm13530_vm0, %v8725_v43  ;;  %v8806_v62 = vld [vmem:[#allocation2 + $0x812] sm:$0xff]  ;;  %v8974_v2 = vld [vmem:[#allocation2 + $0x79e] sm:$0xff] }
  0xf2   : > { %13556 = vst [vmem:[#allocation26_spill] sm:$0xff] %v8734_v46  ;;  %1038 = vst.msk [vmem:[#allocation2 + $0x918] sm:$0xff] %vm13530_vm0, %v8734_v46  ;;  %v8804_v61 = vld [vmem:[#allocation2 + $0x81a] sm:$0xff] }
  0xf3   : > { %13557 = vst [vmem:[#allocation27_spill] sm:$0xff] %v8743_v47  ;;  %1041 = vst.msk [vmem:[#allocation2 + $0x960] sm:$0xff] %vm13530_vm0, %v8743_v47  ;;  %1892 = vrot.lane.b32.xlu0 %v8747_v49, %s7631_s20  ;;  %v8812_v63 = vld [vmem:[#allocation2 + $0x85a] sm:$0xff]  ;;  %v8814_v7 = vld [vmem:[#allocation2 + $0x852] sm:$0xff] }
  0xf4   : > { %13558 = vst [vmem:[#allocation28_spill] sm:$0xff] %v8752_v50  ;;  %1040 = vst.msk [vmem:[#allocation2 + $0x958] sm:$0xff] %vm13530_vm0, %v8752_v50  ;;  %1894 = vrot.lane.b32.xlu1 %v8745_v48, %s7631_s20 }
  0xf5   : > { %13559 = vst [vmem:[#allocation29_spill] sm:$0xff] %v8761_v51  ;;  %1043 = vst.msk [vmem:[#allocation2 + $0x9a0] sm:$0xff] %vm13530_vm0, %v8761_v51 }
  0xf6   : > { %13560 = vst [vmem:[#allocation30_spill] sm:$0xff] %v8770_v54  ;;  %1042 = vst.msk [vmem:[#allocation2 + $0x998] sm:$0xff] %vm13530_vm0, %v8770_v54  ;;  %v8984_v54 = vld [vmem:[#allocation2 + $0x7e6] sm:$0xff] }
  0xf7   : > { %1896 = vrot.lane.b32.xlu0 %v8765_v53, %s7631_s20  ;;  %13561 = vst [vmem:[#allocation31_spill] sm:$0xff] %v8779_v55  ;;  %1045 = vst.msk [vmem:[#allocation2 + $0x9e0] sm:$0xff] %vm13530_vm0, %v8779_v55 }
  0xf8   : > { %1898 = vrot.lane.b32.xlu1 %v8763_v52, %s7631_s20  ;;  %13562 = vst [vmem:[#allocation32_spill] sm:$0xff] %v8788_v58  ;;  %1044 = vst.msk [vmem:[#allocation2 + $0x9d8] sm:$0xff] %vm13530_vm0, %v8788_v58 }
  0xfb   : > { %1900 = vrot.lane.b32.xlu0 %v8783_v57, %s7631_s20 }
  0xfc   : > { %1902 = vrot.lane.b32.xlu1 %v8781_v56, %s7631_s20 }
  0xff   : > { %1904 = vrot.lane.b32.xlu0 %v8798_v60, %s7631_s20 }
 0x100   : > { %1906 = vrot.lane.b32.xlu1 %v8796_v59, %s7631_s20 }
 0x103   : > { %1908 = vrot.lane.b32.xlu0 %v8806_v62, %s7631_s20 }
 0x104   : > { %1910 = vrot.lane.b32.xlu1 %v8804_v61, %s7631_s20 }
 0x107   : > { %1912 = vrot.lane.b32.xlu0 %v8814_v7, %s7631_s20 }
 0x108   : > { %1914 = vrot.lane.b32.xlu1 %v8812_v63, %s7631_s20 }
 0x10b   : > { %1980 = vrot.lane.b32.xlu0 %v1079_v9, %s7632_s21  ;;  %v1092_v9 = vld [vmem:[#allocation2 + $0x620] sm:$0xff] }
 0x10c   : > { %1982 = vrot.lane.b32.xlu1 %v1080_v8, %s7632_s21  ;;  %v1089_v8 = vld [vmem:[#allocation2 + $0x5d8] sm:$0xff] }
 0x10f   : > { %1984 = vrot.lane.b32.xlu0 %v1081_v16, %s7632_s21  ;;  %v1094_v16 = vld [vmem:[#allocation2 + $0x660] sm:$0xff] }
 0x110   : > { %1986 = vrot.lane.b32.xlu1 %v1082_v10, %s7632_s21  ;;  %v1091_v10 = vld [vmem:[#allocation2 + $0x618] sm:$0xff] }
 0x113   : > { %1988 = vrot.lane.b32.xlu0 %v1083_v18, %s7632_s21  ;;  %v1096_v18 = vld [vmem:[#allocation2 + $0x6a0] sm:$0xff] }
 0x114   : > { %1990 = vrot.lane.b32.xlu1 %v1084_v17, %s7632_s21  ;;  %v1093_v17 = vld [vmem:[#allocation2 + $0x658] sm:$0xff] }
 0x117   : > { %1992 = vrot.lane.b32.xlu0 %v1085_v29, %s7632_s21  ;;  %v1098_v29 = vld [vmem:[#allocation2 + $0x6e0] sm:$0xff] }
 0x118   : > { %1994 = vrot.lane.b32.xlu1 %v1086_v22, %s7632_s21  ;;  %v1095_v22 = vld [vmem:[#allocation2 + $0x698] sm:$0xff] }
 0x11b   : > { %1996 = vrot.lane.b32.xlu0 %v1087_v31, %s7632_s21  ;;  %v1100_v31 = vld [vmem:[#allocation2 + $0x720] sm:$0xff] }
 0x11c   : > { %1998 = vrot.lane.b32.xlu1 %v1088_v30, %s7632_s21  ;;  %v1097_v30 = vld [vmem:[#allocation2 + $0x6d8] sm:$0xff] }
 0x11f   : > { %2000 = vrot.lane.b32.xlu0 %v1089_v8, %s7632_s21  ;;  %v1102_v8 = vld [vmem:[#allocation2 + $0x760] sm:$0xff] }
 0x120   : > { %2002 = vrot.lane.b32.xlu1 %v1090_v32, %s7632_s21  ;;  %v1099_v32 = vld [vmem:[#allocation2 + $0x718] sm:$0xff] }
 0x123   : > { %2004 = vrot.lane.b32.xlu0 %v1091_v10, %s7632_s21  ;;  %v1104_v10 = vld [vmem:[#allocation2 + $0x7a0] sm:$0xff] }
 0x124   : > { %2006 = vrot.lane.b32.xlu1 %v1092_v9, %s7632_s21  ;;  %v1101_v9 = vld [vmem:[#allocation2 + $0x758] sm:$0xff] }
 0x127   : > { %2008 = vrot.lane.b32.xlu0 %v1093_v17, %s7632_s21  ;;  %v1106_v17 = vld [vmem:[#allocation2 + $0x7e0] sm:$0xff] }
 0x128   : > { %2010 = vrot.lane.b32.xlu1 %v1094_v16, %s7632_s21  ;;  %v1103_v16 = vld [vmem:[#allocation2 + $0x798] sm:$0xff] }
 0x12b   : > { %2012 = vrot.lane.b32.xlu0 %v1095_v22, %s7632_s21  ;;  %v8846_v22 = vpop.permute.xlu1 %1856 }
 0x12c   : > { %2014 = vrot.lane.b32.xlu1 %v1096_v18, %s7632_s21  ;;  %v1105_v18 = vld [vmem:[#allocation2 + $0x7d8] sm:$0xff]  ;;  %13563 = vst [vmem:[#allocation33_spill] sm:$0xff] %v8846_v22 }
 0x12d   : > { %v8926_v22 = vld [vmem:[#allocation2 + $0x69e] sm:$0xff] }
 0x12f   : > { %2016 = vrot.lane.b32.xlu0 %v1097_v30, %s7632_s21  ;;  %v1108_v30 = vld [vmem:[#allocation2 + $0x820] sm:$0xff] }
 0x130   : > { %2018 = vrot.lane.b32.xlu1 %v1098_v29, %s7632_s21  ;;  %v8848_v29 = vpop.permute.xlu0 %1852 }
 0x131   : > { %13564 = vst [vmem:[#allocation34_spill] sm:$0xff] %v8848_v29 }
 0x133   : > { %2020 = vrot.lane.b32.xlu0 %v1099_v32, %s7632_s21  ;;  %v8852_v32 = vpop.permute.xlu1 %1858 }
 0x134   : > { %2022 = vrot.lane.b32.xlu1 %v1100_v31, %s7632_s21  ;;  %v1107_v31 = vld [vmem:[#allocation2 + $0x818] sm:$0xff]  ;;  %13565 = vst [vmem:[#allocation35_spill] sm:$0xff] %v8852_v32 }
 0x137   : > { %2024 = vrot.lane.b32.xlu0 %v1101_v9, %s7632_s21  ;;  %v1110_v9 = vld [vmem:[#allocation2 + $0x860] sm:$0xff] }
 0x138   : > { %2026 = vrot.lane.b32.xlu1 %v1102_v8, %s7632_s21  ;;  %v8854_v8 = vpop.permute.xlu0 %1854 }
 0x139   : > { %13566 = vst [vmem:[#allocation36_spill] sm:$0xff] %v8854_v8 }
 0x13b   : > { %2028 = vrot.lane.b32.xlu0 %v1103_v16, %s7632_s21  ;;  %v8858_v16 = vpop.permute.xlu1 %1862 }
 0x13c   : > { %2030 = vrot.lane.b32.xlu1 %v1104_v10, %s7632_s21  ;;  %v1109_v10 = vld [vmem:[#allocation2 + $0x858] sm:$0xff]  ;;  %13567 = vst [vmem:[#allocation37_spill] sm:$0xff] %v8858_v16  ;;  %v8860_v0 = vpop.permute.xlu0 %1860 }
 0x13d   : > { %13568 = vst [vmem:[#allocation38_spill] sm:$0xff] %v8860_v0 }
 0x13f   : > { %2032 = vrot.lane.b32.xlu0 %v1105_v18, %s7632_s21  ;;  %v1111_v18 = vld [vmem:[#allocation2 + $0x49e] sm:$0xff]  ;;  %v8864_v29 = vpop.permute.xlu1 %1866 }
 0x140   : > { %2034 = vrot.lane.b32.xlu1 %v1106_v17, %s7632_s21  ;;  %v1112_v17 = vld [vmem:[#allocation2 + $0x4a6] sm:$0xff]  ;;  %13569 = vst [vmem:[#allocation39_spill] sm:$0xff] %v8864_v29  ;;  %v8866_v32 = vpop.permute.xlu0 %1864 }
 0x141   : > { %13570 = vst [vmem:[#allocation40_spill] sm:$0xff] %v8866_v32 }
 0x143   : > { %2036 = vrot.lane.b32.xlu0 %v1107_v31, %s7632_s21  ;;  %v1113_v31 = vld [vmem:[#allocation2 + $0x4de] sm:$0xff]  ;;  %v8870_v16 = vpop.permute.xlu1 %1870 }
 0x144   : > { %2038 = vrot.lane.b32.xlu1 %v1108_v30, %s7632_s21  ;;  %v1114_v30 = vld [vmem:[#allocation2 + $0x4e6] sm:$0xff]  ;;  %13571 = vst [vmem:[#allocation41_spill] sm:$0xff] %v8870_v16  ;;  %v8872_v0 = vpop.permute.xlu0 %1868 }
 0x145   : > { %13572 = vst [vmem:[#allocation42_spill] sm:$0xff] %v8872_v0 }
 0x147   : > { %2040 = vrot.lane.b32.xlu0 %v1109_v10, %s7632_s21  ;;  %v1115_v10 = vld [vmem:[#allocation2 + $0x51e] sm:$0xff]  ;;  %v8876_v29 = vpop.permute.xlu1 %1874 }
 0x148   : > { %2042 = vrot.lane.b32.xlu1 %v1110_v9, %s7632_s21  ;;  %v1116_v9 = vld [vmem:[#allocation2 + $0x526] sm:$0xff]  ;;  %13573 = vst [vmem:[#allocation43_spill] sm:$0xff] %v8876_v29  ;;  %v8878_v32 = vpop.permute.xlu0 %1872 }
 0x149   : > { %13574 = vst [vmem:[#allocation44_spill] sm:$0xff] %v8878_v32 }
 0x14b   : > { %2108 = vrot.lane.b32.xlu0 %v1111_v18, %s7633_s22  ;;  %v1117_v18 = vld [vmem:[#allocation2 + $0x55e] sm:$0xff] }
 0x14c   : > { %2110 = vrot.lane.b32.xlu1 %v1112_v17, %s7633_s22  ;;  %v1118_v17 = vld [vmem:[#allocation2 + $0x566] sm:$0xff] }
 0x14f   : > { %2112 = vrot.lane.b32.xlu0 %v1113_v31, %s7633_s22  ;;  %v1119_v31 = vld [vmem:[#allocation2 + $0x59e] sm:$0xff] }
 0x150   : > { %2114 = vrot.lane.b32.xlu1 %v1114_v30, %s7633_s22  ;;  %v1120_v30 = vld [vmem:[#allocation2 + $0x5a6] sm:$0xff] }
 0x153   : > { %2116 = vrot.lane.b32.xlu0 %v1115_v10, %s7633_s22  ;;  %v1121_v10 = vld [vmem:[#allocation2 + $0x5de] sm:$0xff] }
 0x154   : > { %2118 = vrot.lane.b32.xlu1 %v1116_v9, %s7633_s22  ;;  %v1122_v9 = vld [vmem:[#allocation2 + $0x5e6] sm:$0xff] }
 0x155   : > { %v8884_v16 = vpop.permute.xlu0 %1876 }
 0x156   : > { %v8882_v8 = vpop.permute.xlu1 %1878  ;;  %13576 = vst [vmem:[#allocation46_spill] sm:$0xff] %v8884_v16  ;;  %v8924_v16 = vld [vmem:[#allocation2 + $0x6a6] sm:$0xff] }
 0x157   : > { %13575 = vst [vmem:[#allocation45_spill] sm:$0xff] %v8882_v8  ;;  %2120 = vrot.lane.b32.xlu0 %v1117_v18, %s7633_s22  ;;  %v8902_v18 = vld [vmem:[#allocation2 + $0x61e] sm:$0xff] }
 0x158   : > { %2122 = vrot.lane.b32.xlu1 %v1118_v17, %s7633_s22  ;;  %v8900_v17 = vld [vmem:[#allocation2 + $0x626] sm:$0xff] }
 0x159   : > { %v8890_v29 = vpop.permute.xlu0 %1880 }
 0x15a   : > { %v8888_v0 = vpop.permute.xlu1 %1882  ;;  %13578 = vst [vmem:[#allocation48_spill] sm:$0xff] %v8890_v29 }
 0x15b   : > { %13577 = vst [vmem:[#allocation47_spill] sm:$0xff] %v8888_v0  ;;  %2124 = vrot.lane.b32.xlu0 %v1119_v31, %s7633_s22  ;;  %v8914_v31 = vld [vmem:[#allocation2 + $0x65e] sm:$0xff] }
 0x15c   : > { %2126 = vrot.lane.b32.xlu1 %v1120_v30, %s7633_s22  ;;  %v8912_v30 = vld [vmem:[#allocation2 + $0x666] sm:$0xff] }
 0x15d   : > { %v8896_v8 = vpop.permute.xlu0 %1884 }
 0x15e   : > { %v8894_v32 = vpop.permute.xlu1 %1886 }
 0x15f   : > { %2128 = vrot.lane.b32.xlu0 %v1121_v10, %s7633_s22 }
 0x160   : > { %2130 = vrot.lane.b32.xlu1 %v1122_v9, %s7633_s22 }
 0x161   : > { %v8906_v29 = vpop.permute.xlu0 %1888 }
 0x162   : > { %v8904_v0 = vpop.permute.xlu1 %1890 }
 0x163   : > { %2132 = vrot.lane.b32.xlu0 %v8902_v18, %s7633_s22 }
 0x164   : > { %2134 = vrot.lane.b32.xlu1 %v8900_v17, %s7633_s22 }
 0x165   : > { %v8918_v10 = vpop.permute.xlu0 %1892 }
 0x166   : > { %v8916_v9 = vpop.permute.xlu1 %1894 }
 0x167   : > { %2136 = vrot.lane.b32.xlu0 %v8914_v31, %s7633_s22 }
 0x168   : > { %2138 = vrot.lane.b32.xlu1 %v8912_v30, %s7633_s22 }
 0x169   : > { %v8930_v24 = vpop.permute.xlu0 %1896 }
 0x16a   : > { %v8928_v23 = vpop.permute.xlu1 %1898 }
 0x16b   : > { %2140 = vrot.lane.b32.xlu0 %v8926_v22, %s7633_s22 }
 0x16c   : > { %2142 = vrot.lane.b32.xlu1 %v8924_v16, %s7633_s22 }
 0x16d   : > { %v8942_v19 = vpop.permute.xlu0 %1900 }
 0x16e   : > { %v8940_v15 = vpop.permute.xlu1 %1902 }
 0x16f   : > { %2144 = vrot.lane.b32.xlu0 %v8938_v21, %s7633_s22 }
 0x170   : > { %2146 = vrot.lane.b32.xlu1 %v8936_v20, %s7633_s22 }
 0x171   : > { %v8954_v12 = vpop.permute.xlu0 %1904 }
 0x172   : > { %v8952_v11 = vpop.permute.xlu1 %1906  ;;  %13580 = vst [vmem:[#allocation50_spill] sm:$0xff] %v8954_v12 }
 0x173   : > { %13579 = vst [vmem:[#allocation49_spill] sm:$0xff] %v8952_v11  ;;  %2148 = vrot.lane.b32.xlu0 %v8950_v14, %s7633_s22 }
 0x174   : > { %2150 = vrot.lane.b32.xlu1 %v8948_v13, %s7633_s22 }
 0x175   : > { %v8966_v1 = vpop.permute.xlu0 %1908 }
 0x176   : > { %v8964_v3 = vpop.permute.xlu1 %1910  ;;  %13582 = vst [vmem:[#allocation52_spill] sm:$0xff] %v8966_v1  ;;  %v8986_v1 = vld [vmem:[#allocation2 + $0x7de] sm:$0xff] }
 0x177   : > { %13581 = vst [vmem:[#allocation51_spill] sm:$0xff] %v8964_v3  ;;  %2152 = vrot.lane.b32.xlu0 %v8962_v6, %s7633_s22 }
 0x178   : > { %2154 = vrot.lane.b32.xlu1 %v8960_v5, %s7633_s22 }
 0x179   : > { %v8978_v55 = vpop.permute.xlu0 %1912 }
 0x17a   : > { %v8976_v58 = vpop.permute.xlu1 %1914  ;;  %13584 = vst [vmem:[#allocation54_spill] sm:$0xff] %v8978_v55  ;;  %v8996_v55 = vld [vmem:[#allocation2 + $0x826] sm:$0xff] }
 0x17b   : > { %13583 = vst [vmem:[#allocation53_spill] sm:$0xff] %v8976_v58  ;;  %2156 = vrot.lane.b32.xlu0 %v8974_v2, %s7633_s22  ;;  %v8998_v58 = vld [vmem:[#allocation2 + $0x81e] sm:$0xff] }
 0x17c   : > { %2158 = vrot.lane.b32.xlu1 %v8972_v4, %s7633_s22 }
 0x17d   : > { %v8990_v3 = vpop.permute.xlu0 %1980 }
 0x17e   : > { %v8988_v51 = vpop.permute.xlu1 %1982  ;;  %13586 = vst [vmem:[#allocation56_spill] sm:$0xff] %v8990_v3  ;;  %v9008_v3 = vld [vmem:[#allocation2 + $0x866] sm:$0xff] }
 0x17f   : > { %13585 = vst [vmem:[#allocation55_spill] sm:$0xff] %v8988_v51  ;;  %2160 = vrot.lane.b32.xlu0 %v8986_v1, %s7633_s22  ;;  %v9010_v51 = vld [vmem:[#allocation2 + $0x85e] sm:$0xff] }
 0x180   : > { %2162 = vrot.lane.b32.xlu1 %v8984_v54, %s7633_s22 }
 0x181   : > { %v9002_v12 = vpop.permute.xlu0 %1984 }
 0x182   : > { %v9000_v50 = vpop.permute.xlu1 %1986  ;;  %13588 = vst [vmem:[#allocation58_spill] sm:$0xff] %v9002_v12 }
 0x183   : > { %13587 = vst [vmem:[#allocation57_spill] sm:$0xff] %v9000_v50  ;;  %2164 = vrot.lane.b32.xlu0 %v8998_v58, %s7633_s22 }
 0x184   : > { %2166 = vrot.lane.b32.xlu1 %v8996_v55, %s7633_s22 }
 0x185   : > { %v9014_v11 = vpop.permute.xlu0 %1988 }
 0x186   : > { %v9012_v47 = vpop.permute.xlu1 %1990  ;;  %13590 = vst [vmem:[#allocation60_spill] sm:$0xff] %v9014_v11 }
 0x187   : > { %13589 = vst [vmem:[#allocation59_spill] sm:$0xff] %v9012_v47  ;;  %2168 = vrot.lane.b32.xlu0 %v9010_v51, %s7633_s22 }
 0x188   : > { %2170 = vrot.lane.b32.xlu1 %v9008_v3, %s7633_s22 }
 0x189   : > { %v9022_v50 = vpop.permute.xlu0 %1992 }
 0x18a   : > { %v9020_v12 = vpop.permute.xlu1 %1994  ;;  %13592 = vst [vmem:[#allocation62_spill] sm:$0xff] %v9022_v50 }
 0x18b   : > { %13591 = vst [vmem:[#allocation61_spill] sm:$0xff] %v9020_v12  ;;  %2236 = vrot.lane.b32.xlu0 %v8682_v34, %s7634_s23 }
 0x18c   : > { %2238 = vrot.lane.b32.xlu1 %v8680_v33, %s7634_s23 }
 0x18d   : > { %v9030_v11 = vpop.permute.xlu0 %1996 }
 0x18e   : > { %v9028_v47 = vpop.permute.xlu1 %1998  ;;  %13594 = vst [vmem:[#allocation64_spill] sm:$0xff] %v9030_v11  ;;  %v9138_v11 = vld [vmem:[#allocation2 + $0x952] sm:$0xff] }
 0x18f   : > { %13593 = vst [vmem:[#allocation63_spill] sm:$0xff] %v9028_v47  ;;  %2240 = vrot.lane.b32.xlu0 %v8690_v36, %s7634_s23  ;;  %v9136_v47 = vld [vmem:[#allocation2 + $0x95a] sm:$0xff] }
 0x190   : > { %2242 = vrot.lane.b32.xlu1 %v8688_v35, %s7634_s23 }
 0x191   : > { %v9038_v50 = vpop.permute.xlu0 %2000 }
 0x192   : > { %v9036_v12 = vpop.permute.xlu1 %2002  ;;  %13596 = vst [vmem:[#allocation66_spill] sm:$0xff] %v9038_v50 }
 0x193   : > { %13595 = vst [vmem:[#allocation65_spill] sm:$0xff] %v9036_v12  ;;  %2244 = vrot.lane.b32.xlu0 %v8698_v38, %s7634_s23 }
 0x194   : > { %2246 = vrot.lane.b32.xlu1 %v8696_v37, %s7634_s23 }
 0x195   : > { %v9046_v34 = vpop.permute.xlu0 %2004 }
 0x196   : > { %v9044_v33 = vpop.permute.xlu1 %2006  ;;  %13598 = vst [vmem:[#allocation68_spill] sm:$0xff] %v9046_v34  ;;  %v9126_v34 = vld [vmem:[#allocation2 + $0x912] sm:$0xff] }
 0x197   : > { %13597 = vst [vmem:[#allocation67_spill] sm:$0xff] %v9044_v33  ;;  %2248 = vrot.lane.b32.xlu0 %v8729_v45, %s7634_s23  ;;  %v9124_v33 = vld [vmem:[#allocation2 + $0x91a] sm:$0xff] }
 0x198   : > { %2250 = vrot.lane.b32.xlu1 %v8727_v44, %s7634_s23 }
 0x199   : > { %v9054_v36 = vpop.permute.xlu0 %2008 }
 0x19a   : > { %v9052_v35 = vpop.permute.xlu1 %2010  ;;  %13600 = vst [vmem:[#allocation70_spill] sm:$0xff] %v9054_v36 }
 0x19b   : > { %13599 = vst [vmem:[#allocation69_spill] sm:$0xff] %v9052_v35  ;;  %2252 = vrot.lane.b32.xlu0 %v8747_v49, %s7634_s23 }
 0x19c   : > { %2254 = vrot.lane.b32.xlu1 %v8745_v48, %s7634_s23 }
 0x19d   : > { %v9062_v38 = vpop.permute.xlu0 %2012 }
 0x19e   : > { %v9060_v37 = vpop.permute.xlu1 %2014 }
 0x19f   : > { %2256 = vrot.lane.b32.xlu0 %v8765_v53, %s7634_s23 }
 0x1a0   : > { %2258 = vrot.lane.b32.xlu1 %v8763_v52, %s7634_s23 }
 0x1a1   : > { %v9070_v45 = vpop.permute.xlu0 %2016 }
 0x1a2   : > { %v9068_v44 = vpop.permute.xlu1 %2018 }
 0x1a3   : > { %2260 = vrot.lane.b32.xlu0 %v8783_v57, %s7634_s23 }
 0x1a4   : > { %2262 = vrot.lane.b32.xlu1 %v8781_v56, %s7634_s23 }
 0x1a5   : > { %v9078_v49 = vpop.permute.xlu0 %2020 }
 0x1a6   : > { %v9076_v48 = vpop.permute.xlu1 %2022 }
 0x1a7   : > { %2264 = vrot.lane.b32.xlu0 %v8798_v60, %s7634_s23  ;;  %v9102_v60 = vld [vmem:[#allocation2 + $0x892] sm:$0xff] }
 0x1a8   : > { %2266 = vrot.lane.b32.xlu1 %v8796_v59, %s7634_s23  ;;  %v9100_v59 = vld [vmem:[#allocation2 + $0x89a] sm:$0xff] }
 0x1a9   : > { %v9086_v53 = vpop.permute.xlu0 %2024 }
 0x1aa   : > { %v9084_v52 = vpop.permute.xlu1 %2026 }
 0x1ab   : > { %2268 = vrot.lane.b32.xlu0 %v8806_v62, %s7634_s23  ;;  %v9112_v62 = vld [vmem:[#allocation2 + $0x8da] sm:$0xff] }
 0x1ac   : > { %2270 = vrot.lane.b32.xlu1 %v8804_v61, %s7634_s23 }
 0x1ad   : > { %v9094_v57 = vpop.permute.xlu0 %2028 }
 0x1ae   : > { %v9092_v56 = vpop.permute.xlu1 %2030  ;;  %13602 = vst [vmem:[#allocation72_spill] sm:$0xff] %v9094_v57 }
 0x1af   : > { %13601 = vst [vmem:[#allocation71_spill] sm:$0xff] %v9092_v56  ;;  %2272 = vrot.lane.b32.xlu0 %v8814_v7, %s7634_s23 }
 0x1b0   : > { %2274 = vrot.lane.b32.xlu1 %v8812_v63, %s7634_s23  ;;  %v9114_v63 = vld [vmem:[#allocation2 + $0x8d2] sm:$0xff] }
 0x1b1   : > { %v9106_v61 = vpop.permute.xlu0 %2032 }
 0x1b2   : > { %v9104_v35 = vpop.permute.xlu1 %2034  ;;  %13604 = vst [vmem:[#allocation74_spill] sm:$0xff] %v9106_v61 }
 0x1b3   : > { %13603 = vst [vmem:[#allocation73_spill] sm:$0xff] %v9104_v35  ;;  %2276 = vrot.lane.b32.xlu0 %v9102_v60, %s7634_s23 }
 0x1b4   : > { %2278 = vrot.lane.b32.xlu1 %v9100_v59, %s7634_s23 }
 0x1b5   : > { %v9118_v7 = vpop.permute.xlu0 %2036 }
 0x1b6   : > { %v9116_v36 = vpop.permute.xlu1 %2038  ;;  %13606 = vst [vmem:[#allocation76_spill] sm:$0xff] %v9118_v7 }
 0x1b7   : > { %13605 = vst [vmem:[#allocation75_spill] sm:$0xff] %v9116_v36  ;;  %2280 = vrot.lane.b32.xlu0 %v9114_v63, %s7634_s23 }
 0x1b8   : > { %2282 = vrot.lane.b32.xlu1 %v9112_v62, %s7634_s23 }
 0x1b9   : > { %v9130_v50 = vpop.permute.xlu0 %2040 }
 0x1ba   : > { %v9128_v12 = vpop.permute.xlu1 %2042  ;;  %13608 = vst [vmem:[#allocation78_spill] sm:$0xff] %v9130_v50  ;;  %v9148_v50 = vld [vmem:[#allocation2 + $0x99a] sm:$0xff] }
 0x1bb   : > { %13607 = vst [vmem:[#allocation77_spill] sm:$0xff] %v9128_v12  ;;  %2284 = vrot.lane.b32.xlu0 %v9126_v34, %s7634_s23  ;;  %v9150_v12 = vld [vmem:[#allocation2 + $0x992] sm:$0xff] }
 0x1bc   : > { %2286 = vrot.lane.b32.xlu1 %v9124_v33, %s7634_s23 }
 0x1bd   : > { %v9142_v36 = vpop.permute.xlu0 %2108 }
 0x1be   : > { %v9140_v7 = vpop.permute.xlu1 %2110  ;;  %13610 = vst [vmem:[#allocation80_spill] sm:$0xff] %v9142_v36  ;;  %v9160_v36 = vld [vmem:[#allocation2 + $0x9da] sm:$0xff] }
 0x1bf   : > { %13609 = vst [vmem:[#allocation79_spill] sm:$0xff] %v9140_v7  ;;  %2288 = vrot.lane.b32.xlu0 %v9138_v11, %s7634_s23  ;;  %v9162_v7 = vld [vmem:[#allocation2 + $0x9d2] sm:$0xff] }
 0x1c0   : > { %2290 = vrot.lane.b32.xlu1 %v9136_v47, %s7634_s23 }
 0x1c1   : > { %v9154_v35 = vpop.permute.xlu0 %2112 }
 0x1c2   : > { %v9152_v61 = vpop.permute.xlu1 %2114  ;;  %13612 = vst [vmem:[#allocation82_spill] sm:$0xff] %v9154_v35 }
 0x1c3   : > { %13611 = vst [vmem:[#allocation81_spill] sm:$0xff] %v9152_v61  ;;  %2292 = vrot.lane.b32.xlu0 %v9150_v12, %s7634_s23 }
 0x1c4   : > { %2294 = vrot.lane.b32.xlu1 %v9148_v50, %s7634_s23 }
 0x1c5   : > { %v9166_v56 = vpop.permute.xlu0 %2116 }
 0x1c6   : > { %v9164_v57 = vpop.permute.xlu1 %2118  ;;  %13614 = vst [vmem:[#allocation84_spill] sm:$0xff] %v9166_v56 }
 0x1c7   : > { %13613 = vst [vmem:[#allocation83_spill] sm:$0xff] %v9164_v57  ;;  %2296 = vrot.lane.b32.xlu0 %v9162_v7, %s7634_s23 }
 0x1c8   : > { %2298 = vrot.lane.b32.xlu1 %v9160_v36, %s7634_s23 }
 0x1c9   : > { %v9174_v61 = vpop.permute.xlu0 %2120 }
 0x1ca   : > { %v9172_v35 = vpop.permute.xlu1 %2122  ;;  %13616 = vst [vmem:[#allocation86_spill] sm:$0xff] %v9174_v61 }
 0x1cb   : > { %13615 = vst [vmem:[#allocation85_spill] sm:$0xff] %v9172_v35  ;;  %2364 = vrot.lane.b32.xlu0 %v8902_v18, %s7635_s24 }
 0x1cc   : > { %2366 = vrot.lane.b32.xlu1 %v8900_v17, %s7635_s24 }
 0x1cd   : > { %v9182_v56 = vpop.permute.xlu0 %2124 }
 0x1ce   : > { %v9180_v57 = vpop.permute.xlu1 %2126  ;;  %13618 = vst [vmem:[#allocation88_spill] sm:$0xff] %v9182_v56  ;;  %v9290_v56 = vld [vmem:[#allocation2 + $0x95e] sm:$0xff] }
 0x1cf   : > { %13617 = vst [vmem:[#allocation87_spill] sm:$0xff] %v9180_v57  ;;  %2368 = vrot.lane.b32.xlu0 %v8914_v31, %s7635_s24  ;;  %v9288_v57 = vld [vmem:[#allocation2 + $0x966] sm:$0xff] }
 0x1d0   : > { %2370 = vrot.lane.b32.xlu1 %v8912_v30, %s7635_s24 }
 0x1d1   : > { %v9190_v61 = vpop.permute.xlu0 %2128 }
 0x1d2   : > { %v9188_v35 = vpop.permute.xlu1 %2130  ;;  %13620 = vst [vmem:[#allocation90_spill] sm:$0xff] %v9190_v61 }
 0x1d3   : > { %13619 = vst [vmem:[#allocation89_spill] sm:$0xff] %v9188_v35  ;;  %2372 = vrot.lane.b32.xlu0 %v8926_v22, %s7635_s24 }
 0x1d4   : > { %2374 = vrot.lane.b32.xlu1 %v8924_v16, %s7635_s24 }
 0x1d5   : > { %v9198_v18 = vpop.permute.xlu0 %2132 }
 0x1d6   : > { %v9196_v17 = vpop.permute.xlu1 %2134  ;;  %13622 = vst [vmem:[#allocation92_spill] sm:$0xff] %v9198_v18  ;;  %v9278_v18 = vld [vmem:[#allocation2 + $0x91e] sm:$0xff] }
 0x1d7   : > { %13621 = vst [vmem:[#allocation91_spill] sm:$0xff] %v9196_v17  ;;  %2376 = vrot.lane.b32.xlu0 %v8938_v21, %s7635_s24  ;;  %v9276_v17 = vld [vmem:[#allocation2 + $0x926] sm:$0xff] }
 0x1d8   : > { %2378 = vrot.lane.b32.xlu1 %v8936_v20, %s7635_s24 }
 0x1d9   : > { %v9206_v31 = vpop.permute.xlu0 %2136 }
 0x1da   : > { %v9204_v30 = vpop.permute.xlu1 %2138  ;;  %13624 = vst [vmem:[#allocation94_spill] sm:$0xff] %v9206_v31 }
 0x1db   : > { %13623 = vst [vmem:[#allocation93_spill] sm:$0xff] %v9204_v30  ;;  %2380 = vrot.lane.b32.xlu0 %v8950_v14, %s7635_s24 }
 0x1dc   : > { %2382 = vrot.lane.b32.xlu1 %v8948_v13, %s7635_s24 }
 0x1dd   : > { %v9214_v16 = vpop.permute.xlu0 %2140 }
 0x1de   : > { %v9212_v22 = vpop.permute.xlu1 %2142  ;;  %13625 = vst [vmem:[#allocation95_spill] sm:$0xff] %v9214_v16 }
 0x1df   : > { %2384 = vrot.lane.b32.xlu0 %v8962_v6, %s7635_s24 }
 0x1e0   : > { %2386 = vrot.lane.b32.xlu1 %v8960_v5, %s7635_s24 }
 0x1e1   : > { %v9222_v21 = vpop.permute.xlu0 %2144 }
 0x1e2   : > { %v9220_v20 = vpop.permute.xlu1 %2146  ;;  %13627 = vst [vmem:[#allocation97_spill] sm:$0xff] %v9222_v21  ;;  %v1213_v21 = vld [vmem:[#allocation2 + $0x81a] sm:$0xff] }
 0x1e3   : > { %13626 = vst [vmem:[#allocation96_spill] sm:$0xff] %v9220_v20  ;;  %2388 = vrot.lane.b32.xlu0 %v8974_v2, %s7635_s24  ;;  %v1212_v20 = vld [vmem:[#allocation2 + $0x812] sm:$0xff] }
 0x1e4   : > { %2390 = vrot.lane.b32.xlu1 %v8972_v4, %s7635_s24 }
 0x1e5   : > { %v9230_v14 = vpop.permute.xlu0 %2148 }
 0x1e6   : > { %v9228_v13 = vpop.permute.xlu1 %2150  ;;  %13629 = vst [vmem:[#allocation99_spill] sm:$0xff] %v9230_v14  ;;  %v1210_v14 = vld [vmem:[#allocation2 + $0x7d2] sm:$0xff] }
 0x1e7   : > { %13628 = vst [vmem:[#allocation98_spill] sm:$0xff] %v9228_v13  ;;  %2392 = vrot.lane.b32.xlu0 %v8986_v1, %s7635_s24  ;;  %v9252_v1 = vld [vmem:[#allocation2 + $0x8a6] sm:$0xff] }
 0x1e8   : > { %2394 = vrot.lane.b32.xlu1 %v8984_v54, %s7635_s24  ;;  %v9254_v54 = vld [vmem:[#allocation2 + $0x89e] sm:$0xff] }
 0x1e9   : > { %v9238_v6 = vpop.permute.xlu0 %2152 }
 0x1ea   : > { %v9236_v5 = vpop.permute.xlu1 %2154  ;;  %13631 = vst [vmem:[#allocation101_spill] sm:$0xff] %v9238_v6 }
 0x1eb   : > { %13630 = vst [vmem:[#allocation100_spill] sm:$0xff] %v9236_v5  ;;  %2396 = vrot.lane.b32.xlu0 %v8998_v58, %s7635_s24  ;;  %v9264_v58 = vld [vmem:[#allocation2 + $0x8e6] sm:$0xff] }
 0x1ec   : > { %2398 = vrot.lane.b32.xlu1 %v8996_v55, %s7635_s24 }
 0x1ed   : > { %v9246_v4 = vpop.permute.xlu0 %2156 }
 0x1ee   : > { %v9244_v2 = vpop.permute.xlu1 %2158  ;;  %13633 = vst [vmem:[#allocation103_spill] sm:$0xff] %v9246_v4 }
 0x1ef   : > { %13632 = vst [vmem:[#allocation102_spill] sm:$0xff] %v9244_v2  ;;  %2400 = vrot.lane.b32.xlu0 %v9010_v51, %s7635_s24 }
 0x1f0   : > { %2402 = vrot.lane.b32.xlu1 %v9008_v3, %s7635_s24  ;;  %v9266_v3 = vld [vmem:[#allocation2 + $0x8de] sm:$0xff] }
 0x1f1   : > { %v9258_v55 = vpop.permute.xlu0 %2160 }
 0x1f2   : > { %v9256_v30 = vpop.permute.xlu1 %2162  ;;  %13635 = vst [vmem:[#allocation105_spill] sm:$0xff] %v9258_v55 }
 0x1f3   : > { %13634 = vst [vmem:[#allocation104_spill] sm:$0xff] %v9256_v30  ;;  %2404 = vrot.lane.b32.xlu0 %v9254_v54, %s7635_s24 }
 0x1f4   : > { %2406 = vrot.lane.b32.xlu1 %v9252_v1, %s7635_s24 }
 0x1f5   : > { %v9270_v51 = vpop.permute.xlu0 %2164 }
 0x1f6   : > { %v9268_v31 = vpop.permute.xlu1 %2166  ;;  %13637 = vst [vmem:[#allocation107_spill] sm:$0xff] %v9270_v51 }
 0x1f7   : > { %13636 = vst [vmem:[#allocation106_spill] sm:$0xff] %v9268_v31  ;;  %2408 = vrot.lane.b32.xlu0 %v9266_v3, %s7635_s24 }
 0x1f8   : > { %2410 = vrot.lane.b32.xlu1 %v9264_v58, %s7635_s24 }
 0x1f9   : > { %v9282_v61 = vpop.permute.xlu0 %2168 }
 0x1fa   : > { %v9280_v35 = vpop.permute.xlu1 %2170  ;;  %13639 = vst [vmem:[#allocation109_spill] sm:$0xff] %v9282_v61  ;;  %v9300_v61 = vld [vmem:[#allocation2 + $0x9a6] sm:$0xff] }
 0x1fb   : > { %13638 = vst [vmem:[#allocation108_spill] sm:$0xff] %v9280_v35  ;;  %2412 = vrot.lane.b32.xlu0 %v9278_v18, %s7635_s24  ;;  %v9302_v35 = vld [vmem:[#allocation2 + $0x99e] sm:$0xff] }
 0x1fc   : > { %2414 = vrot.lane.b32.xlu1 %v9276_v17, %s7635_s24 }
 0x1fd   : > { %v9294_v31 = vpop.permute.xlu0 %2236 }
 0x1fe   : > { %v9292_v51 = vpop.permute.xlu1 %2238  ;;  %13641 = vst [vmem:[#allocation111_spill] sm:$0xff] %v9294_v31  ;;  %v9312_v31 = vld [vmem:[#allocation2 + $0x9e6] sm:$0xff] }
 0x1ff   : > { %13640 = vst [vmem:[#allocation110_spill] sm:$0xff] %v9292_v51  ;;  %2416 = vrot.lane.b32.xlu0 %v9290_v56, %s7635_s24  ;;  %v9314_v51 = vld [vmem:[#allocation2 + $0x9de] sm:$0xff] }
 0x200   : > { %2418 = vrot.lane.b32.xlu1 %v9288_v57, %s7635_s24 }
 0x201   : > { %v9306_v30 = vpop.permute.xlu0 %2240 }
 0x202   : > { %v9304_v55 = vpop.permute.xlu1 %2242  ;;  %13643 = vst [vmem:[#allocation113_spill] sm:$0xff] %v9306_v30  ;;  %v1209_v30 = vld [vmem:[#allocation2 + $0x79a] sm:$0xff] }
 0x203   : > { %13642 = vst [vmem:[#allocation112_spill] sm:$0xff] %v9304_v55  ;;  %2420 = vrot.lane.b32.xlu0 %v9302_v35, %s7635_s24  ;;  %v1208_v55 = vld [vmem:[#allocation2 + $0x792] sm:$0xff] }
 0x204   : > { %2422 = vrot.lane.b32.xlu1 %v9300_v61, %s7635_s24 }
 0x205   : > { %v9318_v2 = vpop.permute.xlu0 %2244 }
 0x206   : > { %v9316_v4 = vpop.permute.xlu1 %2246  ;;  %13645 = vst [vmem:[#allocation115_spill] sm:$0xff] %v9318_v2 }
 0x207   : > { %13644 = vst [vmem:[#allocation114_spill] sm:$0xff] %v9316_v4  ;;  %2424 = vrot.lane.b32.xlu0 %v9314_v51, %s7635_s24  ;;  %v1211_v4 = vld [vmem:[#allocation2 + $0x7da] sm:$0xff] }
 0x208   : > { %2426 = vrot.lane.b32.xlu1 %v9312_v31, %s7635_s24 }
 0x209   : > { %v9326_v5 = vpop.permute.xlu0 %2248 }
 0x20a   : > { %v9324_v6 = vpop.permute.xlu1 %2250  ;;  %13647 = vst [vmem:[#allocation117_spill] sm:$0xff] %v9326_v5 }
 0x20b   : > { %13646 = vst [vmem:[#allocation116_spill] sm:$0xff] %v9324_v6  ;;  %2492 = vrot.lane.b32.xlu0 %v1208_v55, %s7636_s25  ;;  %v1214_v55 = vld [vmem:[#allocation2 + $0x852] sm:$0xff] }
 0x20c   : > { %2494 = vrot.lane.b32.xlu1 %v1209_v30, %s7636_s25  ;;  %v1215_v30 = vld [vmem:[#allocation2 + $0x85a] sm:$0xff] }
 0x20d   : > { %v9332_v13 = vpop.permute.xlu0 %2252 }
 0x20e   : > { %v9330_v2 = vpop.permute.xlu1 %2254  ;;  %13649 = vst [vmem:[#allocation119_spill] sm:$0xff] %v9332_v13 }
 0x20f   : > { %13648 = vst [vmem:[#allocation118_spill] sm:$0xff] %v9330_v2  ;;  %2496 = vrot.lane.b32.xlu0 %v1210_v14, %s7636_s25 }
 0x210   : > { %2498 = vrot.lane.b32.xlu1 %v1211_v4, %s7636_s25 }
 0x211   : > { %v9338_v5 = vpop.permute.xlu0 %2256 }
 0x212   : > { %v9336_v6 = vpop.permute.xlu1 %2258  ;;  %13651 = vst [vmem:[#allocation121_spill] sm:$0xff] %v9338_v5 }
 0x213   : > { %13650 = vst [vmem:[#allocation120_spill] sm:$0xff] %v9336_v6  ;;  %2500 = vrot.lane.b32.xlu0 %v1212_v20, %s7636_s25 }
 0x214   : > { %2502 = vrot.lane.b32.xlu1 %v1213_v21, %s7636_s25 }
 0x215   : > { %v9344_v2 = vpop.permute.xlu0 %2260 }
 0x216   : > { %v9342_v16 = vpop.permute.xlu1 %2262  ;;  %13653 = vst [vmem:[#allocation123_spill] sm:$0xff] %v9344_v2 }
 0x217   : > { %13652 = vst [vmem:[#allocation122_spill] sm:$0xff] %v9342_v16  ;;  %2504 = vrot.lane.b32.xlu0 %v1214_v55, %s7636_s25 }
 0x218   : > { %2506 = vrot.lane.b32.xlu1 %v1215_v30, %s7636_s25 }
 0x219   : > { %v9350_v4 = vpop.permute.xlu0 %2264 }
 0x21a   : > { %v9348_v14 = vpop.permute.xlu1 %2266  ;;  %13655 = vst [vmem:[#allocation125_spill] sm:$0xff] %v9350_v4 }
 0x21b   : > { %13654 = vst [vmem:[#allocation124_spill] sm:$0xff] %v9348_v14  ;;  %2508 = vrot.lane.b32.xlu0 %v9102_v60, %s7636_s25 }
 0x21c   : > { %2510 = vrot.lane.b32.xlu1 %v9100_v59, %s7636_s25 }
 0x21d   : > { %v9358_v21 = vpop.permute.xlu0 %2268 }
 0x21e   : > { %v9356_v20 = vpop.permute.xlu1 %2270 }
 0x21f   : > { %2512 = vrot.lane.b32.xlu0 %v9114_v63, %s7636_s25 }
 0x220   : > { %2514 = vrot.lane.b32.xlu1 %v9112_v62, %s7636_s25 }
 0x221   : > { %v9366_v55 = vpop.permute.xlu0 %2272 }
 0x222   : > { %v9364_v30 = vpop.permute.xlu1 %2274 }
 0x223   : > { %2516 = vrot.lane.b32.xlu0 %v9126_v34, %s7636_s25 }
 0x224   : > { %2518 = vrot.lane.b32.xlu1 %v9124_v33, %s7636_s25 }
 0x225   : > { %v9374_v60 = vpop.permute.xlu0 %2276 }
 0x226   : > { %v9372_v59 = vpop.permute.xlu1 %2278  ;;  %13657 = vst [vmem:[#allocation127_spill] sm:$0xff] %v9374_v60  ;;  %v1341_v60 = vld [vmem:[#allocation2 + $0x398] sm:$0xff] }
 0x227   : > { %13656 = vst [vmem:[#allocation126_spill] sm:$0xff] %v9372_v59  ;;  %2520 = vrot.lane.b32.xlu0 %v9138_v11, %s7636_s25  ;;  %v1229_v11 = vld [vmem:[#allocation2 + $0xa1a] sm:$0xff] }
 0x228   : > { %2522 = vrot.lane.b32.xlu1 %v9136_v47, %s7636_s25  ;;  %v1228_v47 = vld [vmem:[#allocation2 + $0xa12] sm:$0xff] }
 0x229   : > { %v9382_v63 = vpop.permute.xlu0 %2280 }
 0x22a   : > { %v9380_v62 = vpop.permute.xlu1 %2282  ;;  %13659 = vst [vmem:[#allocation129_spill] sm:$0xff] %v9382_v63 }
 0x22b   : > { %13658 = vst [vmem:[#allocation128_spill] sm:$0xff] %v9380_v62  ;;  %2524 = vrot.lane.b32.xlu0 %v9150_v12, %s7636_s25  ;;  %v1231_v12 = vld [vmem:[#allocation2 + $0xa5a] sm:$0xff] }
 0x22c   : > { %2526 = vrot.lane.b32.xlu1 %v9148_v50, %s7636_s25  ;;  %v1230_v50 = vld [vmem:[#allocation2 + $0xa52] sm:$0xff] }
 0x22d   : > { %v9390_v34 = vpop.permute.xlu0 %2284 }
 0x22e   : > { %v9388_v33 = vpop.permute.xlu1 %2286  ;;  %13661 = vst [vmem:[#allocation131_spill] sm:$0xff] %v9390_v34 }
 0x22f   : > { %13660 = vst [vmem:[#allocation130_spill] sm:$0xff] %v9388_v33  ;;  %2528 = vrot.lane.b32.xlu0 %v9162_v7, %s7636_s25  ;;  %v1232_v7 = vld [vmem:[#allocation2 + $0xa92] sm:$0xff] }
 0x230   : > { %2530 = vrot.lane.b32.xlu1 %v9160_v36, %s7636_s25  ;;  %v1233_v36 = vld [vmem:[#allocation2 + $0xa9a] sm:$0xff] }
 0x231   : > { %v9398_v4 = vpop.permute.xlu0 %2288 }
 0x232   : > { %v9396_v14 = vpop.permute.xlu1 %2290  ;;  %13663 = vst [vmem:[#allocation133_spill] sm:$0xff] %v9398_v4 }
 0x233   : > { %13662 = vst [vmem:[#allocation132_spill] sm:$0xff] %v9396_v14  ;;  %2532 = vrot.lane.b32.xlu0 %v1228_v47, %s7636_s25  ;;  %v1234_v47 = vld [vmem:[#allocation2 + $0xad2] sm:$0xff] }
 0x234   : > { %2534 = vrot.lane.b32.xlu1 %v1229_v11, %s7636_s25  ;;  %v1235_v11 = vld [vmem:[#allocation2 + $0xada] sm:$0xff] }
 0x235   : > { %v9404_v2 = vpop.permute.xlu0 %2292 }
 0x236   : > { %v9402_v16 = vpop.permute.xlu1 %2294  ;;  %13665 = vst [vmem:[#allocation135_spill] sm:$0xff] %v9404_v2 }
 0x237   : > { %13664 = vst [vmem:[#allocation134_spill] sm:$0xff] %v9402_v16  ;;  %2536 = vrot.lane.b32.xlu0 %v1230_v50, %s7636_s25  ;;  %v1236_v50 = vld [vmem:[#allocation2 + $0xb12] sm:$0xff] }
 0x238   : > { %2538 = vrot.lane.b32.xlu1 %v1231_v12, %s7636_s25  ;;  %v1237_v12 = vld [vmem:[#allocation2 + $0xb1a] sm:$0xff] }
 0x239   : > { %v9410_v5 = vpop.permute.xlu0 %2296 }
 0x23a   : > { %v9408_v6 = vpop.permute.xlu1 %2298  ;;  %13667 = vst [vmem:[#allocation137_spill] sm:$0xff] %v9410_v5 }
 0x23b   : > { %13666 = vst [vmem:[#allocation136_spill] sm:$0xff] %v9408_v6  ;;  %2540 = vrot.lane.b32.xlu0 %v1232_v7, %s7636_s25  ;;  %v1238_v7 = vld [vmem:[#allocation2 + $0xb52] sm:$0xff] }
 0x23c   : > { %2542 = vrot.lane.b32.xlu1 %v1233_v36, %s7636_s25  ;;  %v1239_v36 = vld [vmem:[#allocation2 + $0xb5a] sm:$0xff] }
 0x23d   : > { %v9416_v16 = vpop.permute.xlu0 %2364 }
 0x23e   : > { %v9414_v13 = vpop.permute.xlu1 %2366  ;;  %13669 = vst [vmem:[#allocation139_spill] sm:$0xff] %v9416_v16 }
 0x23f   : > { %13668 = vst [vmem:[#allocation138_spill] sm:$0xff] %v9414_v13  ;;  %2544 = vrot.lane.b32.xlu0 %v1234_v47, %s7636_s25  ;;  %v1240_v47 = vld [vmem:[#allocation2 + $0x798] sm:$0xff] }
 0x240   : > { %2546 = vrot.lane.b32.xlu1 %v1235_v11, %s7636_s25  ;;  %v1241_v11 = vld [vmem:[#allocation2 + $0x7a0] sm:$0xff] }
 0x241   : > { %v9422_v6 = vpop.permute.xlu0 %2368 }
 0x242   : > { %v9420_v2 = vpop.permute.xlu1 %2370  ;;  %13671 = vst [vmem:[#allocation141_spill] sm:$0xff] %v9422_v6 }
 0x243   : > { %13670 = vst [vmem:[#allocation140_spill] sm:$0xff] %v9420_v2  ;;  %2548 = vrot.lane.b32.xlu0 %v1236_v50, %s7636_s25  ;;  %v1242_v50 = vld [vmem:[#allocation2 + $0x7d8] sm:$0xff] }
 0x244   : > { %2550 = vrot.lane.b32.xlu1 %v1237_v12, %s7636_s25  ;;  %v1243_v12 = vld [vmem:[#allocation2 + $0x7e0] sm:$0xff] }
 0x245   : > { %v9428_v13 = vpop.permute.xlu0 %2372 }
 0x246   : > { %v9426_v5 = vpop.permute.xlu1 %2374  ;;  %13673 = vst [vmem:[#allocation143_spill] sm:$0xff] %v9428_v13 }
 0x247   : > { %13672 = vst [vmem:[#allocation142_spill] sm:$0xff] %v9426_v5  ;;  %2552 = vrot.lane.b32.xlu0 %v1238_v7, %s7636_s25  ;;  %v1244_v7 = vld [vmem:[#allocation2 + $0x818] sm:$0xff] }
 0x248   : > { %2554 = vrot.lane.b32.xlu1 %v1239_v36, %s7636_s25  ;;  %v1245_v36 = vld [vmem:[#allocation2 + $0x820] sm:$0xff] }
 0x249   : > { %v9434_v2 = vpop.permute.xlu0 %2376 }
 0x24a   : > { %v9432_v16 = vpop.permute.xlu1 %2378  ;;  %13675 = vst [vmem:[#allocation145_spill] sm:$0xff] %v9434_v2 }
 0x24b   : > { %13674 = vst [vmem:[#allocation144_spill] sm:$0xff] %v9432_v16  ;;  %2620 = vrot.lane.b32.xlu0 %v1240_v47, %s7637_s26  ;;  %v1246_v47 = vld [vmem:[#allocation2 + $0x858] sm:$0xff] }
 0x24c   : > { %2622 = vrot.lane.b32.xlu1 %v1241_v11, %s7637_s26  ;;  %v1247_v11 = vld [vmem:[#allocation2 + $0x860] sm:$0xff] }
 0x24d   : > { %v9440_v13 = vpop.permute.xlu0 %2380 }
 0x24e   : > { %v9438_v5 = vpop.permute.xlu1 %2382  ;;  %13677 = vst [vmem:[#allocation147_spill] sm:$0xff] %v9440_v13 }
 0x24f   : > { %13676 = vst [vmem:[#allocation146_spill] sm:$0xff] %v9438_v5  ;;  %2624 = vrot.lane.b32.xlu0 %v1242_v50, %s7637_s26  ;;  %v1248_v50 = vld [vmem:[#allocation2 + $0x898] sm:$0xff] }
 0x250   : > { %2626 = vrot.lane.b32.xlu1 %v1243_v12, %s7637_s26  ;;  %v1249_v12 = vld [vmem:[#allocation2 + $0x8a0] sm:$0xff] }
 0x251   : > { %v9446_v2 = vpop.permute.xlu0 %2384 }
 0x252   : > { %v9444_v16 = vpop.permute.xlu1 %2386  ;;  %13679 = vst [vmem:[#allocation149_spill] sm:$0xff] %v9446_v2 }
 0x253   : > { %13678 = vst [vmem:[#allocation148_spill] sm:$0xff] %v9444_v16  ;;  %2628 = vrot.lane.b32.xlu0 %v1244_v7, %s7637_s26  ;;  %v1250_v7 = vld [vmem:[#allocation2 + $0x8d8] sm:$0xff] }
 0x254   : > { %2630 = vrot.lane.b32.xlu1 %v1245_v36, %s7637_s26  ;;  %v1251_v36 = vld [vmem:[#allocation2 + $0x8e0] sm:$0xff] }
 0x255   : > { %v9452_v5 = vpop.permute.xlu0 %2388 }
 0x256   : > { %v9450_v6 = vpop.permute.xlu1 %2390  ;;  %13681 = vst [vmem:[#allocation151_spill] sm:$0xff] %v9452_v5 }
 0x257   : > { %13680 = vst [vmem:[#allocation150_spill] sm:$0xff] %v9450_v6  ;;  %2632 = vrot.lane.b32.xlu0 %v1246_v47, %s7637_s26  ;;  %v1252_v47 = vld [vmem:[#allocation2 + $0x918] sm:$0xff] }
 0x258   : > { %2634 = vrot.lane.b32.xlu1 %v1247_v11, %s7637_s26  ;;  %v1253_v11 = vld [vmem:[#allocation2 + $0x920] sm:$0xff] }
 0x259   : > { %v9458_v16 = vpop.permute.xlu0 %2392 }
 0x25a   : > { %v9456_v13 = vpop.permute.xlu1 %2394  ;;  %13683 = vst [vmem:[#allocation153_spill] sm:$0xff] %v9458_v16 }
 0x25b   : > { %13682 = vst [vmem:[#allocation152_spill] sm:$0xff] %v9456_v13  ;;  %2636 = vrot.lane.b32.xlu0 %v1248_v50, %s7637_s26  ;;  %v1254_v50 = vld [vmem:[#allocation2 + $0x958] sm:$0xff] }
 0x25c   : > { %2638 = vrot.lane.b32.xlu1 %v1249_v12, %s7637_s26  ;;  %v1255_v12 = vld [vmem:[#allocation2 + $0x960] sm:$0xff] }
 0x25d   : > { %v9464_v6 = vpop.permute.xlu0 %2396 }
 0x25e   : > { %v9462_v2 = vpop.permute.xlu1 %2398 }
 0x25f   : > { %2640 = vrot.lane.b32.xlu0 %v1250_v7, %s7637_s26  ;;  %v1256_v7 = vld [vmem:[#allocation2 + $0x998] sm:$0xff] }
 0x260   : > { %2642 = vrot.lane.b32.xlu1 %v1251_v36, %s7637_s26  ;;  %v1257_v36 = vld [vmem:[#allocation2 + $0x9a0] sm:$0xff] }
 0x261   : > { %v9470_v13 = vpop.permute.xlu0 %2400 }
 0x262   : > { %v9468_v5 = vpop.permute.xlu1 %2402 }
 0x263   : > { %2644 = vrot.lane.b32.xlu0 %v1252_v47, %s7637_s26  ;;  %v1258_v47 = vld [vmem:[#allocation2 + $0x9d8] sm:$0xff] }
 0x264   : > { %2646 = vrot.lane.b32.xlu1 %v1253_v11, %s7637_s26  ;;  %v1259_v11 = vld [vmem:[#allocation2 + $0x9e0] sm:$0xff] }
 0x265   : > { %v9476_v4 = vpop.permute.xlu0 %2404 }
 0x266   : > { %v9474_v16 = vpop.permute.xlu1 %2406  ;;  %13685 = vst [vmem:[#allocation155_spill] sm:$0xff] %v9476_v4 }
 0x267   : > { %13684 = vst [vmem:[#allocation154_spill] sm:$0xff] %v9474_v16  ;;  %2648 = vrot.lane.b32.xlu0 %v1254_v50, %s7637_s26  ;;  %v1260_v50 = vld [vmem:[#allocation2 + $0xa18] sm:$0xff]  ;;  %v1342_v16 = vld [vmem:[#allocation2 + $0x3a0] sm:$0xff] }
 0x268   : > { %2650 = vrot.lane.b32.xlu1 %v1255_v12, %s7637_s26  ;;  %v1261_v12 = vld [vmem:[#allocation2 + $0xa20] sm:$0xff] }
 0x269   : > { %v9482_v34 = vpop.permute.xlu0 %2408 }
 0x26a   : > { %v9480_v14 = vpop.permute.xlu1 %2410  ;;  %13687 = vst [vmem:[#allocation157_spill] sm:$0xff] %v9482_v34 }
 0x26b   : > { %13686 = vst [vmem:[#allocation156_spill] sm:$0xff] %v9480_v14  ;;  %2652 = vrot.lane.b32.xlu0 %v1256_v7, %s7637_s26  ;;  %v1262_v7 = vld [vmem:[#allocation2 + $0xa58] sm:$0xff] }
 0x26c   : > { %2654 = vrot.lane.b32.xlu1 %v1257_v36, %s7637_s26  ;;  %v1263_v36 = vld [vmem:[#allocation2 + $0xa60] sm:$0xff] }
 0x26d   : > { %v9488_v63 = vpop.permute.xlu0 %2412 }
 0x26e   : > { %v9486_v33 = vpop.permute.xlu1 %2414  ;;  %13689 = vst [vmem:[#allocation159_spill] sm:$0xff] %v9488_v63 }
 0x26f   : > { %13688 = vst [vmem:[#allocation158_spill] sm:$0xff] %v9486_v33  ;;  %2656 = vrot.lane.b32.xlu0 %v1258_v47, %s7637_s26  ;;  %v1264_v47 = vld [vmem:[#allocation2 + $0xa98] sm:$0xff] }
 0x270   : > { %2658 = vrot.lane.b32.xlu1 %v1259_v11, %s7637_s26  ;;  %v1265_v11 = vld [vmem:[#allocation2 + $0xaa0] sm:$0xff] }
 0x271   : > { %v9494_v14 = vpop.permute.xlu0 %2416 }
 0x272   : > { %v9492_v62 = vpop.permute.xlu1 %2418  ;;  %13691 = vst [vmem:[#allocation161_spill] sm:$0xff] %v9494_v14 }
 0x273   : > { %13690 = vst [vmem:[#allocation160_spill] sm:$0xff] %v9492_v62  ;;  %2660 = vrot.lane.b32.xlu0 %v1260_v50, %s7637_s26  ;;  %v1266_v50 = vld [vmem:[#allocation2 + $0xad8] sm:$0xff] }
 0x274   : > { %2662 = vrot.lane.b32.xlu1 %v1261_v12, %s7637_s26  ;;  %v1267_v12 = vld [vmem:[#allocation2 + $0xae0] sm:$0xff] }
 0x275   : > { %v9500_v33 = vpop.permute.xlu0 %2420 }
 0x276   : > { %v9498_v34 = vpop.permute.xlu1 %2422  ;;  %13693 = vst [vmem:[#allocation163_spill] sm:$0xff] %v9500_v33 }
 0x277   : > { %13692 = vst [vmem:[#allocation162_spill] sm:$0xff] %v9498_v34  ;;  %2664 = vrot.lane.b32.xlu0 %v1262_v7, %s7637_s26  ;;  %v1268_v7 = vld [vmem:[#allocation2 + $0xb18] sm:$0xff] }
 0x278   : > { %2666 = vrot.lane.b32.xlu1 %v1263_v36, %s7637_s26  ;;  %v1269_v36 = vld [vmem:[#allocation2 + $0xb20] sm:$0xff] }
 0x279   : > { %v9506_v62 = vpop.permute.xlu0 %2424 }
 0x27a   : > { %v9504_v63 = vpop.permute.xlu1 %2426  ;;  %13695 = vst [vmem:[#allocation165_spill] sm:$0xff] %v9506_v62 }
 0x27b   : > { %13694 = vst [vmem:[#allocation164_spill] sm:$0xff] %v9504_v63  ;;  %2668 = vrot.lane.b32.xlu0 %v1264_v47, %s7637_s26  ;;  %v1270_v47 = vld [vmem:[#allocation2 + $0xb58] sm:$0xff] }
 0x27c   : > { %2670 = vrot.lane.b32.xlu1 %v1265_v11, %s7637_s26  ;;  %v1271_v11 = vld [vmem:[#allocation2 + $0xb60] sm:$0xff] }
 0x27d   : > { %v9512_v34 = vpop.permute.xlu0 %2492 }
 0x27e   : > { %v9510_v14 = vpop.permute.xlu1 %2494  ;;  %13697 = vst [vmem:[#allocation167_spill] sm:$0xff] %v9512_v34 }
 0x27f   : > { %13696 = vst [vmem:[#allocation166_spill] sm:$0xff] %v9510_v14  ;;  %2672 = vrot.lane.b32.xlu0 %v1266_v50, %s7637_s26  ;;  %v1272_v50 = vld [vmem:[#allocation2 + $0x79e] sm:$0xff] }
 0x280   : > { %2674 = vrot.lane.b32.xlu1 %v1267_v12, %s7637_s26  ;;  %v1273_v12 = vld [vmem:[#allocation2 + $0x7a6] sm:$0xff] }
 0x281   : > { %v9518_v63 = vpop.permute.xlu0 %2496 }
 0x282   : > { %v9516_v33 = vpop.permute.xlu1 %2498  ;;  %13699 = vst [vmem:[#allocation169_spill] sm:$0xff] %v9518_v63 }
 0x283   : > { %13698 = vst [vmem:[#allocation168_spill] sm:$0xff] %v9516_v33  ;;  %2676 = vrot.lane.b32.xlu0 %v1268_v7, %s7637_s26  ;;  %v1274_v7 = vld [vmem:[#allocation2 + $0x7de] sm:$0xff] }
 0x284   : > { %2678 = vrot.lane.b32.xlu1 %v1269_v36, %s7637_s26  ;;  %v1275_v36 = vld [vmem:[#allocation2 + $0x7e6] sm:$0xff] }
 0x285   : > { %v9524_v14 = vpop.permute.xlu0 %2500 }
 0x286   : > { %v9522_v62 = vpop.permute.xlu1 %2502  ;;  %13701 = vst [vmem:[#allocation171_spill] sm:$0xff] %v9524_v14 }
 0x287   : > { %13700 = vst [vmem:[#allocation170_spill] sm:$0xff] %v9522_v62  ;;  %2680 = vrot.lane.b32.xlu0 %v1270_v47, %s7637_s26  ;;  %v1276_v47 = vld [vmem:[#allocation2 + $0x81e] sm:$0xff] }
 0x288   : > { %2682 = vrot.lane.b32.xlu1 %v1271_v11, %s7637_s26  ;;  %v1277_v11 = vld [vmem:[#allocation2 + $0x826] sm:$0xff] }
 0x289   : > { %v9530_v33 = vpop.permute.xlu0 %2504 }
 0x28a   : > { %v9528_v34 = vpop.permute.xlu1 %2506  ;;  %13703 = vst [vmem:[#allocation173_spill] sm:$0xff] %v9530_v33 }
 0x28b   : > { %13702 = vst [vmem:[#allocation172_spill] sm:$0xff] %v9528_v34  ;;  %2748 = vrot.lane.b32.xlu0 %v1272_v50, %s7638_s27  ;;  %v1278_v50 = vld [vmem:[#allocation2 + $0x85e] sm:$0xff] }
 0x28c   : > { %2750 = vrot.lane.b32.xlu1 %v1273_v12, %s7638_s27  ;;  %v1279_v12 = vld [vmem:[#allocation2 + $0x866] sm:$0xff] }
 0x28d   : > { %v9536_v14 = vpop.permute.xlu0 %2508 }
 0x28e   : > { %v9534_v62 = vpop.permute.xlu1 %2510  ;;  %13705 = vst [vmem:[#allocation175_spill] sm:$0xff] %v9536_v14 }
 0x28f   : > { %13704 = vst [vmem:[#allocation174_spill] sm:$0xff] %v9534_v62  ;;  %2752 = vrot.lane.b32.xlu0 %v1274_v7, %s7638_s27 }
 0x290   : > { %2754 = vrot.lane.b32.xlu1 %v1275_v36, %s7638_s27 }
 0x291   : > { %v9542_v33 = vpop.permute.xlu0 %2512 }
 0x292   : > { %v9540_v34 = vpop.permute.xlu1 %2514  ;;  %13707 = vst [vmem:[#allocation177_spill] sm:$0xff] %v9542_v33 }
 0x293   : > { %13706 = vst [vmem:[#allocation176_spill] sm:$0xff] %v9540_v34  ;;  %2756 = vrot.lane.b32.xlu0 %v1276_v47, %s7638_s27 }
 0x294   : > { %2758 = vrot.lane.b32.xlu1 %v1277_v11, %s7638_s27 }
 0x295   : > { %v9548_v62 = vpop.permute.xlu0 %2516 }
 0x296   : > { %v9546_v63 = vpop.permute.xlu1 %2518  ;;  %13709 = vst [vmem:[#allocation179_spill] sm:$0xff] %v9548_v62 }
 0x297   : > { %13708 = vst [vmem:[#allocation178_spill] sm:$0xff] %v9546_v63  ;;  %2760 = vrot.lane.b32.xlu0 %v1278_v50, %s7638_s27 }
 0x298   : > { %2762 = vrot.lane.b32.xlu1 %v1279_v12, %s7638_s27 }
 0x299   : > { %v9554_v7 = vpop.permute.xlu0 %2520 }
 0x29a   : > { %v9552_v36 = vpop.permute.xlu1 %2522  ;;  %13711 = vst [vmem:[#allocation181_spill] sm:$0xff] %v9554_v7 }
 0x29b   : > { %13710 = vst [vmem:[#allocation180_spill] sm:$0xff] %v9552_v36  ;;  %2764 = vrot.lane.b32.xlu0 %v9254_v54, %s7638_s27 }
 0x29c   : > { %2766 = vrot.lane.b32.xlu1 %v9252_v1, %s7638_s27 }
 0x29d   : > { %v9562_v47 = vpop.permute.xlu0 %2524 }
 0x29e   : > { %v9560_v11 = vpop.permute.xlu1 %2526 }
 0x29f   : > { %2768 = vrot.lane.b32.xlu0 %v9266_v3, %s7638_s27 }
 0x2a0   : > { %2770 = vrot.lane.b32.xlu1 %v9264_v58, %s7638_s27 }
 0x2a1   : > { %v9570_v50 = vpop.permute.xlu0 %2528 }
 0x2a2   : > { %v9568_v12 = vpop.permute.xlu1 %2530  ;;  %13713 = vst [vmem:[#allocation183_spill] sm:$0xff] %v9570_v50 }
 0x2a3   : > { %13712 = vst [vmem:[#allocation182_spill] sm:$0xff] %v9568_v12  ;;  %2772 = vrot.lane.b32.xlu0 %v9278_v18, %s7638_s27 }
 0x2a4   : > { %2774 = vrot.lane.b32.xlu1 %v9276_v17, %s7638_s27 }
 0x2a5   : > { %v9578_v54 = vpop.permute.xlu0 %2532 }
 0x2a6   : > { %v9576_v1 = vpop.permute.xlu1 %2534  ;;  %13715 = vst [vmem:[#allocation185_spill] sm:$0xff] %v9578_v54 }
 0x2a7   : > { %13714 = vst [vmem:[#allocation184_spill] sm:$0xff] %v9576_v1  ;;  %2776 = vrot.lane.b32.xlu0 %v9290_v56, %s7638_s27  ;;  %v1293_v56 = vld [vmem:[#allocation2 + $0xa26] sm:$0xff]  ;;  %v1339_v1 = vld [vmem:[#allocation2 + $0x358] sm:$0xff] }
 0x2a8   : > { %2778 = vrot.lane.b32.xlu1 %v9288_v57, %s7638_s27  ;;  %v1292_v57 = vld [vmem:[#allocation2 + $0xa1e] sm:$0xff] }
 0x2a9   : > { %v9586_v3 = vpop.permute.xlu0 %2536 }
 0x2aa   : > { %v9584_v58 = vpop.permute.xlu1 %2538  ;;  %13717 = vst [vmem:[#allocation187_spill] sm:$0xff] %v9586_v3 }
 0x2ab   : > { %13716 = vst [vmem:[#allocation186_spill] sm:$0xff] %v9584_v58  ;;  %2780 = vrot.lane.b32.xlu0 %v9302_v35, %s7638_s27  ;;  %v1295_v35 = vld [vmem:[#allocation2 + $0xa66] sm:$0xff] }
 0x2ac   : > { %2782 = vrot.lane.b32.xlu1 %v9300_v61, %s7638_s27  ;;  %v1294_v61 = vld [vmem:[#allocation2 + $0xa5e] sm:$0xff] }
 0x2ad   : > { %v9594_v18 = vpop.permute.xlu0 %2540 }
 0x2ae   : > { %v9592_v17 = vpop.permute.xlu1 %2542  ;;  %13719 = vst [vmem:[#allocation189_spill] sm:$0xff] %v9594_v18 }
 0x2af   : > { %13718 = vst [vmem:[#allocation188_spill] sm:$0xff] %v9592_v17  ;;  %2784 = vrot.lane.b32.xlu0 %v9314_v51, %s7638_s27  ;;  %v1296_v51 = vld [vmem:[#allocation2 + $0xa9e] sm:$0xff] }
 0x2b0   : > { %2786 = vrot.lane.b32.xlu1 %v9312_v31, %s7638_s27  ;;  %v1297_v31 = vld [vmem:[#allocation2 + $0xaa6] sm:$0xff] }
 0x2b1   : > { %v9602_v7 = vpop.permute.xlu0 %2544 }
 0x2b2   : > { %v9600_v36 = vpop.permute.xlu1 %2546  ;;  %13721 = vst [vmem:[#allocation191_spill] sm:$0xff] %v9602_v7 }
 0x2b3   : > { %13720 = vst [vmem:[#allocation190_spill] sm:$0xff] %v9600_v36  ;;  %2788 = vrot.lane.b32.xlu0 %v1292_v57, %s7638_s27  ;;  %v1298_v57 = vld [vmem:[#allocation2 + $0xade] sm:$0xff] }
 0x2b4   : > { %2790 = vrot.lane.b32.xlu1 %v1293_v56, %s7638_s27  ;;  %v1299_v56 = vld [vmem:[#allocation2 + $0xae6] sm:$0xff] }
 0x2b5   : > { %v9608_v62 = vpop.permute.xlu0 %2548 }
 0x2b6   : > { %v9606_v63 = vpop.permute.xlu1 %2550  ;;  %13723 = vst [vmem:[#allocation193_spill] sm:$0xff] %v9608_v62 }
 0x2b7   : > { %13722 = vst [vmem:[#allocation192_spill] sm:$0xff] %v9606_v63  ;;  %2792 = vrot.lane.b32.xlu0 %v1294_v61, %s7638_s27  ;;  %v1300_v61 = vld [vmem:[#allocation2 + $0xb1e] sm:$0xff] }
 0x2b8   : > { %2794 = vrot.lane.b32.xlu1 %v1295_v35, %s7638_s27  ;;  %v1301_v35 = vld [vmem:[#allocation2 + $0xb26] sm:$0xff] }
 0x2b9   : > { %v9614_v33 = vpop.permute.xlu0 %2552 }
 0x2ba   : > { %v9612_v34 = vpop.permute.xlu1 %2554  ;;  %13725 = vst [vmem:[#allocation195_spill] sm:$0xff] %v9614_v33 }
 0x2bb   : > { %13724 = vst [vmem:[#allocation194_spill] sm:$0xff] %v9612_v34  ;;  %2796 = vrot.lane.b32.xlu0 %v1296_v51, %s7638_s27  ;;  %v1302_v51 = vld [vmem:[#allocation2 + $0xb5e] sm:$0xff] }
 0x2bc   : > { %2798 = vrot.lane.b32.xlu1 %v1297_v31, %s7638_s27  ;;  %v1303_v31 = vld [vmem:[#allocation2 + $0xb66] sm:$0xff] }
 0x2bd   : > { %v9620_v63 = vpop.permute.xlu0 %2620 }
 0x2be   : > { %v9618_v14 = vpop.permute.xlu1 %2622  ;;  %13727 = vst [vmem:[#allocation197_spill] sm:$0xff] %v9620_v63 }
 0x2bf   : > { %13726 = vst [vmem:[#allocation196_spill] sm:$0xff] %v9618_v14  ;;  %2800 = vrot.lane.b32.xlu0 %v1298_v57, %s7638_s27  ;;  %v1305_v57 = vld [vmem:[#allocation2 + $0x30c] sm:$0xff] }
 0x2c0   : > { %2802 = vrot.lane.b32.xlu1 %v1299_v56, %s7638_s27  ;;  %v1306_v56 = vld [vmem:[#allocation2 + $0x314] sm:$0xff] }
 0x2c1   : > { %v9626_v34 = vpop.permute.xlu0 %2624 }
 0x2c2   : > { %v9624_v62 = vpop.permute.xlu1 %2626  ;;  %13729 = vst [vmem:[#allocation199_spill] sm:$0xff] %v9626_v34 }
 0x2c3   : > { %13728 = vst [vmem:[#allocation198_spill] sm:$0xff] %v9624_v62  ;;  %2804 = vrot.lane.b32.xlu0 %v1300_v61, %s7638_s27  ;;  %v1307_v61 = vld [vmem:[#allocation2 + $0x34c] sm:$0xff] }
 0x2c4   : > { %2806 = vrot.lane.b32.xlu1 %v1301_v35, %s7638_s27  ;;  %v1308_v35 = vld [vmem:[#allocation2 + $0x354] sm:$0xff] }
 0x2c5   : > { %v9632_v14 = vpop.permute.xlu0 %2628 }
 0x2c6   : > { %v9630_v33 = vpop.permute.xlu1 %2630  ;;  %13731 = vst [vmem:[#allocation201_spill] sm:$0xff] %v9632_v14 }
 0x2c7   : > { %13730 = vst [vmem:[#allocation200_spill] sm:$0xff] %v9630_v33  ;;  %2808 = vrot.lane.b32.xlu0 %v1302_v51, %s7638_s27  ;;  %v1309_v51 = vld [vmem:[#allocation2 + $0x38c] sm:$0xff] }
 0x2c8   : > { %2810 = vrot.lane.b32.xlu1 %v1303_v31, %s7638_s27  ;;  %v1310_v31 = vld [vmem:[#allocation2 + $0x394] sm:$0xff] }
 0x2c9   : > { %v9638_v62 = vpop.permute.xlu0 %2632 }
 0x2ca   : > { %v9636_v63 = vpop.permute.xlu1 %2634  ;;  %13733 = vst [vmem:[#allocation203_spill] sm:$0xff] %v9638_v62 }
 0x2cb   : > { %13732 = vst [vmem:[#allocation202_spill] sm:$0xff] %v9636_v63  ;;  %2876 = vrot.lane.b32.xlu0 %v1305_v57, %s7639_s28  ;;  %v1311_v57 = vld [vmem:[#allocation2 + $0x3cc] sm:$0xff] }
 0x2cc   : > { %2878 = vrot.lane.b32.xlu1 %v1306_v56, %s7639_s28  ;;  %v1312_v56 = vld [vmem:[#allocation2 + $0x3d4] sm:$0xff] }
 0x2cd   : > { %v9644_v14 = vpop.permute.xlu0 %2636 }
 0x2ce   : > { %v9642_v33 = vpop.permute.xlu1 %2638  ;;  %13735 = vst [vmem:[#allocation205_spill] sm:$0xff] %v9644_v14 }
 0x2cf   : > { %13734 = vst [vmem:[#allocation204_spill] sm:$0xff] %v9642_v33  ;;  %2880 = vrot.lane.b32.xlu0 %v1307_v61, %s7639_s28  ;;  %v1313_v61 = vld [vmem:[#allocation2 + $0x40c] sm:$0xff] }
 0x2d0   : > { %2882 = vrot.lane.b32.xlu1 %v1308_v35, %s7639_s28  ;;  %v1314_v35 = vld [vmem:[#allocation2 + $0x414] sm:$0xff] }
 0x2d1   : > { %v9650_v62 = vpop.permute.xlu0 %2640 }
 0x2d2   : > { %v9648_v63 = vpop.permute.xlu1 %2642  ;;  %13737 = vst [vmem:[#allocation207_spill] sm:$0xff] %v9650_v62 }
 0x2d3   : > { %13736 = vst [vmem:[#allocation206_spill] sm:$0xff] %v9648_v63  ;;  %2884 = vrot.lane.b32.xlu0 %v1309_v51, %s7639_s28  ;;  %v1315_v51 = vld [vmem:[#allocation2 + $0x44c] sm:$0xff] }
 0x2d4   : > { %2886 = vrot.lane.b32.xlu1 %v1310_v31, %s7639_s28  ;;  %v1316_v31 = vld [vmem:[#allocation2 + $0x454] sm:$0xff] }
 0x2d5   : > { %v9656_v33 = vpop.permute.xlu0 %2644 }
 0x2d6   : > { %v9654_v34 = vpop.permute.xlu1 %2646  ;;  %13739 = vst [vmem:[#allocation209_spill] sm:$0xff] %v9656_v33 }
 0x2d7   : > { %13738 = vst [vmem:[#allocation208_spill] sm:$0xff] %v9654_v34  ;;  %2888 = vrot.lane.b32.xlu0 %v1311_v57, %s7639_s28  ;;  %v1317_v57 = vld [vmem:[#allocation2 + $0x48c] sm:$0xff] }
 0x2d8   : > { %2890 = vrot.lane.b32.xlu1 %v1312_v56, %s7639_s28  ;;  %v1318_v56 = vld [vmem:[#allocation2 + $0x494] sm:$0xff] }
 0x2d9   : > { %v9662_v63 = vpop.permute.xlu0 %2648 }
 0x2da   : > { %v9660_v14 = vpop.permute.xlu1 %2650  ;;  %13741 = vst [vmem:[#allocation211_spill] sm:$0xff] %v9662_v63 }
 0x2db   : > { %13740 = vst [vmem:[#allocation210_spill] sm:$0xff] %v9660_v14  ;;  %2892 = vrot.lane.b32.xlu0 %v1313_v61, %s7639_s28  ;;  %v1319_v61 = vld [vmem:[#allocation2 + $0x4cc] sm:$0xff] }
 0x2dc   : > { %2894 = vrot.lane.b32.xlu1 %v1314_v35, %s7639_s28  ;;  %v1320_v35 = vld [vmem:[#allocation2 + $0x4d4] sm:$0xff] }
 0x2dd   : > { %v9668_v34 = vpop.permute.xlu0 %2652 }
 0x2de   : > { %v9666_v62 = vpop.permute.xlu1 %2654 }
 0x2df   : > { %2896 = vrot.lane.b32.xlu0 %v1315_v51, %s7639_s28  ;;  %v1321_v51 = vld [vmem:[#allocation2 + $0x50c] sm:$0xff] }
 0x2e0   : > { %2898 = vrot.lane.b32.xlu1 %v1316_v31, %s7639_s28  ;;  %v1322_v31 = vld [vmem:[#allocation2 + $0x514] sm:$0xff] }
 0x2e1   : > { %v9674_v14 = vpop.permute.xlu0 %2656 }
 0x2e2   : > { %v9672_v33 = vpop.permute.xlu1 %2658  ;;  %13743 = vst [vmem:[#allocation213_spill] sm:$0xff] %v9674_v14 }
 0x2e3   : > { %13742 = vst [vmem:[#allocation212_spill] sm:$0xff] %v9672_v33  ;;  %2900 = vrot.lane.b32.xlu0 %v1317_v57, %s7639_s28  ;;  %v1323_v57 = vld [vmem:[#allocation2 + $0x54c] sm:$0xff] }
 0x2e4   : > { %2902 = vrot.lane.b32.xlu1 %v1318_v56, %s7639_s28  ;;  %v1324_v56 = vld [vmem:[#allocation2 + $0x554] sm:$0xff] }
 0x2e5   : > { %v9680_v7 = vpop.permute.xlu0 %2660 }
 0x2e6   : > { %v9678_v63 = vpop.permute.xlu1 %2662  ;;  %13745 = vst [vmem:[#allocation215_spill] sm:$0xff] %v9680_v7 }
 0x2e7   : > { %13744 = vst [vmem:[#allocation214_spill] sm:$0xff] %v9678_v63  ;;  %2904 = vrot.lane.b32.xlu0 %v1319_v61, %s7639_s28  ;;  %v1325_v61 = vld [vmem:[#allocation2 + $0x58c] sm:$0xff] }
 0x2e8   : > { %2906 = vrot.lane.b32.xlu1 %v1320_v35, %s7639_s28  ;;  %v1326_v35 = vld [vmem:[#allocation2 + $0x594] sm:$0xff] }
 0x2e9   : > { %v9686_v18 = vpop.permute.xlu0 %2664 }
 0x2ea   : > { %v9684_v36 = vpop.permute.xlu1 %2666  ;;  %13747 = vst [vmem:[#allocation217_spill] sm:$0xff] %v9686_v18 }
 0x2eb   : > { %13746 = vst [vmem:[#allocation216_spill] sm:$0xff] %v9684_v36  ;;  %2908 = vrot.lane.b32.xlu0 %v1321_v51, %s7639_s28  ;;  %v1327_v51 = vld [vmem:[#allocation2 + $0x5cc] sm:$0xff] }
 0x2ec   : > { %2910 = vrot.lane.b32.xlu1 %v1322_v31, %s7639_s28  ;;  %v1328_v31 = vld [vmem:[#allocation2 + $0x5d4] sm:$0xff] }
 0x2ed   : > { %v9692_v3 = vpop.permute.xlu0 %2668 }
 0x2ee   : > { %v9690_v17 = vpop.permute.xlu1 %2670  ;;  %13749 = vst [vmem:[#allocation219_spill] sm:$0xff] %v9692_v3 }
 0x2ef   : > { %13748 = vst [vmem:[#allocation218_spill] sm:$0xff] %v9690_v17  ;;  %2912 = vrot.lane.b32.xlu0 %v1323_v57, %s7639_s28  ;;  %v9710_v57 = vld [vmem:[#allocation2 + $0x60c] sm:$0xff] }
 0x2f0   : > { %2914 = vrot.lane.b32.xlu1 %v1324_v56, %s7639_s28  ;;  %v9708_v56 = vld [vmem:[#allocation2 + $0x614] sm:$0xff] }
 0x2f1   : > { %v9698_v36 = vpop.permute.xlu0 %2672 }
 0x2f2   : > { %v9696_v58 = vpop.permute.xlu1 %2674  ;;  %13751 = vst [vmem:[#allocation221_spill] sm:$0xff] %v9698_v36 }
 0x2f3   : > { %13750 = vst [vmem:[#allocation220_spill] sm:$0xff] %v9696_v58  ;;  %2916 = vrot.lane.b32.xlu0 %v1325_v61, %s7639_s28  ;;  %v9722_v61 = vld [vmem:[#allocation2 + $0x64c] sm:$0xff] }
 0x2f4   : > { %2918 = vrot.lane.b32.xlu1 %v1326_v35, %s7639_s28  ;;  %v9720_v35 = vld [vmem:[#allocation2 + $0x654] sm:$0xff] }
 0x2f5   : > { %v9704_v17 = vpop.permute.xlu0 %2676 }
 0x2f6   : > { %v9702_v18 = vpop.permute.xlu1 %2678  ;;  %13753 = vst [vmem:[#allocation223_spill] sm:$0xff] %v9704_v17 }
 0x2f7   : > { %13752 = vst [vmem:[#allocation222_spill] sm:$0xff] %v9702_v18  ;;  %2920 = vrot.lane.b32.xlu0 %v1327_v51, %s7639_s28 }
 0x2f8   : > { %2922 = vrot.lane.b32.xlu1 %v1328_v31, %s7639_s28 }
 0x2f9   : > { %v9714_v36 = vpop.permute.xlu0 %2680 }
 0x2fa   : > { %v9712_v58 = vpop.permute.xlu1 %2682  ;;  %13755 = vst [vmem:[#allocation225_spill] sm:$0xff] %v9714_v36  ;;  %v9732_v36 = vld [vmem:[#allocation2 + $0x694] sm:$0xff] }
 0x2fb   : > { %13754 = vst [vmem:[#allocation224_spill] sm:$0xff] %v9712_v58  ;;  %2924 = vrot.lane.b32.xlu0 %v9710_v57, %s7639_s28  ;;  %v9734_v58 = vld [vmem:[#allocation2 + $0x68c] sm:$0xff] }
 0x2fc   : > { %2926 = vrot.lane.b32.xlu1 %v9708_v56, %s7639_s28 }
 0x2fd   : > { %v9726_v51 = vpop.permute.xlu0 %2748 }
 0x2fe   : > { %v9724_v31 = vpop.permute.xlu1 %2750  ;;  %13757 = vst [vmem:[#allocation227_spill] sm:$0xff] %v9726_v51  ;;  %v9744_v51 = vld [vmem:[#allocation2 + $0x6d4] sm:$0xff] }
 0x2ff   : > { %13756 = vst [vmem:[#allocation226_spill] sm:$0xff] %v9724_v31  ;;  %2928 = vrot.lane.b32.xlu0 %v9722_v61, %s7639_s28  ;;  %v9746_v31 = vld [vmem:[#allocation2 + $0x6cc] sm:$0xff] }
 0x300   : > { %2930 = vrot.lane.b32.xlu1 %v9720_v35, %s7639_s28 }
 0x301   : > { %v9738_v18 = vpop.permute.xlu0 %2752 }
 0x302   : > { %v9736_v17 = vpop.permute.xlu1 %2754  ;;  %13759 = vst [vmem:[#allocation229_spill] sm:$0xff] %v9738_v18  ;;  %v1337_v18 = vld [vmem:[#allocation2 + $0x318] sm:$0xff] }
 0x303   : > { %13758 = vst [vmem:[#allocation228_spill] sm:$0xff] %v9736_v17  ;;  %2932 = vrot.lane.b32.xlu0 %v9734_v58, %s7639_s28  ;;  %v1338_v17 = vld [vmem:[#allocation2 + $0x320] sm:$0xff] }
 0x304   : > { %2934 = vrot.lane.b32.xlu1 %v9732_v36, %s7639_s28 }
 0x305   : > { %v9750_v7 = vpop.permute.xlu0 %2756 }
 0x306   : > { %v9748_v3 = vpop.permute.xlu1 %2758  ;;  %13761 = vst [vmem:[#allocation231_spill] sm:$0xff] %v9750_v7 }
 0x307   : > { %13760 = vst [vmem:[#allocation230_spill] sm:$0xff] %v9748_v3  ;;  %2936 = vrot.lane.b32.xlu0 %v9746_v31, %s7639_s28  ;;  %v1340_v3 = vld [vmem:[#allocation2 + $0x360] sm:$0xff] }
 0x308   : > { %2938 = vrot.lane.b32.xlu1 %v9744_v51, %s7639_s28  ;;  %s7644_s28 = smov 56  }
 0x309   : > { %v9758_v54 = vpop.permute.xlu0 %2760 }
 0x30a   : > { %v9756_v63 = vpop.permute.xlu1 %2762  ;;  %13763 = vst [vmem:[#allocation233_spill] sm:$0xff] %v9758_v54 }
 0x30b   : > { %13762 = vst [vmem:[#allocation232_spill] sm:$0xff] %v9756_v63  ;;  %3004 = vrot.lane.b32.xlu0 %v1337_v18, %s7640_s15  ;;  %v1343_v18 = vld [vmem:[#allocation2 + $0x3d8] sm:$0xff] }
 0x30c   : > { %3006 = vrot.lane.b32.xlu1 %v1338_v17, %s7640_s15  ;;  %v1344_v17 = vld [vmem:[#allocation2 + $0x3e0] sm:$0xff] }
 0x30d   : > { %v9764_v4 = vpop.permute.xlu0 %2764 }
 0x30e   : > { %v9762_v7 = vpop.permute.xlu1 %2766  ;;  %13765 = vst [vmem:[#allocation235_spill] sm:$0xff] %v9764_v4 }
 0x30f   : > { %13764 = vst [vmem:[#allocation234_spill] sm:$0xff] %v9762_v7  ;;  %3008 = vrot.lane.b32.xlu0 %v1339_v1, %s7640_s15  ;;  %v1346_v1 = vld [vmem:[#allocation2 + $0x420] sm:$0xff] }
 0x310   : > { %3010 = vrot.lane.b32.xlu1 %v1340_v3, %s7640_s15  ;;  %v1345_v3 = vld [vmem:[#allocation2 + $0x418] sm:$0xff] }
 0x311   : > { %v9770_v54 = vpop.permute.xlu0 %2768 }
 0x312   : > { %v9768_v63 = vpop.permute.xlu1 %2770  ;;  %13767 = vst [vmem:[#allocation237_spill] sm:$0xff] %v9770_v54 }
 0x313   : > { %13766 = vst [vmem:[#allocation236_spill] sm:$0xff] %v9768_v63  ;;  %3012 = vrot.lane.b32.xlu0 %v1341_v60, %s7640_s15  ;;  %v1347_v60 = vld [vmem:[#allocation2 + $0x458] sm:$0xff] }
 0x314   : > { %3014 = vrot.lane.b32.xlu1 %v1342_v16, %s7640_s15  ;;  %v1348_v16 = vld [vmem:[#allocation2 + $0x460] sm:$0xff] }
 0x315   : > { %v9776_v7 = vpop.permute.xlu0 %2772 }
 0x316   : > { %v9774_v59 = vpop.permute.xlu1 %2774  ;;  %13769 = vst [vmem:[#allocation239_spill] sm:$0xff] %v9776_v7 }
 0x317   : > { %13768 = vst [vmem:[#allocation238_spill] sm:$0xff] %v9774_v59  ;;  %3016 = vrot.lane.b32.xlu0 %v1343_v18, %s7640_s15  ;;  %v1349_v18 = vld [vmem:[#allocation2 + $0x498] sm:$0xff] }
 0x318   : > { %3018 = vrot.lane.b32.xlu1 %v1344_v17, %s7640_s15  ;;  %v1350_v17 = vld [vmem:[#allocation2 + $0x4a0] sm:$0xff] }
 0x319   : > { %v9782_v63 = vpop.permute.xlu0 %2776 }
 0x31a   : > { %v9780_v4 = vpop.permute.xlu1 %2778  ;;  %13771 = vst [vmem:[#allocation241_spill] sm:$0xff] %v9782_v63 }
 0x31b   : > { %13770 = vst [vmem:[#allocation240_spill] sm:$0xff] %v9780_v4  ;;  %3020 = vrot.lane.b32.xlu0 %v1345_v3, %s7640_s15  ;;  %v1351_v3 = vld [vmem:[#allocation2 + $0x4d8] sm:$0xff] }
 0x31c   : > { %3022 = vrot.lane.b32.xlu1 %v1346_v1, %s7640_s15  ;;  %v1352_v1 = vld [vmem:[#allocation2 + $0x4e0] sm:$0xff] }
 0x31d   : > { %v9788_v59 = vpop.permute.xlu0 %2780 }
 0x31e   : > { %v9786_v54 = vpop.permute.xlu1 %2782 }
 0x31f   : > { %3024 = vrot.lane.b32.xlu0 %v1347_v60, %s7640_s15  ;;  %v1353_v60 = vld [vmem:[#allocation2 + $0x518] sm:$0xff] }
 0x320   : > { %3026 = vrot.lane.b32.xlu1 %v1348_v16, %s7640_s15  ;;  %v1354_v16 = vld [vmem:[#allocation2 + $0x520] sm:$0xff] }
 0x321   : > { %v9794_v4 = vpop.permute.xlu0 %2784 }
 0x322   : > { %v9792_v7 = vpop.permute.xlu1 %2786  ;;  %13773 = vst [vmem:[#allocation243_spill] sm:$0xff] %v9794_v4 }
 0x323   : > { %13772 = vst [vmem:[#allocation242_spill] sm:$0xff] %v9792_v7  ;;  %3028 = vrot.lane.b32.xlu0 %v1349_v18, %s7640_s15  ;;  %v1355_v18 = vld [vmem:[#allocation2 + $0x558] sm:$0xff] }
 0x324   : > { %3030 = vrot.lane.b32.xlu1 %v1350_v17, %s7640_s15  ;;  %v1356_v17 = vld [vmem:[#allocation2 + $0x560] sm:$0xff] }
 0x325   : > { %v9800_v14 = vpop.permute.xlu0 %2788 }
 0x326   : > { %v9798_v63 = vpop.permute.xlu1 %2790  ;;  %13775 = vst [vmem:[#allocation245_spill] sm:$0xff] %v9800_v14 }
 0x327   : > { %13774 = vst [vmem:[#allocation244_spill] sm:$0xff] %v9798_v63  ;;  %3032 = vrot.lane.b32.xlu0 %v1351_v3, %s7640_s15  ;;  %v1357_v3 = vld [vmem:[#allocation2 + $0x598] sm:$0xff] }
 0x328   : > { %3034 = vrot.lane.b32.xlu1 %v1352_v1, %s7640_s15  ;;  %v1358_v1 = vld [vmem:[#allocation2 + $0x5a0] sm:$0xff] }
 0x329   : > { %v9806_v7 = vpop.permute.xlu0 %2792 }
 0x32a   : > { %v9804_v33 = vpop.permute.xlu1 %2794  ;;  %13777 = vst [vmem:[#allocation247_spill] sm:$0xff] %v9806_v7 }
 0x32b   : > { %13776 = vst [vmem:[#allocation246_spill] sm:$0xff] %v9804_v33  ;;  %3036 = vrot.lane.b32.xlu0 %v1353_v60, %s7640_s15  ;;  %v1359_v60 = vld [vmem:[#allocation2 + $0x5d8] sm:$0xff] }
 0x32c   : > { %3038 = vrot.lane.b32.xlu1 %v1354_v16, %s7640_s15  ;;  %v1360_v16 = vld [vmem:[#allocation2 + $0x5e0] sm:$0xff] }
 0x32d   : > { %v9812_v63 = vpop.permute.xlu0 %2796 }
 0x32e   : > { %v9810_v4 = vpop.permute.xlu1 %2798  ;;  %13779 = vst [vmem:[#allocation249_spill] sm:$0xff] %v9812_v63 }
 0x32f   : > { %13778 = vst [vmem:[#allocation248_spill] sm:$0xff] %v9810_v4  ;;  %3040 = vrot.lane.b32.xlu0 %v1355_v18, %s7640_s15  ;;  %v1361_v18 = vld [vmem:[#allocation2 + $0x618] sm:$0xff] }
 0x330   : > { %3042 = vrot.lane.b32.xlu1 %v1356_v17, %s7640_s15  ;;  %v1362_v17 = vld [vmem:[#allocation2 + $0x620] sm:$0xff] }
 0x331   : > { %v9818_v33 = vpop.permute.xlu0 %2800 }
 0x332   : > { %v9816_v14 = vpop.permute.xlu1 %2802  ;;  %13781 = vst [vmem:[#allocation251_spill] sm:$0xff] %v9818_v33 }
 0x333   : > { %13780 = vst [vmem:[#allocation250_spill] sm:$0xff] %v9816_v14  ;;  %3044 = vrot.lane.b32.xlu0 %v1357_v3, %s7640_s15  ;;  %v1363_v3 = vld [vmem:[#allocation2 + $0x658] sm:$0xff] }
 0x334   : > { %3046 = vrot.lane.b32.xlu1 %v1358_v1, %s7640_s15  ;;  %v1364_v1 = vld [vmem:[#allocation2 + $0x660] sm:$0xff] }
 0x335   : > { %v9824_v4 = vpop.permute.xlu0 %2804 }
 0x336   : > { %v9822_v7 = vpop.permute.xlu1 %2806  ;;  %13783 = vst [vmem:[#allocation253_spill] sm:$0xff] %v9824_v4 }
 0x337   : > { %13782 = vst [vmem:[#allocation252_spill] sm:$0xff] %v9822_v7  ;;  %3048 = vrot.lane.b32.xlu0 %v1359_v60, %s7640_s15  ;;  %v1365_v60 = vld [vmem:[#allocation2 + $0x698] sm:$0xff] }
 0x338   : > { %3050 = vrot.lane.b32.xlu1 %v1360_v16, %s7640_s15  ;;  %v1366_v16 = vld [vmem:[#allocation2 + $0x6a0] sm:$0xff] }
 0x339   : > { %v9830_v14 = vpop.permute.xlu0 %2808 }
 0x33a   : > { %v9828_v63 = vpop.permute.xlu1 %2810  ;;  %13785 = vst [vmem:[#allocation255_spill] sm:$0xff] %v9830_v14 }
 0x33b   : > { %13784 = vst [vmem:[#allocation254_spill] sm:$0xff] %v9828_v63  ;;  %3052 = vrot.lane.b32.xlu0 %v1361_v18, %s7640_s15  ;;  %v1367_v18 = vld [vmem:[#allocation2 + $0x6d8] sm:$0xff] }
 0x33c   : > { %3054 = vrot.lane.b32.xlu1 %v1362_v17, %s7640_s15  ;;  %v1368_v17 = vld [vmem:[#allocation2 + $0x6e0] sm:$0xff] }
 0x33d   : > { %v9836_v7 = vpop.permute.xlu0 %2876 }
 0x33e   : > { %v9834_v33 = vpop.permute.xlu1 %2878  ;;  %13787 = vst [vmem:[#allocation257_spill] sm:$0xff] %v9836_v7 }
 0x33f   : > { %13786 = vst [vmem:[#allocation256_spill] sm:$0xff] %v9834_v33  ;;  %3056 = vrot.lane.b32.xlu0 %v1363_v3, %s7640_s15  ;;  %v1369_v3 = vld [vmem:[#allocation2 + $0x324] sm:$0xff] }
 0x340   : > { %3058 = vrot.lane.b32.xlu1 %v1364_v1, %s7640_s15  ;;  %v1370_v1 = vld [vmem:[#allocation2 + $0x32c] sm:$0xff] }
 0x341   : > { %v9842_v63 = vpop.permute.xlu0 %2880 }
 0x342   : > { %v9840_v4 = vpop.permute.xlu1 %2882  ;;  %13789 = vst [vmem:[#allocation259_spill] sm:$0xff] %v9842_v63 }
 0x343   : > { %13788 = vst [vmem:[#allocation258_spill] sm:$0xff] %v9840_v4  ;;  %3060 = vrot.lane.b32.xlu0 %v1365_v60, %s7640_s15  ;;  %v1371_v60 = vld [vmem:[#allocation2 + $0x364] sm:$0xff] }
 0x344   : > { %3062 = vrot.lane.b32.xlu1 %v1366_v16, %s7640_s15  ;;  %v1372_v16 = vld [vmem:[#allocation2 + $0x36c] sm:$0xff] }
 0x345   : > { %v9848_v33 = vpop.permute.xlu0 %2884 }
 0x346   : > { %v9846_v14 = vpop.permute.xlu1 %2886  ;;  %13791 = vst [vmem:[#allocation261_spill] sm:$0xff] %v9848_v33 }
 0x347   : > { %13790 = vst [vmem:[#allocation260_spill] sm:$0xff] %v9846_v14  ;;  %3064 = vrot.lane.b32.xlu0 %v1367_v18, %s7640_s15  ;;  %v1373_v18 = vld [vmem:[#allocation2 + $0x3a4] sm:$0xff] }
 0x348   : > { %3066 = vrot.lane.b32.xlu1 %v1368_v17, %s7640_s15  ;;  %v1374_v17 = vld [vmem:[#allocation2 + $0x3ac] sm:$0xff] }
 0x349   : > { %v9854_v4 = vpop.permute.xlu0 %2888 }
 0x34a   : > { %v9852_v7 = vpop.permute.xlu1 %2890  ;;  %13793 = vst [vmem:[#allocation263_spill] sm:$0xff] %v9854_v4 }
 0x34b   : > { %13792 = vst [vmem:[#allocation262_spill] sm:$0xff] %v9852_v7  ;;  %3132 = vrot.lane.b32.xlu0 %v1369_v3, %s7641_s17  ;;  %v1375_v3 = vld [vmem:[#allocation2 + $0x3e4] sm:$0xff] }
 0x34c   : > { %3134 = vrot.lane.b32.xlu1 %v1370_v1, %s7641_s17  ;;  %v1376_v1 = vld [vmem:[#allocation2 + $0x3ec] sm:$0xff] }
 0x34d   : > { %v9860_v33 = vpop.permute.xlu0 %2892 }
 0x34e   : > { %v9858_v14 = vpop.permute.xlu1 %2894  ;;  %13795 = vst [vmem:[#allocation265_spill] sm:$0xff] %v9860_v33 }
 0x34f   : > { %13794 = vst [vmem:[#allocation264_spill] sm:$0xff] %v9858_v14  ;;  %3136 = vrot.lane.b32.xlu0 %v1371_v60, %s7641_s17  ;;  %v1377_v60 = vld [vmem:[#allocation2 + $0x424] sm:$0xff] }
 0x350   : > { %3138 = vrot.lane.b32.xlu1 %v1372_v16, %s7641_s17  ;;  %v1378_v16 = vld [vmem:[#allocation2 + $0x42c] sm:$0xff] }
 0x351   : > { %v9866_v4 = vpop.permute.xlu0 %2896 }
 0x352   : > { %v9864_v7 = vpop.permute.xlu1 %2898  ;;  %13797 = vst [vmem:[#allocation267_spill] sm:$0xff] %v9866_v4 }
 0x353   : > { %13796 = vst [vmem:[#allocation266_spill] sm:$0xff] %v9864_v7  ;;  %3140 = vrot.lane.b32.xlu0 %v1373_v18, %s7641_s17  ;;  %v1379_v18 = vld [vmem:[#allocation2 + $0x464] sm:$0xff] }
 0x354   : > { %3142 = vrot.lane.b32.xlu1 %v1374_v17, %s7641_s17  ;;  %v1380_v17 = vld [vmem:[#allocation2 + $0x46c] sm:$0xff] }
 0x355   : > { %v9872_v14 = vpop.permute.xlu0 %2900 }
 0x356   : > { %v9870_v63 = vpop.permute.xlu1 %2902  ;;  %13799 = vst [vmem:[#allocation269_spill] sm:$0xff] %v9872_v14 }
 0x357   : > { %13798 = vst [vmem:[#allocation268_spill] sm:$0xff] %v9870_v63  ;;  %3144 = vrot.lane.b32.xlu0 %v1375_v3, %s7641_s17  ;;  %v1381_v3 = vld [vmem:[#allocation2 + $0x4a4] sm:$0xff] }
 0x358   : > { %3146 = vrot.lane.b32.xlu1 %v1376_v1, %s7641_s17  ;;  %v1382_v1 = vld [vmem:[#allocation2 + $0x4ac] sm:$0xff] }
 0x359   : > { %v9878_v7 = vpop.permute.xlu0 %2904 }
 0x35a   : > { %v9876_v33 = vpop.permute.xlu1 %2906  ;;  %13801 = vst [vmem:[#allocation271_spill] sm:$0xff] %v9878_v7 }
 0x35b   : > { %13800 = vst [vmem:[#allocation270_spill] sm:$0xff] %v9876_v33  ;;  %3148 = vrot.lane.b32.xlu0 %v1377_v60, %s7641_s17  ;;  %v1383_v60 = vld [vmem:[#allocation2 + $0x4e4] sm:$0xff] }
 0x35c   : > { %3150 = vrot.lane.b32.xlu1 %v1378_v16, %s7641_s17  ;;  %v1384_v16 = vld [vmem:[#allocation2 + $0x4ec] sm:$0xff] }
 0x35d   : > { %v9884_v63 = vpop.permute.xlu0 %2908 }
 0x35e   : > { %v9882_v4 = vpop.permute.xlu1 %2910 }
 0x35f   : > { %3152 = vrot.lane.b32.xlu0 %v1379_v18, %s7641_s17  ;;  %v1385_v18 = vld [vmem:[#allocation2 + $0x524] sm:$0xff] }
 0x360   : > { %3154 = vrot.lane.b32.xlu1 %v1380_v17, %s7641_s17  ;;  %v1386_v17 = vld [vmem:[#allocation2 + $0x52c] sm:$0xff] }
 0x361   : > { %v9890_v33 = vpop.permute.xlu0 %2912 }
 0x362   : > { %v9888_v14 = vpop.permute.xlu1 %2914  ;;  %13803 = vst [vmem:[#allocation273_spill] sm:$0xff] %v9890_v33 }
 0x363   : > { %13802 = vst [vmem:[#allocation272_spill] sm:$0xff] %v9888_v14  ;;  %3156 = vrot.lane.b32.xlu0 %v1381_v3, %s7641_s17  ;;  %v1387_v3 = vld [vmem:[#allocation2 + $0x564] sm:$0xff] }
 0x364   : > { %3158 = vrot.lane.b32.xlu1 %v1382_v1, %s7641_s17  ;;  %v1388_v1 = vld [vmem:[#allocation2 + $0x56c] sm:$0xff] }
 0x365   : > { %v9896_v50 = vpop.permute.xlu0 %2916 }
 0x366   : > { %v9894_v7 = vpop.permute.xlu1 %2918  ;;  %13805 = vst [vmem:[#allocation275_spill] sm:$0xff] %v9896_v50 }
 0x367   : > { %13804 = vst [vmem:[#allocation274_spill] sm:$0xff] %v9894_v7  ;;  %3160 = vrot.lane.b32.xlu0 %v1383_v60, %s7641_s17  ;;  %v1389_v60 = vld [vmem:[#allocation2 + $0x5a4] sm:$0xff] }
 0x368   : > { %3162 = vrot.lane.b32.xlu1 %v1384_v16, %s7641_s17  ;;  %v1390_v16 = vld [vmem:[#allocation2 + $0x5ac] sm:$0xff] }
 0x369   : > { %v9902_v14 = vpop.permute.xlu0 %2920 }
 0x36a   : > { %v9900_v12 = vpop.permute.xlu1 %2922  ;;  %13807 = vst [vmem:[#allocation277_spill] sm:$0xff] %v9902_v14 }
 0x36b   : > { %13806 = vst [vmem:[#allocation276_spill] sm:$0xff] %v9900_v12  ;;  %3164 = vrot.lane.b32.xlu0 %v1385_v18, %s7641_s17  ;;  %v1391_v18 = vld [vmem:[#allocation2 + $0x5e4] sm:$0xff] }
 0x36c   : > { %3166 = vrot.lane.b32.xlu1 %v1386_v17, %s7641_s17  ;;  %v1392_v17 = vld [vmem:[#allocation2 + $0x5ec] sm:$0xff] }
 0x36d   : > { %v9908_v7 = vpop.permute.xlu0 %2924 }
 0x36e   : > { %v9906_v33 = vpop.permute.xlu1 %2926 }
 0x36f   : > { %13808 = vst [vmem:[#allocation278_spill] sm:$0xff] %v9906_v33  ;;  %3168 = vrot.lane.b32.xlu0 %v1387_v3, %s7641_s17  ;;  %v9926_v3 = vld [vmem:[#allocation2 + $0x624] sm:$0xff] }
 0x370   : > { %3170 = vrot.lane.b32.xlu1 %v1388_v1, %s7641_s17  ;;  %v9924_v1 = vld [vmem:[#allocation2 + $0x62c] sm:$0xff]  ;;  %13812 = vst [vmem:[#allocation282_spill] sm:$0xff] %v9926_v3 }
 0x371   : > { %v9914_v12 = vpop.permute.xlu0 %2928  ;;  %13811 = vst [vmem:[#allocation281_spill] sm:$0xff] %v9924_v1 }
 0x372   : > { %v9912_v50 = vpop.permute.xlu1 %2930  ;;  %13810 = vst [vmem:[#allocation280_spill] sm:$0xff] %v9914_v12 }
 0x373   : > { %13809 = vst [vmem:[#allocation279_spill] sm:$0xff] %v9912_v50  ;;  %3172 = vrot.lane.b32.xlu0 %v1389_v60, %s7641_s17  ;;  %v9938_v60 = vld [vmem:[#allocation2 + $0x664] sm:$0xff] }
 0x374   : > { %3174 = vrot.lane.b32.xlu1 %v1390_v16, %s7641_s17  ;;  %v9936_v16 = vld [vmem:[#allocation2 + $0x66c] sm:$0xff]  ;;  %13816 = vst [vmem:[#allocation286_spill] sm:$0xff] %v9938_v60 }
 0x375   : > { %v9920_v33 = vpop.permute.xlu0 %2932  ;;  %13815 = vst [vmem:[#allocation285_spill] sm:$0xff] %v9936_v16 }
 0x376   : > { %v9918_v14 = vpop.permute.xlu1 %2934 }
 0x377   : > { %3176 = vrot.lane.b32.xlu0 %v1391_v18, %s7641_s17 }
 0x378   : > { %3178 = vrot.lane.b32.xlu1 %v1392_v17, %s7641_s17 }
 0x379   : > { %v9930_v12 = vpop.permute.xlu0 %2936 }
 0x37a   : > { %v9928_v50 = vpop.permute.xlu1 %2938  ;;  %13814 = vst [vmem:[#allocation284_spill] sm:$0xff] %v9930_v12  ;;  %v9948_v12 = vld [vmem:[#allocation2 + $0x6ac] sm:$0xff] }
 0x37b   : > { %13813 = vst [vmem:[#allocation283_spill] sm:$0xff] %v9928_v50  ;;  %3180 = vrot.lane.b32.xlu0 %v9926_v3, %s7641_s17 }
 0x37c   : > { %3182 = vrot.lane.b32.xlu1 %v9924_v1, %s7641_s17  ;;  %v9950_v1 = vld [vmem:[#allocation2 + $0x6a4] sm:$0xff] }
 0x37d   : > { %v9942_v18 = vpop.permute.xlu0 %3004 }
 0x37e   : > { %v9940_v17 = vpop.permute.xlu1 %3006  ;;  %13818 = vst [vmem:[#allocation288_spill] sm:$0xff] %v9942_v18  ;;  %v9960_v18 = vld [vmem:[#allocation2 + $0x6ec] sm:$0xff] }
 0x37f   : > { %13817 = vst [vmem:[#allocation287_spill] sm:$0xff] %v9940_v17  ;;  %3184 = vrot.lane.b32.xlu0 %v9938_v60, %s7641_s17  ;;  %v9962_v17 = vld [vmem:[#allocation2 + $0x6e4] sm:$0xff] }
 0x380   : > { %3186 = vrot.lane.b32.xlu1 %v9936_v16, %s7641_s17  ;;  %13821 = vst [vmem:[#allocation291_spill] sm:$0xff] %v9962_v17 }
 0x381   : > { %v9954_v3 = vpop.permute.xlu0 %3008 }
 0x382   : > { %v9952_v50 = vpop.permute.xlu1 %3010  ;;  %13820 = vst [vmem:[#allocation290_spill] sm:$0xff] %v9954_v3 }
 0x383   : > { %13819 = vst [vmem:[#allocation289_spill] sm:$0xff] %v9952_v50  ;;  %3188 = vrot.lane.b32.xlu0 %v9950_v1, %s7641_s17 }
 0x384   : > { %3190 = vrot.lane.b32.xlu1 %v9948_v12, %s7641_s17 }
 0x385   : > { %v9966_v60 = vpop.permute.xlu0 %3012 }
 0x386   : > { %v9964_v16 = vpop.permute.xlu1 %3014  ;;  %13823 = vst [vmem:[#allocation293_spill] sm:$0xff] %v9966_v60  ;;  %v3756_v60 = vsel %vm13530_vm0, %v8655_v25, %v8896_v8  ;;  %v3760_v8 = vsel %vm13530_vm0, %v8706_v40, %v8918_v10  ;;  %v13829_v10 = vld [vmem:[#allocation27_spill] sm:$0xff]  ;;  %v13835_v40 = vld [vmem:[#allocation30_spill] sm:$0xff] }
 0x387   : > { %13822 = vst [vmem:[#allocation292_spill] sm:$0xff] %v9964_v16  ;;  %3192 = vrot.lane.b32.xlu0 %v9962_v17, %s7641_s17  ;;  %v3757_v16 = vsel %vm13530_vm0, %v8658_v26, %v8894_v32  ;;  %v3761_v32 = vsel %vm13530_vm0, %v8701_v39, %v8916_v9  ;;  %v3764_v9 = vsel %vm13530_vm0, %v8734_v46, %v8942_v19  ;;  %v13836_v39 = vld [vmem:[#allocation53_spill] sm:$0xff]  ;;  %v13838_v46 = vld [vmem:[#allocation54_spill] sm:$0xff] }
 0x388   : > { %3194 = vrot.lane.b32.xlu1 %v9960_v18, %s7641_s17 }
 0x389   : > { %v9974_v3 = vpop.permute.xlu0 %3016 }
 0x38a   : > { %v9972_v50 = vpop.permute.xlu1 %3018  ;;  %13825 = vst [vmem:[#allocation295_spill] sm:$0xff] %v9974_v3  ;;  %v13831_v3 = vld [vmem:[#allocation28_spill] sm:$0xff] }
 0x38b   : > { %13824 = vst [vmem:[#allocation294_spill] sm:$0xff] %v9972_v50  ;;  %3260 = vrot.lane.b32.xlu0 %v9710_v57, %s7642_s18  ;;  %v3758_v57 = vsel %vm13530_vm0, %v8661_v27, %v8906_v29  ;;  %v3765_v29 = vsel %vm13530_vm0, %v8725_v43, %v8940_v15  ;;  %v13832_v15 = vld [vmem:[#allocation51_spill] sm:$0xff]  ;;  %v13833_v43 = vld [vmem:[#allocation29_spill] sm:$0xff] }
 0x38c   : > { %3262 = vrot.lane.b32.xlu1 %v9708_v56, %s7642_s18  ;;  %v3759_v56 = vsel %vm13530_vm0, %v8668_v28, %v8904_v0  ;;  %v3762_v0 = vsel %vm13530_vm0, %v8714_v42, %v8930_v24  ;;  %v13830_v24 = vld [vmem:[#allocation50_spill] sm:$0xff]  ;;  %v13837_v27 = vld [vmem:[#allocation31_spill] sm:$0xff]  ;;  %v13839_v28 = vld [vmem:[#allocation32_spill] sm:$0xff] }
 0x38d   : > { %v9988_v50 = vpop.permute.xlu0 %3020  ;;  %v3766_v42 = vsel %vm13530_vm0, %v13831_v3, %v13830_v24  ;;  %v3771_v19 = vsel %vm13530_vm0, %v13837_v27, %v13836_v39  ;;  %v3791_v39 = vsel %vm13529_vm1, %v3758_v57, %v9070_v45  ;;  %v3794_v27 = vsel %vm13529_vm1, %v3761_v32, %v9076_v48  ;;  %v13843_v45 = vld [vmem:[#allocation72_spill] sm:$0xff]  ;;  %v13848_v57 = vld [vmem:[#allocation77_spill] sm:$0xff] }
 0x38e   : > { %v9986_v17 = vpop.permute.xlu1 %3022  ;;  %13827 = vst [vmem:[#allocation297_spill] sm:$0xff] %v9988_v50  ;;  %v3797_v48 = vsel %vm13529_vm1, %v3764_v9, %v13843_v45  ;;  %v10080_v32 = vsel %vm13529_vm1, %v3771_v19, %v13848_v57  ;;  %v13854_v45 = vld [vmem:[#allocation97_spill] sm:$0xff] }
 0x38f   : > { %13826 = vst [vmem:[#allocation296_spill] sm:$0xff] %v9986_v17  ;;  %v3763_v17 = vsel %vm13530_vm0, %v8711_v41, %v8928_v23  ;;  %3264 = vrot.lane.b32.xlu0 %v9722_v61, %s7642_s18  ;;  %v13828_v23 = vld [vmem:[#allocation49_spill] sm:$0xff]  ;;  %v3769_v41 = vsel %vm13530_vm0, %v13833_v43, %v13832_v15  ;;  %v3789_v15 = vsel %vm13529_vm1, %v3756_v60, %v9062_v38  ;;  %v13842_v38 = vld [vmem:[#allocation71_spill] sm:$0xff] }
 0x390   : > { %3266 = vrot.lane.b32.xlu1 %v9720_v35, %s7642_s18  ;;  %v3767_v50 = vsel %vm13530_vm0, %v13829_v10, %v13828_v23  ;;  %v13834_v35 = vld [vmem:[#allocation52_spill] sm:$0xff]  ;;  %v3770_v23 = vsel %vm13530_vm0, %v13839_v28, %v13838_v46  ;;  %v3790_v10 = vsel %vm13529_vm1, %v3757_v16, %v9060_v37  ;;  %v3793_v46 = vsel %vm13529_vm1, %v3760_v8, %v9078_v49  ;;  %v13844_v49 = vld [vmem:[#allocation73_spill] sm:$0xff]  ;;  %v13849_v8 = vld [vmem:[#allocation78_spill] sm:$0xff] }
 0x391   : > { %v3768_v61 = vsel %vm13530_vm0, %v13835_v40, %v13834_v35  ;;  %v10040_v3 = vpop.permute.xlu0 %3024  ;;  %v3792_v35 = vsel %vm13529_vm1, %v3759_v56, %v9068_v44  ;;  %v3796_v37 = vsel %vm13529_vm1, %v3763_v17, %v9084_v52  ;;  %v3795_v16 = vsel %vm13529_vm1, %v3762_v0, %v9086_v53  ;;  %v13845_v52 = vld [vmem:[#allocation74_spill] sm:$0xff]  ;;  %v13846_v53 = vld [vmem:[#allocation75_spill] sm:$0xff] }
 0x392   : > { %v10038_v24 = vpop.permute.xlu1 %3026  ;;  %13841 = vst [vmem:[#allocation50_spill] sm:$0xff] %v10040_v3  ;;  %v3798_v44 = vsel %vm13529_vm1, %v3765_v29, %v13842_v38  ;;  %v3800_v60 = vsel %vm13529_vm1, %v3767_v50, %v13844_v49  ;;  %v10068_v17 = vsel %vm13529_vm1, %v3766_v42, %v13845_v52  ;;  %v10072_v56 = vsel %vm13529_vm1, %v3769_v41, %v13846_v53  ;;  %v13852_v29 = vld [vmem:[#allocation95_spill] sm:$0xff]  ;;  %v13855_v49 = vld [vmem:[#allocation98_spill] sm:$0xff] }
 0x393   : > { %13840 = vst [vmem:[#allocation49_spill] sm:$0xff] %v10038_v24  ;;  %3268 = vrot.lane.b32.xlu0 %v9734_v58, %s7642_s18  ;;  %v10084_v0 = vsel %vm13529_vm1, %v3770_v23, %v13849_v8  ;;  %v3823_v41 = vsel %vm13528_vm2, %v3790_v10, %v9212_v22  ;;  %v3822_v9 = vsel %vm13528_vm2, %v3789_v15, %v13852_v29  ;;  %v13856_v52 = vld [vmem:[#allocation99_spill] sm:$0xff]  ;;  %v13858_v22 = vld [vmem:[#allocation101_spill] sm:$0xff]  ;;  %v13859_v15 = vld [vmem:[#allocation102_spill] sm:$0xff] }
 0x394   : > { %3270 = vrot.lane.b32.xlu1 %v9732_v36, %s7642_s18  ;;  %v13847_v36 = vld [vmem:[#allocation76_spill] sm:$0xff]  ;;  %v3824_v19 = vsel %vm13528_vm2, %v3791_v39, %v13854_v45  ;;  %v3827_v23 = vsel %vm13528_vm2, %v3794_v27, %v13855_v49  ;;  %v3826_v53 = vsel %vm13528_vm2, %v3793_v46, %v13856_v52  ;;  %v10112_v10 = vsel %vm13528_vm2, %v3795_v16, %v13858_v22  ;;  %v1410_v46 = vld [vmem:[#allocation2 + $0x714] sm:$0xff] }
 0x395   : > { %v10076_v58 = vsel %vm13529_vm1, %v3768_v61, %v13847_v36  ;;  %v10088_v42 = vpop.permute.xlu0 %3028  ;;  %v13853_v61 = vld [vmem:[#allocation96_spill] sm:$0xff]  ;;  %v10116_v27 = vsel %vm13528_vm2, %v3798_v44, %v13859_v15  ;;  %v3855_v39 = vsel %vm3838_vm3, %v3822_v9, %v9358_v21  ;;  %v13863_v45 = vld [vmem:[#allocation182_spill] sm:$0xff]  ;;  %v13867_v22 = vld [vmem:[#allocation213_spill] sm:$0xff] }
 0x396   : > { %v10086_v50 = vpop.permute.xlu1 %3030  ;;  %13851 = vst [vmem:[#allocation29_spill] sm:$0xff] %v10088_v42  ;;  %v3825_v38 = vsel %vm13528_vm2, %v3792_v35, %v13853_v61  ;;  %v13857_v36 = vld [vmem:[#allocation100_spill] sm:$0xff]  ;;  %v3856_v35 = vsel %vm3838_vm3, %v3823_v41, %v9356_v20  ;;  %v3888_v16 = vsel %vm13527_vm4, %v3855_v39, %v9464_v6 }
 0x397   : > { %13850 = vst [vmem:[#allocation51_spill] sm:$0xff] %v10086_v50  ;;  %v10104_v57 = vsel %vm13528_vm2, %v3796_v37, %v13857_v36  ;;  %3272 = vrot.lane.b32.xlu0 %v9746_v31, %s7642_s18  ;;  %v1409_v37 = vld [vmem:[#allocation2 + $0x70c] sm:$0xff]  ;;  %v3889_v31 = vsel %vm13527_vm4, %v3856_v35, %v9462_v2  ;;  %v3858_v20 = vsel %vm3838_vm3, %v3825_v38, %v9364_v30  ;;  %v13868_v35 = vld [vmem:[#allocation126_spill] sm:$0xff] }
 0x398   : > { %3274 = vrot.lane.b32.xlu1 %v9744_v51, %s7642_s18  ;;  %v13860_v51 = vld [vmem:[#allocation103_spill] sm:$0xff]  ;;  %v3922_v21 = vsel %vm3904_vm5, %v3889_v31, %v9560_v11  ;;  %v3857_v2 = vsel %vm3838_vm3, %v3824_v19, %v9366_v55  ;;  %v3891_v30 = vsel %vm13527_vm4, %v3858_v20, %v9468_v5  ;;  %v13865_v52 = vld [vmem:[#allocation104_spill] sm:$0xff]  ;;  %v3860_v39 = vsel %vm3838_vm3, %v3827_v23, %v13868_v35  ;;  %v1414_v20 = vld [vmem:[#allocation2 + $0x794] sm:$0xff] }
 0x399   : > { %v10124_v8 = vsel %vm13528_vm2, %v3797_v48, %v13860_v51  ;;  %v10132_v29 = vpop.permute.xlu0 %3032  ;;  %v3921_v48 = vsel %vm3904_vm5, %v3888_v16, %v9562_v47  ;;  %v3955_v6 = vsel %vm3937_vm6, %v3922_v21, %v9666_v62  ;;  %v1412_v47 = vld [vmem:[#allocation2 + $0x754] sm:$0xff]  ;;  %v1411_v62 = vld [vmem:[#allocation2 + $0x74c] sm:$0xff]  ;;  %v13864_v19 = vld [vmem:[#allocation183_spill] sm:$0xff] }
 0x39a   : > { %v10130_v44 = vpop.permute.xlu1 %3034  ;;  %13862 = vst [vmem:[#allocation30_spill] sm:$0xff] %v10132_v29  ;;  %v3954_v41 = vsel %vm3937_vm6, %v3921_v48, %v9668_v34  ;;  %v3988_v11 = vsel %vm3970_vm7, %v3955_v6, %v9786_v54  ;;  %v3890_v34 = vsel %vm13527_vm4, %v3857_v2, %v9470_v13  ;;  %v3924_v54 = vsel %vm3904_vm5, %v3891_v30, %v13863_v45  ;;  %v13870_v51 = vld [vmem:[#allocation242_spill] sm:$0xff]  ;;  %v13871_v31 = vld [vmem:[#allocation243_spill] sm:$0xff]  ;;  %v1413_v21 = vld [vmem:[#allocation2 + $0x78c] sm:$0xff] }
 0x39b   : > { %13861 = vst [vmem:[#allocation52_spill] sm:$0xff] %v10130_v44  ;;  %3276 = vrot.lane.b32.xlu0 %v1409_v37, %s7642_s18  ;;  %v3987_v55 = vsel %vm3970_vm7, %v3954_v41, %v9788_v59  ;;  %v4021_v9 = vsel %vm13531_vm8, %v3988_v11, %v9882_v4  ;;  %v3923_v59 = vsel %vm3904_vm5, %v3890_v34, %v13864_v19  ;;  %v13872_v48 = vld [vmem:[#allocation154_spill] sm:$0xff]  ;;  %v13873_v6 = vld [vmem:[#allocation155_spill] sm:$0xff]  ;;  %v13874_v30 = vld [vmem:[#allocation272_spill] sm:$0xff] }
 0x39c   : > { %3278 = vrot.lane.b32.xlu1 %v1410_v46, %s7642_s18  ;;  %v4020_v61 = vsel %vm13531_vm8, %v3987_v55, %v9884_v63  ;;  %v10172_v4 = vsel %vm13528_vm2, %v3800_v60, %v13865_v52  ;;  %v13866_v63 = vld [vmem:[#allocation212_spill] sm:$0xff]  ;;  %v3956_v15 = vsel %vm3937_vm6, %v3923_v59, %v13867_v22  ;;  %v13869_v46 = vld [vmem:[#allocation127_spill] sm:$0xff]  ;;  %v3893_v2 = vsel %vm13527_vm4, %v3860_v39, %v13872_v48  ;;  %v13875_v11 = vld [vmem:[#allocation273_spill] sm:$0xff] }
 0x39d   : > { %v3037_v38 = vpop.permute.xlu0 %3036  ;;  %v3957_v36 = vsel %vm3937_vm6, %v3924_v54, %v13866_v63  ;;  %v3859_v37 = vsel %vm3838_vm3, %v3826_v53, %v13869_v46  ;;  %v3989_v16 = vsel %vm3970_vm7, %v3956_v15, %v13871_v31  ;;  %v13878_v45 = vld [vmem:[#allocation105_spill] sm:$0xff]  ;;  %v13879_v19 = vld [vmem:[#allocation214_spill] sm:$0xff]  ;;  %v13880_v52 = vld [vmem:[#allocation215_spill] sm:$0xff] }
 0x39e   : > { %v3039_v5 = vpop.permute.xlu1 %3038  ;;  %v10168_v13 = vsel %vm4036_vm9, %v4020_v61, %v3037_v38  ;;  %v3990_v60 = vsel %vm3970_vm7, %v3957_v36, %v13870_v51  ;;  %v3892_v41 = vsel %vm13527_vm4, %v3859_v37, %v13873_v6  ;;  %v4022_v53 = vsel %vm13531_vm8, %v3989_v16, %v13875_v11  ;;  %v13881_v36 = vld [vmem:[#allocation128_spill] sm:$0xff]  ;;  %v13882_v15 = vld [vmem:[#allocation129_spill] sm:$0xff]  ;;  %v13887_v48 = vld [vmem:[#allocation274_spill] sm:$0xff] }
 0x39f   : > { %v10165_v49 = vsel %vm4036_vm9, %v4021_v9, %v3039_v5  ;;  %3280 = vrot.lane.b32.xlu0 %v1411_v62, %s7642_s18  ;;  %v4023_v23 = vsel %vm13531_vm8, %v3990_v60, %v13874_v30  ;;  %v13876_v62 = vld [vmem:[#allocation184_spill] sm:$0xff]  ;;  %v13877_v9 = vld [vmem:[#allocation185_spill] sm:$0xff]  ;;  %v3832_v54 = vsel %vm13528_vm2, %v10068_v17, %v13878_v45  ;;  %v3862_v22 = vsel %vm3838_vm3, %v10104_v57, %v13881_v36  ;;  %v13889_v30 = vld [vmem:[#allocation186_spill] sm:$0xff] }
 0x3a0   : > { %3282 = vrot.lane.b32.xlu1 %v1412_v47, %s7642_s18  ;;  %v3926_v34 = vsel %vm3904_vm5, %v3893_v2, %v13876_v62  ;;  %v3925_v61 = vsel %vm3904_vm5, %v3892_v41, %v13877_v9  ;;  %v3861_v35 = vsel %vm3838_vm3, %v10112_v10, %v13882_v15  ;;  %v13883_v39 = vld [vmem:[#allocation244_spill] sm:$0xff]  ;;  %v13884_v46 = vld [vmem:[#allocation245_spill] sm:$0xff]  ;;  %v13888_v2 = vld [vmem:[#allocation275_spill] sm:$0xff] }
 0x3a1   : > { %v3041_v47 = vpop.permute.xlu0 %3040  ;;  %v3959_v59 = vsel %vm3937_vm6, %v3926_v34, %v13879_v19  ;;  %v3958_v63 = vsel %vm3937_vm6, %v3925_v61, %v13880_v52  ;;  %v1416_v51 = vld [vmem:[#allocation2 + $0x7d4] sm:$0xff]  ;;  %v1415_v60 = vld [vmem:[#allocation2 + $0x7cc] sm:$0xff]  ;;  %v13890_v11 = vld [vmem:[#allocation187_spill] sm:$0xff] }
 0x3a2   : > { %v3043_v55 = vpop.permute.xlu1 %3042  ;;  %v10204_v38 = vsel %vm4036_vm9, %v4022_v53, %v3041_v47  ;;  %v3992_v17 = vsel %vm3970_vm7, %v3959_v59, %v13883_v39  ;;  %v3991_v37 = vsel %vm3970_vm7, %v3958_v63, %v13884_v46  ;;  %v13885_v31 = vld [vmem:[#allocation156_spill] sm:$0xff]  ;;  %v13891_v62 = vld [vmem:[#allocation106_spill] sm:$0xff]  ;;  %v13893_v45 = vld [vmem:[#allocation217_spill] sm:$0xff] }
 0x3a3   : > { %v10201_v5 = vsel %vm4036_vm9, %v4023_v23, %v3043_v55  ;;  %3284 = vrot.lane.b32.xlu0 %v1413_v21, %s7642_s18  ;;  %v3895_v16 = vsel %vm13527_vm4, %v3862_v22, %v13885_v31  ;;  %v4025_v57 = vsel %vm13531_vm8, %v3992_v17, %v13887_v48  ;;  %v4024_v10 = vsel %vm13531_vm8, %v3991_v37, %v13888_v2  ;;  %v13892_v9 = vld [vmem:[#allocation216_spill] sm:$0xff]  ;;  %v13894_v59 = vld [vmem:[#allocation130_spill] sm:$0xff]  ;;  %v13895_v63 = vld [vmem:[#allocation131_spill] sm:$0xff] }
 0x3a4   : > { %3286 = vrot.lane.b32.xlu1 %v1414_v20, %s7642_s18  ;;  %v13886_v20 = vld [vmem:[#allocation157_spill] sm:$0xff]  ;;  %v3928_v23 = vsel %vm3904_vm5, %v3895_v16, %v13889_v30  ;;  %v3835_v34 = vsel %vm13528_vm2, %v10072_v56, %v13891_v62  ;;  %v3864_v52 = vsel %vm3838_vm3, %v10116_v27, %v13894_v59  ;;  %v3863_v36 = vsel %vm3838_vm3, %v10124_v8, %v13895_v63  ;;  %v13896_v22 = vld [vmem:[#allocation246_spill] sm:$0xff]  ;;  %v13897_v15 = vld [vmem:[#allocation247_spill] sm:$0xff] }
 0x3a5   : > { %v3894_v21 = vsel %vm13527_vm4, %v3861_v35, %v13886_v20  ;;  %v3045_v41 = vpop.permute.xlu0 %3044  ;;  %v3961_v61 = vsel %vm3937_vm6, %v3928_v23, %v13892_v9  ;;  %v1418_v39 = vld [vmem:[#allocation2 + $0x814] sm:$0xff]  ;;  %v1417_v17 = vld [vmem:[#allocation2 + $0x80c] sm:$0xff]  ;;  %v13904_v30 = vld [vmem:[#allocation107_spill] sm:$0xff] }
 0x3a6   : > { %v3047_v6 = vpop.permute.xlu1 %3046  ;;  %v3927_v53 = vsel %vm3904_vm5, %v3894_v21, %v13890_v11  ;;  %v10241_v47 = vsel %vm4036_vm9, %v4024_v10, %v3045_v41  ;;  %v3994_v56 = vsel %vm3970_vm7, %v3961_v61, %v13896_v22  ;;  %v13898_v46 = vld [vmem:[#allocation158_spill] sm:$0xff]  ;;  %v13900_v31 = vld [vmem:[#allocation276_spill] sm:$0xff]  ;;  %v13901_v16 = vld [vmem:[#allocation277_spill] sm:$0xff]  ;;  %v3834_v23 = vsel %vm13528_vm2, %v10076_v58, %v13904_v30 }
 0x3a7   : > { %v10238_v55 = vsel %vm4036_vm9, %v4025_v57, %v3047_v6  ;;  %v3960_v19 = vsel %vm3937_vm6, %v3927_v53, %v13893_v45  ;;  %3288 = vrot.lane.b32.xlu0 %v1415_v60, %s7642_s18  ;;  %v3897_v37 = vsel %vm13527_vm4, %v3864_v52, %v13898_v46  ;;  %v4027_v27 = vsel %vm13531_vm8, %v3994_v56, %v13900_v31  ;;  %v13902_v48 = vld [vmem:[#allocation188_spill] sm:$0xff]  ;;  %v13903_v2 = vld [vmem:[#allocation189_spill] sm:$0xff]  ;;  %v13905_v11 = vld [vmem:[#allocation218_spill] sm:$0xff] }
 0x3a8   : > { %3290 = vrot.lane.b32.xlu1 %v1416_v51, %s7642_s18  ;;  %v3993_v35 = vsel %vm3970_vm7, %v3960_v19, %v13897_v15  ;;  %v13899_v51 = vld [vmem:[#allocation159_spill] sm:$0xff]  ;;  %v3930_v57 = vsel %vm3904_vm5, %v3897_v37, %v13902_v48  ;;  %v13907_v61 = vld [vmem:[#allocation132_spill] sm:$0xff]  ;;  %v13908_v19 = vld [vmem:[#allocation133_spill] sm:$0xff] }
 0x3a9   : > { %v3896_v60 = vsel %vm13527_vm4, %v3863_v36, %v13899_v51  ;;  %v4026_v8 = vsel %vm13531_vm8, %v3993_v35, %v13901_v16  ;;  %v3049_v21 = vpop.permute.xlu0 %3048  ;;  %v3963_v53 = vsel %vm3937_vm6, %v3930_v57, %v13905_v11  ;;  %v13906_v62 = vld [vmem:[#allocation219_spill] sm:$0xff]  ;;  %v3866_v45 = vsel %vm3838_vm3, %v10172_v4, %v13907_v61  ;;  %v13909_v52 = vld [vmem:[#allocation248_spill] sm:$0xff]  ;;  %v13910_v63 = vld [vmem:[#allocation249_spill] sm:$0xff] }
 0x3aa   : > { %v3051_v20 = vpop.permute.xlu1 %3050  ;;  %v3929_v10 = vsel %vm3904_vm5, %v3896_v60, %v13903_v2  ;;  %v10278_v41 = vsel %vm4036_vm9, %v4026_v8, %v3049_v21  ;;  %v3865_v59 = vsel %vm3838_vm3, %v3832_v54, %v13908_v19  ;;  %v3996_v58 = vsel %vm3970_vm7, %v3963_v53, %v13909_v52  ;;  %v1420_v22 = vld [vmem:[#allocation2 + $0x854] sm:$0xff]  ;;  %v1419_v56 = vld [vmem:[#allocation2 + $0x84c] sm:$0xff]  ;;  %v13920_v53 = vld [vmem:[#allocation135_spill] sm:$0xff] }
 0x3ab   : > { %v10275_v6 = vsel %vm4036_vm9, %v4027_v27, %v3051_v20  ;;  %v3962_v9 = vsel %vm3937_vm6, %v3929_v10, %v13906_v62  ;;  %3292 = vrot.lane.b32.xlu0 %v1417_v17, %s7642_s18  ;;  %v13911_v15 = vld [vmem:[#allocation160_spill] sm:$0xff]  ;;  %v13913_v46 = vld [vmem:[#allocation278_spill] sm:$0xff]  ;;  %v13915_v27 = vld [vmem:[#allocation191_spill] sm:$0xff]  ;;  %v3867_v62 = vsel %vm3838_vm3, %v3834_v23, %v13920_v53 }
 0x3ac   : > { %3294 = vrot.lane.b32.xlu1 %v1418_v39, %s7642_s18  ;;  %v3995_v36 = vsel %vm3970_vm7, %v3962_v9, %v13910_v63  ;;  %v3899_v35 = vsel %vm13527_vm4, %v3866_v45, %v13911_v15  ;;  %v13912_v39 = vld [vmem:[#allocation161_spill] sm:$0xff]  ;;  %v4029_v4 = vsel %vm13531_vm8, %v3996_v58, %v13913_v46  ;;  %v13914_v60 = vld [vmem:[#allocation190_spill] sm:$0xff]  ;;  %v13916_v21 = vld [vmem:[#allocation108_spill] sm:$0xff] }
 0x3ad   : > { %v3898_v17 = vsel %vm13527_vm4, %v3865_v59, %v13912_v39  ;;  %v4028_v54 = vsel %vm13531_vm8, %v3995_v36, %v9908_v7  ;;  %v3053_v51 = vpop.permute.xlu0 %3052  ;;  %v3932_v31 = vsel %vm3904_vm5, %v3899_v35, %v13914_v60  ;;  %v3837_v48 = vsel %vm13528_vm2, %v10080_v32, %v13916_v21  ;;  %v13917_v57 = vld [vmem:[#allocation220_spill] sm:$0xff]  ;;  %v13918_v2 = vld [vmem:[#allocation221_spill] sm:$0xff]  ;;  %v13919_v30 = vld [vmem:[#allocation134_spill] sm:$0xff] }
 0x3ae   : > { %v3055_v37 = vpop.permute.xlu1 %3054  ;;  %v3931_v16 = vsel %vm3904_vm5, %v3898_v17, %v13915_v27  ;;  %v10314_v20 = vsel %vm4036_vm9, %v4028_v54, %v3053_v51  ;;  %v3965_v7 = vsel %vm3937_vm6, %v3932_v31, %v13917_v57  ;;  %v3868_v11 = vsel %vm3838_vm3, %v3835_v34, %v13919_v30  ;;  %v13921_v9 = vld [vmem:[#allocation250_spill] sm:$0xff]  ;;  %v13922_v32 = vld [vmem:[#allocation251_spill] sm:$0xff]  ;;  %v1421_v59 = vld [vmem:[#allocation2 + $0x88c] sm:$0xff] }
 0x3af   : > { %v10311_v8 = vsel %vm4036_vm9, %v4029_v4, %v3055_v37  ;;  %v3964_v10 = vsel %vm3937_vm6, %v3931_v16, %v13918_v2  ;;  %3296 = vrot.lane.b32.xlu0 %v1419_v56, %s7642_s18  ;;  %v3998_v61 = vsel %vm3970_vm7, %v3965_v7, %v13921_v9  ;;  %v1422_v19 = vld [vmem:[#allocation2 + $0x894] sm:$0xff]  ;;  %v13924_v63 = vld [vmem:[#allocation163_spill] sm:$0xff]  ;;  %v13926_v56 = vld [vmem:[#allocation280_spill] sm:$0xff] }
 0x3b0   : > { %3298 = vrot.lane.b32.xlu1 %v1420_v22, %s7642_s18  ;;  %v3997_v45 = vsel %vm3970_vm7, %v3964_v10, %v13922_v32  ;;  %v13923_v52 = vld [vmem:[#allocation162_spill] sm:$0xff]  ;;  %v3900_v36 = vsel %vm13527_vm4, %v3867_v62, %v13924_v63  ;;  %v13925_v22 = vld [vmem:[#allocation279_spill] sm:$0xff]  ;;  %v13927_v39 = vld [vmem:[#allocation192_spill] sm:$0xff] }
 0x3b1   : > { %v3901_v58 = vsel %vm13527_vm4, %v3868_v11, %v13923_v52  ;;  %v4031_v34 = vsel %vm13531_vm8, %v3998_v61, %v13925_v22  ;;  %v4030_v23 = vsel %vm13531_vm8, %v3997_v45, %v13926_v56  ;;  %v3057_v35 = vpop.permute.xlu0 %3056  ;;  %v13928_v46 = vld [vmem:[#allocation193_spill] sm:$0xff]  ;;  %v13930_v31 = vld [vmem:[#allocation222_spill] sm:$0xff]  ;;  %v13931_v16 = vld [vmem:[#allocation223_spill] sm:$0xff] }
 0x3b2   : > { %v3059_v15 = vpop.permute.xlu1 %3058  ;;  %v3934_v17 = vsel %vm3904_vm5, %v3901_v58, %v13927_v39  ;;  %v3933_v4 = vsel %vm3904_vm5, %v3900_v36, %v13928_v46  ;;  %v10349_v37 = vsel %vm4036_vm9, %v4030_v23, %v3057_v35  ;;  %v13929_v51 = vld [vmem:[#allocation109_spill] sm:$0xff]  ;;  %v13932_v57 = vld [vmem:[#allocation136_spill] sm:$0xff]  ;;  %v13938_v63 = vld [vmem:[#allocation194_spill] sm:$0xff] }
 0x3b3   : > { %v10346_v54 = vsel %vm4036_vm9, %v4031_v34, %v3059_v15  ;;  %v3836_v60 = vsel %vm13528_vm2, %v10084_v0, %v13929_v51  ;;  %v3967_v27 = vsel %vm3937_vm6, %v3934_v17, %v13930_v31  ;;  %v3966_v21 = vsel %vm3937_vm6, %v3933_v4, %v13931_v16  ;;  %3300 = vrot.lane.b32.xlu0 %v1421_v59, %s7642_s18  ;;  %v13933_v2 = vld [vmem:[#allocation137_spill] sm:$0xff]  ;;  %v13934_v30 = vld [vmem:[#allocation252_spill] sm:$0xff]  ;;  %v13939_v22 = vld [vmem:[#allocation195_spill] sm:$0xff] }
 0x3b4   : > { %3302 = vrot.lane.b32.xlu1 %v1422_v19, %s7642_s18  ;;  %v3870_v7 = vsel %vm3838_vm3, %v3837_v48, %v13932_v57  ;;  %v3869_v10 = vsel %vm3838_vm3, %v3836_v60, %v13933_v2  ;;  %v4000_v11 = vsel %vm3970_vm7, %v3967_v27, %v13934_v30  ;;  %v13935_v0 = vld [vmem:[#allocation253_spill] sm:$0xff]  ;;  %v13936_v61 = vld [vmem:[#allocation164_spill] sm:$0xff]  ;;  %v13942_v39 = vld [vmem:[#allocation254_spill] sm:$0xff] }
 0x3b5   : > { %v3999_v53 = vsel %vm3970_vm7, %v3966_v21, %v13935_v0  ;;  %v1424_v62 = vld [vmem:[#allocation2 + $0x8d4] sm:$0xff]  ;;  %v1423_v9 = vld [vmem:[#allocation2 + $0x8cc] sm:$0xff]  ;;  %v3903_v32 = vsel %vm13527_vm4, %v3870_v7, %v13936_v61  ;;  %v4033_v48 = vsel %vm13531_vm8, %v4000_v11, %v9918_v14  ;;  %v3061_v58 = vpop.permute.xlu0 %3060  ;;  %v13943_v46 = vld [vmem:[#allocation255_spill] sm:$0xff] }
 0x3b6   : > { %v13937_v45 = vld [vmem:[#allocation165_spill] sm:$0xff]  ;;  %v4032_v59 = vsel %vm13531_vm8, %v3999_v53, %v9920_v33  ;;  %v3063_v52 = vpop.permute.xlu1 %3062  ;;  %v3936_v36 = vsel %vm3904_vm5, %v3903_v32, %v13938_v63  ;;  %v13940_v15 = vld [vmem:[#allocation224_spill] sm:$0xff]  ;;  %v13944_v31 = vld [vmem:[#allocation283_spill] sm:$0xff] }
 0x3b7   : > { %v3902_v19 = vsel %vm13527_vm4, %v3869_v10, %v13937_v45  ;;  %v10381_v56 = vsel %vm4036_vm9, %v4033_v48, %v3063_v52  ;;  %v10384_v23 = vsel %vm4036_vm9, %v4032_v59, %v3061_v58  ;;  %v3969_v14 = vsel %vm3937_vm6, %v3936_v36, %v13940_v15  ;;  %v13941_v35 = vld [vmem:[#allocation225_spill] sm:$0xff]  ;;  %3304 = vrot.lane.b32.xlu0 %v1423_v9, %s7642_s18  ;;  %v13945_v16 = vld [vmem:[#allocation284_spill] sm:$0xff]  ;;  %v13955_v36 = vld [vmem:[#allocation282_spill] sm:$0xff] }
 0x3b8   : > { %v3935_v34 = vsel %vm3904_vm5, %v3902_v19, %v13939_v22  ;;  %3306 = vrot.lane.b32.xlu1 %v1424_v62, %s7642_s18  ;;  %v4002_v17 = vsel %vm3970_vm7, %v3969_v14, %v13942_v39  ;;  %v10396_v51 = vld [vmem:[#allocation2 + $0x914] sm:$0xff]  ;;  %v10398_v60 = vld [vmem:[#allocation2 + $0x90c] sm:$0xff] }
 0x3b9   : > { %v3968_v33 = vsel %vm3937_vm6, %v3935_v34, %v13941_v35  ;;  %v4035_v27 = vsel %vm13531_vm8, %v4002_v17, %v13944_v31  ;;  %v3065_v7 = vpop.permute.xlu0 %3064  ;;  %v10414_v30 = vld [vmem:[#allocation2 + $0x954] sm:$0xff]  ;;  %v10416_v11 = vld [vmem:[#allocation2 + $0x94c] sm:$0xff]  ;;  %v1441_v31 = vld [vmem:[#allocation2 + $0x724] sm:$0xff] }
 0x3ba   : > { %v4001_v4 = vsel %vm3970_vm7, %v3968_v33, %v13943_v46  ;;  %v3067_v57 = vpop.permute.xlu1 %3066  ;;  %v10426_v62 = vld [vmem:[#allocation2 + $0x994] sm:$0xff]  ;;  %v10428_v9 = vld [vmem:[#allocation2 + $0x98c] sm:$0xff]  ;;  %v13964_v46 = vld [vmem:[#allocation291_spill] sm:$0xff] }
 0x3bb   : > { %v4034_v21 = vsel %vm13531_vm8, %v4001_v4, %v13945_v16  ;;  %v10405_v2 = vsel %vm4036_vm9, %v4035_v27, %v3067_v57  ;;  %3308 = vrot.lane.b32.xlu0 %v10398_v60, %s7642_s18  ;;  %v10438_v45 = vld [vmem:[#allocation2 + $0x9d4] sm:$0xff]  ;;  %v10440_v19 = vld [vmem:[#allocation2 + $0x9cc] sm:$0xff] }
 0x3bc   : > { %v10408_v10 = vsel %vm4036_vm9, %v4034_v21, %v3065_v7  ;;  %3310 = vrot.lane.b32.xlu1 %v10396_v51, %s7642_s18  ;;  %v13954_v63 = vld [vmem:[#allocation281_spill] sm:$0xff]  ;;  %v13959_v14 = vld [vmem:[#allocation286_spill] sm:$0xff] }
 0x3bd   : > { %v10420_v53 = vpop.permute.xlu0 %3132  ;;  %v13958_v15 = vld [vmem:[#allocation285_spill] sm:$0xff] }
 0x3be   : > { %v10418_v0 = vpop.permute.xlu1 %3134  ;;  %13947 = vst [vmem:[#allocation54_spill] sm:$0xff] %v10420_v53  ;;  %v1442_v4 = vld [vmem:[#allocation2 + $0x72c] sm:$0xff] }
 0x3bf   : > { %13946 = vst [vmem:[#allocation53_spill] sm:$0xff] %v10418_v0  ;;  %3312 = vrot.lane.b32.xlu0 %v10416_v11, %s7642_s18 }
 0x3c0   : > { %3314 = vrot.lane.b32.xlu1 %v10414_v30, %s7642_s18 }
 0x3c1   : > { %v10432_v32 = vpop.permute.xlu0 %3136 }
 0x3c2   : > { %v10430_v61 = vpop.permute.xlu1 %3138  ;;  %13949 = vst [vmem:[#allocation71_spill] sm:$0xff] %v10432_v32 }
 0x3c3   : > { %13948 = vst [vmem:[#allocation32_spill] sm:$0xff] %v10430_v61  ;;  %3316 = vrot.lane.b32.xlu0 %v10428_v9, %s7642_s18 }
 0x3c4   : > { %3318 = vrot.lane.b32.xlu1 %v10426_v62, %s7642_s18 }
 0x3c5   : > { %v10444_v59 = vpop.permute.xlu0 %3140 }
 0x3c6   : > { %v10442_v48 = vpop.permute.xlu1 %3142  ;;  %13951 = vst [vmem:[#allocation73_spill] sm:$0xff] %v10444_v59 }
 0x3c7   : > { %13950 = vst [vmem:[#allocation72_spill] sm:$0xff] %v10442_v48  ;;  %3320 = vrot.lane.b32.xlu0 %v10440_v19, %s7642_s18 }
 0x3c8   : > { %3322 = vrot.lane.b32.xlu1 %v10438_v45, %s7642_s18 }
 0x3c9   : > { %v10452_v58 = vpop.permute.xlu0 %3144 }
 0x3ca   : > { %v10450_v52 = vpop.permute.xlu1 %3146  ;;  %13953 = vst [vmem:[#allocation75_spill] sm:$0xff] %v10452_v58 }
 0x3cb   : > { %13952 = vst [vmem:[#allocation74_spill] sm:$0xff] %v10450_v52  ;;  %3388 = vrot.lane.b32.xlu0 %v13955_v36, %s7643_s19  ;;  %v1445_v36 = vld [vmem:[#allocation2 + $0x7a4] sm:$0xff] }
 0x3cc   : > { %3390 = vrot.lane.b32.xlu1 %v13954_v63, %s7643_s19  ;;  %v1446_v63 = vld [vmem:[#allocation2 + $0x7ac] sm:$0xff] }
 0x3cd   : > { %v10460_v34 = vpop.permute.xlu0 %3148 }
 0x3ce   : > { %v10458_v22 = vpop.permute.xlu1 %3150  ;;  %13957 = vst [vmem:[#allocation77_spill] sm:$0xff] %v10460_v34 }
 0x3cf   : > { %13956 = vst [vmem:[#allocation76_spill] sm:$0xff] %v10458_v22  ;;  %3392 = vrot.lane.b32.xlu0 %v13959_v14, %s7643_s19 }
 0x3d0   : > { %3394 = vrot.lane.b32.xlu1 %v13958_v15, %s7643_s19 }
 0x3d1   : > { %v10468_v33 = vpop.permute.xlu0 %3152 }
 0x3d2   : > { %v10466_v35 = vpop.permute.xlu1 %3154  ;;  %13961 = vst [vmem:[#allocation95_spill] sm:$0xff] %v10468_v33 }
 0x3d3   : > { %13960 = vst [vmem:[#allocation78_spill] sm:$0xff] %v10466_v35  ;;  %3396 = vrot.lane.b32.xlu0 %v9950_v1, %s7643_s19  ;;  %v1443_v1 = vld [vmem:[#allocation2 + $0x764] sm:$0xff] }
 0x3d4   : > { %3398 = vrot.lane.b32.xlu1 %v9948_v12, %s7643_s19  ;;  %v1444_v12 = vld [vmem:[#allocation2 + $0x76c] sm:$0xff] }
 0x3d5   : > { %v10476_v17 = vpop.permute.xlu0 %3156 }
 0x3d6   : > { %v10474_v39 = vpop.permute.xlu1 %3158  ;;  %13963 = vst [vmem:[#allocation97_spill] sm:$0xff] %v10476_v17 }
 0x3d7   : > { %13962 = vst [vmem:[#allocation96_spill] sm:$0xff] %v10474_v39  ;;  %3400 = vrot.lane.b32.xlu0 %v13964_v46, %s7643_s19 }
 0x3d8   : > { %3402 = vrot.lane.b32.xlu1 %v9960_v18, %s7643_s19 }
 0x3d9   : > { %v10484_v16 = vpop.permute.xlu0 %3160 }
 0x3da   : > { %v10482_v27 = vpop.permute.xlu1 %3162  ;;  %13966 = vst [vmem:[#allocation99_spill] sm:$0xff] %v10484_v16 }
 0x3db   : > { %13965 = vst [vmem:[#allocation98_spill] sm:$0xff] %v10482_v27  ;;  %3404 = vrot.lane.b32.xlu0 %v1441_v31, %s7643_s19 }
 0x3dc   : > { %3406 = vrot.lane.b32.xlu1 %v1442_v4, %s7643_s19  ;;  %v1447_v4 = vld [vmem:[#allocation2 + $0x7e4] sm:$0xff] }
 0x3dd   : > { %v3165_v57 = vpop.permute.xlu0 %3164 }
 0x3de   : > { %v3167_v21 = vpop.permute.xlu1 %3166  ;;  %v10494_v7 = vsel %vm4069_vm10, %v10168_v13, %v3165_v57  ;;  %v1448_v13 = vld [vmem:[#allocation2 + $0x7ec] sm:$0xff] }
 0x3df   : > { %v10490_v18 = vsel %vm4069_vm10, %v10165_v49, %v3167_v21  ;;  %3408 = vrot.lane.b32.xlu0 %v1443_v1, %s7643_s19  ;;  %v1449_v21 = vld [vmem:[#allocation2 + $0x824] sm:$0xff] }
 0x3e0   : > { %3410 = vrot.lane.b32.xlu1 %v1444_v12, %s7643_s19 }
 0x3e1   : > { %v3169_v14 = vpop.permute.xlu0 %3168 }
 0x3e2   : > { %v3171_v15 = vpop.permute.xlu1 %3170  ;;  %v10504_v49 = vsel %vm4069_vm10, %v10204_v38, %v3169_v14  ;;  %v1450_v38 = vld [vmem:[#allocation2 + $0x82c] sm:$0xff] }
 0x3e3   : > { %v10500_v46 = vsel %vm4069_vm10, %v10201_v5, %v3171_v15  ;;  %3412 = vrot.lane.b32.xlu0 %v1445_v36, %s7643_s19  ;;  %v1451_v15 = vld [vmem:[#allocation2 + $0x864] sm:$0xff] }
 0x3e4   : > { %3414 = vrot.lane.b32.xlu1 %v1446_v63, %s7643_s19 }
 0x3e5   : > { %v3173_v12 = vpop.permute.xlu0 %3172 }
 0x3e6   : > { %v3175_v31 = vpop.permute.xlu1 %3174  ;;  %v10514_v5 = vsel %vm4069_vm10, %v10241_v47, %v3173_v12  ;;  %v1452_v47 = vld [vmem:[#allocation2 + $0x86c] sm:$0xff] }
 0x3e7   : > { %v10510_v1 = vsel %vm4069_vm10, %v10238_v55, %v3175_v31  ;;  %3416 = vrot.lane.b32.xlu0 %v1447_v4, %s7643_s19  ;;  %v1453_v31 = vld [vmem:[#allocation2 + $0x8a4] sm:$0xff] }
 0x3e8   : > { %3418 = vrot.lane.b32.xlu1 %v1448_v13, %s7643_s19 }
 0x3e9   : > { %v3177_v63 = vpop.permute.xlu0 %3176 }
 0x3ea   : > { %v3179_v57 = vpop.permute.xlu1 %3178  ;;  %v10524_v55 = vsel %vm4069_vm10, %v10278_v41, %v3177_v63  ;;  %v1454_v41 = vld [vmem:[#allocation2 + $0x8ac] sm:$0xff] }
 0x3eb   : > { %v10520_v36 = vsel %vm4069_vm10, %v10275_v6, %v3179_v57  ;;  %3420 = vrot.lane.b32.xlu0 %v1449_v21, %s7643_s19  ;;  %v1455_v57 = vld [vmem:[#allocation2 + $0x8e4] sm:$0xff] }
 0x3ec   : > { %3422 = vrot.lane.b32.xlu1 %v1450_v38, %s7643_s19 }
 0x3ed   : > { %v3181_v13 = vpop.permute.xlu0 %3180 }
 0x3ee   : > { %v3183_v14 = vpop.permute.xlu1 %3182  ;;  %v10534_v6 = vsel %vm4069_vm10, %v10314_v20, %v3181_v13  ;;  %v1456_v20 = vld [vmem:[#allocation2 + $0x8ec] sm:$0xff] }
 0x3ef   : > { %v10530_v4 = vsel %vm4069_vm10, %v10311_v8, %v3183_v14  ;;  %3424 = vrot.lane.b32.xlu0 %v1451_v15, %s7643_s19  ;;  %v1457_v14 = vld [vmem:[#allocation2 + $0x924] sm:$0xff] }
 0x3f0   : > { %3426 = vrot.lane.b32.xlu1 %v1452_v47, %s7643_s19 }
 0x3f1   : > { %v3185_v38 = vpop.permute.xlu0 %3184 }
 0x3f2   : > { %v3187_v12 = vpop.permute.xlu1 %3186  ;;  %v10544_v8 = vsel %vm4069_vm10, %v10349_v37, %v3185_v38  ;;  %v1458_v37 = vld [vmem:[#allocation2 + $0x92c] sm:$0xff] }
 0x3f3   : > { %v10540_v21 = vsel %vm4069_vm10, %v10346_v54, %v3187_v12  ;;  %3428 = vrot.lane.b32.xlu0 %v1453_v31, %s7643_s19  ;;  %v1459_v12 = vld [vmem:[#allocation2 + $0x964] sm:$0xff] }
 0x3f4   : > { %3430 = vrot.lane.b32.xlu1 %v1454_v41, %s7643_s19 }
 0x3f5   : > { %v3189_v47 = vpop.permute.xlu0 %3188 }
 0x3f6   : > { %v3191_v63 = vpop.permute.xlu1 %3190  ;;  %v10554_v54 = vsel %vm4069_vm10, %v10384_v23, %v3189_v47  ;;  %v1460_v23 = vld [vmem:[#allocation2 + $0x96c] sm:$0xff] }
 0x3f7   : > { %v10550_v15 = vsel %vm4069_vm10, %v10381_v56, %v3191_v63  ;;  %3432 = vrot.lane.b32.xlu0 %v1455_v57, %s7643_s19  ;;  %v1461_v57 = vld [vmem:[#allocation2 + $0x9a4] sm:$0xff]  ;;  %v1464_v47 = vld [vmem:[#allocation2 + $0x9ec] sm:$0xff] }
 0x3f8   : > { %3434 = vrot.lane.b32.xlu1 %v1456_v20, %s7643_s19 }
 0x3f9   : > { %v3193_v41 = vpop.permute.xlu0 %3192 }
 0x3fa   : > { %v3195_v13 = vpop.permute.xlu1 %3194  ;;  %v10564_v56 = vsel %vm4069_vm10, %v10408_v10, %v3193_v41 }
 0x3fb   : > { %v10560_v31 = vsel %vm4069_vm10, %v10405_v2, %v3195_v13  ;;  %3436 = vrot.lane.b32.xlu0 %v1457_v14, %s7643_s19  ;;  %v1462_v2 = vld [vmem:[#allocation2 + $0x9ac] sm:$0xff] }
 0x3fc   : > { %3438 = vrot.lane.b32.xlu1 %v1458_v37, %s7643_s19  ;;  %v1463_v37 = vld [vmem:[#allocation2 + $0x9e4] sm:$0xff] }
 0x3fd   : > { %v10570_v20 = vpop.permute.xlu0 %3260 }
 0x3fe   : > { %v10568_v38 = vpop.permute.xlu1 %3262  ;;  %13968 = vst [vmem:[#allocation101_spill] sm:$0xff] %v10570_v20 }
 0x3ff   : > { %13967 = vst [vmem:[#allocation100_spill] sm:$0xff] %v10568_v38  ;;  %3440 = vrot.lane.b32.xlu0 %v1459_v12, %s7643_s19 }
 0x400   : > { %3442 = vrot.lane.b32.xlu1 %v1460_v23, %s7643_s19 }
 0x401   : > { %v10576_v10 = vpop.permute.xlu0 %3264 }
 0x402   : > { %v10574_v63 = vpop.permute.xlu1 %3266  ;;  %13970 = vst [vmem:[#allocation103_spill] sm:$0xff] %v10576_v10 }
 0x403   : > { %13969 = vst [vmem:[#allocation102_spill] sm:$0xff] %v10574_v63  ;;  %3444 = vrot.lane.b32.xlu0 %v1461_v57, %s7643_s19 }
 0x404   : > { %3446 = vrot.lane.b32.xlu1 %v1462_v2, %s7643_s19 }
 0x405   : > { %v10582_v13 = vpop.permute.xlu0 %3268 }
 0x406   : > { %v10580_v14 = vpop.permute.xlu1 %3270  ;;  %13972 = vst [vmem:[#allocation183_spill] sm:$0xff] %v10582_v13 }
 0x407   : > { %13971 = vst [vmem:[#allocation182_spill] sm:$0xff] %v10580_v14  ;;  %3448 = vrot.lane.b32.xlu0 %v1463_v37, %s7643_s19 }
 0x408   : > { %3450 = vrot.lane.b32.xlu1 %v1464_v47, %s7643_s19 }
 0x409   : > { %v10588_v23 = vpop.permute.xlu0 %3272 }
 0x40a   : > { %v10586_v41 = vpop.permute.xlu1 %3274  ;;  %13974 = vst [vmem:[#allocation212_spill] sm:$0xff] %v10588_v23 }
 0x40b   : > { %13973 = vst [vmem:[#allocation104_spill] sm:$0xff] %v10586_v41  ;;  %3516 = vrot.lane.b32.xlu0 %v10398_v60, %s7644_s28 }
 0x40c   : > { %3518 = vrot.lane.b32.xlu1 %v10396_v51, %s7644_s28 }
 0x40d   : > { %v10596_v2 = vpop.permute.xlu0 %3276 }
 0x40e   : > { %v10594_v12 = vpop.permute.xlu1 %3278  ;;  %13976 = vst [vmem:[#allocation126_spill] sm:$0xff] %v10596_v2 }
 0x40f   : > { %13975 = vst [vmem:[#allocation213_spill] sm:$0xff] %v10594_v12  ;;  %3520 = vrot.lane.b32.xlu0 %v10416_v11, %s7644_s28  ;;  %v1474_v11 = vld [vmem:[#allocation2 + $0xa0c] sm:$0xff] }
 0x410   : > { %3522 = vrot.lane.b32.xlu1 %v10414_v30, %s7644_s28  ;;  %v1475_v30 = vld [vmem:[#allocation2 + $0xa14] sm:$0xff] }
 0x411   : > { %v10604_v47 = vpop.permute.xlu0 %3280 }
 0x412   : > { %v10602_v57 = vpop.permute.xlu1 %3282  ;;  %13978 = vst [vmem:[#allocation242_spill] sm:$0xff] %v10604_v47 }
 0x413   : > { %13977 = vst [vmem:[#allocation127_spill] sm:$0xff] %v10602_v57  ;;  %3524 = vrot.lane.b32.xlu0 %v10428_v9, %s7644_s28  ;;  %v1476_v9 = vld [vmem:[#allocation2 + $0xa4c] sm:$0xff] }
 0x414   : > { %3526 = vrot.lane.b32.xlu1 %v10426_v62, %s7644_s28  ;;  %v1477_v62 = vld [vmem:[#allocation2 + $0xa54] sm:$0xff] }
 0x415   : > { %v10612_v60 = vpop.permute.xlu0 %3284 }
 0x416   : > { %v10610_v51 = vpop.permute.xlu1 %3286  ;;  %13980 = vst [vmem:[#allocation154_spill] sm:$0xff] %v10612_v60 }
 0x417   : > { %13979 = vst [vmem:[#allocation243_spill] sm:$0xff] %v10610_v51  ;;  %3528 = vrot.lane.b32.xlu0 %v10440_v19, %s7644_s28 }
 0x418   : > { %3530 = vrot.lane.b32.xlu1 %v10438_v45, %s7644_s28 }
 0x419   : > { %v10620_v27 = vpop.permute.xlu0 %3288 }
 0x41a   : > { %v10618_v37 = vpop.permute.xlu1 %3290  ;;  %13982 = vst [vmem:[#allocation272_spill] sm:$0xff] %v10620_v27 }
 0x41b   : > { %13981 = vst [vmem:[#allocation155_spill] sm:$0xff] %v10618_v37  ;;  %3532 = vrot.lane.b32.xlu0 %v1474_v11, %s7644_s28  ;;  %v1478_v37 = vld [vmem:[#allocation2 + $0xa8c] sm:$0xff] }
 0x41c   : > { %3534 = vrot.lane.b32.xlu1 %v1475_v30, %s7644_s28  ;;  %v1479_v30 = vld [vmem:[#allocation2 + $0xa94] sm:$0xff] }
 0x41d   : > { %v3293_v16 = vpop.permute.xlu0 %3292 }
 0x41e   : > { %v3295_v44 = vpop.permute.xlu1 %3294  ;;  %v10630_v19 = vsel %vm4102_vm11, %v10494_v7, %v3293_v16  ;;  %v1481_v16 = vld [vmem:[#allocation2 + $0xad4] sm:$0xff] }
 0x41f   : > { %v10626_v45 = vsel %vm4102_vm11, %v10490_v18, %v3295_v44  ;;  %3536 = vrot.lane.b32.xlu0 %v1476_v9, %s7644_s28  ;;  %v1480_v18 = vld [vmem:[#allocation2 + $0xacc] sm:$0xff] }
 0x420   : > { %3538 = vrot.lane.b32.xlu1 %v1477_v62, %s7644_s28 }
 0x421   : > { %v3297_v27 = vpop.permute.xlu0 %3296 }
 0x422   : > { %v3299_v11 = vpop.permute.xlu1 %3298  ;;  %v10640_v44 = vsel %vm4102_vm11, %v10504_v49, %v3297_v27  ;;  %v1483_v27 = vld [vmem:[#allocation2 + $0xb14] sm:$0xff]  ;;  %v1482_v49 = vld [vmem:[#allocation2 + $0xb0c] sm:$0xff] }
 0x423   : > { %v10636_v29 = vsel %vm4102_vm11, %v10500_v46, %v3299_v11  ;;  %3540 = vrot.lane.b32.xlu0 %v1478_v37, %s7644_s28 }
 0x424   : > { %3542 = vrot.lane.b32.xlu1 %v1479_v30, %s7644_s28 }
 0x425   : > { %v3301_v62 = vpop.permute.xlu0 %3300 }
 0x426   : > { %v3303_v7 = vpop.permute.xlu1 %3302  ;;  %v10650_v46 = vsel %vm4102_vm11, %v10514_v5, %v3301_v62  ;;  %v1485_v5 = vld [vmem:[#allocation2 + $0xb54] sm:$0xff] }
 0x427   : > { %v10646_v9 = vsel %vm4102_vm11, %v10510_v1, %v3303_v7  ;;  %3544 = vrot.lane.b32.xlu0 %v1480_v18, %s7644_s28 }
 0x428   : > { %3546 = vrot.lane.b32.xlu1 %v1481_v16, %s7644_s28  ;;  %v1484_v16 = vld [vmem:[#allocation2 + $0xb4c] sm:$0xff] }
 0x429   : > { %v3305_v37 = vpop.permute.xlu0 %3304 }
 0x42a   : > { %v3307_v30 = vpop.permute.xlu1 %3306  ;;  %v10660_v1 = vsel %vm4102_vm11, %v10524_v55, %v3305_v37  ;;  %v1487_v55 = vld [vmem:[#allocation2 + $0xb94] sm:$0xff] }
 0x42b   : > { %v10656_v11 = vsel %vm4102_vm11, %v10520_v36, %v3307_v30  ;;  %3548 = vrot.lane.b32.xlu0 %v1482_v49, %s7644_s28 }
 0x42c   : > { %3550 = vrot.lane.b32.xlu1 %v1483_v27, %s7644_s28  ;;  %v1486_v27 = vld [vmem:[#allocation2 + $0xb8c] sm:$0xff] }
 0x42d   : > { %v3309_v18 = vpop.permute.xlu0 %3308 }
 0x42e   : > { %v3311_v7 = vpop.permute.xlu1 %3310  ;;  %v10670_v36 = vsel %vm4102_vm11, %v10534_v6, %v3309_v18  ;;  %v1489_v6 = vld [vmem:[#allocation2 + $0xbd4] sm:$0xff] }
 0x42f   : > { %v10666_v62 = vsel %vm4102_vm11, %v10530_v4, %v3311_v7  ;;  %3552 = vrot.lane.b32.xlu0 %v1484_v16, %s7644_s28 }
 0x430   : > { %3554 = vrot.lane.b32.xlu1 %v1485_v5, %s7644_s28  ;;  %v1488_v5 = vld [vmem:[#allocation2 + $0xbcc] sm:$0xff] }
 0x431   : > { %v3313_v49 = vpop.permute.xlu0 %3312 }
 0x432   : > { %v3315_v30 = vpop.permute.xlu1 %3314  ;;  %v10680_v4 = vsel %vm4102_vm11, %v10544_v8, %v3313_v49  ;;  %v1563_v8 = vld [vmem:[#allocation2 + $0x186] sm:$0xff] }
 0x433   : > { %v10676_v37 = vsel %vm4102_vm11, %v10540_v21, %v3315_v30  ;;  %3556 = vrot.lane.b32.xlu0 %v1486_v27, %s7644_s28 }
 0x434   : > { %3558 = vrot.lane.b32.xlu1 %v1487_v55, %s7644_s28  ;;  %v1490_v55 = vld [vmem:[#allocation2 + $0xc0c] sm:$0xff] }
 0x435   : > { %v3317_v16 = vpop.permute.xlu0 %3316 }
 0x436   : > { %v3319_v7 = vpop.permute.xlu1 %3318  ;;  %v10690_v21 = vsel %vm4102_vm11, %v10554_v54, %v3317_v16  ;;  %v1595_v54 = vld [vmem:[#allocation2 + $0x198] sm:$0xff]  ;;  %v1596_v16 = vld [vmem:[#allocation2 + $0x1a0] sm:$0xff] }
 0x437   : > { %v10686_v18 = vsel %vm4102_vm11, %v10550_v15, %v3319_v7  ;;  %3560 = vrot.lane.b32.xlu0 %v1488_v5, %s7644_s28 }
 0x438   : > { %3562 = vrot.lane.b32.xlu1 %v1489_v6, %s7644_s28  ;;  %v1564_v6 = vld [vmem:[#allocation2 + $0x18e] sm:$0xff] }
 0x439   : > { %v3321_v27 = vpop.permute.xlu0 %3320 }
 0x43a   : > { %v3323_v30 = vpop.permute.xlu1 %3322  ;;  %v10700_v15 = vsel %vm4102_vm11, %v10564_v56, %v3321_v27 }
 0x43b   : > { %v10696_v49 = vsel %vm4102_vm11, %v10560_v31, %v3323_v30  ;;  %3564 = vrot.lane.b32.xlu0 %v1490_v55, %s7644_s28  ;;  %v1627_v31 = vld [vmem:[#allocation2 + $0x1aa] sm:$0xff]  ;;  %v1628_v55 = vld [vmem:[#allocation2 + $0x1b2] sm:$0xff] }
 0x43c   : > { %4266 = vrot.lane.b32.xlu1 %v1563_v8, %s7631_s20  ;;  %v1659_v8 = vld [vmem:[#allocation2 + $0x606] sm:$0xff] }
 0x43d   : > { %v10706_v5 = vpop.permute.xlu0 %3388 }
 0x43e   : > { %v10704_v7 = vpop.permute.xlu1 %3390  ;;  %13984 = vst [vmem:[#allocation184_spill] sm:$0xff] %v10706_v5 }
 0x43f   : > { %13983 = vst [vmem:[#allocation273_spill] sm:$0xff] %v10704_v7  ;;  %4268 = vrot.lane.b32.xlu0 %v1564_v6, %s7631_s20  ;;  %v1565_v6 = vld [vmem:[#allocation2 + $0x1c6] sm:$0xff] }
 0x440   : > { %4394 = vrot.lane.b32.xlu1 %v1595_v54, %s7632_s21  ;;  %v1660_v54 = vld [vmem:[#allocation2 + $0x60e] sm:$0xff] }
 0x441   : > { %v10712_v56 = vpop.permute.xlu0 %3392 }
 0x442   : > { %v10710_v30 = vpop.permute.xlu1 %3394  ;;  %13986 = vst [vmem:[#allocation105_spill] sm:$0xff] %v10712_v56 }
 0x443   : > { %13985 = vst [vmem:[#allocation185_spill] sm:$0xff] %v10710_v30  ;;  %4396 = vrot.lane.b32.xlu0 %v1596_v16, %s7632_s21  ;;  %v1691_v16 = vld [vmem:[#allocation2 + $0x62a] sm:$0xff] }
 0x444   : > { %4522 = vrot.lane.b32.xlu1 %v1627_v31, %s7633_s22  ;;  %v1566_v31 = vld [vmem:[#allocation2 + $0x1ce] sm:$0xff] }
 0x445   : > { %v10718_v51 = vpop.permute.xlu0 %3396 }
 0x446   : > { %v10716_v27 = vpop.permute.xlu1 %3398  ;;  %13988 = vst [vmem:[#allocation215_spill] sm:$0xff] %v10718_v51 }
 0x447   : > { %13987 = vst [vmem:[#allocation214_spill] sm:$0xff] %v10716_v27  ;;  %4524 = vrot.lane.b32.xlu0 %v1628_v55, %s7633_s22  ;;  %v1597_v55 = vld [vmem:[#allocation2 + $0x1d8] sm:$0xff] }
 0x448   : > { %4650 = vrot.lane.b32.xlu1 %v1659_v8, %s7634_s23  ;;  %v1692_v8 = vld [vmem:[#allocation2 + $0x632] sm:$0xff] }
 0x449   : > { %v10724_v50 = vpop.permute.xlu0 %3400 }
 0x44a   : > { %v10722_v39 = vpop.permute.xlu1 %3402  ;;  %13990 = vst [vmem:[#allocation129_spill] sm:$0xff] %v10724_v50 }
 0x44b   : > { %13989 = vst [vmem:[#allocation128_spill] sm:$0xff] %v10722_v39  ;;  %4270 = vrot.lane.b32.xlu0 %v1565_v6, %s7631_s20  ;;  %v1724_v6 = vld [vmem:[#allocation2 + $0xa86] sm:$0xff] }
 0x44c   : > { %4652 = vrot.lane.b32.xlu1 %v1660_v54, %s7634_s23  ;;  %v1598_v54 = vld [vmem:[#allocation2 + $0x1e0] sm:$0xff] }
 0x44d   : > { %v10730_v17 = vpop.permute.xlu0 %3404 }
 0x44e   : > { %v10728_v60 = vpop.permute.xlu1 %3406  ;;  %13992 = vst [vmem:[#allocation245_spill] sm:$0xff] %v10730_v17 }
 0x44f   : > { %13991 = vst [vmem:[#allocation244_spill] sm:$0xff] %v10728_v60  ;;  %4778 = vrot.lane.b32.xlu0 %v1691_v16, %s7635_s24  ;;  %v1629_v16 = vld [vmem:[#allocation2 + $0x1ea] sm:$0xff] }
 0x450   : > { %4272 = vrot.lane.b32.xlu1 %v1566_v31, %s7631_s20  ;;  %v1725_v31 = vld [vmem:[#allocation2 + $0xa8e] sm:$0xff] }
 0x451   : > { %v10736_v57 = vpop.permute.xlu0 %3408 }
 0x452   : > { %v10734_v42 = vpop.permute.xlu1 %3410  ;;  %13994 = vst [vmem:[#allocation157_spill] sm:$0xff] %v10736_v57 }
 0x453   : > { %13993 = vst [vmem:[#allocation156_spill] sm:$0xff] %v10734_v42  ;;  %4398 = vrot.lane.b32.xlu0 %v1597_v55, %s7632_s21  ;;  %v1756_v55 = vld [vmem:[#allocation2 + $0xa98] sm:$0xff] }
 0x454   : > { %4780 = vrot.lane.b32.xlu1 %v1692_v8, %s7635_s24  ;;  %v1630_v8 = vld [vmem:[#allocation2 + $0x1f2] sm:$0xff] }
 0x455   : > { %v10742_v24 = vpop.permute.xlu0 %3412 }
 0x456   : > { %v10740_v35 = vpop.permute.xlu1 %3414  ;;  %13996 = vst [vmem:[#allocation275_spill] sm:$0xff] %v10742_v24 }
 0x457   : > { %13995 = vst [vmem:[#allocation274_spill] sm:$0xff] %v10740_v35  ;;  %4906 = vrot.lane.b32.xlu0 %v1724_v6, %s7636_s25 }
 0x458   : > { %4400 = vrot.lane.b32.xlu1 %v1598_v54, %s7632_s21 }
 0x459   : > { %v10748_v42 = vpop.permute.xlu0 %3416 }
 0x45a   : > { %v10746_v47 = vpop.permute.xlu1 %3418  ;;  %13998 = vst [vmem:[#allocation187_spill] sm:$0xff] %v10748_v42 }
 0x45b   : > { %13997 = vst [vmem:[#allocation186_spill] sm:$0xff] %v10746_v47  ;;  %4526 = vrot.lane.b32.xlu0 %v1629_v16, %s7633_s22  ;;  %v1661_v47 = vld [vmem:[#allocation2 + $0x646] sm:$0xff] }
 0x45c   : > { %4908 = vrot.lane.b32.xlu1 %v1725_v31, %s7636_s25  ;;  %v1757_v31 = vld [vmem:[#allocation2 + $0xaa0] sm:$0xff] }
 0x45d   : > { %v3421_v57 = vpop.permute.xlu0 %3420 }
 0x45e   : > { %v3423_v35 = vpop.permute.xlu1 %3422  ;;  %v10758_v6 = vsel %vm4135_vm12, %v10630_v19, %v3421_v57  ;;  %v1567_v57 = vld [vmem:[#allocation2 + $0x206] sm:$0xff] }
 0x45f   : > { %v10754_v54 = vsel %vm4135_vm12, %v10626_v45, %v3423_v35  ;;  %14000 = vst [vmem:[#allocation216_spill] sm:$0xff] %v10758_v6  ;;  %5034 = vrot.lane.b32.xlu0 %v1756_v55, %s7637_s26  ;;  %v1788_v45 = vld [vmem:[#allocation2 + $0xaaa] sm:$0xff] }
 0x460   : > { %13999 = vst [vmem:[#allocation106_spill] sm:$0xff] %v10754_v54  ;;  %4528 = vrot.lane.b32.xlu1 %v1630_v8, %s7633_s22 }
 0x461   : > { %v3425_v42 = vpop.permute.xlu0 %3424 }
 0x462   : > { %v3427_v16 = vpop.permute.xlu1 %3426  ;;  %v10768_v35 = vsel %vm4135_vm12, %v10640_v44, %v3425_v42  ;;  %v1693_v42 = vld [vmem:[#allocation2 + $0x66a] sm:$0xff] }
 0x463   : > { %v10764_v24 = vsel %vm4135_vm12, %v10636_v29, %v3427_v16  ;;  %14002 = vst [vmem:[#allocation130_spill] sm:$0xff] %v10768_v35  ;;  %4654 = vrot.lane.b32.xlu0 %v1661_v47, %s7634_s23  ;;  %v1662_v44 = vld [vmem:[#allocation2 + $0x64e] sm:$0xff] }
 0x464   : > { %14001 = vst [vmem:[#allocation217_spill] sm:$0xff] %v10764_v24  ;;  %5036 = vrot.lane.b32.xlu1 %v1757_v31, %s7637_s26 }
 0x465   : > { %v3429_v8 = vpop.permute.xlu0 %3428 }
 0x466   : > { %v3431_v19 = vpop.permute.xlu1 %3430  ;;  %v10778_v29 = vsel %vm4135_vm12, %v10650_v46, %v3429_v8  ;;  %v1568_v46 = vld [vmem:[#allocation2 + $0x20e] sm:$0xff] }
 0x467   : > { %v10774_v55 = vsel %vm4135_vm12, %v10646_v9, %v3431_v19  ;;  %14004 = vst [vmem:[#allocation246_spill] sm:$0xff] %v10778_v29  ;;  %5162 = vrot.lane.b32.xlu0 %v1788_v45, %s7638_s27 }
 0x468   : > { %14003 = vst [vmem:[#allocation131_spill] sm:$0xff] %v10774_v55  ;;  %4274 = vrot.lane.b32.xlu1 %v1567_v57, %s7631_s20  ;;  %v1789_v57 = vld [vmem:[#allocation2 + $0xab2] sm:$0xff] }
 0x469   : > { %v3433_v47 = vpop.permute.xlu0 %3432 }
 0x46a   : > { %v3435_v31 = vpop.permute.xlu1 %3434  ;;  %v10788_v9 = vsel %vm4135_vm12, %v10660_v1, %v3433_v47  ;;  %v1694_v1 = vld [vmem:[#allocation2 + $0x672] sm:$0xff] }
 0x46b   : > { %v10784_v16 = vsel %vm4135_vm12, %v10656_v11, %v3435_v31  ;;  %14006 = vst [vmem:[#allocation158_spill] sm:$0xff] %v10788_v9  ;;  %4656 = vrot.lane.b32.xlu0 %v1662_v44, %s7634_s23 }
 0x46c   : > { %14005 = vst [vmem:[#allocation247_spill] sm:$0xff] %v10784_v16  ;;  %4782 = vrot.lane.b32.xlu1 %v1693_v42, %s7635_s24  ;;  %v1599_v42 = vld [vmem:[#allocation2 + $0x218] sm:$0xff] }
 0x46d   : > { %v3437_v45 = vpop.permute.xlu0 %3436 }
 0x46e   : > { %v3439_v19 = vpop.permute.xlu1 %3438  ;;  %v10798_v11 = vsel %vm4135_vm12, %v10670_v36, %v3437_v45  ;;  %v1600_v36 = vld [vmem:[#allocation2 + $0x220] sm:$0xff] }
 0x46f   : > { %v10794_v8 = vsel %vm4135_vm12, %v10666_v62, %v3439_v19  ;;  %14008 = vst [vmem:[#allocation276_spill] sm:$0xff] %v10798_v11  ;;  %5164 = vrot.lane.b32.xlu0 %v1789_v57, %s7638_s27 }
 0x470   : > { %14007 = vst [vmem:[#allocation159_spill] sm:$0xff] %v10794_v8  ;;  %4276 = vrot.lane.b32.xlu1 %v1568_v46, %s7631_s20  ;;  %v1726_v46 = vld [vmem:[#allocation2 + $0xac6] sm:$0xff] }
 0x471   : > { %v3441_v44 = vpop.permute.xlu0 %3440 }
 0x472   : > { %v3443_v31 = vpop.permute.xlu1 %3442  ;;  %v10808_v62 = vsel %vm4135_vm12, %v10680_v4, %v3441_v44  ;;  %v1727_v4 = vld [vmem:[#allocation2 + $0xace] sm:$0xff] }
 0x473   : > { %v10804_v47 = vsel %vm4135_vm12, %v10676_v37, %v3443_v31  ;;  %14010 = vst [vmem:[#allocation188_spill] sm:$0xff] %v10808_v62  ;;  %4402 = vrot.lane.b32.xlu0 %v1599_v42, %s7632_s21 }
 0x474   : > { %14009 = vst [vmem:[#allocation277_spill] sm:$0xff] %v10804_v47  ;;  %4784 = vrot.lane.b32.xlu1 %v1694_v1, %s7635_s24  ;;  %v1631_v1 = vld [vmem:[#allocation2 + $0x22a] sm:$0xff] }
 0x475   : > { %v3445_v57 = vpop.permute.xlu0 %3444 }
 0x476   : > { %v3447_v19 = vpop.permute.xlu1 %3446  ;;  %v10818_v37 = vsel %vm4135_vm12, %v10690_v21, %v3445_v57  ;;  %v1632_v21 = vld [vmem:[#allocation2 + $0x232] sm:$0xff]  ;;  %v1663_v57 = vld [vmem:[#allocation2 + $0x686] sm:$0xff] }
 0x477   : > { %v10814_v45 = vsel %vm4135_vm12, %v10686_v18, %v3447_v19  ;;  %14012 = vst [vmem:[#allocation107_spill] sm:$0xff] %v10818_v37  ;;  %4910 = vrot.lane.b32.xlu0 %v1726_v46, %s7636_s25 }
 0x478   : > { %14011 = vst [vmem:[#allocation189_spill] sm:$0xff] %v10814_v45  ;;  %4404 = vrot.lane.b32.xlu1 %v1600_v36, %s7632_s21  ;;  %v1758_v36 = vld [vmem:[#allocation2 + $0xad8] sm:$0xff] }
 0x479   : > { %v3449_v42 = vpop.permute.xlu0 %3448 }
 0x47a   : > { %v3451_v31 = vpop.permute.xlu1 %3450  ;;  %v10828_v18 = vsel %vm4135_vm12, %v10700_v15, %v3449_v42 }
 0x47b   : > { %v10824_v44 = vsel %vm4135_vm12, %v10696_v49, %v3451_v31  ;;  %14014 = vst [vmem:[#allocation219_spill] sm:$0xff] %v10828_v18  ;;  %4530 = vrot.lane.b32.xlu0 %v1631_v1, %s7633_s22  ;;  %v1759_v49 = vld [vmem:[#allocation2 + $0xae0] sm:$0xff]  ;;  %v1790_v1 = vld [vmem:[#allocation2 + $0xaea] sm:$0xff] }
 0x47c   : > { %14013 = vst [vmem:[#allocation218_spill] sm:$0xff] %v10824_v44  ;;  %4912 = vrot.lane.b32.xlu1 %v1727_v4, %s7636_s25  ;;  %v1569_v4 = vld [vmem:[#allocation2 + $0x246] sm:$0xff] }
 0x47d   : > { %v10834_v46 = vpop.permute.xlu0 %3516 }
 0x47e   : > { %v10832_v19 = vpop.permute.xlu1 %3518  ;;  %14016 = vst [vmem:[#allocation133_spill] sm:$0xff] %v10834_v46 }
 0x47f   : > { %14015 = vst [vmem:[#allocation132_spill] sm:$0xff] %v10832_v19  ;;  %5038 = vrot.lane.b32.xlu0 %v1758_v36, %s7637_s26  ;;  %v1664_v36 = vld [vmem:[#allocation2 + $0x68e] sm:$0xff] }
 0x480   : > { %4532 = vrot.lane.b32.xlu1 %v1632_v21, %s7633_s22  ;;  %v1695_v21 = vld [vmem:[#allocation2 + $0x6aa] sm:$0xff] }
 0x481   : > { %v10840_v15 = vpop.permute.xlu0 %3520 }
 0x482   : > { %v10838_v31 = vpop.permute.xlu1 %3522  ;;  %14018 = vst [vmem:[#allocation249_spill] sm:$0xff] %v10840_v15 }
 0x483   : > { %14017 = vst [vmem:[#allocation248_spill] sm:$0xff] %v10838_v31  ;;  %4658 = vrot.lane.b32.xlu0 %v1663_v57, %s7634_s23  ;;  %v1791_v57 = vld [vmem:[#allocation2 + $0xaf2] sm:$0xff] }
 0x484   : > { %5040 = vrot.lane.b32.xlu1 %v1759_v49, %s7637_s26  ;;  %v1570_v49 = vld [vmem:[#allocation2 + $0x24e] sm:$0xff] }
 0x485   : > { %v10846_v18 = vpop.permute.xlu0 %3524 }
 0x486   : > { %v10844_v42 = vpop.permute.xlu1 %3526  ;;  %14020 = vst [vmem:[#allocation161_spill] sm:$0xff] %v10846_v18 }
 0x487   : > { %14019 = vst [vmem:[#allocation160_spill] sm:$0xff] %v10844_v42  ;;  %5166 = vrot.lane.b32.xlu0 %v1790_v1, %s7638_s27  ;;  %v1601_v1 = vld [vmem:[#allocation2 + $0x258] sm:$0xff] }
 0x488   : > { %4278 = vrot.lane.b32.xlu1 %v1569_v4, %s7631_s20  ;;  %v1696_v4 = vld [vmem:[#allocation2 + $0x6b2] sm:$0xff] }
 0x489   : > { %v10852_v37 = vpop.permute.xlu0 %3528 }
 0x48a   : > { %v10850_v44 = vpop.permute.xlu1 %3530  ;;  %14022 = vst [vmem:[#allocation190_spill] sm:$0xff] %v10852_v37 }
 0x48b   : > { %14021 = vst [vmem:[#allocation278_spill] sm:$0xff] %v10850_v44  ;;  %4660 = vrot.lane.b32.xlu0 %v1664_v36, %s7634_s23  ;;  %v1728_v36 = vld [vmem:[#allocation2 + $0xb06] sm:$0xff] }
 0x48c   : > { %4786 = vrot.lane.b32.xlu1 %v1695_v21, %s7635_s24  ;;  %v1602_v21 = vld [vmem:[#allocation2 + $0x260] sm:$0xff] }
 0x48d   : > { %v10858_v62 = vpop.permute.xlu0 %3532 }
 0x48e   : > { %v10856_v45 = vpop.permute.xlu1 %3534  ;;  %14024 = vst [vmem:[#allocation108_spill] sm:$0xff] %v10858_v62 }
 0x48f   : > { %14023 = vst [vmem:[#allocation191_spill] sm:$0xff] %v10856_v45  ;;  %5168 = vrot.lane.b32.xlu0 %v1791_v57, %s7638_s27  ;;  %v1633_v57 = vld [vmem:[#allocation2 + $0x26a] sm:$0xff] }
 0x490   : > { %4280 = vrot.lane.b32.xlu1 %v1570_v49, %s7631_s20  ;;  %v1729_v49 = vld [vmem:[#allocation2 + $0xb0e] sm:$0xff] }
 0x491   : > { %v10864_v8 = vpop.permute.xlu0 %3536 }
 0x492   : > { %v10862_v47 = vpop.permute.xlu1 %3538  ;;  %14026 = vst [vmem:[#allocation221_spill] sm:$0xff] %v10864_v8 }
 0x493   : > { %14025 = vst [vmem:[#allocation220_spill] sm:$0xff] %v10862_v47  ;;  %4406 = vrot.lane.b32.xlu0 %v1601_v1, %s7632_s21  ;;  %v1760_v1 = vld [vmem:[#allocation2 + $0xb18] sm:$0xff] }
 0x494   : > { %4788 = vrot.lane.b32.xlu1 %v1696_v4, %s7635_s24  ;;  %v1634_v4 = vld [vmem:[#allocation2 + $0x272] sm:$0xff] }
 0x495   : > { %v10870_v16 = vpop.permute.xlu0 %3540 }
 0x496   : > { %v10868_v11 = vpop.permute.xlu1 %3542  ;;  %14028 = vst [vmem:[#allocation135_spill] sm:$0xff] %v10870_v16 }
 0x497   : > { %14027 = vst [vmem:[#allocation134_spill] sm:$0xff] %v10868_v11  ;;  %4914 = vrot.lane.b32.xlu0 %v1728_v36, %s7636_s25  ;;  %v1665_v36 = vld [vmem:[#allocation2 + $0x6c6] sm:$0xff] }
 0x498   : > { %4408 = vrot.lane.b32.xlu1 %v1602_v21, %s7632_s21  ;;  %v1761_v21 = vld [vmem:[#allocation2 + $0xb20] sm:$0xff] }
 0x499   : > { %v10876_v55 = vpop.permute.xlu0 %3544 }
 0x49a   : > { %v10874_v9 = vpop.permute.xlu1 %3546  ;;  %14030 = vst [vmem:[#allocation251_spill] sm:$0xff] %v10876_v55 }
 0x49b   : > { %14029 = vst [vmem:[#allocation250_spill] sm:$0xff] %v10874_v9  ;;  %4534 = vrot.lane.b32.xlu0 %v1633_v57, %s7633_s22  ;;  %v1792_v57 = vld [vmem:[#allocation2 + $0xb2a] sm:$0xff] }
 0x49c   : > { %4916 = vrot.lane.b32.xlu1 %v1729_v49, %s7636_s25  ;;  %v1571_v49 = vld [vmem:[#allocation2 + $0x286] sm:$0xff] }
 0x49d   : > { %v10882_v24 = vpop.permute.xlu0 %3548 }
 0x49e   : > { %v10880_v29 = vpop.permute.xlu1 %3550  ;;  %14032 = vst [vmem:[#allocation163_spill] sm:$0xff] %v10882_v24 }
 0x49f   : > { %14031 = vst [vmem:[#allocation162_spill] sm:$0xff] %v10880_v29  ;;  %5042 = vrot.lane.b32.xlu0 %v1760_v1, %s7637_s26  ;;  %v1666_v1 = vld [vmem:[#allocation2 + $0x6ce] sm:$0xff] }
 0x4a0   : > { %4536 = vrot.lane.b32.xlu1 %v1634_v4, %s7633_s22  ;;  %v1697_v4 = vld [vmem:[#allocation2 + $0x6ea] sm:$0xff] }
 0x4a1   : > { %v10888_v54 = vpop.permute.xlu0 %3552 }
 0x4a2   : > { %v10886_v35 = vpop.permute.xlu1 %3554  ;;  %14034 = vst [vmem:[#allocation280_spill] sm:$0xff] %v10888_v54 }
 0x4a3   : > { %14033 = vst [vmem:[#allocation279_spill] sm:$0xff] %v10886_v35  ;;  %4662 = vrot.lane.b32.xlu0 %v1665_v36, %s7634_s23  ;;  %v1793_v36 = vld [vmem:[#allocation2 + $0xb32] sm:$0xff] }
 0x4a4   : > { %5044 = vrot.lane.b32.xlu1 %v1761_v21, %s7637_s26  ;;  %v1572_v21 = vld [vmem:[#allocation2 + $0x28e] sm:$0xff] }
 0x4a5   : > { %v10894_v29 = vpop.permute.xlu0 %3556 }
 0x4a6   : > { %v10892_v6 = vpop.permute.xlu1 %3558  ;;  %14036 = vst [vmem:[#allocation193_spill] sm:$0xff] %v10894_v29 }
 0x4a7   : > { %14035 = vst [vmem:[#allocation192_spill] sm:$0xff] %v10892_v6  ;;  %5170 = vrot.lane.b32.xlu0 %v1792_v57, %s7638_s27  ;;  %v1603_v57 = vld [vmem:[#allocation2 + $0x298] sm:$0xff] }
 0x4a8   : > { %4282 = vrot.lane.b32.xlu1 %v1571_v49, %s7631_s20  ;;  %v1698_v49 = vld [vmem:[#allocation2 + $0x6f2] sm:$0xff] }
 0x4a9   : > { %v10900_v35 = vpop.permute.xlu0 %3560 }
 0x4aa   : > { %v10898_v24 = vpop.permute.xlu1 %3562  ;;  %14038 = vst [vmem:[#allocation222_spill] sm:$0xff] %v10900_v35 }
 0x4ab   : > { %14037 = vst [vmem:[#allocation109_spill] sm:$0xff] %v10898_v24  ;;  %4664 = vrot.lane.b32.xlu0 %v1666_v1, %s7634_s23  ;;  %v1730_v1 = vld [vmem:[#allocation2 + $0xb46] sm:$0xff] }
 0x4ac   : > { %4790 = vrot.lane.b32.xlu1 %v1697_v4, %s7635_s24  ;;  %v1604_v4 = vld [vmem:[#allocation2 + $0x2a0] sm:$0xff] }
 0x4ad   : > { %v10906_v6 = vpop.permute.xlu0 %3564 }
 0x4ae   : > { %v10904_v54 = vpop.permute.xlu1 %4266  ;;  %14039 = vst [vmem:[#allocation223_spill] sm:$0xff] %v10906_v6 }
 0x4af   : > { %5172 = vrot.lane.b32.xlu0 %v1793_v36, %s7638_s27  ;;  %v1635_v36 = vld [vmem:[#allocation2 + $0x2aa] sm:$0xff] }
 0x4b0   : > { %4284 = vrot.lane.b32.xlu1 %v1572_v21, %s7631_s20  ;;  %v1731_v21 = vld [vmem:[#allocation2 + $0xb4e] sm:$0xff] }
 0x4b1   : > { %v10912_v24 = vpop.permute.xlu0 %4268 }
 0x4b2   : > { %v10910_v29 = vpop.permute.xlu1 %4394 }
 0x4b3   : > { %4410 = vrot.lane.b32.xlu0 %v1603_v57, %s7632_s21  ;;  %v1762_v57 = vld [vmem:[#allocation2 + $0xb58] sm:$0xff] }
 0x4b4   : > { %4792 = vrot.lane.b32.xlu1 %v1698_v49, %s7635_s24  ;;  %v1636_v49 = vld [vmem:[#allocation2 + $0x2b2] sm:$0xff] }
 0x4b5   : > { %v10918_v9 = vpop.permute.xlu0 %4396 }
 0x4b6   : > { %v10916_v35 = vpop.permute.xlu1 %4522 }
 0x4b7   : > { %4918 = vrot.lane.b32.xlu0 %v1730_v1, %s7636_s25  ;;  %v1667_v1 = vld [vmem:[#allocation2 + $0x706] sm:$0xff] }
 0x4b8   : > { %4412 = vrot.lane.b32.xlu1 %v1604_v4, %s7632_s21  ;;  %v1763_v4 = vld [vmem:[#allocation2 + $0xb60] sm:$0xff] }
 0x4b9   : > { %v10924_v55 = vpop.permute.xlu0 %4524 }
 0x4ba   : > { %v10922_v6 = vpop.permute.xlu1 %4650 }
 0x4bb   : > { %4538 = vrot.lane.b32.xlu0 %v1635_v36, %s7633_s22  ;;  %v1794_v36 = vld [vmem:[#allocation2 + $0xb6a] sm:$0xff] }
 0x4bc   : > { %4920 = vrot.lane.b32.xlu1 %v1731_v21, %s7636_s25  ;;  %v1573_v21 = vld [vmem:[#allocation2 + $0x2c6] sm:$0xff] }
 0x4bd   : > { %v10930_v16 = vpop.permute.xlu0 %4270 }
 0x4be   : > { %v10928_v11 = vpop.permute.xlu1 %4652 }
 0x4bf   : > { %5046 = vrot.lane.b32.xlu0 %v1762_v57, %s7637_s26  ;;  %v1668_v57 = vld [vmem:[#allocation2 + $0x70e] sm:$0xff] }
 0x4c0   : > { %4540 = vrot.lane.b32.xlu1 %v1636_v49, %s7633_s22  ;;  %v1699_v49 = vld [vmem:[#allocation2 + $0x72a] sm:$0xff] }
 0x4c1   : > { %v10936_v8 = vpop.permute.xlu0 %4778 }
 0x4c2   : > { %v10934_v47 = vpop.permute.xlu1 %4272 }
 0x4c3   : > { %4666 = vrot.lane.b32.xlu0 %v1667_v1, %s7634_s23  ;;  %v1795_v1 = vld [vmem:[#allocation2 + $0xb72] sm:$0xff] }
 0x4c4   : > { %5048 = vrot.lane.b32.xlu1 %v1763_v4, %s7637_s26  ;;  %v1574_v4 = vld [vmem:[#allocation2 + $0x2ce] sm:$0xff] }
 0x4c5   : > { %v10942_v45 = vpop.permute.xlu0 %4398 }
 0x4c6   : > { %v10940_v33 = vpop.permute.xlu1 %4780 }
 0x4c7   : > { %5174 = vrot.lane.b32.xlu0 %v1794_v36, %s7638_s27  ;;  %v1605_v36 = vld [vmem:[#allocation2 + $0x2d8] sm:$0xff] }
 0x4c8   : > { %4286 = vrot.lane.b32.xlu1 %v1573_v21, %s7631_s20  ;;  %v1700_v21 = vld [vmem:[#allocation2 + $0x732] sm:$0xff] }
 0x4c9   : > { %v10948_v60 = vpop.permute.xlu0 %4906 }
 0x4ca   : > { %v10946_v3 = vpop.permute.xlu1 %4400 }
 0x4cb   : > { %4668 = vrot.lane.b32.xlu0 %v1668_v57, %s7634_s23  ;;  %v1732_v57 = vld [vmem:[#allocation2 + $0xb86] sm:$0xff] }
 0x4cc   : > { %4794 = vrot.lane.b32.xlu1 %v1699_v49, %s7635_s24  ;;  %v1606_v49 = vld [vmem:[#allocation2 + $0x2e0] sm:$0xff] }
 0x4cd   : > { %v10954_v22 = vpop.permute.xlu0 %4526 }
 0x4ce   : > { %v10952_v12 = vpop.permute.xlu1 %4908 }
 0x4cf   : > { %5176 = vrot.lane.b32.xlu0 %v1795_v1, %s7638_s27  ;;  %v1637_v1 = vld [vmem:[#allocation2 + $0x2ea] sm:$0xff] }
 0x4d0   : > { %4288 = vrot.lane.b32.xlu1 %v1574_v4, %s7631_s20  ;;  %v1733_v4 = vld [vmem:[#allocation2 + $0xb8e] sm:$0xff] }
 0x4d1   : > { %v10960_v17 = vpop.permute.xlu0 %5034 }
 0x4d2   : > { %v10958_v62 = vpop.permute.xlu1 %4528 }
 0x4d3   : > { %4414 = vrot.lane.b32.xlu0 %v1605_v36, %s7632_s21  ;;  %v1764_v36 = vld [vmem:[#allocation2 + $0xb98] sm:$0xff] }
 0x4d4   : > { %4796 = vrot.lane.b32.xlu1 %v1700_v21, %s7635_s24  ;;  %v1638_v21 = vld [vmem:[#allocation2 + $0x2f2] sm:$0xff] }
 0x4d5   : > { %v10966_v34 = vpop.permute.xlu0 %4654 }
 0x4d6   : > { %v10964_v2 = vpop.permute.xlu1 %5036 }
 0x4d7   : > { %4922 = vrot.lane.b32.xlu0 %v1732_v57, %s7636_s25  ;;  %v1669_v57 = vld [vmem:[#allocation2 + $0x746] sm:$0xff] }
 0x4d8   : > { %4416 = vrot.lane.b32.xlu1 %v1606_v49, %s7632_s21  ;;  %v1765_v49 = vld [vmem:[#allocation2 + $0xba0] sm:$0xff] }
 0x4d9   : > { %v10972_v39 = vpop.permute.xlu0 %5162 }
 0x4da   : > { %v10970_v44 = vpop.permute.xlu1 %4274 }
 0x4db   : > { %4542 = vrot.lane.b32.xlu0 %v1637_v1, %s7633_s22  ;;  %v1796_v1 = vld [vmem:[#allocation2 + $0xbaa] sm:$0xff] }
 0x4dc   : > { %4924 = vrot.lane.b32.xlu1 %v1733_v4, %s7636_s25  ;;  %v1575_v4 = vld [vmem:[#allocation2 + $0x306] sm:$0xff] }
 0x4dd   : > { %v10978_v52 = vpop.permute.xlu0 %4656 }
 0x4de   : > { %v10976_v41 = vpop.permute.xlu1 %4782 }
 0x4df   : > { %5050 = vrot.lane.b32.xlu0 %v1764_v36, %s7637_s26  ;;  %v1670_v36 = vld [vmem:[#allocation2 + $0x74e] sm:$0xff] }
 0x4e0   : > { %4544 = vrot.lane.b32.xlu1 %v1638_v21, %s7633_s22  ;;  %v1701_v21 = vld [vmem:[#allocation2 + $0x76a] sm:$0xff] }
 0x4e1   : > { %v10984_v50 = vpop.permute.xlu0 %5164 }
 0x4e2   : > { %v10982_v37 = vpop.permute.xlu1 %4276 }
 0x4e3   : > { %4670 = vrot.lane.b32.xlu0 %v1669_v57, %s7634_s23  ;;  %v1797_v57 = vld [vmem:[#allocation2 + $0xbb2] sm:$0xff] }
 0x4e4   : > { %5052 = vrot.lane.b32.xlu1 %v1765_v49, %s7637_s26  ;;  %v1576_v49 = vld [vmem:[#allocation2 + $0x30e] sm:$0xff] }
 0x4e5   : > { %v10990_v58 = vpop.permute.xlu0 %4402 }
 0x4e6   : > { %v10988_v23 = vpop.permute.xlu1 %4784 }
 0x4e7   : > { %5178 = vrot.lane.b32.xlu0 %v1796_v1, %s7638_s27  ;;  %v1607_v1 = vld [vmem:[#allocation2 + $0x318] sm:$0xff] }
 0x4e8   : > { %4290 = vrot.lane.b32.xlu1 %v1575_v4, %s7631_s20  ;;  %v1702_v4 = vld [vmem:[#allocation2 + $0x772] sm:$0xff] }
 0x4e9   : > { %v10996_v27 = vpop.permute.xlu0 %4910 }
 0x4ea   : > { %v10994_v42 = vpop.permute.xlu1 %4404 }
 0x4eb   : > { %4672 = vrot.lane.b32.xlu0 %v1670_v36, %s7634_s23  ;;  %v1734_v36 = vld [vmem:[#allocation2 + $0xbc6] sm:$0xff] }
 0x4ec   : > { %4798 = vrot.lane.b32.xlu1 %v1701_v21, %s7635_s24  ;;  %v1608_v21 = vld [vmem:[#allocation2 + $0x320] sm:$0xff] }
 0x4ed   : > { %v11002_v48 = vpop.permute.xlu0 %4530 }
 0x4ee   : > { %v11000_v14 = vpop.permute.xlu1 %4912 }
 0x4ef   : > { %5180 = vrot.lane.b32.xlu0 %v1797_v57, %s7638_s27  ;;  %v1639_v57 = vld [vmem:[#allocation2 + $0x32a] sm:$0xff] }
 0x4f0   : > { %4292 = vrot.lane.b32.xlu1 %v1576_v49, %s7631_s20  ;;  %v1735_v49 = vld [vmem:[#allocation2 + $0xbce] sm:$0xff] }
 0x4f1   : > { %v11008_v51 = vpop.permute.xlu0 %5038 }
 0x4f2   : > { %v11006_v18 = vpop.permute.xlu1 %4532 }
 0x4f3   : > { %4418 = vrot.lane.b32.xlu0 %v1607_v1, %s7632_s21  ;;  %v1766_v1 = vld [vmem:[#allocation2 + $0xbd8] sm:$0xff] }
 0x4f4   : > { %4800 = vrot.lane.b32.xlu1 %v1702_v4, %s7635_s24  ;;  %v1640_v4 = vld [vmem:[#allocation2 + $0x332] sm:$0xff] }
 0x4f5   : > { %v11014_v59 = vpop.permute.xlu0 %4658 }
 0x4f6   : > { %v11012_v13 = vpop.permute.xlu1 %5040 }
 0x4f7   : > { %4926 = vrot.lane.b32.xlu0 %v1734_v36, %s7636_s25  ;;  %v1671_v36 = vld [vmem:[#allocation2 + $0x786] sm:$0xff] }
 0x4f8   : > { %4420 = vrot.lane.b32.xlu1 %v1608_v21, %s7632_s21  ;;  %v1767_v21 = vld [vmem:[#allocation2 + $0xbe0] sm:$0xff] }
 0x4f9   : > { %v11020_v30 = vpop.permute.xlu0 %5166 }
 0x4fa   : > { %v11018_v31 = vpop.permute.xlu1 %4278 }
 0x4fb   : > { %14040 = vst [vmem:[#allocation136_spill] sm:$0xff] %v11018_v31  ;;  %4546 = vrot.lane.b32.xlu0 %v1639_v57, %s7633_s22  ;;  %v1798_v57 = vld [vmem:[#allocation2 + $0xbea] sm:$0xff]  ;;  %v14155_v31 = vld [vmem:[#allocation7_spill] sm:$0xff] }
 0x4fc   : > { %4928 = vrot.lane.b32.xlu1 %v1735_v49, %s7636_s25  ;;  %v1577_v49 = vld [vmem:[#allocation2 + $0x346] sm:$0xff] }
 0x4fd   : > { %v11026_v61 = vpop.permute.xlu0 %4660 }
 0x4fe   : > { %v11024_v63 = vpop.permute.xlu1 %4786  ;;  %14041 = vst [vmem:[#allocation137_spill] sm:$0xff] %v11026_v61 }
 0x4ff   : > { %5054 = vrot.lane.b32.xlu0 %v1766_v1, %s7637_s26  ;;  %v1672_v1 = vld [vmem:[#allocation2 + $0x78e] sm:$0xff] }
 0x500   : > { %4548 = vrot.lane.b32.xlu1 %v1640_v4, %s7633_s22  ;;  %v1703_v4 = vld [vmem:[#allocation2 + $0x7aa] sm:$0xff] }
 0x501   : > { %v11032_v56 = vpop.permute.xlu0 %5168 }
 0x502   : > { %v11030_v15 = vpop.permute.xlu1 %4280 }
 0x503   : > { %14042 = vst [vmem:[#allocation252_spill] sm:$0xff] %v11030_v15  ;;  %4674 = vrot.lane.b32.xlu0 %v1671_v36, %s7634_s23  ;;  %v1799_v36 = vld [vmem:[#allocation2 + $0xbf2] sm:$0xff] }
 0x504   : > { %5056 = vrot.lane.b32.xlu1 %v1767_v21, %s7637_s26  ;;  %v1578_v21 = vld [vmem:[#allocation2 + $0x34e] sm:$0xff] }
 0x505   : > { %v11038_v32 = vpop.permute.xlu0 %4406 }
 0x506   : > { %v11036_v10 = vpop.permute.xlu1 %4788  ;;  %14044 = vst [vmem:[#allocation164_spill] sm:$0xff] %v11038_v32  ;;  %v1749_v32 = vld [vmem:[#allocation2 + $0xd8e] sm:$0xff] }
 0x507   : > { %14043 = vst [vmem:[#allocation253_spill] sm:$0xff] %v11036_v10  ;;  %5182 = vrot.lane.b32.xlu0 %v1798_v57, %s7638_s27  ;;  %v1609_v57 = vld [vmem:[#allocation2 + $0x358] sm:$0xff] }
 0x508   : > { %4294 = vrot.lane.b32.xlu1 %v1577_v49, %s7631_s20  ;;  %v1704_v49 = vld [vmem:[#allocation2 + $0x7b2] sm:$0xff] }
 0x509   : > { %v11044_v7 = vpop.permute.xlu0 %4914 }
 0x50a   : > { %v11042_v19 = vpop.permute.xlu1 %4408 }
 0x50b   : > { %14045 = vst [vmem:[#allocation165_spill] sm:$0xff] %v11042_v19  ;;  %4676 = vrot.lane.b32.xlu0 %v1672_v1, %s7634_s23  ;;  %v1736_v1 = vld [vmem:[#allocation2 + $0xc06] sm:$0xff] }
 0x50c   : > { %4802 = vrot.lane.b32.xlu1 %v1703_v4, %s7635_s24  ;;  %v1610_v4 = vld [vmem:[#allocation2 + $0x360] sm:$0xff] }
 0x50d   : > { %v11050_v46 = vpop.permute.xlu0 %4534 }
 0x50e   : > { %v11048_v38 = vpop.permute.xlu1 %4916  ;;  %14047 = vst [vmem:[#allocation195_spill] sm:$0xff] %v11050_v46 }
 0x50f   : > { %14046 = vst [vmem:[#allocation194_spill] sm:$0xff] %v11048_v38  ;;  %5184 = vrot.lane.b32.xlu0 %v1799_v36, %s7638_s27  ;;  %v1641_v36 = vld [vmem:[#allocation2 + $0x36a] sm:$0xff] }
 0x510   : > { %4296 = vrot.lane.b32.xlu1 %v1578_v21, %s7631_s20  ;;  %v1737_v21 = vld [vmem:[#allocation2 + $0xc0e] sm:$0xff] }
 0x511   : > { %v11056_v5 = vpop.permute.xlu0 %5042 }
 0x512   : > { %v11054_v0 = vpop.permute.xlu1 %4536  ;;  %14049 = vst [vmem:[#allocation225_spill] sm:$0xff] %v11056_v5 }
 0x513   : > { %14048 = vst [vmem:[#allocation224_spill] sm:$0xff] %v11054_v0  ;;  %4422 = vrot.lane.b32.xlu0 %v1609_v57, %s7632_s21  ;;  %v1768_v57 = vld [vmem:[#allocation2 + $0xc18] sm:$0xff] }
 0x514   : > { %4804 = vrot.lane.b32.xlu1 %v1704_v49, %s7635_s24  ;;  %v1642_v49 = vld [vmem:[#allocation2 + $0x372] sm:$0xff] }
 0x515   : > { %v11062_v53 = vpop.permute.xlu0 %4662 }
 0x516   : > { %v11060_v20 = vpop.permute.xlu1 %5044  ;;  %14051 = vst [vmem:[#allocation255_spill] sm:$0xff] %v11062_v53 }
 0x517   : > { %14050 = vst [vmem:[#allocation254_spill] sm:$0xff] %v11060_v20  ;;  %4930 = vrot.lane.b32.xlu0 %v1736_v1, %s7636_s25  ;;  %v1673_v1 = vld [vmem:[#allocation2 + $0x7c6] sm:$0xff] }
 0x518   : > { %4424 = vrot.lane.b32.xlu1 %v1610_v4, %s7632_s21  ;;  %v1769_v4 = vld [vmem:[#allocation2 + $0xc20] sm:$0xff] }
 0x519   : > { %v11068_v0 = vpop.permute.xlu0 %5170 }
 0x51a   : > { %v11066_v19 = vpop.permute.xlu1 %4282  ;;  %14053 = vst [vmem:[#allocation284_spill] sm:$0xff] %v11068_v0  ;;  %v1654_v0 = vld [vmem:[#allocation2 + $0x4f2] sm:$0xff] }
 0x51b   : > { %14052 = vst [vmem:[#allocation283_spill] sm:$0xff] %v11066_v19  ;;  %4550 = vrot.lane.b32.xlu0 %v1641_v36, %s7633_s22  ;;  %v1800_v36 = vld [vmem:[#allocation2 + $0xc2a] sm:$0xff] }
 0x51c   : > { %4932 = vrot.lane.b32.xlu1 %v1737_v21, %s7636_s25  ;;  %v1579_v21 = vld [vmem:[#allocation2 + $0x386] sm:$0xff] }
 0x51d   : > { %v11074_v20 = vpop.permute.xlu0 %4664 }
 0x51e   : > { %v11072_v15 = vpop.permute.xlu1 %4790  ;;  %14055 = vst [vmem:[#allocation282_spill] sm:$0xff] %v11074_v20 }
 0x51f   : > { %14054 = vst [vmem:[#allocation281_spill] sm:$0xff] %v11072_v15  ;;  %5058 = vrot.lane.b32.xlu0 %v1768_v57, %s7637_s26  ;;  %v1674_v57 = vld [vmem:[#allocation2 + $0x7ce] sm:$0xff] }
 0x520   : > { %4552 = vrot.lane.b32.xlu1 %v1642_v49, %s7633_s22  ;;  %v1705_v49 = vld [vmem:[#allocation2 + $0x7ea] sm:$0xff] }
 0x521   : > { %v11080_v19 = vpop.permute.xlu0 %5172 }
 0x522   : > { %v11078_v53 = vpop.permute.xlu1 %4284  ;;  %14057 = vst [vmem:[#allocation286_spill] sm:$0xff] %v11080_v19 }
 0x523   : > { %14056 = vst [vmem:[#allocation285_spill] sm:$0xff] %v11078_v53  ;;  %4678 = vrot.lane.b32.xlu0 %v1673_v1, %s7634_s23  ;;  %v1801_v1 = vld [vmem:[#allocation2 + $0xc32] sm:$0xff] }
 0x524   : > { %5060 = vrot.lane.b32.xlu1 %v1769_v4, %s7637_s26  ;;  %v1580_v4 = vld [vmem:[#allocation2 + $0x38e] sm:$0xff] }
 0x525   : > { %v11086_v15 = vpop.permute.xlu0 %4410 }
 0x526   : > { %v11084_v46 = vpop.permute.xlu1 %4792  ;;  %14059 = vst [vmem:[#allocation298_spill] sm:$0xff] %v11086_v15 }
 0x527   : > { %14058 = vst [vmem:[#allocation291_spill] sm:$0xff] %v11084_v46  ;;  %5186 = vrot.lane.b32.xlu0 %v1800_v36, %s7638_s27  ;;  %v1611_v36 = vld [vmem:[#allocation2 + $0x398] sm:$0xff] }
 0x528   : > { %4298 = vrot.lane.b32.xlu1 %v1579_v21, %s7631_s20  ;;  %v1706_v21 = vld [vmem:[#allocation2 + $0x7f2] sm:$0xff] }
 0x529   : > { %v11092_v53 = vpop.permute.xlu0 %4918 }
 0x52a   : > { %v11090_v20 = vpop.permute.xlu1 %4412  ;;  %14061 = vst [vmem:[#allocation300_spill] sm:$0xff] %v11092_v53 }
 0x52b   : > { %14060 = vst [vmem:[#allocation299_spill] sm:$0xff] %v11090_v20  ;;  %4680 = vrot.lane.b32.xlu0 %v1674_v57, %s7634_s23  ;;  %v1738_v57 = vld [vmem:[#allocation2 + $0xc46] sm:$0xff] }
 0x52c   : > { %4806 = vrot.lane.b32.xlu1 %v1705_v49, %s7635_s24  ;;  %v1612_v49 = vld [vmem:[#allocation2 + $0x3a0] sm:$0xff] }
 0x52d   : > { %v11098_v46 = vpop.permute.xlu0 %4538 }
 0x52e   : > { %v11096_v19 = vpop.permute.xlu1 %4920  ;;  %14063 = vst [vmem:[#allocation302_spill] sm:$0xff] %v11098_v46 }
 0x52f   : > { %14062 = vst [vmem:[#allocation301_spill] sm:$0xff] %v11096_v19  ;;  %5188 = vrot.lane.b32.xlu0 %v1801_v1, %s7638_s27  ;;  %v1643_v1 = vld [vmem:[#allocation2 + $0x3aa] sm:$0xff] }
 0x530   : > { %4300 = vrot.lane.b32.xlu1 %v1580_v4, %s7631_s20  ;;  %v1739_v4 = vld [vmem:[#allocation2 + $0xc4e] sm:$0xff] }
 0x531   : > { %v11104_v20 = vpop.permute.xlu0 %5046 }
 0x532   : > { %v11102_v15 = vpop.permute.xlu1 %4540  ;;  %14065 = vst [vmem:[#allocation304_spill] sm:$0xff] %v11104_v20 }
 0x533   : > { %14064 = vst [vmem:[#allocation303_spill] sm:$0xff] %v11102_v15  ;;  %4426 = vrot.lane.b32.xlu0 %v1611_v36, %s7632_s21  ;;  %v1770_v36 = vld [vmem:[#allocation2 + $0xc58] sm:$0xff] }
 0x534   : > { %4808 = vrot.lane.b32.xlu1 %v1706_v21, %s7635_s24  ;;  %v1644_v21 = vld [vmem:[#allocation2 + $0x3b2] sm:$0xff] }
 0x535   : > { %v11110_v19 = vpop.permute.xlu0 %4666 }
 0x536   : > { %v11108_v53 = vpop.permute.xlu1 %5048  ;;  %14067 = vst [vmem:[#allocation306_spill] sm:$0xff] %v11110_v19 }
 0x537   : > { %14066 = vst [vmem:[#allocation305_spill] sm:$0xff] %v11108_v53  ;;  %4934 = vrot.lane.b32.xlu0 %v1738_v57, %s7636_s25  ;;  %v1675_v57 = vld [vmem:[#allocation2 + $0x806] sm:$0xff] }
 0x538   : > { %4428 = vrot.lane.b32.xlu1 %v1612_v49, %s7632_s21  ;;  %v1771_v49 = vld [vmem:[#allocation2 + $0xc60] sm:$0xff] }
 0x539   : > { %v11116_v15 = vpop.permute.xlu0 %5174 }
 0x53a   : > { %v11114_v46 = vpop.permute.xlu1 %4286  ;;  %14069 = vst [vmem:[#allocation308_spill] sm:$0xff] %v11116_v15 }
 0x53b   : > { %14068 = vst [vmem:[#allocation307_spill] sm:$0xff] %v11114_v46  ;;  %4554 = vrot.lane.b32.xlu0 %v1643_v1, %s7633_s22  ;;  %v1802_v1 = vld [vmem:[#allocation2 + $0xc6a] sm:$0xff] }
 0x53c   : > { %4936 = vrot.lane.b32.xlu1 %v1739_v4, %s7636_s25  ;;  %v1581_v4 = vld [vmem:[#allocation2 + $0x3c6] sm:$0xff] }
 0x53d   : > { %v11122_v53 = vpop.permute.xlu0 %4668 }
 0x53e   : > { %v11120_v20 = vpop.permute.xlu1 %4794  ;;  %14071 = vst [vmem:[#allocation310_spill] sm:$0xff] %v11122_v53 }
 0x53f   : > { %14070 = vst [vmem:[#allocation309_spill] sm:$0xff] %v11120_v20  ;;  %5062 = vrot.lane.b32.xlu0 %v1770_v36, %s7637_s26  ;;  %v1676_v36 = vld [vmem:[#allocation2 + $0x80e] sm:$0xff] }
 0x540   : > { %4556 = vrot.lane.b32.xlu1 %v1644_v21, %s7633_s22  ;;  %v1707_v21 = vld [vmem:[#allocation2 + $0x82a] sm:$0xff] }
 0x541   : > { %v11128_v46 = vpop.permute.xlu0 %5176 }
 0x542   : > { %v11126_v19 = vpop.permute.xlu1 %4288  ;;  %14073 = vst [vmem:[#allocation312_spill] sm:$0xff] %v11128_v46 }
 0x543   : > { %14072 = vst [vmem:[#allocation311_spill] sm:$0xff] %v11126_v19  ;;  %4682 = vrot.lane.b32.xlu0 %v1675_v57, %s7634_s23  ;;  %v1803_v57 = vld [vmem:[#allocation2 + $0xc72] sm:$0xff] }
 0x544   : > { %5064 = vrot.lane.b32.xlu1 %v1771_v49, %s7637_s26  ;;  %v1582_v49 = vld [vmem:[#allocation2 + $0x3ce] sm:$0xff] }
 0x545   : > { %v11134_v20 = vpop.permute.xlu0 %4414 }
 0x546   : > { %v11132_v15 = vpop.permute.xlu1 %4796  ;;  %14075 = vst [vmem:[#allocation314_spill] sm:$0xff] %v11134_v20 }
 0x547   : > { %14074 = vst [vmem:[#allocation313_spill] sm:$0xff] %v11132_v15  ;;  %5190 = vrot.lane.b32.xlu0 %v1802_v1, %s7638_s27  ;;  %v1613_v1 = vld [vmem:[#allocation2 + $0x3d8] sm:$0xff] }
 0x548   : > { %4302 = vrot.lane.b32.xlu1 %v1581_v4, %s7631_s20  ;;  %v1708_v4 = vld [vmem:[#allocation2 + $0x832] sm:$0xff] }
 0x549   : > { %v11140_v19 = vpop.permute.xlu0 %4922 }
 0x54a   : > { %v11138_v53 = vpop.permute.xlu1 %4416  ;;  %14077 = vst [vmem:[#allocation316_spill] sm:$0xff] %v11140_v19 }
 0x54b   : > { %14076 = vst [vmem:[#allocation315_spill] sm:$0xff] %v11138_v53  ;;  %4684 = vrot.lane.b32.xlu0 %v1676_v36, %s7634_s23  ;;  %v1740_v36 = vld [vmem:[#allocation2 + $0xc86] sm:$0xff] }
 0x54c   : > { %4810 = vrot.lane.b32.xlu1 %v1707_v21, %s7635_s24  ;;  %v1614_v21 = vld [vmem:[#allocation2 + $0x3e0] sm:$0xff] }
 0x54d   : > { %v11146_v15 = vpop.permute.xlu0 %4542 }
 0x54e   : > { %v11144_v46 = vpop.permute.xlu1 %4924  ;;  %14079 = vst [vmem:[#allocation318_spill] sm:$0xff] %v11146_v15 }
 0x54f   : > { %14078 = vst [vmem:[#allocation317_spill] sm:$0xff] %v11144_v46  ;;  %5192 = vrot.lane.b32.xlu0 %v1803_v57, %s7638_s27  ;;  %v1645_v57 = vld [vmem:[#allocation2 + $0x3ea] sm:$0xff] }
 0x550   : > { %4304 = vrot.lane.b32.xlu1 %v1582_v49, %s7631_s20  ;;  %v1741_v49 = vld [vmem:[#allocation2 + $0xc8e] sm:$0xff] }
 0x551   : > { %v11152_v53 = vpop.permute.xlu0 %5050 }
 0x552   : > { %v11150_v20 = vpop.permute.xlu1 %4544  ;;  %14081 = vst [vmem:[#allocation320_spill] sm:$0xff] %v11152_v53 }
 0x553   : > { %14080 = vst [vmem:[#allocation319_spill] sm:$0xff] %v11150_v20  ;;  %4430 = vrot.lane.b32.xlu0 %v1613_v1, %s7632_s21  ;;  %v1772_v1 = vld [vmem:[#allocation2 + $0xc98] sm:$0xff] }
 0x554   : > { %4812 = vrot.lane.b32.xlu1 %v1708_v4, %s7635_s24  ;;  %v1646_v4 = vld [vmem:[#allocation2 + $0x3f2] sm:$0xff] }
 0x555   : > { %v11158_v46 = vpop.permute.xlu0 %4670 }
 0x556   : > { %v11156_v19 = vpop.permute.xlu1 %5052  ;;  %14083 = vst [vmem:[#allocation322_spill] sm:$0xff] %v11158_v46 }
 0x557   : > { %14082 = vst [vmem:[#allocation321_spill] sm:$0xff] %v11156_v19  ;;  %4938 = vrot.lane.b32.xlu0 %v1740_v36, %s7636_s25  ;;  %v1677_v36 = vld [vmem:[#allocation2 + $0x846] sm:$0xff] }
 0x558   : > { %4432 = vrot.lane.b32.xlu1 %v1614_v21, %s7632_s21  ;;  %v1773_v21 = vld [vmem:[#allocation2 + $0xca0] sm:$0xff] }
 0x559   : > { %v11164_v20 = vpop.permute.xlu0 %5178 }
 0x55a   : > { %v11162_v15 = vpop.permute.xlu1 %4290  ;;  %14085 = vst [vmem:[#allocation324_spill] sm:$0xff] %v11164_v20 }
 0x55b   : > { %14084 = vst [vmem:[#allocation323_spill] sm:$0xff] %v11162_v15  ;;  %4558 = vrot.lane.b32.xlu0 %v1645_v57, %s7633_s22  ;;  %v1804_v57 = vld [vmem:[#allocation2 + $0xcaa] sm:$0xff] }
 0x55c   : > { %4940 = vrot.lane.b32.xlu1 %v1741_v49, %s7636_s25  ;;  %v1583_v49 = vld [vmem:[#allocation2 + $0x406] sm:$0xff] }
 0x55d   : > { %v11170_v19 = vpop.permute.xlu0 %4672 }
 0x55e   : > { %v11168_v53 = vpop.permute.xlu1 %4798  ;;  %14087 = vst [vmem:[#allocation326_spill] sm:$0xff] %v11170_v19 }
 0x55f   : > { %14086 = vst [vmem:[#allocation325_spill] sm:$0xff] %v11168_v53  ;;  %5066 = vrot.lane.b32.xlu0 %v1772_v1, %s7637_s26  ;;  %v1678_v1 = vld [vmem:[#allocation2 + $0x84e] sm:$0xff] }
 0x560   : > { %4560 = vrot.lane.b32.xlu1 %v1646_v4, %s7633_s22  ;;  %v1709_v4 = vld [vmem:[#allocation2 + $0x86a] sm:$0xff] }
 0x561   : > { %v11176_v15 = vpop.permute.xlu0 %5180 }
 0x562   : > { %v11174_v46 = vpop.permute.xlu1 %4292  ;;  %14089 = vst [vmem:[#allocation328_spill] sm:$0xff] %v11176_v15 }
 0x563   : > { %14088 = vst [vmem:[#allocation327_spill] sm:$0xff] %v11174_v46  ;;  %4686 = vrot.lane.b32.xlu0 %v1677_v36, %s7634_s23  ;;  %v1805_v36 = vld [vmem:[#allocation2 + $0xcb2] sm:$0xff] }
 0x564   : > { %5068 = vrot.lane.b32.xlu1 %v1773_v21, %s7637_s26  ;;  %v1584_v21 = vld [vmem:[#allocation2 + $0x40e] sm:$0xff] }
 0x565   : > { %v11182_v53 = vpop.permute.xlu0 %4418 }
 0x566   : > { %v11180_v20 = vpop.permute.xlu1 %4800  ;;  %14091 = vst [vmem:[#allocation330_spill] sm:$0xff] %v11182_v53 }
 0x567   : > { %14090 = vst [vmem:[#allocation329_spill] sm:$0xff] %v11180_v20  ;;  %5194 = vrot.lane.b32.xlu0 %v1804_v57, %s7638_s27  ;;  %v1615_v57 = vld [vmem:[#allocation2 + $0x418] sm:$0xff] }
 0x568   : > { %4306 = vrot.lane.b32.xlu1 %v1583_v49, %s7631_s20  ;;  %v1710_v49 = vld [vmem:[#allocation2 + $0x872] sm:$0xff] }
 0x569   : > { %v11188_v46 = vpop.permute.xlu0 %4926 }
 0x56a   : > { %v11186_v19 = vpop.permute.xlu1 %4420  ;;  %14093 = vst [vmem:[#allocation332_spill] sm:$0xff] %v11188_v46 }
 0x56b   : > { %14092 = vst [vmem:[#allocation331_spill] sm:$0xff] %v11186_v19  ;;  %4688 = vrot.lane.b32.xlu0 %v1678_v1, %s7634_s23  ;;  %v1742_v1 = vld [vmem:[#allocation2 + $0xcc6] sm:$0xff] }
 0x56c   : > { %4814 = vrot.lane.b32.xlu1 %v1709_v4, %s7635_s24  ;;  %v1616_v4 = vld [vmem:[#allocation2 + $0x420] sm:$0xff] }
 0x56d   : > { %v11194_v20 = vpop.permute.xlu0 %4546 }
 0x56e   : > { %v11192_v15 = vpop.permute.xlu1 %4928  ;;  %14095 = vst [vmem:[#allocation334_spill] sm:$0xff] %v11194_v20 }
 0x56f   : > { %14094 = vst [vmem:[#allocation333_spill] sm:$0xff] %v11192_v15  ;;  %5196 = vrot.lane.b32.xlu0 %v1805_v36, %s7638_s27  ;;  %v1647_v36 = vld [vmem:[#allocation2 + $0x42a] sm:$0xff] }
 0x570   : > { %4308 = vrot.lane.b32.xlu1 %v1584_v21, %s7631_s20  ;;  %v1743_v21 = vld [vmem:[#allocation2 + $0xcce] sm:$0xff] }
 0x571   : > { %v11200_v19 = vpop.permute.xlu0 %5054 }
 0x572   : > { %v11198_v53 = vpop.permute.xlu1 %4548  ;;  %14097 = vst [vmem:[#allocation336_spill] sm:$0xff] %v11200_v19 }
 0x573   : > { %14096 = vst [vmem:[#allocation335_spill] sm:$0xff] %v11198_v53  ;;  %4434 = vrot.lane.b32.xlu0 %v1615_v57, %s7632_s21  ;;  %v1774_v57 = vld [vmem:[#allocation2 + $0xcd8] sm:$0xff] }
 0x574   : > { %4816 = vrot.lane.b32.xlu1 %v1710_v49, %s7635_s24  ;;  %v1648_v49 = vld [vmem:[#allocation2 + $0x432] sm:$0xff] }
 0x575   : > { %v11206_v15 = vpop.permute.xlu0 %4674 }
 0x576   : > { %v11204_v46 = vpop.permute.xlu1 %5056  ;;  %14099 = vst [vmem:[#allocation338_spill] sm:$0xff] %v11206_v15 }
 0x577   : > { %14098 = vst [vmem:[#allocation337_spill] sm:$0xff] %v11204_v46  ;;  %4942 = vrot.lane.b32.xlu0 %v1742_v1, %s7636_s25  ;;  %v1679_v1 = vld [vmem:[#allocation2 + $0x886] sm:$0xff] }
 0x578   : > { %4436 = vrot.lane.b32.xlu1 %v1616_v4, %s7632_s21  ;;  %v1775_v4 = vld [vmem:[#allocation2 + $0xce0] sm:$0xff] }
 0x579   : > { %v11212_v53 = vpop.permute.xlu0 %5182 }
 0x57a   : > { %v11210_v20 = vpop.permute.xlu1 %4294  ;;  %14101 = vst [vmem:[#allocation340_spill] sm:$0xff] %v11212_v53 }
 0x57b   : > { %14100 = vst [vmem:[#allocation339_spill] sm:$0xff] %v11210_v20  ;;  %4562 = vrot.lane.b32.xlu0 %v1647_v36, %s7633_s22  ;;  %v1806_v36 = vld [vmem:[#allocation2 + $0xcea] sm:$0xff] }
 0x57c   : > { %4944 = vrot.lane.b32.xlu1 %v1743_v21, %s7636_s25  ;;  %v1585_v21 = vld [vmem:[#allocation2 + $0x446] sm:$0xff] }
 0x57d   : > { %v11218_v46 = vpop.permute.xlu0 %4676 }
 0x57e   : > { %v11216_v19 = vpop.permute.xlu1 %4802  ;;  %14103 = vst [vmem:[#allocation342_spill] sm:$0xff] %v11218_v46 }
 0x57f   : > { %14102 = vst [vmem:[#allocation341_spill] sm:$0xff] %v11216_v19  ;;  %5070 = vrot.lane.b32.xlu0 %v1774_v57, %s7637_s26  ;;  %v1680_v57 = vld [vmem:[#allocation2 + $0x88e] sm:$0xff] }
 0x580   : > { %4564 = vrot.lane.b32.xlu1 %v1648_v49, %s7633_s22  ;;  %v1711_v49 = vld [vmem:[#allocation2 + $0x8aa] sm:$0xff] }
 0x581   : > { %v11224_v20 = vpop.permute.xlu0 %5184 }
 0x582   : > { %v11222_v15 = vpop.permute.xlu1 %4296  ;;  %14105 = vst [vmem:[#allocation344_spill] sm:$0xff] %v11224_v20 }
 0x583   : > { %14104 = vst [vmem:[#allocation343_spill] sm:$0xff] %v11222_v15  ;;  %4690 = vrot.lane.b32.xlu0 %v1679_v1, %s7634_s23  ;;  %v1807_v1 = vld [vmem:[#allocation2 + $0xcf2] sm:$0xff] }
 0x584   : > { %5072 = vrot.lane.b32.xlu1 %v1775_v4, %s7637_s26  ;;  %v1586_v4 = vld [vmem:[#allocation2 + $0x44e] sm:$0xff] }
 0x585   : > { %v11230_v19 = vpop.permute.xlu0 %4422 }
 0x586   : > { %v11228_v53 = vpop.permute.xlu1 %4804  ;;  %14107 = vst [vmem:[#allocation346_spill] sm:$0xff] %v11230_v19 }
 0x587   : > { %14106 = vst [vmem:[#allocation345_spill] sm:$0xff] %v11228_v53  ;;  %5198 = vrot.lane.b32.xlu0 %v1806_v36, %s7638_s27  ;;  %v1617_v36 = vld [vmem:[#allocation2 + $0x458] sm:$0xff] }
 0x588   : > { %4310 = vrot.lane.b32.xlu1 %v1585_v21, %s7631_s20  ;;  %v1712_v21 = vld [vmem:[#allocation2 + $0x8b2] sm:$0xff] }
 0x589   : > { %v11236_v15 = vpop.permute.xlu0 %4930 }
 0x58a   : > { %v11234_v46 = vpop.permute.xlu1 %4424  ;;  %14109 = vst [vmem:[#allocation348_spill] sm:$0xff] %v11236_v15 }
 0x58b   : > { %14108 = vst [vmem:[#allocation347_spill] sm:$0xff] %v11234_v46  ;;  %4692 = vrot.lane.b32.xlu0 %v1680_v57, %s7634_s23  ;;  %v1744_v57 = vld [vmem:[#allocation2 + $0xd06] sm:$0xff] }
 0x58c   : > { %4818 = vrot.lane.b32.xlu1 %v1711_v49, %s7635_s24  ;;  %v1618_v49 = vld [vmem:[#allocation2 + $0x460] sm:$0xff] }
 0x58d   : > { %v11242_v53 = vpop.permute.xlu0 %4550 }
 0x58e   : > { %v11240_v20 = vpop.permute.xlu1 %4932  ;;  %14111 = vst [vmem:[#allocation350_spill] sm:$0xff] %v11242_v53 }
 0x58f   : > { %14110 = vst [vmem:[#allocation349_spill] sm:$0xff] %v11240_v20  ;;  %5200 = vrot.lane.b32.xlu0 %v1807_v1, %s7638_s27  ;;  %v1649_v1 = vld [vmem:[#allocation2 + $0x46a] sm:$0xff] }
 0x590   : > { %4312 = vrot.lane.b32.xlu1 %v1586_v4, %s7631_s20  ;;  %v1745_v4 = vld [vmem:[#allocation2 + $0xd0e] sm:$0xff] }
 0x591   : > { %v11248_v46 = vpop.permute.xlu0 %5058 }
 0x592   : > { %v11246_v19 = vpop.permute.xlu1 %4552  ;;  %14113 = vst [vmem:[#allocation352_spill] sm:$0xff] %v11248_v46 }
 0x593   : > { %14112 = vst [vmem:[#allocation351_spill] sm:$0xff] %v11246_v19  ;;  %4438 = vrot.lane.b32.xlu0 %v1617_v36, %s7632_s21  ;;  %v1776_v36 = vld [vmem:[#allocation2 + $0xd18] sm:$0xff] }
 0x594   : > { %4820 = vrot.lane.b32.xlu1 %v1712_v21, %s7635_s24  ;;  %v1650_v21 = vld [vmem:[#allocation2 + $0x472] sm:$0xff] }
 0x595   : > { %v11254_v20 = vpop.permute.xlu0 %4678 }
 0x596   : > { %v11252_v15 = vpop.permute.xlu1 %5060  ;;  %14115 = vst [vmem:[#allocation354_spill] sm:$0xff] %v11254_v20 }
 0x597   : > { %14114 = vst [vmem:[#allocation353_spill] sm:$0xff] %v11252_v15  ;;  %4946 = vrot.lane.b32.xlu0 %v1744_v57, %s7636_s25  ;;  %v1681_v57 = vld [vmem:[#allocation2 + $0x8c6] sm:$0xff] }
 0x598   : > { %4440 = vrot.lane.b32.xlu1 %v1618_v49, %s7632_s21  ;;  %v1777_v49 = vld [vmem:[#allocation2 + $0xd20] sm:$0xff] }
 0x599   : > { %v11260_v19 = vpop.permute.xlu0 %5186 }
 0x59a   : > { %v11258_v53 = vpop.permute.xlu1 %4298  ;;  %14117 = vst [vmem:[#allocation356_spill] sm:$0xff] %v11260_v19 }
 0x59b   : > { %14116 = vst [vmem:[#allocation355_spill] sm:$0xff] %v11258_v53  ;;  %4566 = vrot.lane.b32.xlu0 %v1649_v1, %s7633_s22  ;;  %v1808_v1 = vld [vmem:[#allocation2 + $0xd2a] sm:$0xff] }
 0x59c   : > { %4948 = vrot.lane.b32.xlu1 %v1745_v4, %s7636_s25  ;;  %v1587_v4 = vld [vmem:[#allocation2 + $0x486] sm:$0xff] }
 0x59d   : > { %v11266_v15 = vpop.permute.xlu0 %4680 }
 0x59e   : > { %v11264_v46 = vpop.permute.xlu1 %4806  ;;  %14119 = vst [vmem:[#allocation358_spill] sm:$0xff] %v11266_v15 }
 0x59f   : > { %14118 = vst [vmem:[#allocation357_spill] sm:$0xff] %v11264_v46  ;;  %5074 = vrot.lane.b32.xlu0 %v1776_v36, %s7637_s26  ;;  %v1682_v36 = vld [vmem:[#allocation2 + $0x8ce] sm:$0xff] }
 0x5a0   : > { %4568 = vrot.lane.b32.xlu1 %v1650_v21, %s7633_s22  ;;  %v1713_v21 = vld [vmem:[#allocation2 + $0x8ea] sm:$0xff] }
 0x5a1   : > { %v11272_v53 = vpop.permute.xlu0 %5188 }
 0x5a2   : > { %v11270_v20 = vpop.permute.xlu1 %4300  ;;  %14121 = vst [vmem:[#allocation360_spill] sm:$0xff] %v11272_v53 }
 0x5a3   : > { %14120 = vst [vmem:[#allocation359_spill] sm:$0xff] %v11270_v20  ;;  %4694 = vrot.lane.b32.xlu0 %v1681_v57, %s7634_s23  ;;  %v1809_v57 = vld [vmem:[#allocation2 + $0xd32] sm:$0xff] }
 0x5a4   : > { %5076 = vrot.lane.b32.xlu1 %v1777_v49, %s7637_s26  ;;  %v1588_v49 = vld [vmem:[#allocation2 + $0x48e] sm:$0xff] }
 0x5a5   : > { %v11278_v46 = vpop.permute.xlu0 %4426 }
 0x5a6   : > { %v11276_v19 = vpop.permute.xlu1 %4808  ;;  %14123 = vst [vmem:[#allocation362_spill] sm:$0xff] %v11278_v46 }
 0x5a7   : > { %14122 = vst [vmem:[#allocation361_spill] sm:$0xff] %v11276_v19  ;;  %5202 = vrot.lane.b32.xlu0 %v1808_v1, %s7638_s27  ;;  %v1619_v1 = vld [vmem:[#allocation2 + $0x498] sm:$0xff] }
 0x5a8   : > { %4314 = vrot.lane.b32.xlu1 %v1587_v4, %s7631_s20  ;;  %v1714_v4 = vld [vmem:[#allocation2 + $0x8f2] sm:$0xff] }
 0x5a9   : > { %v11284_v20 = vpop.permute.xlu0 %4934 }
 0x5aa   : > { %v11282_v15 = vpop.permute.xlu1 %4428  ;;  %14125 = vst [vmem:[#allocation364_spill] sm:$0xff] %v11284_v20 }
 0x5ab   : > { %14124 = vst [vmem:[#allocation363_spill] sm:$0xff] %v11282_v15  ;;  %4696 = vrot.lane.b32.xlu0 %v1682_v36, %s7634_s23  ;;  %v1746_v36 = vld [vmem:[#allocation2 + $0xd46] sm:$0xff] }
 0x5ac   : > { %4822 = vrot.lane.b32.xlu1 %v1713_v21, %s7635_s24  ;;  %v1620_v21 = vld [vmem:[#allocation2 + $0x4a0] sm:$0xff] }
 0x5ad   : > { %v11290_v19 = vpop.permute.xlu0 %4554 }
 0x5ae   : > { %v11288_v53 = vpop.permute.xlu1 %4936  ;;  %14127 = vst [vmem:[#allocation366_spill] sm:$0xff] %v11290_v19 }
 0x5af   : > { %14126 = vst [vmem:[#allocation365_spill] sm:$0xff] %v11288_v53  ;;  %5204 = vrot.lane.b32.xlu0 %v1809_v57, %s7638_s27  ;;  %v1651_v57 = vld [vmem:[#allocation2 + $0x4aa] sm:$0xff] }
 0x5b0   : > { %4316 = vrot.lane.b32.xlu1 %v1588_v49, %s7631_s20  ;;  %v1747_v49 = vld [vmem:[#allocation2 + $0xd4e] sm:$0xff] }
 0x5b1   : > { %v11296_v15 = vpop.permute.xlu0 %5062 }
 0x5b2   : > { %v11294_v46 = vpop.permute.xlu1 %4556  ;;  %14129 = vst [vmem:[#allocation368_spill] sm:$0xff] %v11296_v15 }
 0x5b3   : > { %14128 = vst [vmem:[#allocation367_spill] sm:$0xff] %v11294_v46  ;;  %4442 = vrot.lane.b32.xlu0 %v1619_v1, %s7632_s21  ;;  %v1778_v1 = vld [vmem:[#allocation2 + $0xd58] sm:$0xff] }
 0x5b4   : > { %4824 = vrot.lane.b32.xlu1 %v1714_v4, %s7635_s24  ;;  %v1652_v4 = vld [vmem:[#allocation2 + $0x4b2] sm:$0xff] }
 0x5b5   : > { %v11302_v53 = vpop.permute.xlu0 %4682 }
 0x5b6   : > { %v11300_v20 = vpop.permute.xlu1 %5064  ;;  %14131 = vst [vmem:[#allocation370_spill] sm:$0xff] %v11302_v53 }
 0x5b7   : > { %14130 = vst [vmem:[#allocation369_spill] sm:$0xff] %v11300_v20  ;;  %4950 = vrot.lane.b32.xlu0 %v1746_v36, %s7636_s25  ;;  %v1683_v36 = vld [vmem:[#allocation2 + $0x906] sm:$0xff] }
 0x5b8   : > { %4444 = vrot.lane.b32.xlu1 %v1620_v21, %s7632_s21  ;;  %v1779_v21 = vld [vmem:[#allocation2 + $0xd60] sm:$0xff] }
 0x5b9   : > { %v11308_v46 = vpop.permute.xlu0 %5190 }
 0x5ba   : > { %v11306_v19 = vpop.permute.xlu1 %4302  ;;  %14133 = vst [vmem:[#allocation372_spill] sm:$0xff] %v11308_v46 }
 0x5bb   : > { %14132 = vst [vmem:[#allocation371_spill] sm:$0xff] %v11306_v19  ;;  %4570 = vrot.lane.b32.xlu0 %v1651_v57, %s7633_s22  ;;  %v1810_v57 = vld [vmem:[#allocation2 + $0xd6a] sm:$0xff] }
 0x5bc   : > { %4952 = vrot.lane.b32.xlu1 %v1747_v49, %s7636_s25  ;;  %v1589_v49 = vld [vmem:[#allocation2 + $0x4c6] sm:$0xff] }
 0x5bd   : > { %v11314_v20 = vpop.permute.xlu0 %4684 }
 0x5be   : > { %v11312_v15 = vpop.permute.xlu1 %4810  ;;  %14135 = vst [vmem:[#allocation374_spill] sm:$0xff] %v11314_v20 }
 0x5bf   : > { %14134 = vst [vmem:[#allocation373_spill] sm:$0xff] %v11312_v15  ;;  %5078 = vrot.lane.b32.xlu0 %v1778_v1, %s7637_s26  ;;  %v1684_v1 = vld [vmem:[#allocation2 + $0x90e] sm:$0xff] }
 0x5c0   : > { %4572 = vrot.lane.b32.xlu1 %v1652_v4, %s7633_s22  ;;  %v1715_v4 = vld [vmem:[#allocation2 + $0x92a] sm:$0xff] }
 0x5c1   : > { %v11320_v19 = vpop.permute.xlu0 %5192 }
 0x5c2   : > { %v11318_v53 = vpop.permute.xlu1 %4304  ;;  %14137 = vst [vmem:[#allocation376_spill] sm:$0xff] %v11320_v19 }
 0x5c3   : > { %14136 = vst [vmem:[#allocation375_spill] sm:$0xff] %v11318_v53  ;;  %4698 = vrot.lane.b32.xlu0 %v1683_v36, %s7634_s23  ;;  %v1811_v36 = vld [vmem:[#allocation2 + $0xd72] sm:$0xff] }
 0x5c4   : > { %5080 = vrot.lane.b32.xlu1 %v1779_v21, %s7637_s26  ;;  %v1590_v21 = vld [vmem:[#allocation2 + $0x4ce] sm:$0xff] }
 0x5c5   : > { %v11326_v15 = vpop.permute.xlu0 %4430 }
 0x5c6   : > { %v11324_v46 = vpop.permute.xlu1 %4812  ;;  %14139 = vst [vmem:[#allocation378_spill] sm:$0xff] %v11326_v15 }
 0x5c7   : > { %14138 = vst [vmem:[#allocation377_spill] sm:$0xff] %v11324_v46  ;;  %5206 = vrot.lane.b32.xlu0 %v1810_v57, %s7638_s27  ;;  %v1621_v57 = vld [vmem:[#allocation2 + $0x4d8] sm:$0xff] }
 0x5c8   : > { %4318 = vrot.lane.b32.xlu1 %v1589_v49, %s7631_s20  ;;  %v1716_v49 = vld [vmem:[#allocation2 + $0x932] sm:$0xff] }
 0x5c9   : > { %v11332_v53 = vpop.permute.xlu0 %4938 }
 0x5ca   : > { %v11330_v20 = vpop.permute.xlu1 %4432  ;;  %14141 = vst [vmem:[#allocation380_spill] sm:$0xff] %v11332_v53 }
 0x5cb   : > { %14140 = vst [vmem:[#allocation379_spill] sm:$0xff] %v11330_v20  ;;  %4700 = vrot.lane.b32.xlu0 %v1684_v1, %s7634_s23  ;;  %v1748_v1 = vld [vmem:[#allocation2 + $0xd86] sm:$0xff] }
 0x5cc   : > { %4826 = vrot.lane.b32.xlu1 %v1715_v4, %s7635_s24  ;;  %v1622_v4 = vld [vmem:[#allocation2 + $0x4e0] sm:$0xff] }
 0x5cd   : > { %v11338_v46 = vpop.permute.xlu0 %4558 }
 0x5ce   : > { %v11336_v19 = vpop.permute.xlu1 %4940  ;;  %14143 = vst [vmem:[#allocation382_spill] sm:$0xff] %v11338_v46 }
 0x5cf   : > { %14142 = vst [vmem:[#allocation381_spill] sm:$0xff] %v11336_v19  ;;  %5208 = vrot.lane.b32.xlu0 %v1811_v36, %s7638_s27 }
 0x5d0   : > { %4320 = vrot.lane.b32.xlu1 %v1590_v21, %s7631_s20  ;;  %v14148_v21 = vld [vmem:[#allocation4_spill] sm:$0xff] }
 0x5d1   : > { %v11344_v20 = vpop.permute.xlu0 %5066  ;;  %v6429_v36 = vsel %vm13530_vm0, %v14148_v21, 0.0  ;;  %v14154_v21 = vld [vmem:[#allocation8_spill] sm:$0xff] }
 0x5d2   : > { %v11342_v15 = vpop.permute.xlu1 %4560  ;;  %14145 = vst [vmem:[#allocation384_spill] sm:$0xff] %v11344_v20  ;;  %v14150_v20 = vld [vmem:[#allocation3_spill] sm:$0xff] }
 0x5d3   : > { %14144 = vst [vmem:[#allocation383_spill] sm:$0xff] %v11342_v15  ;;  %4446 = vrot.lane.b32.xlu0 %v1621_v57, %s7632_s21  ;;  %v14149_v15 = vld [vmem:[#allocation6_spill] sm:$0xff]  ;;  %v14151_v57 = vld [vmem:[#allocation5_spill] sm:$0xff] }
 0x5d4   : > { %4828 = vrot.lane.b32.xlu1 %v1716_v49, %s7635_s24  ;;  %v6430_v46 = vsel %vm13530_vm0, %v14149_v15, 0.0  ;;  %v6398_v49 = vsel %vm13530_vm0, %v14150_v20, 0.0  ;;  %v6399_v38 = vsel %vm13530_vm0, %v14151_v57, 0.0  ;;  %v6432_v15 = vsel %vm13530_vm0, %v14154_v21, 0.0  ;;  %v1780_v57 = vld [vmem:[#allocation2 + $0xd98] sm:$0xff] }
 0x5d5   : > { %v11350_v19 = vpop.permute.xlu0 %4686  ;;  %v6401_v20 = vsel %vm13530_vm0, %v14155_v31, 0.0 }
 0x5d6   : > { %v11348_v53 = vpop.permute.xlu1 %5068  ;;  %14147 = vst [vmem:[#allocation386_spill] sm:$0xff] %v11350_v19 }
 0x5d7   : > { %14146 = vst [vmem:[#allocation385_spill] sm:$0xff] %v11348_v53  ;;  %4954 = vrot.lane.b32.xlu0 %v1748_v1, %s7636_s25  ;;  %v1653_v53 = vld [vmem:[#allocation2 + $0x4ea] sm:$0xff]  ;;  %v6400_v1 = vadd.f32 %v6399_v38, %v6398_v49 }
 0x5d8   : > { %4448 = vrot.lane.b32.xlu1 %v1622_v4, %s7632_s21  ;;  %v6431_v4 = vadd.f32 %v6430_v46, %v6429_v36  ;;  %v14159_v38 = vld [vmem:[#allocation9_spill] sm:$0xff]  ;;  %v1781_v36 = vld [vmem:[#allocation2 + $0xda0] sm:$0xff] }
 0x5d9   : > { %v11364_v19 = vpop.permute.xlu0 %5194  ;;  %v6403_v46 = vsel %vm13530_vm0, %v14159_v38, 0.0  ;;  %v1685_v49 = vld [vmem:[#allocation2 + $0x946] sm:$0xff] }
 0x5da   : > { %v11362_v10 = vpop.permute.xlu1 %4306  ;;  %14153 = vst [vmem:[#allocation388_spill] sm:$0xff] %v11364_v19  ;;  %v6402_v19 = vadd.f32 %v6401_v20, %v6400_v1  ;;  %v1812_v1 = vld [vmem:[#allocation2 + $0xdaa] sm:$0xff] }
 0x5db   : > { %14152 = vst [vmem:[#allocation387_spill] sm:$0xff] %v11362_v10  ;;  %4574 = vrot.lane.b32.xlu0 %v1653_v53, %s7633_s22  ;;  %v6433_v10 = vadd.f32 %v6432_v15, %v6431_v4  ;;  %v14163_v15 = vld [vmem:[#allocation11_spill] sm:$0xff] }
 0x5dc   : > { %4956 = vrot.lane.b32.xlu1 %v1749_v32, %s7636_s25  ;;  %v14158_v32 = vld [vmem:[#allocation10_spill] sm:$0xff]  ;;  %v1591_v4 = vld [vmem:[#allocation2 + $0x506] sm:$0xff] }
 0x5dd   : > { %v11374_v5 = vpop.permute.xlu0 %4688  ;;  %v6434_v53 = vsel %vm13530_vm0, %v14158_v32, 0.0 }
 0x5de   : > { %v11372_v61 = vpop.permute.xlu1 %4814  ;;  %14157 = vst [vmem:[#allocation390_spill] sm:$0xff] %v11374_v5  ;;  %v6404_v5 = vadd.f32 %v6403_v46, %v6402_v19 }
 0x5df   : > { %14156 = vst [vmem:[#allocation389_spill] sm:$0xff] %v11372_v61  ;;  %5082 = vrot.lane.b32.xlu0 %v1780_v57, %s7637_s26  ;;  %v6435_v61 = vadd.f32 %v6434_v53, %v6433_v10  ;;  %v6405_v57 = vsel %vm13530_vm0, %v14163_v15, 0.0  ;;  %v14166_v10 = vld [vmem:[#allocation14_spill] sm:$0xff]  ;;  %v14167_v53 = vld [vmem:[#allocation13_spill] sm:$0xff] }
 0x5e0   : > { %4576 = vrot.lane.b32.xlu1 %v1654_v0, %s7633_s22  ;;  %v14162_v0 = vld [vmem:[#allocation12_spill] sm:$0xff]  ;;  %v6438_v19 = vsel %vm13530_vm0, %v14166_v10, 0.0  ;;  %v6407_v46 = vsel %vm13530_vm0, %v14167_v53, 0.0 }
 0x5e1   : > { %v11384_v21 = vpop.permute.xlu0 %5196  ;;  %v6436_v20 = vsel %vm13530_vm0, %v14162_v0, 0.0 }
 0x5e2   : > { %v11382_v31 = vpop.permute.xlu1 %4308  ;;  %14161 = vst [vmem:[#allocation392_spill] sm:$0xff] %v11384_v21  ;;  %v6406_v21 = vadd.f32 %v6405_v57, %v6404_v5 }
 0x5e3   : > { %14160 = vst [vmem:[#allocation391_spill] sm:$0xff] %v11382_v31  ;;  %4702 = vrot.lane.b32.xlu0 %v1685_v49, %s7634_s23  ;;  %v6437_v31 = vadd.f32 %v6436_v20, %v6435_v61  ;;  %v1686_v49 = vld [vmem:[#allocation2 + $0x94e] sm:$0xff]  ;;  %v14171_v20 = vld [vmem:[#allocation15_spill] sm:$0xff] }
 0x5e4   : > { %5084 = vrot.lane.b32.xlu1 %v1781_v36, %s7637_s26  ;;  %v1717_v36 = vld [vmem:[#allocation2 + $0x96a] sm:$0xff]  ;;  %v6409_v57 = vsel %vm13530_vm0, %v14171_v20, 0.0 }
 0x5e5   : > { %v11394_v32 = vpop.permute.xlu0 %4434  ;;  %v14170_v61 = vld [vmem:[#allocation16_spill] sm:$0xff] }
 0x5e6   : > { %v11392_v38 = vpop.permute.xlu1 %4816  ;;  %14165 = vst [vmem:[#allocation394_spill] sm:$0xff] %v11394_v32  ;;  %v6408_v32 = vadd.f32 %v6407_v46, %v6406_v21  ;;  %v6440_v5 = vsel %vm13530_vm0, %v14170_v61, 0.0 }
 0x5e7   : > { %14164 = vst [vmem:[#allocation393_spill] sm:$0xff] %v11392_v38  ;;  %5210 = vrot.lane.b32.xlu0 %v1812_v1, %s7638_s27  ;;  %v6439_v38 = vadd.f32 %v6438_v19, %v6437_v31  ;;  %v1813_v1 = vld [vmem:[#allocation2 + $0xdb2] sm:$0xff] }
 0x5e8   : > { %4322 = vrot.lane.b32.xlu1 %v1591_v4, %s7631_s20  ;;  %v1592_v4 = vld [vmem:[#allocation2 + $0x50e] sm:$0xff]  ;;  %v14174_v31 = vld [vmem:[#allocation18_spill] sm:$0xff] }
 0x5e9   : > { %v11404_v0 = vpop.permute.xlu0 %4942  ;;  %v6442_v21 = vsel %vm13530_vm0, %v14174_v31, 0.0  ;;  %v14175_v19 = vld [vmem:[#allocation17_spill] sm:$0xff] }
 0x5ea   : > { %v11402_v15 = vpop.permute.xlu1 %4436  ;;  %14169 = vst [vmem:[#allocation396_spill] sm:$0xff] %v11404_v0  ;;  %v6410_v0 = vadd.f32 %v6409_v57, %v6408_v32  ;;  %v6411_v46 = vsel %vm13530_vm0, %v14175_v19, 0.0  ;;  %v6444_v32 = vsel %vm13530_vm0, %v8658_v26, 0.0  ;;  %v1750_v57 = vld [vmem:[#allocation2 + $0xdc6] sm:$0xff] }
 0x5eb   : > { %14168 = vst [vmem:[#allocation395_spill] sm:$0xff] %v11402_v15  ;;  %4704 = vrot.lane.b32.xlu0 %v1686_v49, %s7634_s23  ;;  %v6441_v15 = vadd.f32 %v6440_v5, %v6439_v38  ;;  %v1623_v49 = vld [vmem:[#allocation2 + $0x518] sm:$0xff]  ;;  %v6413_v38 = vsel %vm13530_vm0, %v8655_v25, 0.0  ;;  %v1624_v5 = vld [vmem:[#allocation2 + $0x520] sm:$0xff]  ;;  %v1655_v25 = vld [vmem:[#allocation2 + $0x52a] sm:$0xff] }
 0x5ec   : > { %4830 = vrot.lane.b32.xlu1 %v1717_v36, %s7635_s24  ;;  %v1718_v36 = vld [vmem:[#allocation2 + $0x972] sm:$0xff] }
 0x5ed   : > { %v11414_v53 = vpop.permute.xlu0 %4562 }
 0x5ee   : > { %v11412_v10 = vpop.permute.xlu1 %4944  ;;  %14173 = vst [vmem:[#allocation398_spill] sm:$0xff] %v11414_v53  ;;  %v6412_v53 = vadd.f32 %v6411_v46, %v6410_v0  ;;  %v14179_v0 = vld [vmem:[#allocation20_spill] sm:$0xff] }
 0x5ef   : > { %14172 = vst [vmem:[#allocation397_spill] sm:$0xff] %v11412_v10  ;;  %5212 = vrot.lane.b32.xlu0 %v1813_v1, %s7638_s27  ;;  %v6443_v10 = vadd.f32 %v6442_v21, %v6441_v15  ;;  %v6446_v15 = vsel %vm13530_vm0, %v14179_v0, 0.0  ;;  %v14180_v21 = vld [vmem:[#allocation19_spill] sm:$0xff]  ;;  %v1751_v46 = vld [vmem:[#allocation2 + $0xdce] sm:$0xff] }
 0x5f0   : > { %4324 = vrot.lane.b32.xlu1 %v1592_v4, %s7631_s20  ;;  %v6414_v19 = vadd.f32 %v6413_v38, %v6412_v53  ;;  %v6415_v26 = vsel %vm13530_vm0, %v14180_v21, 0.0 }
 0x5f1   : > { %v11424_v20 = vpop.permute.xlu0 %5070  ;;  %v6445_v31 = vadd.f32 %v6444_v32, %v6443_v10  ;;  %v14182_v10 = vld [vmem:[#allocation21_spill] sm:$0xff]  ;;  %v14183_v32 = vld [vmem:[#allocation22_spill] sm:$0xff] }
 0x5f2   : > { %v11422_v61 = vpop.permute.xlu1 %4564  ;;  %v6448_v53 = vsel %vm13530_vm0, %v14182_v10, 0.0  ;;  %v6417_v38 = vsel %vm13530_vm0, %v14183_v32, 0.0 }
 0x5f3   : > { %14176 = vst [vmem:[#allocation399_spill] sm:$0xff] %v11422_v61  ;;  %4450 = vrot.lane.b32.xlu0 %v1623_v49, %s7632_s21  ;;  %v6447_v61 = vadd.f32 %v6446_v15, %v6445_v31  ;;  %v14186_v31 = vld [vmem:[#allocation23_spill] sm:$0xff]  ;;  %v14187_v15 = vld [vmem:[#allocation24_spill] sm:$0xff] }
 0x5f4   : > { %4832 = vrot.lane.b32.xlu1 %v1718_v36, %s7635_s24 }
 0x5f5   : > { %v11434_v1 = vpop.permute.xlu0 %4690 }
 0x5f6   : > { %v11432_v4 = vpop.permute.xlu1 %5072  ;;  %14178 = vst [vmem:[#allocation401_spill] sm:$0xff] %v11434_v1  ;;  %v6416_v1 = vadd.f32 %v6415_v26, %v6414_v19  ;;  %v6450_v19 = vsel %vm13530_vm0, %v14186_v31, 0.0  ;;  %v6419_v26 = vsel %vm13530_vm0, %v14187_v15, 0.0 }
 0x5f7   : > { %14177 = vst [vmem:[#allocation400_spill] sm:$0xff] %v11432_v4  ;;  %4958 = vrot.lane.b32.xlu0 %v1750_v57, %s7636_s25  ;;  %v1782_v57 = vld [vmem:[#allocation2 + $0xdd8] sm:$0xff] }
 0x5f8   : > { %4452 = vrot.lane.b32.xlu1 %v1624_v5, %s7632_s21  ;;  %v1656_v5 = vld [vmem:[#allocation2 + $0x532] sm:$0xff]  ;;  %v6418_v4 = vadd.f32 %v6417_v38, %v6416_v1 }
 0x5f9   : > { %v11444_v49 = vpop.permute.xlu0 %5198 }
 0x5fa   : > { %v11442_v36 = vpop.permute.xlu1 %4310 }
 0x5fb   : > { %14181 = vst [vmem:[#allocation20_spill] sm:$0xff] %v11442_v36  ;;  %4578 = vrot.lane.b32.xlu0 %v1655_v25, %s7633_s22  ;;  %v6449_v36 = vadd.f32 %v6448_v53, %v6447_v61  ;;  %v1687_v25 = vld [vmem:[#allocation2 + $0x986] sm:$0xff]  ;;  %v14190_v61 = vld [vmem:[#allocation25_spill] sm:$0xff]  ;;  %v14191_v53 = vld [vmem:[#allocation26_spill] sm:$0xff] }
 0x5fc   : > { %4960 = vrot.lane.b32.xlu1 %v1751_v46, %s7636_s25  ;;  %v1783_v46 = vld [vmem:[#allocation2 + $0xde0] sm:$0xff]  ;;  %v6452_v1 = vsel %vm13530_vm0, %v14190_v61, 0.0  ;;  %v6421_v38 = vsel %vm13530_vm0, %v14191_v53, 0.0 }
 0x5fd   : > { %v11454_v21 = vpop.permute.xlu0 %4692 }
 0x5fe   : > { %v11452_v0 = vpop.permute.xlu1 %4818  ;;  %14185 = vst [vmem:[#allocation21_spill] sm:$0xff] %v11454_v21  ;;  %v6420_v21 = vadd.f32 %v6419_v26, %v6418_v4  ;;  %v14194_v4 = vld [vmem:[#allocation27_spill] sm:$0xff] }
 0x5ff   : > { %14184 = vst [vmem:[#allocation19_spill] sm:$0xff] %v11452_v0  ;;  %5086 = vrot.lane.b32.xlu0 %v1782_v57, %s7637_s26  ;;  %v6451_v0 = vadd.f32 %v6450_v19, %v6449_v36  ;;  %v1814_v57 = vld [vmem:[#allocation2 + $0xdea] sm:$0xff]  ;;  %v6454_v36 = vsel %vm13530_vm0, %v14194_v4, 0.0 }
 0x600   : > { %4580 = vrot.lane.b32.xlu1 %v1656_v5, %s7633_s22  ;;  %v1593_v5 = vld [vmem:[#allocation2 + $0x546] sm:$0xff] }
 0x601   : > { %v11464_v32 = vpop.permute.xlu0 %5200  ;;  %v14195_v19 = vld [vmem:[#allocation28_spill] sm:$0xff] }
 0x602   : > { %v11462_v10 = vpop.permute.xlu1 %4312  ;;  %14189 = vst [vmem:[#allocation23_spill] sm:$0xff] %v11464_v32  ;;  %v6422_v32 = vadd.f32 %v6421_v38, %v6420_v21  ;;  %v6423_v26 = vsel %vm13530_vm0, %v14195_v19, 0.0  ;;  %v6425_v21 = vsel %vm13530_vm0, %v13835_v40, 0.0  ;;  %v1815_v38 = vld [vmem:[#allocation2 + $0xdf2] sm:$0xff] }
 0x603   : > { %14188 = vst [vmem:[#allocation22_spill] sm:$0xff] %v11462_v10  ;;  %4706 = vrot.lane.b32.xlu0 %v1687_v25, %s7634_s23  ;;  %v6453_v10 = vadd.f32 %v6452_v1, %v6451_v0  ;;  %v1688_v25 = vld [vmem:[#allocation2 + $0x98e] sm:$0xff]  ;;  %v6456_v0 = vsel %vm13530_vm0, %v13833_v43, 0.0  ;;  %v6427_v43 = vsel %vm13530_vm0, %v13839_v28, 0.0  ;;  %v1625_v40 = vld [vmem:[#allocation2 + $0x558] sm:$0xff]  ;;  %v5675_v28 = vld [vmem:[%s13454_s1] sm:$0xff] }
 0x604   : > { %5088 = vrot.lane.b32.xlu1 %v1783_v46, %s7637_s26  ;;  %v1719_v46 = vld [vmem:[#allocation2 + $0x9aa] sm:$0xff] }
 0x605   : > { %v11474_v15 = vpop.permute.xlu0 %4438  ;;  %v1594_v1 = vld [vmem:[#allocation2 + $0x54e] sm:$0xff] }
 0x606   : > { %v11472_v31 = vpop.permute.xlu1 %4820  ;;  %14193 = vst [vmem:[#allocation25_spill] sm:$0xff] %v11474_v15  ;;  %v6424_v15 = vadd.f32 %v6423_v26, %v6422_v32 }
 0x607   : > { %14192 = vst [vmem:[#allocation24_spill] sm:$0xff] %v11472_v31  ;;  %5214 = vrot.lane.b32.xlu0 %v1814_v57, %s7638_s27  ;;  %v6455_v31 = vadd.f32 %v6454_v36, %v6453_v10  ;;  %v14197_v10 = vld [vmem:[#allocation31_spill] sm:$0xff]  ;;  %v1720_v36 = vld [vmem:[#allocation2 + $0x9b2] sm:$0xff] }
 0x608   : > { %4326 = vrot.lane.b32.xlu1 %v1593_v5, %s7631_s20  ;;  %v6426_v19 = vadd.f32 %v6425_v21, %v6424_v15  ;;  %v6458_v32 = vsel %vm13530_vm0, %v14197_v10, 0.0  ;;  %v1752_v15 = vld [vmem:[#allocation2 + $0xe06] sm:$0xff]  ;;  %v1753_v10 = vld [vmem:[#allocation2 + $0xe0e] sm:$0xff] }
 0x609   : > { %v11484_v53 = vpop.permute.xlu0 %4946  ;;  %v6457_v4 = vadd.f32 %v6456_v0, %v6455_v31  ;;  %v1626_v31 = vld [vmem:[#allocation2 + $0x560] sm:$0xff] }
 0x60a   : > { %v11482_v61 = vpop.permute.xlu1 %4440 }
 0x60b   : > { %14196 = vst [vmem:[#allocation26_spill] sm:$0xff] %v11482_v61  ;;  %4708 = vrot.lane.b32.xlu0 %v1688_v25, %s7634_s23  ;;  %v6459_v25 = vadd.f32 %v6458_v32, %v6457_v4  ;;  %v6428_v61 = vadd.f32 %v6427_v43, %v6426_v19  ;;  %v1657_v32 = vld [vmem:[#allocation2 + $0x56a] sm:$0xff] }
 0x60c   : > { %4834 = vrot.lane.b32.xlu1 %v1719_v46, %s7635_s24 }
 0x60d   : > { %v11494_v57 = vpop.permute.xlu0 %4566  ;;  %v6460_v4 = vsel %vm13530_vm0, %v6428_v61, 0.0  ;;  %v5678_v61 = vld [vmem:[%s13454_s1 + $0x18] sm:$0xff] }
 0x60e   : > { %v11492_v5 = vpop.permute.xlu1 %4948 }
 0x60f   : > { %5216 = vrot.lane.b32.xlu0 %v1815_v38, %s7638_s27  ;;  %v6461_v38 = vsel %vm13530_vm0, %v6459_v25, 0.0  ;;  %v5677_v25 = vld [vmem:[%s13454_s1 + $0x10] sm:$0xff] }
 0x610   : > { %4328 = vrot.lane.b32.xlu1 %v1594_v1, %s7631_s20  ;;  %v5676_v1 = vld [vmem:[%s13454_s1 + $0x8] sm:$0xff]  ;;  %s7646_s20 = smov 60  }
 0x611   : > { %v11504_v46 = vpop.permute.xlu0 %5074  ;;  %v7424_v19 = vpack.c.bf16 %v5676_v1, %v5675_v28  ;;  %v1784_v28 = vld [vmem:[#allocation2 + $0xe18] sm:$0xff] }
 0x612   : > { %v11502_v26 = vpop.permute.xlu1 %4568 }
 0x613   : > { %14198 = vst [vmem:[#allocation27_spill] sm:$0xff] %v11502_v26  ;;  %4454 = vrot.lane.b32.xlu0 %v1625_v40, %s7632_s21  ;;  %7425 = vmatprep.subr.bf16.mxu0 %v7424_v19  ;;  %v6462_v40 = vadd.f32 %v6461_v38, %v6460_v4  ;;  %v5679_v4 = vld [vmem:[%s13454_s1 + $0x20] sm:$0xff] }
 0x614   : > { %4836 = vrot.lane.b32.xlu1 %v1720_v36, %s7635_s24  ;;  %7427 = vmatpush3.bf16.msra.mxu0 %v7424_v19  ;;  %v5680_v19 = vld [vmem:[%s13454_s1 + $0x28] sm:$0xff] }
 0x615   : > { %v11510_v21 = vpop.permute.xlu0 %4694  ;;  %v6463_v38 = vrot.slane %v6462_v40, 4 }
 0x616   : > { %v11508_v0 = vpop.permute.xlu1 %5076  ;;  %14200 = vst [vmem:[#allocation31_spill] sm:$0xff] %v11510_v21  ;;  %v5683_v21 = vld [vmem:[%s13454_s1 + $0x40] sm:$0xff] }
 0x617   : > { %14199 = vst [vmem:[#allocation28_spill] sm:$0xff] %v11508_v0  ;;  %4962 = vrot.lane.b32.xlu0 %v1752_v15, %s7636_s25  ;;  %v1658_v15 = vld [vmem:[#allocation2 + $0x572] sm:$0xff] }
 0x618   : > { %4456 = vrot.lane.b32.xlu1 %v1626_v31, %s7632_s21  ;;  %v7428_v31 = vpack.c.bf16 %v5678_v61, %v5677_v25  ;;  %v7432_v25 = vpack.c.bf16 %v5680_v19, %v5679_v4  ;;  %v1690_v4 = vld [vmem:[#allocation2 + $0x9ce] sm:$0xff]  ;;  %s13353_s21 = scalar_lea.vmem %s13467_s14, %s7197_s16 }
 0x619   : > { %v11524_v36 = vpop.permute.xlu0 %5202  ;;  %v1816_v19 = vld [vmem:[#allocation2 + $0xe2a] sm:$0xff] }
 0x61a   : > { %v11522_v43 = vpop.permute.xlu1 %4314  ;;  %7429 = vmatprep.subr.bf16.mxu0 %v7428_v31 }
 0x61b   : > { %14201 = vst [vmem:[#allocation402_spill] sm:$0xff] %v11522_v43  ;;  %4582 = vrot.lane.b32.xlu0 %v1657_v32, %s7633_s22  ;;  %7431 = vmatpush3.bf16.msra.mxu0 %v7428_v31  ;;  %v1689_v32 = vld [vmem:[#allocation2 + $0x9c6] sm:$0xff]  ;;  %v5681_v31 = vld [vmem:[%s13454_s1 + $0x30] sm:$0xff] }
 0x61c   : > { %4964 = vrot.lane.b32.xlu1 %v1753_v10, %s7636_s25  ;;  %v1785_v10 = vld [vmem:[#allocation2 + $0xe20] sm:$0xff]  ;;  %7433 = vmatprep.subr.bf16.mxu0 %v7432_v25 }
 0x61d   : > { %v11536_v43 = vpop.permute.xlu0 %4696 }
 0x61e   : > { %v11534_v1 = vpop.permute.xlu1 %4822  ;;  %14203 = vst [vmem:[#allocation404_spill] sm:$0xff] %v11536_v43 }
 0x61f   : > { %14202 = vst [vmem:[#allocation403_spill] sm:$0xff] %v11534_v1  ;;  %5090 = vrot.lane.b32.xlu0 %v1784_v28, %s7637_s26  ;;  %v6464_v28 = vadd.f32 %v6463_v38, %v6462_v40  ;;  %7435 = vmatpush3.bf16.msra.mxu0 %v7432_v25  ;;  %v5684_v40 = vld [vmem:[%s13454_s1 + $0x48] sm:$0xff]  ;;  %v1817_v38 = vld [vmem:[#allocation2 + $0xe32] sm:$0xff] }
 0x620   : > { %4584 = vrot.lane.b32.xlu1 %v1658_v15, %s7633_s22  ;;  %v5682_v15 = vld [vmem:[%s13454_s1 + $0x38] sm:$0xff] }
 0x621   : > { %v11548_v43 = vpop.permute.xlu0 %5204  ;;  %v7436_v26 = vpack.c.bf16 %v5682_v15, %v5681_v31 }
 0x622   : > { %v11546_v61 = vpop.permute.xlu1 %4316  ;;  %14205 = vst [vmem:[#allocation406_spill] sm:$0xff] %v11548_v43 }
 0x623   : > { %14204 = vst [vmem:[#allocation405_spill] sm:$0xff] %v11546_v61  ;;  %4710 = vrot.lane.b32.xlu0 %v1689_v32, %s7634_s23  ;;  %v6465_v61 = vrot.slane %v6464_v28, 2  ;;  %7437 = vmatprep.subr.bf16.mxu0 %v7436_v26  ;;  %v7440_v32 = vpack.c.bf16 %v5684_v40, %v5683_v21  ;;  %v6470_v21 = vld [vmem:[%s13460_s7] sm:$0xf] }
 0x624   : > { %5092 = vrot.lane.b32.xlu1 %v1785_v10, %s7637_s26  ;;  %v1721_v10 = vld [vmem:[#allocation2 + $0x9ea] sm:$0xff]  ;;  %7439 = vmatpush3.bf16.msra.mxu0 %v7436_v26  ;;  %v5686_v26 = vld [vmem:[%s13454_s1 + $0x58] sm:$0xff] }
 0x625   : > { %v11560_v43 = vpop.permute.xlu0 %4442  ;;  %v6466_v0 = vadd.f32 %v6465_v61, %v6464_v28  ;;  %7441 = vmatprep.subr.bf16.mxu0 %v7440_v32  ;;  %v5685_v61 = vld [vmem:[%s13454_s1 + $0x50] sm:$0xff]  ;;  %7359 = vmatpush3.msk.msra.mxu1 %vm5792_vm13, %v6470_v21 }
 0x626   : > { %v11558_v1 = vpop.permute.xlu1 %4824  ;;  %v7444_v40 = vpack.c.bf16 %v5686_v26, %v5685_v61  ;;  %v1754_v61 = vld [vmem:[#allocation2 + $0xe46] sm:$0xff] }
 0x627   : > { %5218 = vrot.lane.b32.xlu0 %v1816_v19, %s7638_s27  ;;  %v6467_v25 = vrot.slane %v6466_v0, 1  ;;  %v1498_v19 = vld [vmem:[#allocation2 + $0x918] sm:$0xff] }
 0x628   : > { %4712 = vrot.lane.b32.xlu1 %v1690_v4, %s7634_s23  ;;  %v1722_v4 = vld [vmem:[#allocation2 + $0x9f2] sm:$0xff]  ;;  %7443 = vmatpush3.bf16.msra.mxu0 %v7440_v32  ;;  %v1499_v32 = vld [vmem:[#allocation2 + $0x920] sm:$0xff] }
 0x629   : > { %v11572_v15 = vpop.permute.xlu0 %4950  ;;  %v6468_v28 = vadd.f32 %v6467_v25, %v6466_v0  ;;  %7445 = vmatprep.subr.bf16.mxu0 %v7444_v40 }
 0x62a   : > { %v11570_v31 = vpop.permute.xlu1 %4444 }
 0x62b   : > { %14206 = vst [vmem:[#allocation407_spill] sm:$0xff] %v11570_v31  ;;  %4838 = vrot.lane.b32.xlu0 %v1721_v10, %s7635_s24  ;;  %v6469_v0 = vmul.f32 0.00390625, %v6468_v28  ;;  %v14208_v10 = vmov 0.0   ;;  %v5687_v28 = vld [vmem:[%s13454_s1 + $0x60] sm:$0xf] }
 0x62c   : > { %5220 = vrot.lane.b32.xlu1 %v1817_v38, %s7638_s27  ;;  %7360 = vmatprep.mubr.msk.f32.mxu1 %vm7645_vm14, %v14208_v10 }
 0x62d   : > { %v11588_v38 = vpop.permute.xlu0 %4570  ;;  %7363 = vmatprep.subr.mxu1 %v14208_v10  ;;  %7361 = vmatmul.mubr.msk.f32.vlgmr.msra.gmra.mrb[0].mxu1 %vm13530_vm0, %v6469_v0  ;;  %v7614_v0 = vld [vmem:[#allocation2 + $0x924] sm:$0xff] }
 0x62e   : > { %v11586_v25 = vpop.permute.xlu1 %4952  ;;  %14207 = vst [vmem:[#allocation408_spill] sm:$0xff] %v11588_v38  ;;  %7447 = vmatpush3.bf16.msra.mxu0 %v7444_v40  ;;  %7365 = vmatprep.mubr.msk.f32.mxu1 %vm7645_vm14, %v14208_v10  ;;  %v1786_v40 = vld [vmem:[#allocation2 + $0xe58] sm:$0xff]  ;;  %v1755_v38 = vld [vmem:[#allocation2 + $0xe4e] sm:$0xff]  ;;  %vm5642_vm14 = vcmask 523264  }
 0x62f   : > { %3644 = vrot.lane.b32.xlu0 %v1498_v19, %s7646_s20  ;;  %7308 = vmatprep.subr.msk.mxu0 %vm5792_vm13, %v5687_v28 }
 0x630   : > { %4840 = vrot.lane.b32.xlu1 %v1722_v4, %s7635_s24  ;;  %v5258_v4 = vsel %vm13530_vm0, %v7614_v0, %v10904_v54  ;;  %v1787_v0 = vld [vmem:[#allocation2 + $0xe60] sm:$0xff]  ;;  %s7647_s24 = smov 64  }
 0x631   : > { %v11601_v21 = vpop.permute.xlu0 %5078  ;;  %v5290_v19 = vsel %vm13529_vm1, %v5258_v4, %v10910_v29 }
 0x632   : > { %v11599_v26 = vpop.permute.xlu1 %4572  ;;  %7309 = vmatpush3.msk.msra.mxu0 %vm5792_vm13, %v5687_v28  ;;  %v5322_v10 = vsel %vm13528_vm2, %v5290_v19, %v10916_v35  ;;  %vm4201_vm13 = vcmask 490496  }
 0x633   : > { %14209 = vst [vmem:[#allocation409_spill] sm:$0xff] %v11599_v26  ;;  %4966 = vrot.lane.b32.xlu0 %v1754_v61, %s7636_s25  ;;  %v5354_v54 = vsel %vm3838_vm3, %v5322_v10, %v10922_v6 }
 0x634   : > { %3646 = vrot.lane.b32.xlu1 %v1499_v32, %s7646_s20  ;;  %v7615_v32 = vld [vmem:[#allocation2 + $0x92c] sm:$0xff]  ;;  %v5386_v29 = vsel %vm13527_vm4, %v5354_v54, %v10936_v8  ;;  %v1500_v54 = vld [vmem:[#allocation2 + $0x958] sm:$0xff] }
 0x635   : > { %v11615_v31 = vpop.permute.xlu0 %4698  ;;  %v5259_v61 = vsel %vm13530_vm0, %v7615_v32, %v10912_v24  ;;  %v5418_v28 = vsel %vm3904_vm5, %v5386_v29, %v10948_v60 }
 0x636   : > { %v11613_v26 = vpop.permute.xlu1 %5080  ;;  %v5291_v35 = vsel %vm13529_vm1, %v5259_v61, %v10918_v9  ;;  %v5450_v24 = vsel %vm3937_vm6, %v5418_v28, %v10960_v17 }
 0x637   : > { %4968 = vrot.lane.b32.xlu0 %v1755_v38, %s7636_s25  ;;  %v5323_v6 = vsel %vm13528_vm2, %v5291_v35, %v10924_v55  ;;  %v5482_v9 = vsel %vm3970_vm7, %v5450_v24, %v10972_v39  ;;  %v1818_v55 = vld [vmem:[#allocation2 + $0xe6a] sm:$0xff] }
 0x638   : > { %5094 = vrot.lane.b32.xlu1 %v1786_v40, %s7637_s26  ;;  %v5355_v38 = vsel %vm3838_vm3, %v5323_v6, %v10928_v11 }
 0x639   : > { %v11635_v8 = vpop.permute.xlu0 %5206  ;;  %v5387_v60 = vsel %vm13527_vm4, %v5355_v38, %v10940_v33  ;;  %v7616_v33 = vld [vmem:[#allocation2 + $0x964] sm:$0xff] }
 0x63a   : > { %v11633_v4 = vpop.permute.xlu1 %4318  ;;  %v5419_v17 = vsel %vm3904_vm5, %v5387_v60, %v10952_v12  ;;  %v5260_v10 = vsel %vm13530_vm0, %v7616_v33, %v10930_v16  ;;  %v7617_v16 = vld [vmem:[#allocation2 + $0x96c] sm:$0xff]  ;;  %v7618_v38 = vld [vmem:[#allocation2 + $0x9a4] sm:$0xff] }
 0x63b   : > { %5546 = vrot.lane.b32.xlu0 %v5482_v9, %s7647_s24  ;;  %v5451_v19 = vsel %vm3937_vm6, %v5419_v17, %v10964_v2  ;;  %v5292_v12 = vsel %vm13529_vm1, %v5260_v10, %v10942_v45  ;;  %v1819_v2 = vld [vmem:[#allocation2 + $0xe72] sm:$0xff]  ;;  %v5261_v35 = vsel %vm13530_vm0, %v7617_v16, %v10934_v47  ;;  %v14215_v16 = vld [vmem:[#allocation164_spill] sm:$0xff] }
 0x63c   : > { %5096 = vrot.lane.b32.xlu1 %v1787_v0, %s7637_s26  ;;  %v5483_v39 = vsel %vm3970_vm7, %v5451_v19, %v10984_v50  ;;  %v5324_v32 = vsel %vm13528_vm2, %v5292_v12, %v10954_v22  ;;  %v5293_v22 = vsel %vm13529_vm1, %v5261_v35, %v10946_v3  ;;  %v1501_v0 = vld [vmem:[#allocation2 + $0x960] sm:$0xff]  ;;  %v1502_v9 = vld [vmem:[#allocation2 + $0x998] sm:$0xff]  ;;  %v14211_v10 = vld [vmem:[#allocation137_spill] sm:$0xff] }
 0x63d   : > { %v11651_v11 = vpop.permute.xlu0 %4700  ;;  %v5356_v50 = vsel %vm3838_vm3, %v5324_v32, %v10966_v34  ;;  %v5325_v34 = vsel %vm13528_vm2, %v5293_v22, %v10958_v62  ;;  %v1503_v19 = vld [vmem:[#allocation2 + $0x9a0] sm:$0xff]  ;;  %v14213_v32 = vld [vmem:[#allocation136_spill] sm:$0xff] }
 0x63e   : > { %v11649_v40 = vpop.permute.xlu1 %4826  ;;  %v5388_v28 = vsel %vm13527_vm4, %v5356_v50, %v10976_v41  ;;  %v5357_v24 = vsel %vm3838_vm3, %v5325_v34, %v10978_v52  ;;  %v14214_v50 = vld [vmem:[#allocation253_spill] sm:$0xff] }
 0x63f   : > { %5222 = vrot.lane.b32.xlu0 %v1818_v55, %s7638_s27  ;;  %v5420_v45 = vsel %vm3904_vm5, %v5388_v28, %v10996_v27  ;;  %v5262_v27 = vsel %vm13530_vm0, %v7618_v38, %v10970_v44  ;;  %v5389_v62 = vsel %vm13527_vm4, %v5357_v24, %v10988_v23  ;;  %v7619_v55 = vld [vmem:[#allocation2 + $0x9ac] sm:$0xff]  ;;  %v14216_v28 = vld [vmem:[#allocation194_spill] sm:$0xff] }
 0x640   : > { %5548 = vrot.lane.b32.xlu1 %v5483_v39, %s7647_s24  ;;  %v5452_v47 = vsel %vm3937_vm6, %v5420_v45, %v11008_v51  ;;  %v5294_v51 = vsel %vm13529_vm1, %v5262_v27, %v10990_v58  ;;  %v5421_v52 = vsel %vm3904_vm5, %v5389_v62, %v11000_v14  ;;  %v5263_v14 = vsel %vm13530_vm0, %v7619_v55, %v10982_v37  ;;  %v14210_v39 = vld [vmem:[#allocation225_spill] sm:$0xff]  ;;  %v1504_v45 = vld [vmem:[#allocation2 + $0x9d8] sm:$0xff]  ;;  %v14219_v27 = vld [vmem:[#allocation255_spill] sm:$0xff] }
 0x641   : > { %v11665_v29 = vpop.permute.xlu0 %5208  ;;  %v5484_v3 = vsel %vm3970_vm7, %v5452_v47, %v11020_v30  ;;  %v5326_v30 = vsel %vm13528_vm2, %v5294_v51, %v11002_v48  ;;  %v5453_v44 = vsel %vm3937_vm6, %v5421_v52, %v11012_v13  ;;  %v5295_v13 = vsel %vm13529_vm1, %v5263_v14, %v10994_v42  ;;  %v14218_v47 = vld [vmem:[#allocation254_spill] sm:$0xff]  ;;  %v14223_v55 = vld [vmem:[#allocation165_spill] sm:$0xff] }
 0x642   : > { %v11663_v61 = vpop.permute.xlu1 %4320  ;;  %v5358_v17 = vsel %vm3838_vm3, %v5326_v30, %v11014_v59  ;;  %v5485_v58 = vsel %vm3970_vm7, %v5453_v44, %v11032_v56  ;;  %v5327_v56 = vsel %vm13528_vm2, %v5295_v13, %v11006_v18  ;;  %v14220_v51 = vld [vmem:[#allocation286_spill] sm:$0xff]  ;;  %v14221_v30 = vld [vmem:[#allocation252_spill] sm:$0xff] }
 0x643   : > { %5224 = vrot.lane.b32.xlu0 %v1819_v2, %s7638_s27  ;;  %v5390_v48 = vsel %vm13527_vm4, %v5358_v17, %v11024_v63  ;;  %v5359_v12 = vsel %vm3838_vm3, %v5327_v56, %v14211_v10  ;;  %v7620_v2 = vld [vmem:[#allocation2 + $0x9e4] sm:$0xff]  ;;  %v14222_v17 = vld [vmem:[#allocation281_spill] sm:$0xff] }
 0x644   : > { %3648 = vrot.lane.b32.xlu1 %v1500_v54, %s7646_s20  ;;  %v5422_v59 = vsel %vm3904_vm5, %v5390_v48, %v11044_v7  ;;  %v14212_v54 = vld [vmem:[#allocation284_spill] sm:$0xff]  ;;  %v5264_v7 = vsel %vm13530_vm0, %v7620_v2, %v14213_v32  ;;  %v5391_v18 = vsel %vm13527_vm4, %v5359_v12, %v14214_v50  ;;  %v14229_v50 = vld [vmem:[#allocation283_spill] sm:$0xff] }
 0x645   : > { %v11685_v41 = vpop.permute.xlu0 %4446  ;;  %v5454_v37 = vsel %vm3937_vm6, %v5422_v59, %v14210_v39  ;;  %v5296_v35 = vsel %vm13529_vm1, %v5264_v7, %v14215_v16  ;;  %v5423_v22 = vsel %vm3904_vm5, %v5391_v18, %v14216_v28  ;;  %v1538_v48 = vld [vmem:[#allocation2 + $0xa24] sm:$0xff]  ;;  %v1539_v28 = vld [vmem:[#allocation2 + $0xa2c] sm:$0xff] }
 0x646   : > { %v11683_v6 = vpop.permute.xlu1 %4828  ;;  %v5486_v42 = vsel %vm3970_vm7, %v5454_v37, %v14212_v54  ;;  %v5455_v24 = vsel %vm3937_vm6, %v5423_v22, %v14218_v47  ;;  %v14224_v13 = vld [vmem:[#allocation300_spill] sm:$0xff]  ;;  %v5266_v18 = vsel %vm13530_vm0, %v1538_v48, %v14229_v50  ;;  %v14230_v16 = vld [vmem:[#allocation291_spill] sm:$0xff]  ;;  %v14231_v22 = vld [vmem:[#allocation298_spill] sm:$0xff] }
 0x647   : > { %3650 = vrot.lane.b32.xlu0 %v1501_v0, %s7646_s20  ;;  %v14217_v0 = vld [vmem:[#allocation195_spill] sm:$0xff]  ;;  %v5487_v52 = vsel %vm3970_vm7, %v5455_v24, %v14220_v51  ;;  %v14225_v56 = vld [vmem:[#allocation224_spill] sm:$0xff]  ;;  %v1506_v47 = vld [vmem:[#allocation2 + $0xa18] sm:$0xff] }
 0x648   : > { %5550 = vrot.lane.b32.xlu1 %v5484_v3, %s7647_s24  ;;  %v5328_v34 = vsel %vm13528_vm2, %v5296_v35, %v14217_v0  ;;  %v14226_v37 = vld [vmem:[#allocation304_spill] sm:$0xff]  ;;  %v14232_v0 = vld [vmem:[#allocation301_spill] sm:$0xff]  ;;  %v14233_v24 = vld [vmem:[#allocation302_spill] sm:$0xff] }
 0x649   : > { %v11707_v23 = vpop.permute.xlu0 %4954  ;;  %v5360_v62 = vsel %vm3838_vm3, %v5328_v34, %v14219_v27  ;;  %v14228_v32 = vld [vmem:[#allocation308_spill] sm:$0xff]  ;;  %v14238_v48 = vld [vmem:[#allocation309_spill] sm:$0xff] }
 0x64a   : > { %v11705_v60 = vpop.permute.xlu1 %4448 }
 0x64b   : > { %5552 = vrot.lane.b32.xlu0 %v5485_v58, %s7647_s24  ;;  %v5392_v58 = vsel %vm13527_vm4, %v5360_v62, %v14222_v17  ;;  %v14234_v62 = vld [vmem:[#allocation305_spill] sm:$0xff]  ;;  %v14236_v17 = vld [vmem:[#allocation312_spill] sm:$0xff] }
 0x64c   : > { %3652 = vrot.lane.b32.xlu1 %v1502_v9, %s7646_s20  ;;  %v7621_v9 = vld [vmem:[#allocation2 + $0x9ec] sm:$0xff]  ;;  %v5424_v59 = vsel %vm3904_vm5, %v5392_v58, %v14224_v13 }
 0x64d   : > { %v11729_v63 = vpop.permute.xlu0 %4574  ;;  %v5265_v44 = vsel %vm13530_vm0, %v7621_v9, %v14221_v30  ;;  %v5456_v10 = vsel %vm3937_vm6, %v5424_v59, %v14226_v37  ;;  %v14235_v30 = vld [vmem:[#allocation306_spill] sm:$0xff]  ;;  %v14239_v59 = vld [vmem:[#allocation299_spill] sm:$0xff] }
 0x64e   : > { %v11727_v33 = vpop.permute.xlu1 %4956  ;;  %v5297_v14 = vsel %vm13529_vm1, %v5265_v44, %v14223_v55  ;;  %v5488_v7 = vsel %vm3970_vm7, %v5456_v10, %v14228_v32  ;;  %v14237_v55 = vld [vmem:[#allocation285_spill] sm:$0xff]  ;;  %v1507_v10 = vld [vmem:[#allocation2 + $0xa20] sm:$0xff]  ;;  %v14242_v32 = vld [vmem:[#allocation320_spill] sm:$0xff] }
 0x64f   : > { %3654 = vrot.lane.b32.xlu0 %v1503_v19, %s7646_s20  ;;  %v1505_v19 = vld [vmem:[#allocation2 + $0x9e0] sm:$0xff]  ;;  %v5329_v39 = vsel %vm13528_vm2, %v5297_v14, %v14225_v56  ;;  %v5267_v14 = vsel %vm13530_vm0, %v1539_v28, %v14237_v55  ;;  %v14244_v28 = vld [vmem:[#allocation324_spill] sm:$0xff]  ;;  %v14250_v55 = vld [vmem:[#allocation321_spill] sm:$0xff] }
 0x650   : > { %5554 = vrot.lane.b32.xlu1 %v5486_v42, %s7647_s24  ;;  %v14227_v42 = vld [vmem:[#allocation282_spill] sm:$0xff]  ;;  %v1540_v56 = vld [vmem:[#allocation2 + $0xa64] sm:$0xff] }
 0x651   : > { %v11751_v38 = vpop.permute.xlu0 %5082  ;;  %v5361_v2 = vsel %vm3838_vm3, %v5329_v39, %v14227_v42  ;;  %v14240_v39 = vld [vmem:[#allocation316_spill] sm:$0xff]  ;;  %v14241_v42 = vld [vmem:[#allocation303_spill] sm:$0xff] }
 0x652   : > { %v11749_v3 = vpop.permute.xlu1 %4576  ;;  %v5393_v35 = vsel %vm13527_vm4, %v5361_v2, %v14230_v16  ;;  %v14243_v16 = vld [vmem:[#allocation310_spill] sm:$0xff] }
 0x653   : > { %5556 = vrot.lane.b32.xlu0 %v5487_v52, %s7647_s24  ;;  %v5425_v34 = vsel %vm3904_vm5, %v5393_v35, %v14232_v0 }
 0x654   : > { %3656 = vrot.lane.b32.xlu1 %v1504_v45, %s7646_s20  ;;  %v5298_v45 = vsel %vm13529_vm1, %v5266_v18, %v14231_v22  ;;  %v5457_v51 = vsel %vm3937_vm6, %v5425_v34, %v14234_v62  ;;  %v14246_v34 = vld [vmem:[#allocation313_spill] sm:$0xff] }
 0x655   : > { %v11773_v54 = vpop.permute.xlu0 %4702  ;;  %v5330_v27 = vsel %vm13528_vm2, %v5298_v45, %v14233_v24  ;;  %v5489_v58 = vsel %vm3970_vm7, %v5457_v51, %v14236_v17  ;;  %v14245_v45 = vld [vmem:[#allocation307_spill] sm:$0xff]  ;;  %v1541_v24 = vld [vmem:[#allocation2 + $0xa6c] sm:$0xff]  ;;  %v14249_v17 = vld [vmem:[#allocation318_spill] sm:$0xff] }
 0x656   : > { %v11771_v12 = vpop.permute.xlu1 %5084  ;;  %v5362_v44 = vsel %vm3838_vm3, %v5330_v27, %v14235_v30  ;;  %v5268_v0 = vsel %vm13530_vm0, %v1540_v56, %v14245_v45  ;;  %v14247_v27 = vld [vmem:[#allocation314_spill] sm:$0xff]  ;;  %v14248_v51 = vld [vmem:[#allocation317_spill] sm:$0xff]  ;;  %v14252_v56 = vld [vmem:[#allocation328_spill] sm:$0xff] }
 0x657   : > { %3658 = vrot.lane.b32.xlu0 %v1505_v19, %s7646_s20  ;;  %v5394_v13 = vsel %vm13527_vm4, %v5362_v44, %v14238_v48  ;;  %v5299_v19 = vsel %vm13529_vm1, %v5267_v14, %v14239_v59  ;;  %v5300_v62 = vsel %vm13529_vm1, %v5268_v0, %v14247_v27  ;;  %v1508_v44 = vld [vmem:[#allocation2 + $0xa58] sm:$0xff]  ;;  %v14257_v45 = vld [vmem:[#allocation319_spill] sm:$0xff] }
 0x658   : > { %5558 = vrot.lane.b32.xlu1 %v5488_v7, %s7647_s24  ;;  %v5426_v37 = vsel %vm3904_vm5, %v5394_v13, %v14240_v39  ;;  %v5331_v2 = vsel %vm13528_vm2, %v5299_v19, %v14241_v42  ;;  %v14251_v59 = vld [vmem:[#allocation322_spill] sm:$0xff]  ;;  %v14254_v42 = vld [vmem:[#allocation325_spill] sm:$0xff] }
 0x659   : > { %v11795_v9 = vpop.permute.xlu0 %5210  ;;  %v5458_v7 = vsel %vm3937_vm6, %v5426_v37, %v14242_v32  ;;  %v5363_v35 = vsel %vm3838_vm3, %v5331_v2, %v14243_v16  ;;  %v14253_v37 = vld [vmem:[#allocation311_spill] sm:$0xff] }
 0x65a   : > { %v11793_v52 = vpop.permute.xlu1 %4322  ;;  %v5490_v22 = vsel %vm3970_vm7, %v5458_v7, %v14244_v28  ;;  %v14255_v32 = vld [vmem:[#allocation315_spill] sm:$0xff] }
 0x65b   : > { %5560 = vrot.lane.b32.xlu0 %v5489_v58, %s7647_s24  ;;  %v5332_v58 = vsel %vm13528_vm2, %v5300_v62, %v14249_v17  ;;  %v1542_v16 = vld [vmem:[#allocation2 + $0xaa4] sm:$0xff]  ;;  %v14259_v62 = vld [vmem:[#allocation326_spill] sm:$0xff] }
 0x65c   : > { %3660 = vrot.lane.b32.xlu1 %v1506_v47, %s7646_s20  ;;  %v5395_v47 = vsel %vm13527_vm4, %v5363_v35, %v14246_v34  ;;  %v5364_v19 = vsel %vm3838_vm3, %v5332_v58, %v14251_v59  ;;  %v14256_v35 = vld [vmem:[#allocation332_spill] sm:$0xff]  ;;  %v14261_v17 = vld [vmem:[#allocation323_spill] sm:$0xff] }
 0x65d   : > { %v11817_v18 = vpop.permute.xlu0 %4704  ;;  %v5427_v30 = vsel %vm3904_vm5, %v5395_v47, %v14248_v51  ;;  %v5396_v2 = vsel %vm13527_vm4, %v5364_v19, %v14254_v42  ;;  %v14258_v34 = vld [vmem:[#allocation336_spill] sm:$0xff]  ;;  %v5270_v58 = vsel %vm13530_vm0, %v1542_v16, %v14261_v17  ;;  %v14263_v19 = vld [vmem:[#allocation330_spill] sm:$0xff] }
 0x65e   : > { %v11815_v50 = vpop.permute.xlu1 %4830  ;;  %v5459_v14 = vsel %vm3937_vm6, %v5427_v30, %v14250_v55  ;;  %v5428_v28 = vsel %vm3904_vm5, %v5396_v2, %v14256_v35  ;;  %v14260_v30 = vld [vmem:[#allocation340_spill] sm:$0xff]  ;;  %v14262_v55 = vld [vmem:[#allocation329_spill] sm:$0xff]  ;;  %v14265_v42 = vld [vmem:[#allocation334_spill] sm:$0xff] }
 0x65f   : > { %3662 = vrot.lane.b32.xlu0 %v1507_v10, %s7646_s20  ;;  %v5491_v39 = vsel %vm3970_vm7, %v5459_v14, %v14252_v56  ;;  %v5269_v10 = vsel %vm13530_vm0, %v1541_v24, %v14253_v37  ;;  %v5460_v47 = vsel %vm3937_vm6, %v5428_v28, %v14258_v34  ;;  %v1543_v59 = vld [vmem:[#allocation2 + $0xaac] sm:$0xff]  ;;  %v5302_v56 = vsel %vm13529_vm1, %v5270_v58, %v14263_v19  ;;  %v14267_v28 = vld [vmem:[#allocation338_spill] sm:$0xff]  ;;  %v14269_v34 = vld [vmem:[#allocation327_spill] sm:$0xff] }
 0x660   : > { %5562 = vrot.lane.b32.xlu1 %v5490_v22, %s7647_s24  ;;  %v5301_v7 = vsel %vm13529_vm1, %v5269_v10, %v14255_v32  ;;  %v1509_v22 = vld [vmem:[#allocation2 + $0xa60] sm:$0xff]  ;;  %v1510_v10 = vld [vmem:[#allocation2 + $0xa98] sm:$0xff]  ;;  %v5334_v2 = vsel %vm13528_vm2, %v5302_v56, %v14265_v42  ;;  %v14266_v32 = vld [vmem:[#allocation337_spill] sm:$0xff] }
 0x661   : > { %v11839_v13 = vpop.permute.xlu0 %5212  ;;  %v5333_v0 = vsel %vm13528_vm2, %v5301_v7, %v14257_v45  ;;  %v14268_v45 = vld [vmem:[#allocation344_spill] sm:$0xff]  ;;  %v14273_v19 = vld [vmem:[#allocation335_spill] sm:$0xff] }
 0x662   : > { %v11837_v48 = vpop.permute.xlu1 %4324  ;;  %v5365_v51 = vsel %vm3838_vm3, %v5333_v0, %v14259_v62  ;;  %v14270_v62 = vld [vmem:[#allocation341_spill] sm:$0xff]  ;;  %v1544_v17 = vld [vmem:[#allocation2 + $0xae4] sm:$0xff] }
 0x663   : > { %5564 = vrot.lane.b32.xlu0 %v5491_v39, %s7647_s24  ;;  %v5397_v14 = vsel %vm13527_vm4, %v5365_v51, %v14262_v55  ;;  %v14264_v39 = vld [vmem:[#allocation333_spill] sm:$0xff]  ;;  %v14272_v58 = vld [vmem:[#allocation348_spill] sm:$0xff] }
 0x664   : > { %3664 = vrot.lane.b32.xlu1 %v1508_v44, %s7646_s20  ;;  %v5492_v44 = vsel %vm3970_vm7, %v5460_v47, %v14260_v30  ;;  %v5429_v37 = vsel %vm3904_vm5, %v5397_v14, %v14264_v39  ;;  %v5271_v47 = vsel %vm13530_vm0, %v1543_v59, %v14269_v34  ;;  %v14271_v30 = vld [vmem:[#allocation331_spill] sm:$0xff]  ;;  %v14274_v39 = vld [vmem:[#allocation352_spill] sm:$0xff] }
 0x665   : > { %v11861_v27 = vpop.permute.xlu0 %4450  ;;  %v5461_v7 = vsel %vm3937_vm6, %v5429_v37, %v14266_v32  ;;  %v1511_v14 = vld [vmem:[#allocation2 + $0xaa0] sm:$0xff]  ;;  %v14276_v32 = vld [vmem:[#allocation356_spill] sm:$0xff] }
 0x666   : > { %v11859_v24 = vpop.permute.xlu1 %4832  ;;  %v5493_v0 = vsel %vm3970_vm7, %v5461_v7, %v14268_v45  ;;  %v14278_v45 = vld [vmem:[#allocation345_spill] sm:$0xff] }
 0x667   : > { %3666 = vrot.lane.b32.xlu0 %v1509_v22, %s7646_s20  ;;  %v5366_v22 = vsel %vm3838_vm3, %v5334_v2, %v14267_v28  ;;  %v14277_v28 = vld [vmem:[#allocation339_spill] sm:$0xff]  ;;  %v1545_v34 = vld [vmem:[#allocation2 + $0xaec] sm:$0xff] }
 0x668   : > { %5566 = vrot.lane.b32.xlu1 %v5492_v44, %s7647_s24  ;;  %v5398_v51 = vsel %vm13527_vm4, %v5366_v22, %v14270_v62  ;;  %v5303_v44 = vsel %vm13529_vm1, %v5271_v47, %v14271_v30  ;;  %v5272_v22 = vsel %vm13530_vm0, %v1544_v17, %v14277_v28  ;;  %v14279_v47 = vld [vmem:[#allocation346_spill] sm:$0xff]  ;;  %v14286_v28 = vld [vmem:[#allocation357_spill] sm:$0xff] }
 0x669   : > { %v11883_v35 = vpop.permute.xlu0 %4958  ;;  %v5430_v55 = vsel %vm3904_vm5, %v5398_v51, %v14272_v58  ;;  %v5335_v56 = vsel %vm13528_vm2, %v5303_v44, %v14273_v19  ;;  %v5304_v62 = vsel %vm13529_vm1, %v5272_v22, %v14279_v47  ;;  %v14280_v51 = vld [vmem:[#allocation349_spill] sm:$0xff]  ;;  %v1512_v44 = vld [vmem:[#allocation2 + $0xad8] sm:$0xff]  ;;  %v1546_v47 = vld [vmem:[#allocation2 + $0xb24] sm:$0xff] }
 0x66a   : > { %v11881_v16 = vpop.permute.xlu1 %4452  ;;  %v5462_v59 = vsel %vm3937_vm6, %v5430_v55, %v14274_v39  ;;  %v14281_v58 = vld [vmem:[#allocation350_spill] sm:$0xff]  ;;  %v14282_v19 = vld [vmem:[#allocation353_spill] sm:$0xff] }
 0x66b   : > { %5568 = vrot.lane.b32.xlu0 %v5493_v0, %s7647_s24  ;;  %v5494_v7 = vsel %vm3970_vm7, %v5462_v59, %v14276_v32  ;;  %v5336_v55 = vsel %vm13528_vm2, %v5304_v62, %v14281_v58  ;;  %v14283_v59 = vld [vmem:[#allocation354_spill] sm:$0xff]  ;;  %v14285_v32 = vld [vmem:[#allocation343_spill] sm:$0xff]  ;;  %v14288_v62 = vld [vmem:[#allocation364_spill] sm:$0xff] }
 0x66c   : > { %3668 = vrot.lane.b32.xlu1 %v1510_v10, %s7646_s20  ;;  %v14275_v10 = vld [vmem:[#allocation342_spill] sm:$0xff]  ;;  %v14289_v58 = vld [vmem:[#allocation351_spill] sm:$0xff] }
 0x66d   : > { %v11905_v42 = vpop.permute.xlu0 %4578  ;;  %v5367_v2 = vsel %vm3838_vm3, %v5335_v56, %v14275_v10  ;;  %v14284_v10 = vld [vmem:[#allocation360_spill] sm:$0xff] }
 0x66e   : > { %v11903_v37 = vpop.permute.xlu1 %4960  ;;  %v5399_v0 = vsel %vm13527_vm4, %v5367_v2, %v14278_v45  ;;  %v14287_v45 = vld [vmem:[#allocation347_spill] sm:$0xff] }
 0x66f   : > { %3670 = vrot.lane.b32.xlu0 %v1511_v14, %s7646_s20  ;;  %v5431_v30 = vsel %vm3904_vm5, %v5399_v0, %v14280_v51  ;;  %v5368_v14 = vsel %vm3838_vm3, %v5336_v55, %v14283_v59 }
 0x670   : > { %5570 = vrot.lane.b32.xlu1 %v5494_v7, %s7647_s24  ;;  %v5463_v17 = vsel %vm3937_vm6, %v5431_v30, %v14282_v19  ;;  %v5273_v7 = vsel %vm13530_vm0, %v1545_v34, %v14285_v32  ;;  %v5400_v22 = vsel %vm13527_vm4, %v5368_v14, %v14286_v28  ;;  %v1513_v30 = vld [vmem:[#allocation2 + $0xae0] sm:$0xff]  ;;  %v14290_v19 = vld [vmem:[#allocation368_spill] sm:$0xff]  ;;  %v14295_v28 = vld [vmem:[#allocation361_spill] sm:$0xff] }
 0x671   : > { %v11927_v39 = vpop.permute.xlu0 %5086  ;;  %v5495_v2 = vsel %vm3970_vm7, %v5463_v17, %v14284_v10  ;;  %v5305_v0 = vsel %vm13529_vm1, %v5273_v7, %v14287_v45  ;;  %v5432_v51 = vsel %vm3904_vm5, %v5400_v22, %v14288_v62  ;;  %v14293_v10 = vld [vmem:[#allocation372_spill] sm:$0xff]  ;;  %v14294_v32 = vld [vmem:[#allocation355_spill] sm:$0xff] }
 0x672   : > { %v11925_v56 = vpop.permute.xlu1 %4580  ;;  %v5337_v55 = vsel %vm13528_vm2, %v5305_v0, %v14289_v58  ;;  %v5464_v34 = vsel %vm3937_vm6, %v5432_v51, %v14290_v19  ;;  %v5274_v7 = vsel %vm13530_vm0, %v1546_v47, %v14294_v32  ;;  %v1547_v45 = vld [vmem:[#allocation2 + $0xb2c] sm:$0xff]  ;;  %v14296_v0 = vld [vmem:[#allocation362_spill] sm:$0xff] }
 0x673   : > { %5572 = vrot.lane.b32.xlu0 %v5495_v2, %s7647_s24  ;;  %v5496_v2 = vsel %vm3970_vm7, %v5464_v34, %v14293_v10  ;;  %v5306_v62 = vsel %vm13529_vm1, %v5274_v7, %v14296_v0  ;;  %v14297_v51 = vld [vmem:[#allocation365_spill] sm:$0xff]  ;;  %v14298_v19 = vld [vmem:[#allocation366_spill] sm:$0xff]  ;;  %v14302_v32 = vld [vmem:[#allocation376_spill] sm:$0xff] }
 0x674   : > { %3672 = vrot.lane.b32.xlu1 %v1512_v44, %s7646_s20  ;;  %v14292_v44 = vld [vmem:[#allocation358_spill] sm:$0xff]  ;;  %v5338_v34 = vsel %vm13528_vm2, %v5306_v62, %v14298_v19  ;;  %v14304_v0 = vld [vmem:[#allocation373_spill] sm:$0xff]  ;;  %v14305_v62 = vld [vmem:[#allocation363_spill] sm:$0xff] }
 0x675   : > { %v11949_v59 = vpop.permute.xlu0 %4706  ;;  %v5369_v14 = vsel %vm3838_vm3, %v5337_v55, %v14292_v44  ;;  %v1514_v55 = vld [vmem:[#allocation2 + $0xb18] sm:$0xff]  ;;  %v14299_v44 = vld [vmem:[#allocation369_spill] sm:$0xff]  ;;  %v1548_v19 = vld [vmem:[#allocation2 + $0xb64] sm:$0xff] }
 0x676   : > { %v11947_v17 = vpop.permute.xlu1 %5088  ;;  %14291 = vst [vmem:[#allocation225_spill] sm:$0xff] %v11949_v59  ;;  %v5401_v22 = vsel %vm13527_vm4, %v5369_v14, %v14295_v28  ;;  %v14303_v28 = vld [vmem:[#allocation359_spill] sm:$0xff] }
 0x677   : > { %3674 = vrot.lane.b32.xlu0 %v1513_v30, %s7646_s20  ;;  %v5433_v58 = vsel %vm3904_vm5, %v5401_v22, %v14297_v51  ;;  %v5275_v22 = vsel %vm13530_vm0, %v1547_v45, %v14303_v28 }
 0x678   : > { %5574 = vrot.lane.b32.xlu1 %v5496_v2, %s7647_s24  ;;  %v5465_v47 = vsel %vm3937_vm6, %v5433_v58, %v14299_v44  ;;  %v14301_v2 = vld [vmem:[#allocation370_spill] sm:$0xff]  ;;  %v5307_v58 = vsel %vm13529_vm1, %v5275_v22, %v14305_v62  ;;  %v14306_v44 = vld [vmem:[#allocation380_spill] sm:$0xff]  ;;  %v14313_v62 = vld [vmem:[#allocation371_spill] sm:$0xff] }
 0x679   : > { %v11971_v14 = vpop.permute.xlu0 %5214  ;;  %v5370_v30 = vsel %vm3838_vm3, %v5338_v34, %v14301_v2  ;;  %v5497_v7 = vsel %vm3970_vm7, %v5465_v47, %v14302_v32  ;;  %v1515_v2 = vld [vmem:[#allocation2 + $0xb20] sm:$0xff]  ;;  %v14308_v32 = vld [vmem:[#allocation384_spill] sm:$0xff] }
 0x67a   : > { %v11969_v10 = vpop.permute.xlu1 %4326  ;;  %v5402_v51 = vsel %vm13527_vm4, %v5370_v30, %v14304_v0  ;;  %v14312_v0 = vld [vmem:[#allocation388_spill] sm:$0xff] }
 0x67b   : > { %14300 = vst [vmem:[#allocation137_spill] sm:$0xff] %v11969_v10  ;;  %5576 = vrot.lane.b32.xlu0 %v5497_v7, %s7647_s24  ;;  %v5434_v34 = vsel %vm3904_vm5, %v5402_v51, %v14306_v44  ;;  %v14307_v10 = vld [vmem:[#allocation367_spill] sm:$0xff]  ;;  %v5276_v51 = vsel %vm13530_vm0, %v1548_v19, %v14313_v62  ;;  %v14314_v44 = vld [vmem:[#allocation377_spill] sm:$0xff] }
 0x67c   : > { %3676 = vrot.lane.b32.xlu1 %v1514_v55, %s7646_s20  ;;  %v5339_v47 = vsel %vm13528_vm2, %v5307_v58, %v14307_v10  ;;  %v5466_v45 = vsel %vm3937_vm6, %v5434_v34, %v14308_v32  ;;  %v14311_v55 = vld [vmem:[#allocation374_spill] sm:$0xff]  ;;  %v1549_v10 = vld [vmem:[#allocation2 + $0xb6c] sm:$0xff] }
 0x67d   : > { %v11993_v30 = vpop.permute.xlu0 %4708  ;;  %v5371_v7 = vsel %vm3838_vm3, %v5339_v47, %v14311_v55  ;;  %v5498_v22 = vsel %vm3970_vm7, %v5466_v45, %v14312_v0  ;;  %v14315_v58 = vld [vmem:[#allocation378_spill] sm:$0xff]  ;;  %v14316_v32 = vld [vmem:[#allocation381_spill] sm:$0xff] }
 0x67e   : > { %v11991_v28 = vpop.permute.xlu1 %4834  ;;  %14310 = vst [vmem:[#allocation136_spill] sm:$0xff] %v11993_v30  ;;  %v5403_v59 = vsel %vm13527_vm4, %v5371_v7, %v14314_v44  ;;  %v5308_v34 = vsel %vm13529_vm1, %v5276_v51, %v14315_v58  ;;  %v1516_v55 = vld [vmem:[#allocation2 + $0xb58] sm:$0xff]  ;;  %v14318_v0 = vld [vmem:[#allocation385_spill] sm:$0xff]  ;;  %v14321_v44 = vld [vmem:[#allocation392_spill] sm:$0xff] }
 0x67f   : > { %14309 = vst [vmem:[#allocation284_spill] sm:$0xff] %v11991_v28  ;;  %3678 = vrot.lane.b32.xlu0 %v1515_v2, %s7646_s20  ;;  %v5435_v47 = vsel %vm3904_vm5, %v5403_v59, %v14316_v32  ;;  %v14317_v28 = vld [vmem:[#allocation382_spill] sm:$0xff]  ;;  %v14322_v58 = vld [vmem:[#allocation375_spill] sm:$0xff]  ;;  %v14323_v32 = vld [vmem:[#allocation389_spill] sm:$0xff] }
 0x680   : > { %5578 = vrot.lane.b32.xlu1 %v5498_v22, %s7647_s24  ;;  %v5340_v45 = vsel %vm13528_vm2, %v5308_v34, %v14317_v28  ;;  %v5467_v19 = vsel %vm3937_vm6, %v5435_v47, %v14318_v0  ;;  %v14320_v22 = vld [vmem:[#allocation386_spill] sm:$0xff]  ;;  %v5277_v59 = vsel %vm13530_vm0, %v1549_v10, %v14322_v58  ;;  %v14324_v28 = vld [vmem:[#allocation379_spill] sm:$0xff]  ;;  %v14325_v0 = vld [vmem:[#allocation396_spill] sm:$0xff] }
 0x681   : > { %v12015_v7 = vpop.permute.xlu0 %5216  ;;  %v5372_v2 = vsel %vm3838_vm3, %v5340_v45, %v14320_v22  ;;  %v5499_v51 = vsel %vm3970_vm7, %v5467_v19, %v14321_v44  ;;  %v5309_v34 = vsel %vm13529_vm1, %v5277_v59, %v14324_v28  ;;  %v1550_v47 = vld [vmem:[#allocation2 + $0xba4] sm:$0xff] }
 0x682   : > { %v12013_v62 = vpop.permute.xlu1 %4328  ;;  %v5404_v30 = vsel %vm13527_vm4, %v5372_v2, %v14323_v32  ;;  %v1517_v22 = vld [vmem:[#allocation2 + $0xb60] sm:$0xff]  ;;  %v14331_v32 = vld [vmem:[#allocation393_spill] sm:$0xff] }
 0x683   : > { %14319 = vst [vmem:[#allocation253_spill] sm:$0xff] %v12013_v62  ;;  %5580 = vrot.lane.b32.xlu0 %v5499_v51, %s7647_s24  ;;  %v5436_v45 = vsel %vm3904_vm5, %v5404_v30, %v14325_v0  ;;  %v14326_v62 = vld [vmem:[#allocation383_spill] sm:$0xff]  ;;  %v14333_v0 = vld [vmem:[#allocation397_spill] sm:$0xff] }
 0x684   : > { %3680 = vrot.lane.b32.xlu1 %v1516_v55, %s7646_s20  ;;  %v5341_v19 = vsel %vm13528_vm2, %v5309_v34, %v14326_v62  ;;  %v5468_v10 = vsel %vm3937_vm6, %v5436_v45, %v11424_v20  ;;  %v14329_v55 = vld [vmem:[#allocation390_spill] sm:$0xff]  ;;  %v14330_v59 = vld [vmem:[#allocation387_spill] sm:$0xff]  ;;  %v1551_v20 = vld [vmem:[#allocation2 + $0xbac] sm:$0xff] }
 0x685   : > { %v12037_v2 = vpop.permute.xlu0 %4454  ;;  %v5373_v51 = vsel %vm3838_vm3, %v5341_v19, %v14329_v55  ;;  %v5500_v58 = vsel %vm3970_vm7, %v5468_v10, %v11444_v49  ;;  %v5278_v30 = vsel %vm13530_vm0, %v1550_v47, %v14330_v59  ;;  %v14332_v62 = vld [vmem:[#allocation394_spill] sm:$0xff]  ;;  %v14335_v10 = vld [vmem:[#allocation400_spill] sm:$0xff] }
 0x686   : > { %v12035_v44 = vpop.permute.xlu1 %4836  ;;  %14328 = vst [vmem:[#allocation194_spill] sm:$0xff] %v12037_v2  ;;  %v5405_v28 = vsel %vm13527_vm4, %v5373_v51, %v14331_v32  ;;  %v5310_v34 = vsel %vm13529_vm1, %v5278_v30, %v14332_v62  ;;  %v1518_v19 = vld [vmem:[#allocation2 + $0xb98] sm:$0xff]  ;;  %v14339_v32 = vld [vmem:[#allocation23_spill] sm:$0xff] }
 0x687   : > { %14327 = vst [vmem:[#allocation164_spill] sm:$0xff] %v12035_v44  ;;  %3682 = vrot.lane.b32.xlu0 %v1517_v22, %s7646_s20  ;;  %v5437_v45 = vsel %vm3904_vm5, %v5405_v28, %v14333_v0  ;;  %v14334_v55 = vld [vmem:[#allocation398_spill] sm:$0xff]  ;;  %v14340_v62 = vld [vmem:[#allocation391_spill] sm:$0xff] }
 0x688   : > { %5582 = vrot.lane.b32.xlu1 %v5500_v58, %s7647_s24  ;;  %v5342_v49 = vsel %vm13528_vm2, %v5310_v34, %v14334_v55  ;;  %v5469_v47 = vsel %vm3937_vm6, %v5437_v45, %v14335_v10  ;;  %v14338_v58 = vld [vmem:[#allocation401_spill] sm:$0xff]  ;;  %v5279_v28 = vsel %vm13530_vm0, %v1551_v20, %v14340_v62  ;;  %v14341_v0 = vld [vmem:[#allocation19_spill] sm:$0xff] }
 0x689   : > { %v12059_v51 = vpop.permute.xlu0 %4962  ;;  %v5374_v22 = vsel %vm3838_vm3, %v5342_v49, %v14338_v58  ;;  %v5501_v30 = vsel %vm3970_vm7, %v5469_v47, %v14339_v32  ;;  %v14342_v34 = vld [vmem:[#allocation395_spill] sm:$0xff] }
 0x68a   : > { %v12057_v59 = vpop.permute.xlu1 %4456  ;;  %14337 = vst [vmem:[#allocation254_spill] sm:$0xff] %v12059_v51  ;;  %v5406_v2 = vsel %vm13527_vm4, %v5374_v22, %v14341_v0  ;;  %v5311_v45 = vsel %vm13529_vm1, %v5279_v28, %v14342_v34  ;;  %v1552_v55 = vld [vmem:[#allocation2 + $0xbe4] sm:$0xff]  ;;  %v14350_v34 = vld [vmem:[#allocation5_spill] sm:$0xff] }
 0x68b   : > { %14336 = vst [vmem:[#allocation195_spill] sm:$0xff] %v12057_v59  ;;  %5584 = vrot.lane.b32.xlu0 %v5501_v30, %s7647_s24  ;;  %v5438_v49 = vsel %vm3904_vm5, %v5406_v2, %v11484_v53  ;;  %v1519_v10 = vld [vmem:[#allocation2 + $0xba0] sm:$0xff]  ;;  %v14347_v28 = vld [vmem:[#allocation20_spill] sm:$0xff]  ;;  %v14361_v59 = vld [vmem:[#allocation37_spill] sm:$0xff] }
 0x68c   : > { %3684 = vrot.lane.b32.xlu1 %v1518_v19, %s7646_s20  ;;  %v14343_v58 = vld [vmem:[#allocation399_spill] sm:$0xff]  ;;  %v5470_v20 = vsel %vm3937_vm6, %v5438_v49, %v11504_v46  ;;  %v14346_v19 = vld [vmem:[#allocation21_spill] sm:$0xff]  ;;  %v5280_v53 = vsel %vm13530_vm0, %v1552_v55, %v14347_v28  ;;  %v14348_v2 = vld [vmem:[#allocation24_spill] sm:$0xff] }
 0x68d   : > { %v5343_v47 = vsel %vm13528_vm2, %v5311_v45, %v14343_v58  ;;  %v12081_v22 = vpop.permute.xlu0 %4582  ;;  %v5502_v62 = vsel %vm3970_vm7, %v5470_v20, %v11524_v36  ;;  %v14349_v46 = vld [vmem:[#allocation33_spill] sm:$0xff]  ;;  %v1520_v20 = vld [vmem:[#allocation2 + $0xbd8] sm:$0xff]  ;;  %v14354_v28 = vld [vmem:[#allocation35_spill] sm:$0xff] }
 0x68e   : > { %v12079_v32 = vpop.permute.xlu1 %4964  ;;  %14345 = vst [vmem:[#allocation286_spill] sm:$0xff] %v12081_v22  ;;  %v5375_v30 = vsel %vm3838_vm3, %v5343_v47, %v14346_v19  ;;  %v3742_v45 = vsel %vm13530_vm0, %v14350_v34, %v14349_v46  ;;  %v1553_v49 = vld [vmem:[#allocation2 + $0xbec] sm:$0xff]  ;;  %v14352_v55 = vld [vmem:[#allocation34_spill] sm:$0xff]  ;;  %v14353_v19 = vld [vmem:[#allocation3_spill] sm:$0xff] }
 0x68f   : > { %14344 = vst [vmem:[#allocation255_spill] sm:$0xff] %v12079_v32  ;;  %v5407_v0 = vsel %vm13527_vm4, %v5375_v30, %v14348_v2  ;;  %3686 = vrot.lane.b32.xlu0 %v1519_v10, %s7646_s20  ;;  %v14351_v58 = vld [vmem:[#allocation25_spill] sm:$0xff]  ;;  %v3740_v30 = vsel %vm13530_vm0, %v14353_v19, %v14352_v55  ;;  %v14356_v46 = vld [vmem:[#allocation28_spill] sm:$0xff]  ;;  %v14363_v32 = vld [vmem:[#allocation31_spill] sm:$0xff] }
 0x690   : > { %5586 = vrot.lane.b32.xlu1 %v5502_v62, %s7647_s24  ;;  %v5312_v47 = vsel %vm13529_vm1, %v5280_v53, %v14351_v58  ;;  %v5439_v36 = vsel %vm3904_vm5, %v5407_v0, %v11492_v5  ;;  %v14355_v62 = vld [vmem:[#allocation6_spill] sm:$0xff]  ;;  %v14359_v5 = vld [vmem:[#allocation36_spill] sm:$0xff]  ;;  %v14368_v51 = vld [vmem:[#allocation403_spill] sm:$0xff] }
 0x691   : > { %v3743_v10 = vsel %vm13530_vm0, %v14355_v62, %v14354_v28  ;;  %v5344_v2 = vsel %vm13528_vm2, %v5312_v47, %v11494_v57  ;;  %v5471_v34 = vsel %vm3937_vm6, %v5439_v36, %v14356_v46  ;;  %v12112_v53 = vpop.permute.xlu0 %5090  ;;  %v14360_v0 = vld [vmem:[#allocation4_spill] sm:$0xff]  ;;  %v14364_v62 = vld [vmem:[#allocation406_spill] sm:$0xff]  ;;  %v14366_v36 = vld [vmem:[#allocation7_spill] sm:$0xff] }
 0x692   : > { %v12110_v22 = vpop.permute.xlu1 %4584  ;;  %14358 = vst [vmem:[#allocation281_spill] sm:$0xff] %v12112_v53  ;;  %v3741_v58 = vsel %vm13530_vm0, %v14360_v0, %v14359_v5  ;;  %v14362_v55 = vld [vmem:[#allocation8_spill] sm:$0xff]  ;;  %v5376_v28 = vsel %vm3838_vm3, %v5344_v2, %v14363_v32  ;;  %v5503_v57 = vsel %vm3970_vm7, %v5471_v34, %v14364_v62  ;;  %v14365_v47 = vld [vmem:[#allocation38_spill] sm:$0xff]  ;;  %v14372_v34 = vld [vmem:[#allocation9_spill] sm:$0xff] }
 0x693   : > { %14357 = vst [vmem:[#allocation252_spill] sm:$0xff] %v12110_v22  ;;  %v3745_v19 = vsel %vm13530_vm0, %v14362_v55, %v14361_v59  ;;  %v3744_v46 = vsel %vm13530_vm0, %v14366_v36, %v14365_v47  ;;  %v14367_v22 = vld [vmem:[#allocation22_spill] sm:$0xff]  ;;  %v5408_v5 = vsel %vm13527_vm4, %v5376_v28, %v14368_v51  ;;  %5588 = vrot.lane.b32.xlu0 %v5503_v57, %s7647_s24  ;;  %v14369_v59 = vld [vmem:[#allocation39_spill] sm:$0xff]  ;;  %v14371_v2 = vld [vmem:[#allocation40_spill] sm:$0xff] }
 0x694   : > { %v5281_v53 = vsel %vm13530_vm0, %v1553_v49, %v14367_v22  ;;  %3688 = vrot.lane.b32.xlu1 %v1520_v20, %s7646_s20  ;;  %v14370_v0 = vld [vmem:[#allocation10_spill] sm:$0xff]  ;;  %v3746_v55 = vsel %vm13530_vm0, %v14372_v34, %v14371_v2  ;;  %v5440_v22 = vsel %vm3904_vm5, %v5408_v5, %v11572_v15  ;;  %v1521_v49 = vld [vmem:[#allocation2 + $0xbe0] sm:$0xff]  ;;  %v14374_v51 = vld [vmem:[#allocation41_spill] sm:$0xff] }
 0x695   : > { %v3747_v32 = vsel %vm13530_vm0, %v14370_v0, %v14369_v59  ;;  %v14373_v62 = vld [vmem:[#allocation26_spill] sm:$0xff]  ;;  %v14375_v28 = vld [vmem:[#allocation12_spill] sm:$0xff]  ;;  %v14378_v36 = vld [vmem:[#allocation11_spill] sm:$0xff]  ;;  %v5472_v2 = vsel %vm3937_vm6, %v5440_v22, %v11601_v21  ;;  %v12157_v34 = vpop.permute.xlu0 %4710 }
 0x696   : > { %v5313_v47 = vsel %vm13529_vm1, %v5281_v53, %v14373_v62  ;;  %v12146_v20 = vsel %vm13530_vm0, %v14375_v28, %v14374_v51  ;;  %v14377_v57 = vld [vmem:[#allocation42_spill] sm:$0xff]  ;;  %v14379_v0 = vld [vmem:[#allocation27_spill] sm:$0xff]  ;;  %v12155_v53 = vpop.permute.xlu1 %5092  ;;  %v14381_v62 = vld [vmem:[#allocation56_spill] sm:$0xff] }
 0x697   : > { %14376 = vst [vmem:[#allocation165_spill] sm:$0xff] %v12146_v20  ;;  %v3748_v59 = vsel %vm13530_vm0, %v14378_v36, %v14377_v57  ;;  %v5345_v44 = vsel %vm13528_vm2, %v5313_v47, %v14379_v0  ;;  %v14380_v15 = vld [vmem:[#allocation55_spill] sm:$0xff]  ;;  %v3773_v51 = vsel %vm13529_vm1, %v3740_v30, %v14381_v62  ;;  %v14382_v28 = vld [vmem:[#allocation404_spill] sm:$0xff]  ;;  %v5504_v57 = vsel %vm3970_vm7, %v5472_v2, %v11635_v8  ;;  %v14383_v47 = vld [vmem:[#allocation57_spill] sm:$0xff] }
 0x698   : > { %v3774_v5 = vsel %vm13529_vm1, %v3741_v58, %v14380_v15  ;;  %v5377_v20 = vsel %vm3838_vm3, %v5345_v44, %v14382_v28  ;;  %v3776_v36 = vsel %vm13529_vm1, %v3743_v10, %v14383_v47  ;;  %v14384_v21 = vld [vmem:[#allocation58_spill] sm:$0xff]  ;;  %5590 = vrot.lane.b32.xlu1 %v5504_v57, %s7647_s24  ;;  %3690 = vrot.lane.b32.xlu0 %v1521_v49, %s7646_s20  ;;  %v14385_v30 = vld [vmem:[#allocation59_spill] sm:$0xff]  ;;  %v14386_v44 = vld [vmem:[#allocation60_spill] sm:$0xff] }
 0x699   : > { %v3775_v22 = vsel %vm13529_vm1, %v3742_v45, %v14384_v21  ;;  %v5409_v0 = vsel %vm13527_vm4, %v5377_v20, %v11558_v1  ;;  %v3778_v58 = vsel %vm13529_vm1, %v3745_v19, %v14385_v30  ;;  %v3777_v15 = vsel %vm13529_vm1, %v3744_v46, %v14386_v44  ;;  %v14387_v8 = vld [vmem:[#allocation61_spill] sm:$0xff]  ;;  %v1554_v10 = vld [vmem:[#allocation2 + $0xc24] sm:$0xff]  ;;  %v14388_v1 = vld [vmem:[#allocation62_spill] sm:$0xff] }
 0x69a   : > { %v3780_v2 = vsel %vm13529_vm1, %v3747_v32, %v14387_v8  ;;  %v1555_v62 = vld [vmem:[#allocation2 + $0xc2c] sm:$0xff]  ;;  %v5441_v45 = vsel %vm3904_vm5, %v5409_v0, %v11586_v25  ;;  %v1491_v28 = vld [vmem:[#allocation2 + $0xc14] sm:$0xff]  ;;  %v3779_v20 = vsel %vm13529_vm1, %v3746_v55, %v14388_v1  ;;  %v14390_v47 = vld [vmem:[#allocation79_spill] sm:$0xff]  ;;  %v12191_v21 = vpop.permute.xlu1 %4712  ;;  %v12193_v32 = vpop.permute.xlu0 %5218 }
 0x69b   : > { %v14389_v57 = vld [vmem:[#allocation64_spill] sm:$0xff]  ;;  %v3807_v19 = vsel %vm13528_vm2, %v3774_v5, %v14390_v47  ;;  %v5473_v46 = vsel %vm3937_vm6, %v5441_v45, %v11613_v26  ;;  %v14392_v0 = vld [vmem:[#allocation81_spill] sm:$0xff]  ;;  %v14393_v55 = vld [vmem:[#allocation82_spill] sm:$0xff] }
 0x69c   : > { %v3781_v49 = vsel %vm13529_vm1, %v3748_v59, %v14389_v57  ;;  %v14391_v30 = vld [vmem:[#allocation80_spill] sm:$0xff]  ;;  %v3809_v44 = vsel %vm13528_vm2, %v3776_v36, %v14392_v0  ;;  %v3808_v8 = vsel %vm13528_vm2, %v3775_v22, %v14393_v55  ;;  %v5505_v59 = vsel %vm3970_vm7, %v5473_v46, %v11665_v29  ;;  %v14394_v5 = vld [vmem:[#allocation83_spill] sm:$0xff]  ;;  %v14395_v26 = vld [vmem:[#allocation402_spill] sm:$0xff]  ;;  %3566 = vrot.lane.b32.xlu1 %v1491_v28, %s7644_s28 }
 0x69d   : > { %v3806_v25 = vsel %vm13528_vm2, %v3773_v51, %v14391_v30  ;;  %v3811_v1 = vsel %vm13528_vm2, %v3778_v58, %v14394_v5  ;;  %v5282_v45 = vsel %vm13530_vm0, %v1554_v10, %v14395_v26  ;;  %v14396_v57 = vld [vmem:[#allocation405_spill] sm:$0xff]  ;;  %5592 = vrot.lane.b32.xlu0 %v5505_v59, %s7647_s24  ;;  %v14397_v51 = vld [vmem:[#allocation84_spill] sm:$0xff]  ;;  %v14399_v58 = vld [vmem:[#allocation407_spill] sm:$0xff] }
 0x69e   : > { %v5283_v47 = vsel %vm13530_vm0, %v1555_v62, %v14396_v57  ;;  %v3810_v36 = vsel %vm13528_vm2, %v3777_v15, %v14397_v51  ;;  %v14398_v22 = vld [vmem:[#allocation85_spill] sm:$0xff]  ;;  %v5314_v29 = vsel %vm13529_vm1, %v5282_v45, %v11560_v43  ;;  %v1523_v10 = vld [vmem:[#allocation2 + $0xc20] sm:$0xff]  ;;  %v1522_v0 = vld [vmem:[#allocation2 + $0xc18] sm:$0xff]  ;;  %v12227_v57 = vpop.permute.xlu1 %5220  ;;  %v12229_v43 = vpop.permute.xlu0 %4838 }
 0x69f   : > { %v3813_v30 = vsel %vm13528_vm2, %v3780_v2, %v14398_v22  ;;  %v5315_v46 = vsel %vm13529_vm1, %v5283_v47, %v14399_v58  ;;  %v14400_v55 = vld [vmem:[#allocation86_spill] sm:$0xff]  ;;  %v14401_v28 = vld [vmem:[#allocation88_spill] sm:$0xff]  ;;  %v14403_v26 = vld [vmem:[#allocation409_spill] sm:$0xff] }
 0x6a0   : > { %v3812_v62 = vsel %vm13528_vm2, %v3779_v20, %v14400_v55  ;;  %v3814_v59 = vsel %vm13528_vm2, %v3781_v49, %v14401_v28  ;;  %v14402_v5 = vld [vmem:[#allocation408_spill] sm:$0xff]  ;;  %v5347_v2 = vsel %vm13528_vm2, %v5315_v46, %v14403_v26  ;;  %v14404_v45 = vld [vmem:[#allocation110_spill] sm:$0xff]  ;;  %v14405_v51 = vld [vmem:[#allocation111_spill] sm:$0xff]  ;;  %3694 = vrot.lane.b32.xlu1 %v1523_v10, %s7646_s20 }
 0x6a1   : > { %v5346_v15 = vsel %vm13528_vm2, %v5314_v29, %v14402_v5  ;;  %v3840_v47 = vsel %vm3838_vm3, %v3807_v19, %v14404_v45  ;;  %v3839_v22 = vsel %vm3838_vm3, %v3806_v25, %v14405_v51  ;;  %v5379_v49 = vsel %vm3838_vm3, %v5347_v2, %v11651_v11  ;;  %v14406_v29 = vld [vmem:[#allocation112_spill] sm:$0xff]  ;;  %3692 = vrot.lane.b32.xlu0 %v1522_v0, %s7646_s20  ;;  %v14407_v19 = vld [vmem:[#allocation113_spill] sm:$0xff]  ;;  %v14412_v2 = vld [vmem:[#allocation138_spill] sm:$0xff] }
 0x6a2   : > { %v5378_v20 = vsel %vm3838_vm3, %v5346_v15, %v11615_v31  ;;  %v3842_v58 = vsel %vm3838_vm3, %v3809_v44, %v14406_v29  ;;  %v5411_v55 = vsel %vm13527_vm4, %v5379_v49, %v11683_v6  ;;  %v3841_v25 = vsel %vm3838_vm3, %v3808_v8, %v14407_v19  ;;  %v14408_v31 = vld [vmem:[#allocation114_spill] sm:$0xff]  ;;  %v14410_v6 = vld [vmem:[#allocation116_spill] sm:$0xff]  ;;  %v12263_v15 = vpop.permute.xlu1 %4840  ;;  %v14411_v26 = vld [vmem:[#allocation117_spill] sm:$0xff] }
 0x6a3   : > { %v5410_v46 = vsel %vm13527_vm4, %v5378_v20, %v11649_v40  ;;  %v3844_v28 = vsel %vm3838_vm3, %v3811_v1, %v14408_v31  ;;  %v5443_v44 = vsel %vm3904_vm5, %v5411_v55, %v11727_v33  ;;  %v14409_v40 = vld [vmem:[#allocation115_spill] sm:$0xff]  ;;  %v3846_v10 = vsel %vm3838_vm3, %v3813_v30, %v14410_v6  ;;  %v3645_v1 = vpop.permute.xlu0 %3644  ;;  %v14415_v20 = vld [vmem:[#allocation166_spill] sm:$0xff]  ;;  %v14417_v29 = vld [vmem:[#allocation141_spill] sm:$0xff] }
 0x6a4   : > { %v5442_v11 = vsel %vm3904_vm5, %v5410_v46, %v11707_v23  ;;  %v3843_v5 = vsel %vm3838_vm3, %v3810_v36, %v14409_v40  ;;  %v5475_v8 = vsel %vm3937_vm6, %v5443_v44, %v11771_v12  ;;  %v3845_v23 = vsel %vm3838_vm3, %v3812_v62, %v14411_v26  ;;  %v14413_v45 = vld [vmem:[#allocation119_spill] sm:$0xff]  ;;  %v14419_v55 = vld [vmem:[#allocation196_spill] sm:$0xff]  ;;  %v14420_v44 = vld [vmem:[#allocation142_spill] sm:$0xff] }
 0x6a5   : > { %v5474_v0 = vsel %vm3937_vm6, %v5442_v11, %v11751_v38  ;;  %v3873_v33 = vsel %vm13527_vm4, %v3840_v47, %v14412_v2  ;;  %v5507_v30 = vsel %vm3970_vm7, %v5475_v8, %v11839_v13  ;;  %v12275_v38 = vsel %vm3838_vm3, %v3814_v59, %v14413_v45  ;;  %v14414_v12 = vld [vmem:[#allocation139_spill] sm:$0xff]  ;;  %v14416_v47 = vld [vmem:[#allocation140_spill] sm:$0xff]  ;;  %v1493_v11 = vld [vmem:[#allocation2 + $0xc54] sm:$0xff] }
 0x6a6   : > { %v5506_v36 = vsel %vm3970_vm7, %v5474_v0, %v11795_v9  ;;  %v3872_v51 = vsel %vm13527_vm4, %v3839_v22, %v14414_v12  ;;  %v3906_v49 = vsel %vm3904_vm5, %v3873_v33, %v14415_v20  ;;  %v1556_v62 = vld [vmem:[#allocation2 + $0xc64] sm:$0xff]  ;;  %5596 = vrot.lane.b32.xlu1 %v5507_v30, %s7647_s24  ;;  %v3875_v9 = vsel %vm13527_vm4, %v3842_v58, %v14416_v47  ;;  %v1557_v19 = vld [vmem:[#allocation2 + $0xc6c] sm:$0xff]  ;;  %v14423_v26 = vld [vmem:[#allocation226_spill] sm:$0xff]  ;;  %v12299_v2 = vpop.permute.xlu1 %3646 }
 0x6a7   : > { %5594 = vrot.lane.b32.xlu0 %v5506_v36, %s7647_s24  ;;  %v3874_v13 = vsel %vm13527_vm4, %v3841_v25, %v14417_v29  ;;  %v14418_v46 = vld [vmem:[#allocation167_spill] sm:$0xff]  ;;  %v3939_v22 = vsel %vm3937_vm6, %v3906_v49, %v14419_v55  ;;  %v1492_v31 = vld [vmem:[#allocation2 + $0xc4c] sm:$0xff]  ;;  %v3877_v40 = vsel %vm13527_vm4, %v3844_v28, %v14420_v44  ;;  %v12301_v33 = vpop.permute.xlu0 %4966  ;;  %v5284_v29 = vsel %vm13530_vm0, %v1556_v62, %v11633_v4  ;;  %v1524_v4 = vld [vmem:[#allocation2 + $0xc58] sm:$0xff] }
 0x6a8   : > { %v3905_v59 = vsel %vm3904_vm5, %v3872_v51, %v14418_v46  ;;  %v14421_v6 = vld [vmem:[#allocation143_spill] sm:$0xff]  ;;  %v14422_v8 = vld [vmem:[#allocation197_spill] sm:$0xff]  ;;  %v3972_v25 = vsel %vm3970_vm7, %v3939_v22, %v14423_v26  ;;  %v14424_v36 = vld [vmem:[#allocation144_spill] sm:$0xff]  ;;  %v5285_v46 = vsel %vm13530_vm0, %v1557_v19, %v11663_v61  ;;  %v5316_v22 = vsel %vm13529_vm1, %v5284_v29, %v11685_v41 }
 0x6a9   : > { %v3876_v0 = vsel %vm13527_vm4, %v3843_v5, %v14421_v6  ;;  %v3938_v58 = vsel %vm3937_vm6, %v3905_v59, %v14422_v8  ;;  %v3879_v30 = vsel %vm13527_vm4, %v3846_v10, %v14424_v36  ;;  %v14425_v45 = vld [vmem:[#allocation145_spill] sm:$0xff]  ;;  %v14426_v28 = vld [vmem:[#allocation227_spill] sm:$0xff]  ;;  %v14427_v5 = vld [vmem:[#allocation256_spill] sm:$0xff]  ;;  %v5317_v44 = vsel %vm13529_vm1, %v5285_v46, %v11705_v60 }
 0x6aa   : > { %v3878_v12 = vsel %vm13527_vm4, %v3845_v23, %v14425_v45  ;;  %v3971_v51 = vsel %vm3970_vm7, %v3938_v58, %v14426_v28  ;;  %v4005_v20 = vsel %vm13531_vm8, %v3972_v25, %v14427_v5  ;;  %v14428_v49 = vld [vmem:[#allocation257_spill] sm:$0xff]  ;;  %3570 = vrot.lane.b32.xlu1 %v1493_v11, %s7644_s28  ;;  %v14429_v10 = vld [vmem:[#allocation287_spill] sm:$0xff]  ;;  %v14430_v59 = vld [vmem:[#allocation288_spill] sm:$0xff]  ;;  %v5348_v19 = vsel %vm13528_vm2, %v5316_v22, %v11729_v63  ;;  %v12333_v11 = vpop.permute.xlu1 %5094 }
 0x6ab   : > { %v4004_v47 = vsel %vm13531_vm8, %v3971_v51, %v14428_v49  ;;  %3568 = vrot.lane.b32.xlu0 %v1492_v31, %s7644_s28  ;;  %v4038_v23 = vsel %vm4036_vm9, %v4005_v20, %v14429_v10  ;;  %v1525_v62 = vld [vmem:[#allocation2 + $0xc60] sm:$0xff]  ;;  %v14431_v6 = vld [vmem:[#allocation54_spill] sm:$0xff]  ;;  %v5349_v31 = vsel %vm13528_vm2, %v5317_v44, %v11749_v3  ;;  %v12335_v8 = vpop.permute.xlu0 %4968  ;;  %v14432_v41 = vld [vmem:[#allocation101_spill] sm:$0xff]  ;;  %v5380_v60 = vsel %vm3838_vm3, %v5348_v19, %v11773_v54 }
 0x6ac   : > { %v4037_v55 = vsel %vm4036_vm9, %v4004_v47, %v14430_v59  ;;  %v5381_v26 = vsel %vm3838_vm3, %v5349_v31, %v11817_v18  ;;  %v14433_v25 = vld [vmem:[#allocation184_spill] sm:$0xff]  ;;  %v5412_v3 = vsel %vm13527_vm4, %v5380_v60, %v11815_v50  ;;  %v14434_v45 = vld [vmem:[#allocation53_spill] sm:$0xff]  ;;  %v14445_v60 = vld [vmem:[#allocation198_spill] sm:$0xff] }
 0x6ad   : > { %v4070_v61 = vsel %vm4069_vm10, %v4037_v55, %v14431_v6  ;;  %v5413_v36 = vsel %vm13527_vm4, %v5381_v26, %v11859_v24  ;;  %v4071_v54 = vsel %vm4069_vm10, %v4038_v23, %v14434_v45  ;;  %v14435_v28 = vld [vmem:[#allocation133_spill] sm:$0xff]  ;;  %v5444_v51 = vsel %vm3904_vm5, %v5412_v3, %v11883_v35  ;;  %v14436_v29 = vld [vmem:[#allocation100_spill] sm:$0xff]  ;;  %v14446_v26 = vld [vmem:[#allocation199_spill] sm:$0xff] }
 0x6ae   : > { %v4103_v58 = vsel %vm4102_vm11, %v4070_v61, %v14432_v41  ;;  %3698 = vrot.lane.b32.xlu1 %v1525_v62, %s7646_s20  ;;  %v5445_v50 = vsel %vm3904_vm5, %v5413_v36, %v11903_v37  ;;  %v5476_v24 = vsel %vm3937_vm6, %v5444_v51, %v11927_v39  ;;  %v12364_v49 = vpop.permute.xlu1 %5096  ;;  %vm5695_vm4 = vcmask 818176   ;;  %v14437_v10 = vld [vmem:[#allocation168_spill] sm:$0xff]  ;;  %v14438_v23 = vld [vmem:[#allocation169_spill] sm:$0xff]  ;;  %v14450_v51 = vld [vmem:[#allocation259_spill] sm:$0xff] }
 0x6af   : > { %v4136_v63 = vsel %vm4135_vm12, %v4103_v58, %v14433_v25  ;;  %3696 = vrot.lane.b32.xlu0 %v1524_v4, %s7646_s20  ;;  %v5477_v5 = vsel %vm3937_vm6, %v5445_v50, %v11947_v17  ;;  %v5547_v47 = vpop.permute.xlu0 %5546  ;;  %v4104_v46 = vsel %vm4102_vm11, %v4071_v54, %v14436_v29  ;;  %v5508_v35 = vsel %vm3970_vm7, %v5476_v24, %v11971_v14  ;;  %v14439_v59 = vld [vmem:[#allocation273_spill] sm:$0xff]  ;;  %v1558_v22 = vld [vmem:[#allocation2 + $0xca4] sm:$0xff]  ;;  %v14440_v14 = vld [vmem:[#allocation170_spill] sm:$0xff] }
 0x6b0   : > { %v4169_v18 = vsel %vm4168_vm15, %v4136_v63, %v14435_v28  ;;  %v5509_v37 = vsel %vm3970_vm7, %v5477_v5, %v12015_v7  ;;  %v3908_v17 = vsel %vm3904_vm5, %v3875_v9, %v14437_v10  ;;  %v4137_v55 = vsel %vm4135_vm12, %v4104_v46, %v14439_v59  ;;  %v14441_v7 = vld [vmem:[#allocation171_spill] sm:$0xff]  ;;  %v14442_v62 = vld [vmem:[#allocation172_spill] sm:$0xff]  ;;  %v1495_v31 = vld [vmem:[#allocation2 + $0xc94] sm:$0xff] }
 0x6b1   : > { %v4202_v20 = vsel %vm4201_vm13, %v4169_v18, %v3645_v1  ;;  %v3907_v1 = vsel %vm3904_vm5, %v3874_v13, %v14438_v23  ;;  %v3910_v44 = vsel %vm3904_vm5, %v3877_v40, %v14440_v14  ;;  %v3909_v4 = vsel %vm3904_vm5, %v3876_v0, %v14441_v7  ;;  %v14443_v6 = vld [vmem:[#allocation132_spill] sm:$0xff]  ;;  %v14444_v41 = vld [vmem:[#allocation173_spill] sm:$0xff]  ;;  %v14454_v10 = vld [vmem:[#allocation71_spill] sm:$0xff] }
 0x6b2   : > { %v5643_v39 = vsel %vm5642_vm14, %v4202_v20, %v5547_v47  ;;  %5600 = vrot.lane.b32.xlu1 %v5509_v37, %s7647_s24  ;;  %v3912_v9 = vsel %vm3904_vm5, %v3879_v30, %v14442_v62  ;;  %v4170_v13 = vsel %vm4168_vm15, %v4137_v55, %v14443_v6  ;;  %v1559_v61 = vld [vmem:[#allocation2 + $0xcac] sm:$0xff]  ;;  %v3911_v58 = vsel %vm3904_vm5, %v3878_v12, %v14444_v41  ;;  %v5549_v25 = vpop.permute.xlu1 %5548  ;;  %v14452_v47 = vld [vmem:[#allocation290_spill] sm:$0xff]  ;;  %v14453_v37 = vld [vmem:[#allocation231_spill] sm:$0xff] }
 0x6b3   : > { %5598 = vrot.lane.b32.xlu0 %v5508_v35, %s7647_s24  ;;  %7310 = vmatprep.mubr.msk.f32.mxu0 %vm5695_vm4, %v5643_v39  ;;  %v1494_v19 = vld [vmem:[#allocation2 + $0xc8c] sm:$0xff]  ;;  %v3941_v40 = vsel %vm3937_vm6, %v3908_v17, %v14445_v60  ;;  %v3940_v0 = vsel %vm3937_vm6, %v3907_v1, %v14446_v26  ;;  %v4203_v30 = vsel %vm4201_vm13, %v4170_v13, %v12299_v2  ;;  %v12398_v63 = vpop.permute.xlu0 %5222  ;;  %v14466_v26 = vld [vmem:[#allocation254_spill] sm:$0xff] }
 0x6b4   : > { %v14447_v3 = vld [vmem:[#allocation200_spill] sm:$0xff]  ;;  %v14448_v45 = vld [vmem:[#allocation201_spill] sm:$0xff]  ;;  %v5644_v18 = vsel %vm5642_vm14, %v4203_v30, %v5549_v25  ;;  %v5286_v2 = vsel %vm13530_vm0, %v1558_v22, %v11793_v52  ;;  %v5287_v24 = vsel %vm13530_vm0, %v1559_v61, %v11837_v48  ;;  %v1526_v52 = vld [vmem:[#allocation2 + $0xc98] sm:$0xff] }
 0x6b5   : > { %v3943_v36 = vsel %vm3937_vm6, %v3910_v44, %v14447_v3  ;;  %v3942_v54 = vsel %vm3937_vm6, %v3909_v4, %v14448_v45  ;;  %v14449_v28 = vld [vmem:[#allocation229_spill] sm:$0xff]  ;;  %v14451_v5 = vld [vmem:[#allocation228_spill] sm:$0xff]  ;;  %v5318_v46 = vsel %vm13529_vm1, %v5286_v2, %v11861_v27  ;;  %v5319_v35 = vsel %vm13529_vm1, %v5287_v24, %v11881_v16  ;;  %7311 = vmatmul.mubr.msk.f32.vlgmr.msra.gmra.mrb[0].mxu0 %vm5695_vm4, %v5644_v18  ;;  %v1527_v48 = vld [vmem:[#allocation2 + $0xca0] sm:$0xff] }
 0x6b6   : > { %v3973_v12 = vsel %vm3970_vm7, %v3940_v0, %v14449_v28  ;;  %3574 = vrot.lane.b32.xlu1 %v1495_v31, %s7644_s28  ;;  %v3974_v20 = vsel %vm3970_vm7, %v3941_v40, %v14451_v5  ;;  %v3975_v39 = vsel %vm3970_vm7, %v3942_v54, %v14453_v37  ;;  %v5350_v23 = vsel %vm13528_vm2, %v5318_v46, %v11905_v42  ;;  %v3649_v27 = vpop.permute.xlu1 %3648  ;;  %v14455_v16 = vld [vmem:[#allocation258_spill] sm:$0xff]  ;;  %v14456_v22 = vld [vmem:[#allocation103_spill] sm:$0xff]  ;;  %v14457_v44 = vld [vmem:[#allocation225_spill] sm:$0xff] }
 0x6b7   : > { %v4006_v50 = vsel %vm13531_vm8, %v3973_v12, %v14450_v51  ;;  %3572 = vrot.lane.b32.xlu0 %v1494_v19, %s7644_s28  ;;  %v5351_v1 = vsel %vm13528_vm2, %v5319_v35, %v11925_v56  ;;  %v12432_v59 = vpop.permute.xlu0 %5224  ;;  %v4007_v55 = vsel %vm13531_vm8, %v3974_v20, %v14455_v16  ;;  %v5382_v7 = vsel %vm3838_vm3, %v5350_v23, %v14457_v44  ;;  %v14458_v4 = vld [vmem:[#allocation136_spill] sm:$0xff]  ;;  %v14459_v6 = vld [vmem:[#allocation105_spill] sm:$0xff]  ;;  %v14467_v30 = vld [vmem:[#allocation255_spill] sm:$0xff] }
 0x6b8   : > { %v4039_v29 = vsel %vm4036_vm9, %v4006_v50, %v14452_v47  ;;  %v5383_v62 = vsel %vm3838_vm3, %v5351_v1, %v14458_v4  ;;  %v14460_v13 = vld [vmem:[#allocation284_spill] sm:$0xff]  ;;  %vm14461_vm2 = vcmask 162816   ;;  %v14464_v31 = vld [vmem:[#allocation289_spill] sm:$0xff]  ;;  %v14470_v2 = vld [vmem:[#allocation102_spill] sm:$0xff] }
 0x6b9   : > { %v4072_v17 = vsel %vm4069_vm10, %v4039_v29, %v14454_v10  ;;  %v5414_v56 = vsel %vm14461_vm2, %v5382_v7, %v14460_v13  ;;  %v14462_v61 = vld [vmem:[#allocation164_spill] sm:$0xff]  ;;  %vm14463_vm1 = vmmov %vm14461_vm2  ;;  %v4040_v41 = vsel %vm4036_vm9, %v4007_v55, %v14464_v31  ;;  %v14465_v60 = vld [vmem:[#allocation249_spill] sm:$0xff] }
 0x6ba   : > { %v4105_v14 = vsel %vm4102_vm11, %v4072_v17, %v14456_v22  ;;  %v5415_v19 = vsel %vm14463_vm1, %v5383_v62, %v14462_v61  ;;  %3702 = vrot.lane.b32.xlu1 %v1527_v48, %s7646_s20  ;;  %v5446_v0 = vsel %vm3904_vm5, %v5414_v56, %v14466_v26  ;;  %v14468_v3 = vld [vmem:[#allocation32_spill] sm:$0xff]  ;;  %v14469_v54 = vld [vmem:[#allocation281_spill] sm:$0xff]  ;;  %v5551_v51 = vpop.permute.xlu1 %5550  ;;  %v14471_v29 = vld [vmem:[#allocation202_spill] sm:$0xff]  ;;  %vm14490_vm1 = vcmask 64512  }
 0x6bb   : > { %v4138_v42 = vsel %vm4135_vm12, %v4105_v14, %v14459_v6  ;;  %3700 = vrot.lane.b32.xlu0 %v1526_v52, %s7646_s20  ;;  %v5447_v25 = vsel %vm3904_vm5, %v5415_v19, %v14467_v30  ;;  %v4073_v45 = vsel %vm4069_vm10, %v4040_v41, %v14468_v3  ;;  %v5478_v28 = vsel %vm3937_vm6, %v5446_v0, %v14469_v54  ;;  %v3651_v50 = vpop.permute.xlu0 %3650  ;;  %v14472_v35 = vld [vmem:[#allocation261_spill] sm:$0xff]  ;;  %v1560_v37 = vld [vmem:[#allocation2 + $0xce4] sm:$0xff]  ;;  %vm14492_vm2 = vmmov %vm14490_vm1 }
 0x6bc   : > { %v4171_v40 = vsel %vm4168_vm15, %v4138_v42, %v14465_v60  ;;  %v5479_v12 = vsel %vm3937_vm6, %v5447_v25, %v12155_v53  ;;  %v4106_v24 = vsel %vm4102_vm11, %v4073_v45, %v14470_v2  ;;  %v5510_v5 = vsel %vm3970_vm7, %v5478_v28, %v12193_v32  ;;  %v14473_v52 = vld [vmem:[#allocation185_spill] sm:$0xff]  ;;  %v14474_v32 = vld [vmem:[#allocation203_spill] sm:$0xff]  ;;  %v14477_v1 = vld [vmem:[#allocation248_spill] sm:$0xff] }
 0x6bd   : > { %v4204_v18 = vsel %vm4201_vm13, %v4171_v40, %v3649_v27  ;;  %v5511_v20 = vsel %vm3970_vm7, %v5479_v12, %v12227_v57  ;;  %v3945_v46 = vsel %vm3937_vm6, %v3912_v9, %v14471_v29  ;;  %v4008_v53 = vsel %vm13531_vm8, %v3975_v39, %v14472_v35  ;;  %v14475_v57 = vld [vmem:[#allocation230_spill] sm:$0xff]  ;;  %v14476_v23 = vld [vmem:[#allocation293_spill] sm:$0xff]  ;;  %v14478_v22 = vld [vmem:[#allocation232_spill] sm:$0xff] }
 0x6be   : > { %v5645_v47 = vsel %vm5642_vm14, %v4204_v18, %v5551_v51  ;;  %v4139_v48 = vsel %vm4135_vm12, %v4106_v24, %v14473_v52  ;;  %5604 = vrot.lane.b32.xlu1 %v5511_v20, %s7647_s24  ;;  %v3944_v10 = vsel %vm3937_vm6, %v3911_v58, %v14474_v32  ;;  %v3976_v17 = vsel %vm3970_vm7, %v3943_v36, %v14475_v57  ;;  %v1561_v27 = vld [vmem:[#allocation2 + $0xcec] sm:$0xff]  ;;  %v1497_v16 = vld [vmem:[#allocation2 + $0xcd4] sm:$0xff]  ;;  %v3653_v62 = vpop.permute.xlu1 %3652  ;;  %v14482_v56 = vld [vmem:[#allocation263_spill] sm:$0xff] }
 0x6bf   : > { %5602 = vrot.lane.b32.xlu0 %v5510_v5, %s7647_s24  ;;  %v4041_v9 = vsel %vm4036_vm9, %v4008_v53, %v14476_v23  ;;  %v4172_v39 = vsel %vm4168_vm15, %v4139_v48, %v14477_v1  ;;  %7313 = vmatprep.mubr.msk.f32.mxu0 %vm5695_vm4, %v5645_v47  ;;  %v1496_v55 = vld [vmem:[#allocation2 + $0xccc] sm:$0xff]  ;;  %v3978_v14 = vsel %vm3970_vm7, %v3945_v46, %v14478_v22  ;;  %v5553_v6 = vpop.permute.xlu0 %5552  ;;  %v14483_v19 = vld [vmem:[#allocation183_spill] sm:$0xff]  ;;  %v14489_v12 = vld [vmem:[#allocation194_spill] sm:$0xff] }
 0x6c0   : > { %v14479_v44 = vld [vmem:[#allocation233_spill] sm:$0xff]  ;;  %v4205_v4 = vsel %vm4201_vm13, %v4172_v39, %v3651_v50  ;;  %v14481_v42 = vld [vmem:[#allocation260_spill] sm:$0xff]  ;;  %v14484_v60 = vld [vmem:[#allocation215_spill] sm:$0xff] }
 0x6c1   : > { %v3977_v58 = vsel %vm3970_vm7, %v3944_v10, %v14479_v44  ;;  %v14480_v7 = vld [vmem:[#allocation73_spill] sm:$0xff]  ;;  %v4009_v13 = vsel %vm13531_vm8, %v3976_v17, %v14481_v42  ;;  %v5646_v41 = vsel %vm5642_vm14, %v4205_v4, %v5553_v6  ;;  %v14487_v3 = vld [vmem:[#allocation292_spill] sm:$0xff]  ;;  %v14491_v51 = vld [vmem:[#allocation195_spill] sm:$0xff] }
 0x6c2   : > { %v4074_v36 = vsel %vm4069_vm10, %v4041_v9, %v14480_v7  ;;  %v4010_v61 = vsel %vm13531_vm8, %v3977_v58, %v14482_v56  ;;  %v14485_v26 = vld [vmem:[#allocation137_spill] sm:$0xff]  ;;  %3578 = vrot.lane.b32.xlu1 %v1497_v16, %s7644_s28  ;;  %v4042_v45 = vsel %vm4036_vm9, %v4009_v13, %v14487_v3  ;;  %7314 = vmatmul.mubr.msk.f32.gmra.mrb[2].mxu0 %vm5695_vm4, %v5646_v41  ;;  %v1529_v2 = vld [vmem:[#allocation2 + $0xce0] sm:$0xff]  ;;  %v1528_v24 = vld [vmem:[#allocation2 + $0xcd8] sm:$0xff]  ;;  %v5555_v52 = vpop.permute.xlu1 %5554 }
 0x6c3   : > { %v4107_v31 = vsel %vm4102_vm11, %v4074_v36, %v14483_v19  ;;  %v5288_v0 = vsel %vm13530_vm0, %v1560_v37, %v14485_v26  ;;  %v14486_v30 = vld [vmem:[#allocation253_spill] sm:$0xff]  ;;  %3576 = vrot.lane.b32.xlu0 %v1496_v55, %s7644_s28  ;;  %v14493_v5 = vld [vmem:[#allocation72_spill] sm:$0xff]  ;;  %v14494_v47 = vld [vmem:[#allocation286_spill] sm:$0xff]  ;;  %v3655_v48 = vpop.permute.xlu0 %3654 }
 0x6c4   : > { %v4140_v40 = vsel %vm4135_vm12, %v4107_v31, %v14484_v60  ;;  %v5289_v25 = vsel %vm13530_vm0, %v1561_v27, %v14486_v30  ;;  %v14488_v54 = vld [vmem:[#allocation161_spill] sm:$0xff]  ;;  %v5320_v18 = vsel %vm14490_vm1, %v5288_v0, %v14489_v12  ;;  %v4075_v20 = vsel %vm4069_vm10, %v4042_v45, %v14493_v5  ;;  %v14496_v46 = vld [vmem:[#allocation252_spill] sm:$0xff]  ;;  %v14498_v37 = vld [vmem:[#allocation182_spill] sm:$0xff] }
 0x6c5   : > { %v4173_v28 = vsel %vm4168_vm15, %v4140_v40, %v14488_v54  ;;  %v5321_v50 = vsel %vm14492_vm2, %v5289_v25, %v14491_v51  ;;  %vm14495_vm0 = vcmask 97280   ;;  %v4108_v32 = vsel %vm4102_vm11, %v4075_v20, %v14498_v37  ;;  %v14499_v23 = vld [vmem:[#allocation214_spill] sm:$0xff]  ;;  %v14502_v27 = vld [vmem:[#allocation295_spill] sm:$0xff]  ;;  %v14503_v16 = vld [vmem:[#allocation160_spill] sm:$0xff] }
 0x6c6   : > { %v5352_v29 = vsel %vm14495_vm0, %v5320_v18, %v14494_v47  ;;  %vm14497_vm8 = vmmov %vm14495_vm0  ;;  %v4206_v53 = vsel %vm4201_vm13, %v4173_v28, %v3653_v62  ;;  %v4141_v9 = vsel %vm4135_vm12, %v4108_v32, %v14499_v23  ;;  %vm14500_vm0 = vcmask 162816   ;;  %3706 = vrot.lane.b32.xlu1 %v1529_v2, %s7646_s20  ;;  %v3657_v36 = vpop.permute.xlu1 %3656  ;;  %v14505_v62 = vld [vmem:[#allocation212_spill] sm:$0xff]  ;;  %v14506_v13 = vld [vmem:[#allocation147_spill] sm:$0xff] }
 0x6c7   : > { %v5353_v35 = vsel %vm14497_vm8, %v5321_v50, %v14496_v46  ;;  %v5384_v10 = vsel %vm3838_vm3, %v5352_v29, %v12157_v34  ;;  %v5647_v17 = vsel %vm5642_vm14, %v4206_v53, %v5555_v52  ;;  %vm14501_vm8 = vmmov %vm14500_vm0  ;;  %3704 = vrot.lane.b32.xlu0 %v1528_v24, %s7646_s20  ;;  %v4043_v34 = vsel %vm4036_vm9, %v4010_v61, %v14502_v27  ;;  %v5557_v4 = vpop.permute.xlu0 %5556  ;;  %v14510_v61 = vld [vmem:[#allocation129_spill] sm:$0xff]  ;;  %v14514_v41 = vld [vmem:[#allocation175_spill] sm:$0xff] }
 0x6c8   : > { %v5385_v57 = vsel %vm3838_vm3, %v5353_v35, %v12191_v21  ;;  %v5416_v1 = vsel %vm14500_vm0, %v5384_v10, %v12229_v43  ;;  %v4174_v21 = vsel %vm4168_vm15, %v4141_v9, %v14503_v16  ;;  %7316 = vmatprep.mubr.msk.f32.mxu0 %vm5695_vm4, %v5647_v17  ;;  %v14504_v43 = vld [vmem:[#allocation75_spill] sm:$0xff]  ;;  %vm14507_vm1 = vmmov %vm14500_vm0  ;;  %vm14509_vm2 = vcmask 293888   ;;  %v14512_v31 = vld [vmem:[#allocation165_spill] sm:$0xff] }
 0x6c9   : > { %v5417_v39 = vsel %vm14501_vm8, %v5385_v57, %v12263_v15  ;;  %v5448_v55 = vsel %vm3904_vm5, %v5416_v1, %v12301_v33  ;;  %v4076_v15 = vsel %vm4069_vm10, %v4043_v34, %v14504_v43  ;;  %v4207_v7 = vsel %vm4201_vm13, %v4174_v21, %v3655_v48  ;;  %v14515_v40 = vld [vmem:[#allocation294_spill] sm:$0xff]  ;;  %v14517_v0 = vld [vmem:[#allocation87_spill] sm:$0xff]  ;;  %v14519_v25 = vld [vmem:[#allocation205_spill] sm:$0xff] }
 0x6ca   : > { %v5449_v22 = vsel %vm3904_vm5, %v5417_v39, %v12335_v8  ;;  %v5480_v44 = vsel %vm3937_vm6, %v5448_v55, %v12333_v11  ;;  %v4109_v33 = vsel %vm4102_vm11, %v4076_v15, %v14505_v62  ;;  %v5648_v42 = vsel %vm5642_vm14, %v4207_v7, %v5557_v4  ;;  %v14516_v26 = vld [vmem:[#allocation190_spill] sm:$0xff]  ;;  %v5559_v12 = vpop.permute.xlu1 %5558  ;;  %v14522_v2 = vld [vmem:[#allocation235_spill] sm:$0xff]  ;;  %v14523_v5 = vld [vmem:[#allocation104_spill] sm:$0xff] }
 0x6cb   : > { %v5481_v58 = vsel %vm3937_vm6, %v5449_v22, %v12364_v49  ;;  %v5512_v8 = vsel %vm3970_vm7, %v5480_v44, %v12398_v63  ;;  %v3880_v11 = vsel %vm14507_vm1, %v12275_v38, %v14506_v13  ;;  %v14508_v49 = vld [vmem:[#allocation262_spill] sm:$0xff]  ;;  %v4142_v19 = vsel %vm4135_vm12, %v4109_v33, %v14510_v61  ;;  %v14511_v63 = vld [vmem:[#allocation63_spill] sm:$0xff]  ;;  %7317 = vmatmul.mubr.msk.f32.gmra.mrb[4].mxu0 %vm5695_vm4, %v5648_v42  ;;  %v3659_v18 = vpop.permute.xlu0 %3658  ;;  %v14524_v29 = vld [vmem:[#allocation44_spill] sm:$0xff] }
 0x6cc   : > { %v5513_v6 = vsel %vm3970_vm7, %v5481_v58, %v12432_v59  ;;  %v4011_v56 = vsel %vm14509_vm2, %v3978_v14, %v14508_v49  ;;  %5606 = vrot.lane.b32.xlu0 %v5512_v8, %s7647_s24  ;;  %vm14513_vm0 = vcmask 64512   ;;  %v3913_v60 = vsel %vm3904_vm5, %v3880_v11, %v14514_v41  ;;  %v14520_v45 = vld [vmem:[#allocation74_spill] sm:$0xff]  ;;  %v14525_v46 = vld [vmem:[#allocation13_spill] sm:$0xff]  ;;  %v14531_v32 = vld [vmem:[#allocation128_spill] sm:$0xff] }
 0x6cd   : > { %5608 = vrot.lane.b32.xlu1 %v5513_v6, %s7647_s24  ;;  %v3782_v59 = vsel %vm14513_vm0, %v14512_v31, %v14511_v63  ;;  %v4044_v38 = vsel %vm4036_vm9, %v4011_v56, %v14515_v40  ;;  %v4175_v14 = vsel %vm4168_vm15, %v4142_v19, %v14516_v26  ;;  %vm14518_vm8 = vcmask 97280   ;;  %v14521_v51 = vld [vmem:[#allocation118_spill] sm:$0xff]  ;;  %v14529_v48 = vld [vmem:[#allocation265_spill] sm:$0xff]  ;;  %v14539_v55 = vld [vmem:[#allocation204_spill] sm:$0xff] }
 0x6ce   : > { %v3815_v30 = vsel %vm14518_vm8, %v3782_v59, %v14517_v0  ;;  %v3946_v3 = vsel %vm3937_vm6, %v3913_v60, %v14519_v25  ;;  %v4077_v54 = vsel %vm4069_vm10, %v4044_v38, %v14520_v45  ;;  %v4208_v28 = vsel %vm4201_vm13, %v4175_v14, %v3657_v36  ;;  %v14527_v53 = vld [vmem:[#allocation146_spill] sm:$0xff]  ;;  %v14535_v1 = vld [vmem:[#allocation297_spill] sm:$0xff]  ;;  %v3661_v58 = vpop.permute.xlu1 %3660  ;;  %v14544_v13 = vld [vmem:[#allocation43_spill] sm:$0xff] }
 0x6cf   : > { %v3848_v50 = vsel %vm3838_vm3, %v3815_v30, %v14521_v51  ;;  %v3979_v24 = vsel %vm3970_vm7, %v3946_v3, %v14522_v2  ;;  %v4110_v20 = vsel %vm4102_vm11, %v4077_v54, %v14523_v5  ;;  %v5649_v47 = vsel %vm5642_vm14, %v4208_v28, %v5559_v12  ;;  %v14532_v57 = vld [vmem:[#allocation66_spill] sm:$0xff]  ;;  %v14540_v43 = vld [vmem:[#allocation77_spill] sm:$0xff]  ;;  %v5561_v7 = vpop.permute.xlu0 %5560  ;;  %v14549_v19 = vld [vmem:[#allocation264_spill] sm:$0xff] }
 0x6d0   : > { %vm14526_vm1 = vcmask 31744   ;;  %vm14528_vm2 = vcmask 162816   ;;  %vm14530_vm0 = vcmask 293888   ;;  %v4143_v10 = vsel %vm4135_vm12, %v4110_v20, %v14531_v32  ;;  %7319 = vmatprep.mubr.msk.f32.mxu0 %vm5695_vm4, %v5649_v47  ;;  %v14534_v23 = vld [vmem:[#allocation174_spill] sm:$0xff]  ;;  %v14541_v36 = vld [vmem:[#allocation121_spill] sm:$0xff]  ;;  %v14555_v26 = vld [vmem:[#allocation296_spill] sm:$0xff] }
 0x6d1   : > { %v3750_v35 = vsel %vm14526_vm1, %v14525_v46, %v14524_v29  ;;  %v3881_v52 = vsel %vm14528_vm2, %v3848_v50, %v14527_v53  ;;  %v4012_v37 = vsel %vm14530_vm0, %v3979_v24, %v14529_v48  ;;  %vm14533_vm8 = vcmask 64512   ;;  %v14536_v27 = vld [vmem:[#allocation278_spill] sm:$0xff]  ;;  %v14547_v56 = vld [vmem:[#allocation149_spill] sm:$0xff]  ;;  %v14556_v0 = vld [vmem:[#allocation108_spill] sm:$0xff] }
 0x6d2   : > { %v3783_v17 = vsel %vm14533_vm8, %v3750_v35, %v14532_v57  ;;  %v3914_v9 = vsel %vm3904_vm5, %v3881_v52, %v14534_v23  ;;  %v4045_v39 = vsel %vm4036_vm9, %v4012_v37, %v14535_v1  ;;  %v4176_v34 = vsel %vm4168_vm15, %v4143_v10, %v14536_v27  ;;  %v14537_v16 = vld [vmem:[#allocation90_spill] sm:$0xff]  ;;  %v14551_v31 = vld [vmem:[#allocation245_spill] sm:$0xff]  ;;  %v14559_v45 = vld [vmem:[#allocation207_spill] sm:$0xff]  ;;  %v5563_v51 = vpop.permute.xlu1 %5562 }
 0x6d3   : > { %vm14538_vm1 = vcmask 97280   ;;  %v3947_v22 = vsel %vm3937_vm6, %v3914_v9, %v14539_v55  ;;  %v4078_v15 = vsel %vm4069_vm10, %v4045_v39, %v14540_v43  ;;  %v4209_v44 = vsel %vm4201_vm13, %v4176_v34, %v3659_v18  ;;  %v14542_v62 = vld [vmem:[#allocation234_spill] sm:$0xff]  ;;  %v14552_v41 = vld [vmem:[#allocation65_spill] sm:$0xff]  ;;  %v14560_v28 = vld [vmem:[#allocation76_spill] sm:$0xff]  ;;  %v3663_v50 = vpop.permute.xlu0 %3662 }
 0x6d4   : > { %v3816_v21 = vsel %vm14538_vm1, %v3783_v17, %v14537_v16  ;;  %v3980_v33 = vsel %vm3970_vm7, %v3947_v22, %v14542_v62  ;;  %v14543_v8 = vld [vmem:[#allocation126_spill] sm:$0xff]  ;;  %v5650_v42 = vsel %vm5642_vm14, %v4209_v44, %v5561_v7  ;;  %vm14546_vm2 = vcmask 31744   ;;  %v14554_v40 = vld [vmem:[#allocation177_spill] sm:$0xff]  ;;  %v14561_v2 = vld [vmem:[#allocation120_spill] sm:$0xff] }
 0x6d5   : > { %v3849_v4 = vsel %vm3838_vm3, %v3816_v21, %v14541_v36  ;;  %v4111_v6 = vsel %vm4102_vm11, %v4078_v15, %v14543_v8  ;;  %v14545_v11 = vld [vmem:[#allocation14_spill] sm:$0xff]  ;;  %vm14548_vm0 = vcmask 162816   ;;  %vm14550_vm8 = vcmask 293888   ;;  %7320 = vmatmul.mubr.msk.f32.gmra.mrb[6].mxu0 %vm5695_vm4, %v5650_v42  ;;  %v14557_v25 = vld [vmem:[#allocation89_spill] sm:$0xff]  ;;  %v14565_v53 = vld [vmem:[#allocation15_spill] sm:$0xff] }
 0x6d6   : > { %v3751_v49 = vsel %vm14546_vm2, %v14545_v11, %v14544_v13  ;;  %v3882_v61 = vsel %vm14548_vm0, %v3849_v4, %v14547_v56  ;;  %v4013_v63 = vsel %vm14550_vm8, %v3980_v33, %v14549_v19  ;;  %v4144_v59 = vsel %vm4135_vm12, %v4111_v6, %v14551_v31  ;;  %v14562_v5 = vld [vmem:[#allocation237_spill] sm:$0xff]  ;;  %v14564_v35 = vld [vmem:[#allocation46_spill] sm:$0xff]  ;;  %v14567_v48 = vld [vmem:[#allocation148_spill] sm:$0xff]  ;;  %v3665_v36 = vpop.permute.xlu1 %3664 }
 0x6d7   : > { %vm14553_vm1 = vcmask 64512   ;;  %v3915_v38 = vsel %vm3904_vm5, %v3882_v61, %v14554_v40  ;;  %v4046_v14 = vsel %vm4036_vm9, %v4013_v63, %v14555_v26  ;;  %v4177_v30 = vsel %vm4168_vm15, %v4144_v59, %v14556_v0  ;;  %v14563_v47 = vld [vmem:[#allocation213_spill] sm:$0xff]  ;;  %v14569_v32 = vld [vmem:[#allocation267_spill] sm:$0xff]  ;;  %v14571_v57 = vld [vmem:[#allocation244_spill] sm:$0xff]  ;;  %v5565_v4 = vpop.permute.xlu0 %5564 }
 0x6d8   : > { %v3784_v60 = vsel %vm14553_vm1, %v3751_v49, %v14552_v41  ;;  %vm14558_vm2 = vcmask 97280   ;;  %v3948_v54 = vsel %vm3937_vm6, %v3915_v38, %v14559_v45  ;;  %v4079_v12 = vsel %vm4069_vm10, %v4046_v14, %v14560_v28  ;;  %v14572_v23 = vld [vmem:[#allocation68_spill] sm:$0xff]  ;;  %v14575_v27 = vld [vmem:[#allocation50_spill] sm:$0xff]  ;;  %v14576_v16 = vld [vmem:[#allocation191_spill] sm:$0xff] }
 0x6d9   : > { %v3817_v3 = vsel %vm14558_vm2, %v3784_v60, %v14557_v25  ;;  %v4210_v18 = vsel %vm4201_vm13, %v4177_v30, %v3661_v58  ;;  %v3981_v20 = vsel %vm3970_vm7, %v3948_v54, %v14562_v5  ;;  %v4112_v29 = vsel %vm4102_vm11, %v4079_v12, %v14563_v47  ;;  %v14574_v1 = vld [vmem:[#allocation176_spill] sm:$0xff]  ;;  %v14579_v43 = vld [vmem:[#allocation206_spill] sm:$0xff]  ;;  %v14580_v44 = vld [vmem:[#allocation95_spill] sm:$0xff] }
 0x6da   : > { %v3850_v24 = vsel %vm3838_vm3, %v3817_v3, %v14561_v2  ;;  %v5651_v46 = vsel %vm5642_vm14, %v4210_v18, %v5563_v51  ;;  %vm14566_vm0 = vcmask 31744   ;;  %vm14568_vm8 = vcmask 162816   ;;  %v14577_v55 = vld [vmem:[#allocation92_spill] sm:$0xff]  ;;  %v14581_v62 = vld [vmem:[#allocation123_spill] sm:$0xff]  ;;  %v14583_v42 = vld [vmem:[#allocation242_spill] sm:$0xff]  ;;  %v5567_v2 = vpop.permute.xlu1 %5566 }
 0x6db   : > { %v3752_v52 = vsel %vm14566_vm0, %v14565_v53, %v14564_v35  ;;  %v3883_v37 = vsel %vm14568_vm8, %v3850_v24, %v14567_v48  ;;  %vm14570_vm1 = vcmask 293888   ;;  %v4145_v17 = vsel %vm4135_vm12, %v4112_v29, %v14571_v57  ;;  %7322 = vmatprep.mubr.msk.f32.mxu0 %vm5695_vm4, %v5651_v46  ;;  %v14582_v8 = vld [vmem:[#allocation236_spill] sm:$0xff]  ;;  %v14584_v49 = vld [vmem:[#allocation45_spill] sm:$0xff]  ;;  %v14587_v19 = vld [vmem:[#allocation151_spill] sm:$0xff]  ;;  %v3667_v24 = vpop.permute.xlu0 %3666 }
 0x6dc   : > { %v4014_v10 = vsel %vm14570_vm1, %v3981_v20, %v14569_v32  ;;  %vm14573_vm2 = vcmask 64512   ;;  %v3916_v39 = vsel %vm3904_vm5, %v3883_v37, %v14574_v1  ;;  %v4178_v21 = vsel %vm4168_vm15, %v4145_v17, %v14576_v16  ;;  %v14585_v56 = vld [vmem:[#allocation16_spill] sm:$0xff]  ;;  %v14589_v31 = vld [vmem:[#allocation266_spill] sm:$0xff]  ;;  %v14591_v41 = vld [vmem:[#allocation157_spill] sm:$0xff] }
 0x6dd   : > { %v3785_v9 = vsel %vm14573_vm2, %v3752_v52, %v14572_v23  ;;  %v4047_v34 = vsel %vm4036_vm9, %v4014_v10, %v14575_v27  ;;  %vm14578_vm0 = vcmask 97280   ;;  %v3949_v15 = vsel %vm3937_vm6, %v3916_v39, %v14579_v43  ;;  %v14592_v40 = vld [vmem:[#allocation67_spill] sm:$0xff]  ;;  %v14595_v0 = vld [vmem:[#allocation49_spill] sm:$0xff]  ;;  %v14600_v18 = vld [vmem:[#allocation78_spill] sm:$0xff] }
 0x6de   : > { %v3818_v22 = vsel %vm14578_vm0, %v3785_v9, %v14577_v55  ;;  %v4080_v58 = vsel %vm4069_vm10, %v4047_v34, %v14580_v44  ;;  %v4211_v7 = vsel %vm4201_vm13, %v4178_v21, %v3663_v50  ;;  %v3982_v6 = vsel %vm3970_vm7, %v3949_v15, %v14582_v8  ;;  %v14594_v26 = vld [vmem:[#allocation179_spill] sm:$0xff]  ;;  %v14596_v25 = vld [vmem:[#allocation221_spill] sm:$0xff]  ;;  %v14601_v5 = vld [vmem:[#allocation122_spill] sm:$0xff] }
 0x6df   : > { %v3851_v33 = vsel %vm3838_vm3, %v3818_v22, %v14581_v62  ;;  %v4113_v13 = vsel %vm4102_vm11, %v4080_v58, %v14583_v42  ;;  %v5652_v11 = vsel %vm5642_vm14, %v4211_v7, %v5565_v4  ;;  %vm14586_vm8 = vcmask 31744   ;;  %v14597_v45 = vld [vmem:[#allocation91_spill] sm:$0xff]  ;;  %v14599_v28 = vld [vmem:[#allocation209_spill] sm:$0xff]  ;;  %v14604_v52 = vld [vmem:[#allocation48_spill] sm:$0xff]  ;;  %v3669_v62 = vpop.permute.xlu1 %3668 }
 0x6e0   : > { %v3753_v61 = vsel %vm14586_vm8, %v14585_v56, %v14584_v49  ;;  %vm14588_vm1 = vcmask 162816   ;;  %vm14590_vm2 = vcmask 293888   ;;  %v4146_v60 = vsel %vm4135_vm12, %v4113_v13, %v14591_v41  ;;  %7323 = vmatmul.mubr.msk.f32.gmra.mrb[8].mxu0 %vm5695_vm4, %v5652_v11  ;;  %v14602_v47 = vld [vmem:[#allocation239_spill] sm:$0xff]  ;;  %v14605_v48 = vld [vmem:[#allocation17_spill] sm:$0xff]  ;;  %v14607_v32 = vld [vmem:[#allocation150_spill] sm:$0xff] }
 0x6e1   : > { %v3884_v63 = vsel %vm14588_vm1, %v3851_v33, %v14587_v19  ;;  %v4015_v59 = vsel %vm14590_vm2, %v3982_v6, %v14589_v31  ;;  %vm14593_vm0 = vcmask 64512   ;;  %v4179_v3 = vsel %vm4168_vm15, %v4146_v60, %v14596_v25  ;;  %v14603_v46 = vld [vmem:[#allocation127_spill] sm:$0xff]  ;;  %v14609_v57 = vld [vmem:[#allocation269_spill] sm:$0xff]  ;;  %v14611_v23 = vld [vmem:[#allocation156_spill] sm:$0xff]  ;;  %v5569_v33 = vpop.permute.xlu0 %5568 }
 0x6e2   : > { %v3786_v38 = vsel %vm14593_vm0, %v3753_v61, %v14592_v40  ;;  %v3917_v14 = vsel %vm3904_vm5, %v3884_v63, %v14594_v26  ;;  %v4048_v30 = vsel %vm4036_vm9, %v4015_v59, %v14595_v0  ;;  %vm14598_vm8 = vcmask 97280   ;;  %v14612_v1 = vld [vmem:[#allocation70_spill] sm:$0xff]  ;;  %v14615_v16 = vld [vmem:[#allocation29_spill] sm:$0xff]  ;;  %v14616_v55 = vld [vmem:[#allocation220_spill] sm:$0xff] }
 0x6e3   : > { %v3819_v54 = vsel %vm14598_vm8, %v3786_v38, %v14597_v45  ;;  %v3950_v12 = vsel %vm3937_vm6, %v3917_v14, %v14599_v28  ;;  %v4081_v51 = vsel %vm4069_vm10, %v4048_v30, %v14600_v18  ;;  %v4212_v50 = vsel %vm4201_vm13, %v4179_v3, %v3665_v36  ;;  %v14614_v27 = vld [vmem:[#allocation178_spill] sm:$0xff]  ;;  %v14619_v44 = vld [vmem:[#allocation208_spill] sm:$0xff]  ;;  %v14620_v7 = vld [vmem:[#allocation97_spill] sm:$0xff] }
 0x6e4   : > { %v3852_v20 = vsel %vm3838_vm3, %v3819_v54, %v14601_v5  ;;  %v3983_v29 = vsel %vm3970_vm7, %v3950_v12, %v14602_v47  ;;  %v4114_v35 = vsel %vm4102_vm11, %v4081_v51, %v14603_v46  ;;  %v5653_v53 = vsel %vm5642_vm14, %v4212_v50, %v5567_v2  ;;  %v14617_v43 = vld [vmem:[#allocation94_spill] sm:$0xff]  ;;  %v14621_v8 = vld [vmem:[#allocation125_spill] sm:$0xff]  ;;  %v14624_v61 = vld [vmem:[#allocation47_spill] sm:$0xff]  ;;  %v5571_v5 = vpop.permute.xlu1 %5570 }
 0x6e5   : > { %vm14606_vm1 = vcmask 31744   ;;  %vm14608_vm2 = vcmask 162816   ;;  %vm14610_vm0 = vcmask 293888   ;;  %v4147_v9 = vsel %vm4135_vm12, %v4114_v35, %v14611_v23  ;;  %7325 = vmatprep.mubr.msk.f32.mxu0 %vm5695_vm4, %v5653_v53  ;;  %v14622_v42 = vld [vmem:[#allocation238_spill] sm:$0xff]  ;;  %v14627_v31 = vld [vmem:[#allocation153_spill] sm:$0xff]  ;;  %v14629_v41 = vld [vmem:[#allocation268_spill] sm:$0xff] }
 0x6e6   : > { %v3754_v37 = vsel %vm14606_vm1, %v14605_v48, %v14604_v52  ;;  %v3885_v10 = vsel %vm14608_vm2, %v3852_v20, %v14607_v32  ;;  %v4016_v17 = vsel %vm14610_vm0, %v3983_v29, %v14609_v57  ;;  %vm14613_vm8 = vcmask 64512   ;;  %v14623_v11 = vld [vmem:[#allocation154_spill] sm:$0xff]  ;;  %v14631_v40 = vld [vmem:[#allocation275_spill] sm:$0xff]  ;;  %v14632_v26 = vld [vmem:[#allocation69_spill] sm:$0xff]  ;;  %v3671_v20 = vpop.permute.xlu0 %3670 }
 0x6e7   : > { %v3787_v39 = vsel %vm14613_vm8, %v3754_v37, %v14612_v1  ;;  %v3918_v34 = vsel %vm3904_vm5, %v3885_v10, %v14614_v27  ;;  %v4049_v21 = vsel %vm4036_vm9, %v4016_v17, %v14615_v16  ;;  %v4180_v22 = vsel %vm4168_vm15, %v4147_v9, %v14616_v55  ;;  %v14625_v19 = vld [vmem:[#allocation18_spill] sm:$0xff]  ;;  %v14634_v0 = vld [vmem:[#allocation181_spill] sm:$0xff]  ;;  %v14635_v25 = vld [vmem:[#allocation51_spill] sm:$0xff] }
 0x6e8   : > { %vm14618_vm1 = vcmask 97280   ;;  %v3951_v58 = vsel %vm3937_vm6, %v3918_v34, %v14619_v44  ;;  %v4082_v36 = vsel %vm4069_vm10, %v4049_v21, %v14620_v7  ;;  %v4213_v4 = vsel %vm4201_vm13, %v4180_v22, %v3667_v24  ;;  %v14636_v45 = vld [vmem:[#allocation135_spill] sm:$0xff]  ;;  %v14637_v28 = vld [vmem:[#allocation93_spill] sm:$0xff]  ;;  %v14640_v50 = vld [vmem:[#allocation96_spill] sm:$0xff]  ;;  %v3673_v44 = vpop.permute.xlu1 %3672 }
 0x6e9   : > { %v3820_v15 = vsel %vm14618_vm1, %v3787_v39, %v14617_v43  ;;  %v3984_v13 = vsel %vm3970_vm7, %v3951_v58, %v14622_v42  ;;  %v4115_v49 = vsel %vm4102_vm11, %v4082_v36, %v14623_v11  ;;  %v5654_v56 = vsel %vm5642_vm14, %v4213_v4, %v5569_v33  ;;  %v14639_v18 = vld [vmem:[#allocation211_spill] sm:$0xff]  ;;  %v14641_v47 = vld [vmem:[#allocation124_spill] sm:$0xff]  ;;  %v14642_v46 = vld [vmem:[#allocation241_spill] sm:$0xff] }
 0x6ea   : > { %v3853_v6 = vsel %vm3838_vm3, %v3820_v15, %v14621_v8  ;;  %vm14626_vm2 = vcmask 31744   ;;  %vm14628_vm0 = vcmask 162816   ;;  %vm14630_vm8 = vcmask 293888   ;;  %7326 = vmatmul.mubr.msk.f32.gmra.mrb[10].mxu0 %vm5695_vm4, %v5654_v56  ;;  %v14643_v53 = vld [vmem:[#allocation243_spill] sm:$0xff]  ;;  %v14644_v37 = vld [vmem:[#allocation152_spill] sm:$0xff]  ;;  %v14646_v17 = vld [vmem:[#allocation274_spill] sm:$0xff]  ;;  %v5573_v58 = vpop.permute.xlu0 %5572 }
 0x6eb   : > { %v3755_v63 = vsel %vm14626_vm2, %v14625_v19, %v14624_v61  ;;  %v3886_v59 = vsel %vm14628_vm0, %v3853_v6, %v14627_v31  ;;  %v4017_v60 = vsel %vm14630_vm8, %v3984_v13, %v14629_v41  ;;  %v4148_v38 = vsel %vm4135_vm12, %v4115_v49, %v14631_v40  ;;  %v14645_v10 = vld [vmem:[#allocation271_spill] sm:$0xff]  ;;  %v14647_v9 = vld [vmem:[#allocation180_spill] sm:$0xff]  ;;  %v14648_v39 = vld [vmem:[#allocation30_spill] sm:$0xff] }
 0x6ec   : > { %vm14633_vm1 = vcmask 64512   ;;  %v3919_v30 = vsel %vm3904_vm5, %v3886_v59, %v14634_v0  ;;  %v4050_v3 = vsel %vm4036_vm9, %v4017_v60, %v14635_v25  ;;  %v4181_v54 = vsel %vm4168_vm15, %v4148_v38, %v14636_v45  ;;  %v14649_v34 = vld [vmem:[#allocation134_spill] sm:$0xff]  ;;  %v14651_v22 = vld [vmem:[#allocation99_spill] sm:$0xff]  ;;  %v14652_v7 = vld [vmem:[#allocation240_spill] sm:$0xff]  ;;  %v5575_v59 = vpop.permute.xlu1 %5574 }
 0x6ed   : > { %v3788_v14 = vsel %vm14633_vm1, %v3755_v63, %v14632_v26  ;;  %vm14638_vm2 = vcmask 97280   ;;  %v3952_v51 = vsel %vm3937_vm6, %v3919_v30, %v14639_v18  ;;  %v4083_v2 = vsel %vm4069_vm10, %v4050_v3, %v14640_v50  ;;  %v14650_v21 = vld [vmem:[#allocation210_spill] sm:$0xff]  ;;  %v14653_v4 = vld [vmem:[#allocation272_spill] sm:$0xff]  ;;  %v14656_v42 = vld [vmem:[#allocation187_spill] sm:$0xff] }
 0x6ee   : > { %v3821_v12 = vsel %vm14638_vm2, %v3788_v14, %v14637_v28  ;;  %v4214_v24 = vsel %vm4201_vm13, %v4181_v54, %v3669_v62  ;;  %v3985_v35 = vsel %vm3970_vm7, %v3952_v51, %v14642_v46  ;;  %v4116_v52 = vsel %vm4102_vm11, %v4083_v2, %v14643_v53  ;;  %v14654_v8 = vld [vmem:[#allocation270_spill] sm:$0xff]  ;;  %v14657_v11 = vld [vmem:[#allocation52_spill] sm:$0xff]  ;;  %v14658_v56 = vld [vmem:[#allocation251_spill] sm:$0xff]  ;;  %v3675_v41 = vpop.permute.xlu0 %3674 }
 0x6ef   : > { %v3854_v29 = vsel %vm3838_vm3, %v3821_v12, %v14641_v47  ;;  %v5655_v48 = vsel %vm5642_vm14, %v4214_v24, %v5571_v5  ;;  %v4018_v57 = vsel %vm14630_vm8, %v3985_v35, %v14645_v10  ;;  %v4149_v23 = vsel %vm4135_vm12, %v4116_v52, %v14646_v17  ;;  %vm14655_vm3 = vmmov %vm14630_vm8  ;;  %v14659_v19 = vld [vmem:[#allocation98_spill] sm:$0xff]  ;;  %v14660_v60 = vld [vmem:[#allocation155_spill] sm:$0xff] }
 0x6f0   : > { %v3887_v32 = vsel %vm14628_vm0, %v3854_v29, %v14644_v37  ;;  %7328 = vmatprep.mubr.msk.f32.mxu0 %vm5695_vm4, %v5655_v48  ;;  %v4051_v27 = vsel %vm4036_vm9, %v4018_v57, %v14648_v39  ;;  %v4182_v16 = vsel %vm4168_vm15, %v4149_v23, %v14649_v34  ;;  %v14661_v26 = vld [vmem:[#allocation186_spill] sm:$0xff]  ;;  %v3677_v3 = vpop.permute.xlu1 %3676  ;;  %v14663_v28 = vld [vmem:[#allocation163_spill] sm:$0xff]  ;;  %v14664_v12 = vld [vmem:[#allocation216_spill] sm:$0xff] }
 0x6f1   : > { %v3920_v1 = vsel %vm3904_vm5, %v3887_v32, %v14647_v9  ;;  %v4084_v43 = vsel %vm4069_vm10, %v4051_v27, %v14651_v22  ;;  %v4215_v15 = vsel %vm4201_vm13, %v4182_v16, %v3671_v20  ;;  %v14662_v0 = vld [vmem:[#allocation250_spill] sm:$0xff]  ;;  %v4185_v18 = vsel %vm4168_vm15, %v14664_v12, %v14663_v28  ;;  %v14667_v52 = vld [vmem:[#allocation280_spill] sm:$0xff]  ;;  %v14669_v23 = vld [vmem:[#allocation279_spill] sm:$0xff] }
 0x6f2   : > { %v3953_v55 = vsel %vm3937_vm6, %v3920_v1, %v14650_v21  ;;  %v4117_v62 = vsel %vm4102_vm11, %v4084_v43, %v14653_v4  ;;  %v5656_v33 = vsel %vm5642_vm14, %v4215_v15, %v5573_v58  ;;  %v5577_v45 = vpop.permute.xlu0 %5576  ;;  %v4218_v51 = vsel %vm4201_vm13, %v4185_v18, %v3677_v3  ;;  %v14665_v5 = vld [vmem:[#allocation162_spill] sm:$0xff]  ;;  %v14670_v9 = vld [vmem:[#allocation217_spill] sm:$0xff]  ;;  %v6471_v43 = vld [vmem:[%s13461_s8] sm:$0x1] }
 0x6f3   : > { %v3986_v36 = vsel %vm3970_vm7, %v3953_v55, %v14652_v7  ;;  %v4150_v13 = vsel %vm4135_vm12, %v4117_v62, %v14656_v42  ;;  %7329 = vmatmul.mubr.msk.f32.gmra.mrb[12].mxu0 %vm5695_vm4, %v5656_v33  ;;  %v14666_v20 = vld [vmem:[#allocation106_spill] sm:$0xff]  ;;  %v4188_v1 = vsel %vm4168_vm15, %v14670_v9, %v14669_v23  ;;  %v14671_v21 = vld [vmem:[#allocation193_spill] sm:$0xff]  ;;  %v14673_v33 = vld [vmem:[#allocation192_spill] sm:$0xff] }
 0x6f4   : > { %v4019_v6 = vsel %vm14655_vm3, %v3986_v36, %v14654_v8  ;;  %v4183_v61 = vsel %vm4168_vm15, %v4150_v13, %v14658_v56  ;;  %v5579_v50 = vpop.permute.xlu1 %5578  ;;  %v4186_v47 = vsel %vm4168_vm15, %v14666_v20, %v14665_v5  ;;  %v14668_v48 = vld [vmem:[#allocation130_spill] sm:$0xff]  ;;  %v14674_v8 = vld [vmem:[#allocation131_spill] sm:$0xff]  ;;  %v14680_v5 = vld [vmem:[#allocation276_spill] sm:$0xff] }
 0x6f5   : > { %v4052_v49 = vsel %vm4036_vm9, %v4019_v6, %v14657_v11  ;;  %v4216_v31 = vsel %vm4201_vm13, %v4183_v61, %v3673_v44  ;;  %v5659_v24 = vsel %vm5642_vm14, %v4218_v51, %v5579_v50  ;;  %v4187_v37 = vsel %vm4168_vm15, %v14668_v48, %v14667_v52  ;;  %v14672_v55 = vld [vmem:[#allocation246_spill] sm:$0xff]  ;;  %v6549_v42 = vld [vmem:[%s13462_s9] sm:$0x1]  ;;  %vm14684_vm5 = vmmov %vm14633_vm1 }
 0x6f6   : > { %v4085_v63 = vsel %vm4069_vm10, %v4052_v49, %v14659_v19  ;;  %v5657_v38 = vsel %vm5642_vm14, %v4216_v31, %v5575_v59  ;;  %v3679_v2 = vpop.permute.xlu0 %3678  ;;  %v4189_v22 = vsel %vm4168_vm15, %v14672_v55, %v14671_v21  ;;  %v4190_v6 = vsel %vm4168_vm15, %v14674_v8, %v14673_v33  ;;  %v6551_v19 = vld [vmem:[%s13463_s10] sm:$0x1]  ;;  %v14675_v31 = vld [vmem:[#allocation222_spill] sm:$0xff]  ;;  %vm14690_vm6 = vmmov %vm14633_vm1 }
 0x6f7   : > { %v4118_v40 = vsel %vm4102_vm11, %v4085_v63, %v14660_v60  ;;  %7331 = vmatprep.mubr.msk.f32.mxu0 %vm5695_vm4, %v5657_v38  ;;  %v4219_v29 = vsel %vm4201_vm13, %v4186_v47, %v3679_v2  ;;  %v14676_v59 = vld [vmem:[#allocation158_spill] sm:$0xff]  ;;  %v6553_v60 = vld [vmem:[%s13464_s11] sm:$0x1]  ;;  %vm14692_vm9 = vmmov %vm14633_vm1 }
 0x6f8   : > { %v4151_v14 = vsel %vm4135_vm12, %v4118_v40, %v14661_v26  ;;  %v3681_v46 = vpop.permute.xlu1 %3680  ;;  %v14678_v3 = vld [vmem:[#allocation247_spill] sm:$0xff]  ;;  %vm14693_vm10 = vmmov %vm14633_vm1 }
 0x6f9   : > { %v4184_v30 = vsel %vm4168_vm15, %v4151_v14, %v14662_v0  ;;  %v4220_v32 = vsel %vm4201_vm13, %v4187_v37, %v3681_v46  ;;  %v14681_v47 = vld [vmem:[#allocation159_spill] sm:$0xff]  ;;  %vm14694_vm11 = vmmov %vm14633_vm1 }
 0x6fa   : > { %v4217_v25 = vsel %vm4201_vm13, %v4184_v30, %v3675_v41  ;;  %v5581_v35 = vpop.permute.xlu0 %5580  ;;  %v4191_v41 = vsel %vm4168_vm15, %v14676_v59, %v14675_v31  ;;  %v6562_v33 = vld [vmem:[%s13465_s12] sm:$0xff]  ;;  %vm14695_vm12 = vmmov %vm14633_vm1 }
 0x6fb   : > { %v5658_v54 = vsel %vm5642_vm14, %v4217_v25, %v5577_v45  ;;  %v5660_v53 = vsel %vm5642_vm14, %v4219_v29, %v5581_v35  ;;  %v14677_v25 = vld [vmem:[#allocation109_spill] sm:$0xff]  ;;  %7364 = vmatpush3.msra.mxu1 %v6562_v33  ;;  %vm14699_vm2 = vmmov %vm14633_vm1 }
 0x6fc   : > { %7332 = vmatmul.mubr.msk.f32.gmra.mrb[14].mxu0 %vm5695_vm4, %v5658_v54  ;;  %v5583_v10 = vpop.permute.xlu1 %5582  ;;  %v4192_v45 = vsel %vm4168_vm15, %v14678_v3, %v14677_v25  ;;  %v14687_v25 = vld [vmem:[#allocation218_spill] sm:$0xff]  ;;  %vm14700_vm0 = vmmov %vm14633_vm1 }
 0x6fd   : > { %7334 = vmatprep.mubr.msk.f32.mxu0 %vm5695_vm4, %v5659_v24  ;;  %v5661_v17 = vsel %vm5642_vm14, %v4220_v32, %v5583_v10  ;;  %v14679_v24 = vld [vmem:[#allocation223_spill] sm:$0xff]  ;;  %vm14701_vm8 = vmmov %vm14700_vm0 }
 0x6fe   : > { %v3683_v57 = vpop.permute.xlu0 %3682  ;;  %v4193_v20 = vsel %vm4168_vm15, %v14680_v5, %v14679_v24  ;;  %v12956_v24 = vld [vmem:[%s13455_s2] ss:$0 sm:$0xff]  ;;  %vm14702_vm3 = vmmov %vm14700_vm0 }
 0x6ff   : > { %v4221_v39 = vsel %vm4201_vm13, %v4188_v1, %v3683_v57  ;;  %v14682_v1 = vld [vmem:[#allocation277_spill] sm:$0xff] }
 0x700   : > { %7335 = vmatmul.mubr.msk.f32.gmra.mrb[16].mxu0 %vm5695_vm4, %v5660_v53  ;;  %v3685_v27 = vpop.permute.xlu1 %3684  ;;  %v6544_v36 = vpop.f32.mrb[0].mxu1 }
 0x701   : > { %7337 = vmatprep.mubr.msk.f32.mxu0 %vm5695_vm4, %v5661_v17  ;;  %v4222_v15 = vsel %vm4201_vm13, %v4189_v22, %v3685_v27  ;;  %v6545_v4 = vadd.f32 %v6544_v36, %v6471_v43  ;;  %v7362_v62 = vpop.f32.mrb[1].mxu1  ;;  %v14683_v27 = vld [vmem:[#allocation188_spill] sm:$0xff] }
 0x702   : > { %v5585_v34 = vpop.permute.xlu0 %5584  ;;  %v6395_v62 = vld [vmem:[%s13459_s6 + $0x8] sm:$0xff] }
 0x703   : > { %v5662_v16 = vsel %vm5642_vm14, %v4221_v39, %v5585_v34  ;;  %v6548_v56 = vmax.f32 %v6545_v4, 0.0  ;;  %v6394_v4 = vld [vmem:[%s13459_s6] sm:$0xff] }
 0x704   : > { %7338 = vmatmul.mubr.msk.f32.gmra.mrb[18].mxu0 %vm5695_vm4, %v5662_v16  ;;  %v5587_v44 = vpop.permute.xlu1 %5586  ;;  %v7448_v8 = vpack.c.bf16 %v6395_v62, %v6394_v4 }
 0x705   : > { %v5663_v7 = vsel %vm5642_vm14, %v4222_v15, %v5587_v44  ;;  %v6550_v63 = vmul.f32 %v6549_v42, %v6548_v56 }
 0x706   : > { %v3687_v58 = vpop.permute.xlu0 %3686  ;;  %7340 = vmatprep.mubr.msk.f32.mxu0 %vm5695_vm4, %v5663_v7  ;;  %7449 = vmatprep.subr.bf16.mxu1 %v7448_v8 }
 0x707   : > { %v4223_v13 = vsel %vm4201_vm13, %v4190_v6, %v3687_v58  ;;  %v6552_v14 = vadd.f32 %v6551_v19, %v6550_v63 }
 0x708   : > { %v3689_v11 = vpop.permute.xlu1 %3688 }
 0x709   : > { %v4224_v40 = vsel %vm4201_vm13, %v4191_v41, %v3689_v11  ;;  %v6554_v30 = vmul.f32 %v6553_v60, %v6552_v14  ;;  %v6397_v11 = vld [vmem:[%s13459_s6 + $0x18] sm:$0xff] }
 0x70a   : > { %v5589_v49 = vpop.permute.xlu0 %5588 }
 0x70b   : > { %v5664_v61 = vsel %vm5642_vm14, %v4223_v13, %v5589_v49  ;;  %v7161_v18 = vmul.f32 -1.442695, %v6554_v30  ;;  %v6396_v13 = vld [vmem:[%s13459_s6 + $0x10] sm:$0xff] }
 0x70c   : > { %7341 = vmatmul.mubr.msk.f32.gmra.mrb[20].mxu0 %vm5695_vm4, %v5664_v61  ;;  %v5591_v38 = vpop.permute.xlu1 %5590  ;;  %v14685_v49 = vld [vmem:[#allocation189_spill] sm:$0xff]  ;;  %v14686_v61 = vld [vmem:[#allocation107_spill] sm:$0xff]  ;;  %v7452_v63 = vpack.c.bf16 %v6397_v11, %v6396_v13 }
 0x70d   : > { %v5665_v0 = vsel %vm5642_vm14, %v4224_v40, %v5591_v38  ;;  %7482 = vpow2.f32 %v7161_v18 }
 0x70e   : > { %v3691_v26 = vpop.permute.xlu0 %3690  ;;  %7343 = vmatprep.mubr.msk.f32.mxu0 %vm5695_vm4, %v5665_v0 }
 0x70f   : > { %v4225_v54 = vsel %vm4201_vm13, %v4192_v45, %v3691_v26  ;;  %v14688_v45 = vld [vmem:[#allocation219_spill] sm:$0xff] }
 0x710   : > { %v3567_v28 = vpop.permute.xlu1 %3566 }
 0x711   : > { %v4194_v29 = vsel %vm4168_vm15, %v14681_v47, %v3567_v28 }
 0x712   : > { %v5593_v12 = vpop.permute.xlu0 %5592 }
 0x713   : > { %v5666_v51 = vsel %vm5642_vm14, %v4225_v54, %v5593_v12 }
 0x714   : > { %7344 = vmatmul.mubr.msk.f32.gmra.mrb[22].mxu0 %vm5695_vm4, %v5666_v51  ;;  %v3695_v50 = vpop.permute.xlu1 %3694 }
 0x715   : > { %v4227_v46 = vsel %vm4201_vm13, %v4194_v29, %v3695_v50  ;;  %v12964_v29 = vld [vmem:[%s13456_s3] ss:$0 sm:$0xff] }
 0x716   : > { %v3693_v2 = vpop.permute.xlu0 %3692 }
 0x717   : > { %v4226_v35 = vsel %vm4201_vm13, %v4193_v20, %v3693_v2  ;;  %v7483_v32 = vpop.eup %7482 }
 0x718   : > { %v5597_v53 = vpop.permute.xlu1 %5596  ;;  %v6558_v17 = vadd.f32 1.0, %v7483_v32 }
 0x719   : > { %v5668_v48 = vsel %vm5642_vm14, %v4227_v46, %v5597_v53  ;;  %v12973_v53 = vld [vmem:[%s13457_s4] ss:$0 sm:$0xff] }
 0x71a   : > { %v5595_v52 = vpop.permute.xlu0 %5594  ;;  %7484 = vrcp.f32 %v6558_v17 }
 0x71b   : > { %v5667_v37 = vsel %vm5642_vm14, %v4226_v35, %v5595_v52 }
 0x71c   : > { %7346 = vmatprep.mubr.msk.f32.mxu0 %vm5695_vm4, %v5667_v37  ;;  %v3571_v10 = vpop.permute.xlu1 %3570  ;;  %v12982_v37 = vld [vmem:[%s13458_s5] ss:$0 sm:$0xff] }
 0x71d   : > { %7347 = vmatmul.mubr.msk.f32.gmra.mrb[24].mxu0 %vm5695_vm4, %v5668_v48  ;;  %v4196_v39 = vsel %vm4168_vm15, %v14682_v1, %v3571_v10 }
 0x71e   : > { %v3569_v57 = vpop.permute.xlu0 %3568 }
 0x71f   : > { %v4195_v34 = vsel %vm4168_vm15, %v14683_v27, %v3569_v57 }
 0x720   : > { %v3699_v23 = vpop.permute.xlu1 %3698 }
 0x721   : > { %v4229_v16 = vsel %vm4201_vm13, %v4196_v39, %v3699_v23 }
 0x722   : > { %v3697_v9 = vpop.permute.xlu0 %3696 }
 0x723   : > { %v4228_v21 = vsel %vm4201_vm13, %v4195_v34, %v3697_v9 }
 0x724   : > { %v5601_v55 = vpop.permute.xlu1 %5600  ;;  %v7485_v7 = vpop.eup %7484 }
 0x725   : > { %v5670_v43 = vsel %vm5642_vm14, %v4229_v16, %v5601_v55  ;;  %v6561_v36 = vmul.f32 %v7485_v7, %v6548_v56 }
 0x726   : > { %v5599_v22 = vpop.permute.xlu0 %5598 }
 0x727   : > { %v5669_v15 = vsel %vm5642_vm14, %v4228_v21, %v5599_v22  ;;  %7366 = vmatmul.mubr.msk.f32.vlgmr.msra.gmra.mrb[2].mxu1 %vm14684_vm5, %v6561_v36  ;;  %vm14703_vm5 = vmmov %vm14700_vm0 }
 0x728   : > { %7349 = vmatprep.mubr.msk.f32.mxu0 %vm5695_vm4, %v5669_v15  ;;  %v3575_v44 = vpop.permute.xlu1 %3574  ;;  %7451 = vmatpush3.bf16.msra.mxu1 %v7448_v8 }
 0x729   : > { %7350 = vmatmul.mubr.msk.f32.gmra.mrb[26].mxu0 %vm5695_vm4, %v5670_v43  ;;  %v4198_v56 = vsel %vm4168_vm15, %v14685_v49, %v3575_v44  ;;  %7453 = vmatprep.subr.bf16.mxu1 %v7452_v63 }
 0x72a   : > { %v3573_v58 = vpop.permute.xlu0 %3572 }
 0x72b   : > { %v4197_v19 = vsel %vm4168_vm15, %v14686_v61, %v3573_v58 }
 0x72c   : > { %v3703_v6 = vpop.permute.xlu1 %3702  ;;  %7455 = vmatpush3.bf16.msra.mxu1 %v7452_v63 }
 0x72d   : > { %v4231_v31 = vsel %vm4201_vm13, %v4198_v56, %v3703_v6 }
 0x72e   : > { %v3701_v42 = vpop.permute.xlu0 %3700 }
 0x72f   : > { %v4230_v59 = vsel %vm4201_vm13, %v4197_v19, %v3701_v42 }
 0x730   : > { %v5605_v41 = vpop.permute.xlu1 %5604 }
 0x731   : > { %v5672_v40 = vsel %vm5642_vm14, %v4231_v31, %v5605_v41 }
 0x732   : > { %v5603_v60 = vpop.permute.xlu0 %5602 }
 0x733   : > { %v5671_v38 = vsel %vm5642_vm14, %v4230_v59, %v5603_v60 }
 0x734   : > { %7352 = vmatprep.mubr.msk.f32.mxu0 %vm5695_vm4, %v5671_v38  ;;  %v3579_v26 = vpop.permute.xlu1 %3578 }
 0x735   : > { %7353 = vmatmul.mubr.msk.f32.gmra.mrb[28].mxu0 %vm5695_vm4, %v5672_v40  ;;  %v4200_v3 = vsel %vm4168_vm15, %v14687_v25, %v3579_v26 }
 0x736   : > { %v3577_v14 = vpop.permute.xlu0 %3576 }
 0x737   : > { %v4199_v54 = vsel %vm4168_vm15, %v14688_v45, %v3577_v14  ;;  %vm14696_vm15 = vmmov %vm14633_vm1 }
 0x738   : > { %v3707_v0 = vpop.permute.xlu1 %3706 }
 0x739   : > { %v4233_v28 = vsel %vm4201_vm13, %v4200_v3, %v3707_v0 }
 0x73a   : > { %v3705_v30 = vpop.permute.xlu0 %3704 }
 0x73b   : > { %v4232_v12 = vsel %vm4201_vm13, %v4199_v54, %v3705_v30  ;;  %vm14697_vm13 = vmmov %vm14633_vm1 }
 0x73e   : > { %v5607_v51 = vpop.permute.xlu0 %5606 }
 0x73f   : > { %v5609_v18 = vpop.permute.xlu1 %5608  ;;  %v5673_v2 = vsel %vm5642_vm14, %v4232_v12, %v5607_v51 }
 0x740   : > { %v5674_v50 = vsel %vm5642_vm14, %v4233_v28, %v5609_v18  ;;  %7355 = vmatprep.mubr.msk.f32.mxu0 %vm5695_vm4, %v5673_v2  ;;  %vm14698_vm14 = vmmov %vm14633_vm1 }
 0x741   : > { %7356 = vmatmul.mubr.msk.f32.gmra.mrb[30].mxu0 %vm5695_vm4, %v5674_v50  ;;  %vm14689_vm4 = vmmov %vm14633_vm1 }
 0x788   : > { %v7312_v5 = vpop.f32.mrb[0].mxu0 }
 0x789   : > { %v12959_v20 = vadd.f32 %v7312_v5, %v12956_v24  ;;  %v5862_v47 = vpop.f32.mrb[1].mxu0 }
 0x78a   : > { %v12967_v46 = vadd.f32 %v12956_v24, %v5862_v47 }
 0x78b   : > { %v6022_v35 = vmax.f32 %v12959_v20, 0.0 }
 0x78c   : > { %v6021_v52 = vmax.f32 %v12967_v46, 0.0 }
 0x78d   : > { %v6061_v48 = vmul.f32 %v12964_v29, %v6022_v35 }
 0x78e   : > { %v6060_v32 = vmul.f32 %v12964_v29, %v6021_v52 }
 0x78f   : > { %v6100_v10 = vadd.f32 %v12973_v53, %v6061_v48 }
 0x790   : > { %v6099_v57 = vadd.f32 %v12973_v53, %v6060_v32 }
 0x791   : > { %v6139_v17 = vmul.f32 %v12982_v37, %v6100_v10 }
 0x792   : > { %v6138_v23 = vmul.f32 %v12982_v37, %v6099_v57 }
 0x793   : > { %v7128_v9 = vmul.f32 -1.442695, %v6139_v17 }
 0x794   : > { %v7127_v1 = vmul.f32 -1.442695, %v6138_v23 }
 0x795   : > { %v7315_v39 = vpop.f32.mrb[2].mxu0  ;;  %7486 = vpow2.f32 %v7128_v9 }
 0x796   : > { %v12992_v27 = vadd.f32 %v7315_v39, %v12956_v24  ;;  %v5872_v34 = vpop.f32.mrb[3].mxu0  ;;  %7488 = vpow2.f32 %v7127_v1 }
 0x797   : > { %v12995_v16 = vadd.f32 %v12956_v24, %v5872_v34 }
 0x798   : > { %v6024_v21 = vmax.f32 %v12992_v27, 0.0 }
 0x799   : > { %v6023_v55 = vmax.f32 %v12995_v16, 0.0 }
 0x79a   : > { %v6063_v22 = vmul.f32 %v12964_v29, %v6024_v21 }
 0x79b   : > { %v6062_v43 = vmul.f32 %v12964_v29, %v6023_v55 }
 0x79c   : > { %v6102_v15 = vadd.f32 %v12973_v53, %v6063_v22 }
 0x79d   : > { %v6101_v44 = vadd.f32 %v12973_v53, %v6062_v43 }
 0x79e   : > { %v7318_v58 = vpop.f32.mrb[4].mxu0  ;;  %v6141_v7 = vmul.f32 %v12982_v37, %v6102_v15 }
 0x79f   : > { %v13009_v36 = vadd.f32 %v7318_v58, %v12956_v24  ;;  %v5882_v4 = vpop.f32.mrb[5].mxu0  ;;  %v6140_v62 = vmul.f32 %v12982_v37, %v6101_v44  ;;  %v7487_v8 = vpop.eup %7486 }
 0x7a0   : > { %v13013_v33 = vadd.f32 %v12956_v24, %v5882_v4  ;;  %v7130_v6 = vmul.f32 -1.442695, %v6141_v7  ;;  %v7489_v13 = vpop.eup %7488  ;;  %v6267_v11 = vadd.f32 1.0, %v7487_v8 }
 0x7a1   : > { %v6026_v42 = vmax.f32 %v13009_v36, 0.0  ;;  %v7129_v49 = vmul.f32 -1.442695, %v6140_v62  ;;  %v6266_v61 = vadd.f32 1.0, %v7489_v13 }
 0x7a2   : > { %v6025_v56 = vmax.f32 %v13013_v33, 0.0  ;;  %7490 = vpow2.f32 %v7130_v6 }
 0x7a3   : > { %v6065_v19 = vmul.f32 %v12964_v29, %v6026_v42  ;;  %7492 = vrcp.f32 %v6267_v11 }
 0x7a4   : > { %v6064_v63 = vmul.f32 %v12964_v29, %v6025_v56  ;;  %7494 = vrcp.f32 %v6266_v61 }
 0x7a5   : > { %v6104_v31 = vadd.f32 %v12973_v53, %v6065_v19  ;;  %7496 = vpow2.f32 %v7129_v49 }
 0x7a6   : > { %v6103_v41 = vadd.f32 %v12973_v53, %v6064_v63 }
 0x7a7   : > { %v6143_v38 = vmul.f32 %v12982_v37, %v6104_v31 }
 0x7a8   : > { %v7321_v59 = vpop.f32.mrb[6].mxu0  ;;  %v6142_v14 = vmul.f32 %v12982_v37, %v6103_v41 }
 0x7a9   : > { %v13026_v60 = vadd.f32 %v7321_v59, %v12956_v24  ;;  %v5892_v40 = vpop.f32.mrb[7].mxu0  ;;  %v7132_v30 = vmul.f32 -1.442695, %v6143_v38 }
 0x7aa   : > { %v13030_v26 = vadd.f32 %v12956_v24, %v5892_v40  ;;  %v7131_v3 = vmul.f32 -1.442695, %v6142_v14 }
 0x7ab   : > { %v6028_v0 = vmax.f32 %v13026_v60, 0.0  ;;  %7498 = vpow2.f32 %v7132_v30 }
 0x7ac   : > { %v6027_v25 = vmax.f32 %v13030_v26, 0.0  ;;  %7500 = vpow2.f32 %v7131_v3  ;;  %v7491_v12 = vpop.eup %7490 }
 0x7ad   : > { %v6067_v45 = vmul.f32 %v12964_v29, %v6028_v0  ;;  %v7493_v50 = vpop.eup %7492  ;;  %v6269_v2 = vadd.f32 1.0, %v7491_v12 }
 0x7ae   : > { %v6066_v54 = vmul.f32 %v12964_v29, %v6027_v25  ;;  %v7495_v32 = vpop.eup %7494  ;;  %v6363_v23 = vmul.f32 %v7493_v50, %v6022_v35 }
 0x7af   : > { %v6106_v28 = vadd.f32 %v12973_v53, %v6067_v45  ;;  %v7497_v17 = vpop.eup %7496  ;;  %v6362_v9 = vmul.f32 %v7495_v32, %v6021_v52  ;;  %7502 = vrcp.f32 %v6269_v2 }
 0x7b0   : > { %v6105_v18 = vadd.f32 %v12973_v53, %v6066_v54  ;;  %v6268_v34 = vadd.f32 1.0, %v7497_v17 }
 0x7b1   : > { %v6145_v5 = vmul.f32 %v12982_v37, %v6106_v28  ;;  %7376 = vmatprep.mubr.msk.f32.mxu1 %vm3970_vm7, %v6362_v9 }
 0x7b2   : > { %v6144_v10 = vmul.f32 %v12982_v37, %v6105_v18  ;;  %7377 = vmatmul.mubr.msk.f32.vlgmr.msra.gmra.mrb[4].mxu1 %vm3970_vm7, %v6363_v23 }
 0x7b3   : > { %v7324_v51 = vpop.f32.mrb[8].mxu0  ;;  %v7134_v1 = vmul.f32 -1.442695, %v6145_v5 }
 0x7b4   : > { %v13045_v47 = vadd.f32 %v7324_v51, %v12956_v24  ;;  %v5902_v48 = vpop.f32.mrb[9].mxu0  ;;  %v7133_v22 = vmul.f32 -1.442695, %v6144_v10 }
 0x7b5   : > { %v13049_v57 = vadd.f32 %v12956_v24, %v5902_v48  ;;  %7504 = vpow2.f32 %v7134_v1  ;;  %v7499_v35 = vpop.eup %7498 }
 0x7b6   : > { %v6030_v39 = vmax.f32 %v13045_v47, 0.0  ;;  %7506 = vrcp.f32 %v6268_v34  ;;  %v7501_v58 = vpop.eup %7500  ;;  %v6271_v7 = vadd.f32 1.0, %v7499_v35 }
 0x7b7   : > { %v6029_v43 = vmax.f32 %v13049_v57, 0.0  ;;  %7508 = vpow2.f32 %v7133_v22  ;;  %v6270_v6 = vadd.f32 1.0, %v7501_v58 }
 0x7b8   : > { %v6069_v15 = vmul.f32 %v12964_v29, %v6030_v39  ;;  %7510 = vrcp.f32 %v6271_v7 }
 0x7b9   : > { %v6068_v20 = vmul.f32 %v12964_v29, %v6029_v43  ;;  %7512 = vrcp.f32 %v6270_v6  ;;  %v7503_v59 = vpop.eup %7502 }
 0x7ba   : > { %v6108_v46 = vadd.f32 %v12973_v53, %v6069_v15  ;;  %v6365_v50 = vmul.f32 %v7503_v59, %v6024_v21 }
 0x7bb   : > { %v6107_v52 = vadd.f32 %v12973_v53, %v6068_v20 }
 0x7bc   : > { %v6147_v4 = vmul.f32 %v12982_v37, %v6108_v46 }
 0x7bd   : > { %v7327_v44 = vpop.f32.mrb[10].mxu0  ;;  %v6146_v13 = vmul.f32 %v12982_v37, %v6107_v52 }
 0x7be   : > { %v13069_v62 = vadd.f32 %v7327_v44, %v12956_v24  ;;  %v5912_v8 = vpop.f32.mrb[11].mxu0  ;;  %v7136_v49 = vmul.f32 -1.442695, %v6147_v4 }
 0x7bf   : > { %v13073_v11 = vadd.f32 %v12956_v24, %v5912_v8  ;;  %v7135_v19 = vmul.f32 -1.442695, %v6146_v13  ;;  %v7505_v40 = vpop.eup %7504 }
 0x7c0   : > { %v6032_v61 = vmax.f32 %v13069_v62, 0.0  ;;  %7514 = vpow2.f32 %v7136_v49  ;;  %v7507_v14 = vpop.eup %7506  ;;  %v6273_v30 = vadd.f32 1.0, %v7505_v40 }
 0x7c1   : > { %v6031_v63 = vmax.f32 %v13073_v11, 0.0  ;;  %7516 = vpow2.f32 %v7135_v19  ;;  %v7509_v54 = vpop.eup %7508  ;;  %v6364_v28 = vmul.f32 %v7507_v14, %v6023_v55 }
 0x7c2   : > { %v6071_v31 = vmul.f32 %v12964_v29, %v6032_v61  ;;  %v6272_v2 = vadd.f32 1.0, %v7509_v54  ;;  %7518 = vrcp.f32 %v6273_v30  ;;  %v7511_v27 = vpop.eup %7510 }
 0x7c3   : > { %v6070_v41 = vmul.f32 %v12964_v29, %v6031_v63  ;;  %7379 = vmatprep.mubr.msk.f32.mxu1 %vm3970_vm7, %v6364_v28  ;;  %v7513_v17 = vpop.eup %7512  ;;  %v6367_v15 = vmul.f32 %v7511_v27, %v6026_v42 }
 0x7c4   : > { %v6110_v38 = vadd.f32 %v12973_v53, %v6071_v31  ;;  %7520 = vrcp.f32 %v6272_v2  ;;  %7380 = vmatmul.mubr.msk.f32.gmra.mrb[6].mxu1 %vm3970_vm7, %v6365_v50  ;;  %v6366_v1 = vmul.f32 %v7513_v17, %v6025_v56 }
 0x7c5   : > { %v6109_v3 = vadd.f32 %v12973_v53, %v6070_v41 }
 0x7c6   : > { %v7330_v45 = vpop.f32.mrb[12].mxu0  ;;  %v6149_v12 = vmul.f32 %v12982_v37, %v6110_v38  ;;  %7382 = vmatprep.mubr.msk.f32.mxu1 %vm3970_vm7, %v6366_v1 }
 0x7c7   : > { %v13089_v18 = vadd.f32 %v7330_v45, %v12956_v24  ;;  %v5922_v51 = vpop.f32.mrb[13].mxu0  ;;  %v6148_v5 = vmul.f32 %v12982_v37, %v6109_v3 }
 0x7c8   : > { %v13095_v48 = vadd.f32 %v12956_v24, %v5922_v51  ;;  %v7138_v32 = vmul.f32 -1.442695, %v6149_v12  ;;  %7383 = vmatmul.mubr.msk.f32.gmra.mrb[8].mxu1 %vm3970_vm7, %v6367_v15 }
 0x7c9   : > { %v6034_v16 = vmax.f32 %v13089_v18, 0.0  ;;  %v7137_v55 = vmul.f32 -1.442695, %v6148_v5 }
 0x7ca   : > { %v6033_v10 = vmax.f32 %v13095_v48, 0.0  ;;  %7522 = vpow2.f32 %v7138_v32  ;;  %v7515_v9 = vpop.eup %7514 }
 0x7cb   : > { %v6073_v21 = vmul.f32 %v12964_v29, %v6034_v16  ;;  %7524 = vpow2.f32 %v7137_v55  ;;  %v7517_v22 = vpop.eup %7516  ;;  %v6275_v20 = vadd.f32 1.0, %v7515_v9 }
 0x7cc   : > { %v6072_v23 = vmul.f32 %v12964_v29, %v6033_v10  ;;  %v6274_v52 = vadd.f32 1.0, %v7517_v22  ;;  %v7519_v6 = vpop.eup %7518 }
 0x7cd   : > { %v6112_v34 = vadd.f32 %v12973_v53, %v6073_v21  ;;  %7526 = vrcp.f32 %v6275_v20  ;;  %v6369_v38 = vmul.f32 %v7519_v6, %v6028_v0 }
 0x7ce   : > { %v6111_v46 = vadd.f32 %v12973_v53, %v6072_v23  ;;  %7528 = vrcp.f32 %v6274_v52  ;;  %v7521_v49 = vpop.eup %7520 }
 0x7cf   : > { %v7333_v35 = vpop.f32.mrb[14].mxu0  ;;  %v6151_v44 = vmul.f32 %v12982_v37, %v6112_v34  ;;  %v6368_v59 = vmul.f32 %v7521_v49, %v6027_v25 }
 0x7d0   : > { %v13115_v58 = vadd.f32 %v7333_v35, %v12956_v24  ;;  %v5932_v33 = vpop.f32.mrb[15].mxu0  ;;  %v6150_v56 = vmul.f32 %v12982_v37, %v6111_v46 }
 0x7d1   : > { %v13120_v7 = vadd.f32 %v12956_v24, %v5932_v33  ;;  %v7140_v36 = vmul.f32 -1.442695, %v6151_v44  ;;  %7385 = vmatprep.mubr.msk.f32.mxu1 %vm3970_vm7, %v6368_v59 }
 0x7d2   : > { %v6036_v42 = vmax.f32 %v13115_v58, 0.0  ;;  %v7139_v4 = vmul.f32 -1.442695, %v6150_v56  ;;  %7386 = vmatmul.mubr.msk.f32.gmra.mrb[10].mxu1 %vm3970_vm7, %v6369_v38 }
 0x7d3   : > { %v6035_v8 = vmax.f32 %v13120_v7, 0.0  ;;  %7530 = vpow2.f32 %v7140_v36  ;;  %v7336_v3 = vpop.f32.mrb[16].mxu0 }
 0x7d4   : > { %v6075_v13 = vmul.f32 %v12964_v29, %v6036_v42  ;;  %7532 = vpow2.f32 %v7139_v4  ;;  %v7523_v31 = vpop.eup %7522  ;;  %v13139_v28 = vadd.f32 %v7336_v3, %v12956_v24  ;;  %v5942_v26 = vpop.f32.mrb[17].mxu0 }
 0x7d5   : > { %v6074_v19 = vmul.f32 %v12964_v29, %v6035_v8  ;;  %v7525_v40 = vpop.eup %7524  ;;  %v6277_v14 = vadd.f32 1.0, %v7523_v31  ;;  %v13144_v12 = vadd.f32 %v12956_v24, %v5942_v26 }
 0x7d6   : > { %v6114_v41 = vadd.f32 %v12973_v53, %v6075_v13  ;;  %v6276_v45 = vadd.f32 1.0, %v7525_v40  ;;  %v6038_v0 = vmax.f32 %v13139_v28, 0.0 }
 0x7d7   : > { %v6113_v30 = vadd.f32 %v12973_v53, %v6074_v19  ;;  %7534 = vrcp.f32 %v6277_v14  ;;  %v7527_v51 = vpop.eup %7526  ;;  %v6037_v2 = vmax.f32 %v13144_v12, 0.0  ;;  %v7339_v22 = vpop.f32.mrb[18].mxu0 }
 0x7d8   : > { %v6153_v54 = vmul.f32 %v12982_v37, %v6114_v41  ;;  %7536 = vrcp.f32 %v6276_v45  ;;  %v7529_v5 = vpop.eup %7528  ;;  %v6077_v32 = vmul.f32 %v12964_v29, %v6038_v0  ;;  %v6371_v17 = vmul.f32 %v7527_v51, %v6030_v39  ;;  %v5952_v20 = vpop.f32.mrb[19].mxu0 }
 0x7d9   : > { %v6152_v25 = vmul.f32 %v12982_v37, %v6113_v30  ;;  %v6370_v55 = vmul.f32 %v7529_v5, %v6029_v43  ;;  %v6076_v27 = vmul.f32 %v12964_v29, %v6037_v2  ;;  %v13164_v15 = vadd.f32 %v7339_v22, %v12956_v24 }
 0x7da   : > { %v7142_v60 = vmul.f32 -1.442695, %v6153_v54  ;;  %v6116_v23 = vadd.f32 %v12973_v53, %v6077_v32  ;;  %v13169_v39 = vadd.f32 %v12956_v24, %v5952_v20 }
 0x7db   : > { %v7141_v50 = vmul.f32 -1.442695, %v6152_v25  ;;  %v6115_v34 = vadd.f32 %v12973_v53, %v6076_v27  ;;  %7388 = vmatprep.mubr.msk.f32.mxu1 %vm3970_vm7, %v6370_v55  ;;  %v6040_v35 = vmax.f32 %v13164_v15, 0.0 }
 0x7dc   : > { %7538 = vpow2.f32 %v7142_v60  ;;  %v6155_v43 = vmul.f32 %v12982_v37, %v6116_v23  ;;  %7389 = vmatmul.mubr.msk.f32.gmra.mrb[12].mxu1 %vm3970_vm7, %v6371_v17  ;;  %v6039_v33 = vmax.f32 %v13169_v39, 0.0 }
 0x7dd   : > { %7540 = vpow2.f32 %v7141_v50  ;;  %v7531_v21 = vpop.eup %7530  ;;  %v6154_v47 = vmul.f32 %v12982_v37, %v6115_v34  ;;  %v6079_v36 = vmul.f32 %v12964_v29, %v6040_v35 }
 0x7de   : > { %v7533_v9 = vpop.eup %7532  ;;  %v6279_v1 = vadd.f32 1.0, %v7531_v21  ;;  %v7144_v46 = vmul.f32 -1.442695, %v6155_v43  ;;  %v6078_v6 = vmul.f32 %v12964_v29, %v6039_v33 }
 0x7df   : > { %v6278_v57 = vadd.f32 1.0, %v7533_v9  ;;  %v7143_v44 = vmul.f32 -1.442695, %v6154_v47  ;;  %v6118_v19 = vadd.f32 %v12973_v53, %v6079_v36  ;;  %v7342_v40 = vpop.f32.mrb[20].mxu0 }
 0x7e0   : > { %7542 = vrcp.f32 %v6279_v1  ;;  %v6117_v41 = vadd.f32 %v12973_v53, %v6078_v6  ;;  %v13188_v38 = vadd.f32 %v7342_v40, %v12956_v24  ;;  %v5962_v14 = vpop.f32.mrb[21].mxu0 }
 0x7e1   : > { %7544 = vrcp.f32 %v6278_v57  ;;  %v7535_v52 = vpop.eup %7534 }
 0x7e2   : > { %v7537_v56 = vpop.eup %7536  ;;  %7546 = vpow2.f32 %v7144_v46  ;;  %v6373_v49 = vmul.f32 %v7535_v52, %v6032_v61  ;;  %v6156_v62 = vmul.f32 %v12982_v37, %v6117_v41  ;;  %v13193_v61 = vadd.f32 %v12956_v24, %v5962_v14 }
 0x7e3   : > { %v6372_v4 = vmul.f32 %v7537_v56, %v6031_v63  ;;  %7548 = vpow2.f32 %v7143_v44  ;;  %v6157_v63 = vmul.f32 %v12982_v37, %v6118_v19  ;;  %v6042_v3 = vmax.f32 %v13188_v38, 0.0 }
 0x7e4   : > { %v7145_v54 = vmul.f32 -1.442695, %v6156_v62  ;;  %v6041_v26 = vmax.f32 %v13193_v61, 0.0 }
 0x7e5   : > { %7391 = vmatprep.mubr.msk.f32.mxu1 %vm3970_vm7, %v6372_v4  ;;  %v7146_v30 = vmul.f32 -1.442695, %v6157_v63  ;;  %v6081_v60 = vmul.f32 %v12964_v29, %v6042_v3 }
 0x7e6   : > { %v7539_v13 = vpop.eup %7538  ;;  %7392 = vmatmul.mubr.msk.f32.gmra.mrb[14].mxu1 %vm3970_vm7, %v6373_v49  ;;  %v6080_v50 = vmul.f32 %v12964_v29, %v6041_v26 }
 0x7e7   : > { %v7541_v31 = vpop.eup %7540  ;;  %v6281_v59 = vadd.f32 1.0, %v7539_v13  ;;  %v6120_v55 = vadd.f32 %v12973_v53, %v6081_v60  ;;  %v7345_v23 = vpop.f32.mrb[22].mxu0 }
 0x7e8   : > { %v6280_v11 = vadd.f32 1.0, %v7541_v31  ;;  %v6119_v17 = vadd.f32 %v12973_v53, %v6080_v50  ;;  %v13212_v9 = vadd.f32 %v7345_v23, %v12956_v24  ;;  %v5972_v1 = vpop.f32.mrb[23].mxu0 }
 0x7e9   : > { %7550 = vrcp.f32 %v6281_v59 }
 0x7ea   : > { %7552 = vrcp.f32 %v6280_v11  ;;  %v7543_v45 = vpop.eup %7542  ;;  %v6158_v18 = vmul.f32 %v12982_v37, %v6119_v17  ;;  %v6044_v22 = vmax.f32 %v13212_v9, 0.0 }
 0x7eb   : > { %v7545_v25 = vpop.eup %7544  ;;  %7554 = vpow2.f32 %v7146_v30  ;;  %v6375_v32 = vmul.f32 %v7543_v45, %v6034_v16  ;;  %v13217_v16 = vadd.f32 %v12956_v24, %v5972_v1 }
 0x7ec   : > { %v6374_v51 = vmul.f32 %v7545_v25, %v6033_v10  ;;  %7556 = vpow2.f32 %v7145_v54  ;;  %v7547_v5 = vpop.eup %7546  ;;  %v6159_v10 = vmul.f32 %v12982_v37, %v6120_v55  ;;  %v7147_v43 = vmul.f32 -1.442695, %v6158_v18 }
 0x7ed   : > { %v7549_v27 = vpop.eup %7548  ;;  %v6283_v21 = vadd.f32 1.0, %v7547_v5  ;;  %v6043_v20 = vmax.f32 %v13217_v16, 0.0  ;;  %v6083_v46 = vmul.f32 %v12964_v29, %v6044_v22 }
 0x7ee   : > { %7394 = vmatprep.mubr.msk.f32.mxu1 %vm3970_vm7, %v6374_v51  ;;  %v6282_v48 = vadd.f32 1.0, %v7549_v27  ;;  %v7148_v34 = vmul.f32 -1.442695, %v6159_v10 }
 0x7ef   : > { %7395 = vmatmul.mubr.msk.f32.gmra.mrb[16].mxu1 %vm3970_vm7, %v6375_v32  ;;  %7558 = vrcp.f32 %v6283_v21  ;;  %v6082_v44 = vmul.f32 %v12964_v29, %v6043_v20  ;;  %v6122_v4 = vadd.f32 %v12973_v53, %v6083_v46 }
 0x7f0   : > { %7560 = vrcp.f32 %v6282_v48 }
 0x7f1   : > { %7562 = vpow2.f32 %v7148_v34  ;;  %v6121_v49 = vadd.f32 %v12973_v53, %v6082_v44  ;;  %v6161_v7 = vmul.f32 %v12982_v37, %v6122_v4 }
 0x7f2   : > { %7564 = vpow2.f32 %v7147_v43 }
 0x7f3   : > { %v7551_v57 = vpop.eup %7550  ;;  %v6160_v31 = vmul.f32 %v12982_v37, %v6121_v49  ;;  %v7150_v59 = vmul.f32 -1.442695, %v6161_v7 }
 0x7f4   : > { %v7553_v47 = vpop.eup %7552  ;;  %v6377_v36 = vmul.f32 %v7551_v57, %v6036_v42 }
 0x7f5   : > { %v6376_v52 = vmul.f32 %v7553_v47, %v6035_v8  ;;  %v7555_v56 = vpop.eup %7554  ;;  %v7348_v8 = vpop.f32.mrb[24].mxu0  ;;  %v7149_v11 = vmul.f32 -1.442695, %v6160_v31 }
 0x7f6   : > { %v7557_v6 = vpop.eup %7556  ;;  %v6285_v13 = vadd.f32 1.0, %v7555_v56  ;;  %v13238_v58 = vadd.f32 %v7348_v8, %v12956_v24  ;;  %v5982_v42 = vpop.f32.mrb[25].mxu0 }
 0x7f7   : > { %7397 = vmatprep.mubr.msk.f32.mxu1 %vm3970_vm7, %v6376_v52  ;;  %v6284_v19 = vadd.f32 1.0, %v7557_v6  ;;  %v13241_v41 = vadd.f32 %v12956_v24, %v5982_v42 }
 0x7f8   : > { %7398 = vmatmul.mubr.msk.f32.gmra.mrb[18].mxu1 %vm3970_vm7, %v6377_v36  ;;  %7566 = vrcp.f32 %v6285_v13  ;;  %v6046_v63 = vmax.f32 %v13238_v58, 0.0 }
 0x7f9   : > { %7568 = vrcp.f32 %v6284_v19  ;;  %v7559_v40 = vpop.eup %7558  ;;  %v6045_v62 = vmax.f32 %v13241_v41, 0.0 }
 0x7fa   : > { %v7561_v14 = vpop.eup %7560  ;;  %7570 = vpow2.f32 %v7150_v59  ;;  %v6085_v45 = vmul.f32 %v12964_v29, %v6046_v63  ;;  %v6379_v25 = vmul.f32 %v7559_v40, %v6038_v0  ;;  %v13281_v46 = vpop.f32.mrb[2].mxu1 }
 0x7fb   : > { %v6378_v30 = vmul.f32 %v7561_v14, %v6037_v2  ;;  %7572 = vpow2.f32 %v7149_v11  ;;  %v7563_v54 = vpop.eup %7562  ;;  %v6084_v60 = vmul.f32 %v12964_v29, %v6045_v62  ;;  %v7367_v56 = vpop.f32.mrb[3].mxu1 }
 0x7fc   : > { %v7565_v51 = vpop.eup %7564  ;;  %v6287_v50 = vadd.f32 1.0, %v7563_v54  ;;  %v6124_v5 = vadd.f32 %v12973_v53, %v6085_v45  ;;  %v7351_v17 = vpop.f32.mrb[26].mxu0 }
 0x7fd   : > { %7400 = vmatprep.mubr.msk.f32.mxu1 %vm3970_vm7, %v6378_v30  ;;  %v6286_v12 = vadd.f32 1.0, %v7565_v51  ;;  %v6123_v2 = vadd.f32 %v12973_v53, %v6084_v60  ;;  %v13264_v48 = vadd.f32 %v7351_v17, %v12956_v24  ;;  %v5992_v10 = vpop.f32.mrb[27].mxu0 }
 0x7fe   : > { %7401 = vmatmul.mubr.msk.f32.gmra.mrb[20].mxu1 %vm3970_vm7, %v6379_v25  ;;  %7574 = vrcp.f32 %v6287_v50  ;;  %v6163_v32 = vmul.f32 %v12982_v37, %v6124_v5  ;;  %v13269_v34 = vadd.f32 %v12956_v24, %v5992_v10 }
 0x7ff   : > { %7576 = vrcp.f32 %v6286_v12  ;;  %v6162_v28 = vmul.f32 %v12982_v37, %v6123_v2  ;;  %v6048_v47 = vmax.f32 %v13264_v48, 0.0 }
 0x800   : > { %v7152_v55 = vmul.f32 -1.442695, %v6163_v32 }
 0x801   : > { %v7151_v21 = vmul.f32 -1.442695, %v6162_v28  ;;  %v6087_v15 = vmul.f32 %v12964_v29, %v6048_v47 }
 0x802   : > { %v7567_v0 = vpop.eup %7566  ;;  %7578 = vpow2.f32 %v7152_v55 }
 0x803   : > { %v7569_v27 = vpop.eup %7568  ;;  %v6381_v18 = vmul.f32 %v7567_v0, %v6040_v35  ;;  %7580 = vpow2.f32 %v7151_v21  ;;  %v6126_v44 = vadd.f32 %v12973_v53, %v6087_v15 }
 0x804   : > { %v6380_v23 = vmul.f32 %v7569_v27, %v6039_v33  ;;  %v7571_v1 = vpop.eup %7570  ;;  %v6047_v33 = vmax.f32 %v13269_v34, 0.0 }
 0x805   : > { %v7573_v57 = vpop.eup %7572  ;;  %v6289_v43 = vadd.f32 1.0, %v7571_v1  ;;  %v6165_v13 = vmul.f32 %v12982_v37, %v6126_v44 }
 0x806   : > { %7403 = vmatprep.mubr.msk.f32.mxu1 %vm3970_vm7, %v6380_v23  ;;  %v6288_v39 = vadd.f32 1.0, %v7573_v57  ;;  %v6086_v35 = vmul.f32 %v12964_v29, %v6047_v33 }
 0x807   : > { %7404 = vmatmul.mubr.msk.f32.gmra.mrb[22].mxu1 %vm3970_vm7, %v6381_v18  ;;  %7582 = vrcp.f32 %v6289_v43  ;;  %v7154_v8 = vmul.f32 -1.442695, %v6165_v13 }
 0x808   : > { %7584 = vrcp.f32 %v6288_v39  ;;  %v7575_v52 = vpop.eup %7574  ;;  %v6125_v4 = vadd.f32 %v12973_v53, %v6086_v35  ;;  %v7354_v40 = vpop.f32.mrb[28].mxu0 }
 0x809   : > { %v7577_v36 = vpop.eup %7576  ;;  %v6383_v49 = vmul.f32 %v7575_v52, %v6042_v3  ;;  %7586 = vpow2.f32 %v7154_v8  ;;  %v13294_v61 = vadd.f32 %v7354_v40, %v12956_v24  ;;  %v6563_v40 = vld [vmem:[%s13466_s13] sm:$0x1] }
 0x80a   : > { %v6382_v6 = vmul.f32 %v7577_v36, %v6041_v26  ;;  %v6164_v19 = vmul.f32 %v12982_v37, %v6125_v4  ;;  %v6002_v26 = vpop.f32.mrb[29].mxu0 }
 0x80b   : > { %v13297_v38 = vadd.f32 %v12956_v24, %v6002_v26  ;;  %v6050_v14 = vmax.f32 %v13294_v61, 0.0 }
 0x80c   : > { %v7579_v7 = vpop.eup %7578  ;;  %7406 = vmatprep.mubr.msk.f32.mxu1 %vm3970_vm7, %v6382_v6  ;;  %v7153_v59 = vmul.f32 -1.442695, %v6164_v19 }
 0x80d   : > { %v7581_v31 = vpop.eup %7580  ;;  %v6291_v42 = vadd.f32 1.0, %v7579_v7  ;;  %7407 = vmatmul.mubr.msk.f32.gmra.mrb[24].mxu1 %vm3970_vm7, %v6383_v49  ;;  %v6049_v45 = vmax.f32 %v13297_v38, 0.0  ;;  %v6089_v25 = vmul.f32 %v12964_v29, %v6050_v14 }
 0x80e   : > { %v6290_v11 = vadd.f32 1.0, %v7581_v31 }
 0x80f   : > { %7588 = vrcp.f32 %v6291_v42  ;;  %v6088_v51 = vmul.f32 %v12964_v29, %v6049_v45  ;;  %v6128_v50 = vadd.f32 %v12973_v53, %v6089_v25  ;;  %v6637_v42 = vlaneseq }
 0x810   : > { %7590 = vrcp.f32 %v6290_v11  ;;  %v6634_v11 = vadd.f32 %v13281_v46, %v6563_v40 }
 0x811   : > { %v7583_v3 = vpop.eup %7582  ;;  %7592 = vpow2.f32 %v7153_v59  ;;  %v6127_v5 = vadd.f32 %v12973_v53, %v6088_v51  ;;  %v6167_v16 = vmul.f32 %v12982_v37, %v6128_v50  ;;  %v6638_v59 = vshrl.u32 %v6637_v42, 7 }
 0x812   : > { %v7585_v30 = vpop.eup %7584  ;;  %v6385_v60 = vmul.f32 %v7583_v3, %v6044_v22 }
 0x813   : > { %v6384_v54 = vmul.f32 %v7585_v30, %v6043_v20  ;;  %v6166_v20 = vmul.f32 %v12982_v37, %v6127_v5  ;;  %v7587_v12 = vpop.eup %7586  ;;  %v7156_v2 = vmul.f32 -1.442695, %v6167_v16  ;;  %v6639_v61 = vsub.s32 0, %v6638_v59 }
 0x814   : > { %v6293_v28 = vadd.f32 1.0, %v7587_v12  ;;  %v7357_v22 = vpop.f32.mrb[30].mxu0 }
 0x815   : > { %7409 = vmatprep.mubr.msk.f32.mxu1 %vm3970_vm7, %v6384_v54  ;;  %v7155_v9 = vmul.f32 -1.442695, %v6166_v20  ;;  %7594 = vpow2.f32 %v7156_v2  ;;  %v6018_v55 = vadd.f32 %v7357_v22, %v12956_v24  ;;  %v6012_v27 = vpop.f32.mrb[31].mxu0  ;;  %v13345_v26 = vrot.slane %v6634_v11, %v6639_v61 }
 0x816   : > { %7410 = vmatmul.mubr.msk.f32.gmra.mrb[26].mxu1 %vm3970_vm7, %v6385_v60  ;;  %v6013_v23 = vadd.f32 %v12956_v24, %v6012_v27 }
 0x817   : > { %7596 = vpow2.f32 %v7155_v9  ;;  %v6052_v18 = vmax.f32 %v6018_v55, 0.0 }
 0x818   : > { %7598 = vrcp.f32 %v6293_v28  ;;  %v6051_v57 = vmax.f32 %v6013_v23, 0.0 }
 0x819   : > { %v7589_v32 = vpop.eup %7588  ;;  %v6091_v43 = vmul.f32 %v12964_v29, %v6052_v18 }
 0x81a   : > { %v7591_v0 = vpop.eup %7590  ;;  %v6387_v10 = vmul.f32 %v7589_v32, %v6046_v63  ;;  %v6090_v41 = vmul.f32 %v12964_v29, %v6051_v57 }
 0x81b   : > { %v7593_v21 = vpop.eup %7592  ;;  %v6386_v17 = vmul.f32 %v7591_v0, %v6045_v62  ;;  %v6130_v62 = vadd.f32 %v12973_v53, %v6091_v43 }
 0x81c   : > { %v6292_v1 = vadd.f32 1.0, %v7593_v21  ;;  %v6129_v24 = vadd.f32 %v12973_v53, %v6090_v41 }
 0x81d   : > { %7412 = vmatprep.mubr.msk.f32.mxu1 %vm3970_vm7, %v6386_v17  ;;  %v6169_v58 = vmul.f32 %v12982_v37, %v6130_v62 }
 0x81e   : > { %7600 = vrcp.f32 %v6292_v1  ;;  %7413 = vmatmul.mubr.msk.f32.gmra.mrb[28].mxu1 %vm3970_vm7, %v6387_v10  ;;  %v6168_v63 = vmul.f32 %v12982_v37, %v6129_v24 }
 0x81f   : > { %v7595_v39 = vpop.eup %7594  ;;  %v7158_v15 = vmul.f32 -1.442695, %v6169_v58 }
 0x820   : > { %v6295_v35 = vadd.f32 1.0, %v7595_v39  ;;  %v7157_v52 = vmul.f32 -1.442695, %v6168_v63 }
 0x821   : > { %v7597_v44 = vpop.eup %7596  ;;  %7602 = vpow2.f32 %v7158_v15 }
 0x822   : > { %v7599_v56 = vpop.eup %7598  ;;  %7604 = vrcp.f32 %v6295_v35  ;;  %v6294_v36 = vadd.f32 1.0, %v7597_v44 }
 0x823   : > { %7606 = vpow2.f32 %v7157_v52  ;;  %v6389_v53 = vmul.f32 %v7599_v56, %v6048_v47 }
 0x824   : > { %7608 = vrcp.f32 %v6294_v36 }
 0x828   : > { %v7601_v4 = vpop.eup %7600 }
 0x829   : > { %v6388_v29 = vmul.f32 %v7601_v4, %v6047_v33 }
 0x82b   : > { %7415 = vmatprep.mubr.msk.f32.mxu1 %vm3970_vm7, %v6388_v29  ;;  %v7603_v37 = vpop.eup %7602 }
 0x82c   : > { %7416 = vmatmul.mubr.msk.f32.gmra.mrb[30].mxu1 %vm3970_vm7, %v6389_v53  ;;  %v7605_v6 = vpop.eup %7604  ;;  %v6297_v13 = vadd.f32 1.0, %v7603_v37 }
 0x82d   : > { %v7607_v49 = vpop.eup %7606  ;;  %v6391_v34 = vmul.f32 %v7605_v6, %v6050_v14 }
 0x82e   : > { %v7609_v19 = vpop.eup %7608  ;;  %v6296_v7 = vadd.f32 1.0, %v7607_v49  ;;  %7610 = vrcp.f32 %v6297_v13 }
 0x82f   : > { %v6390_v8 = vmul.f32 %v7609_v19, %v6049_v45 }
 0x830   : > { %7612 = vrcp.f32 %v6296_v7 }
 0x831   : > { %7418 = vmatprep.mubr.msk.f32.mxu1 %vm3970_vm7, %v6390_v8 }
 0x832   : > { %7419 = vmatmul.mubr.msk.f32.gmra.mrb[32].mxu1 %vm3970_vm7, %v6391_v34 }
 0x838   : > { %v7611_v48 = vpop.eup %7610 }
 0x839   : > { %v6393_v31 = vmul.f32 %v7611_v48, %v6052_v18 }
 0x83a   : > { %v7613_v47 = vpop.eup %7612 }
 0x83b   : > { %v6392_v33 = vmul.f32 %v7613_v47, %v6051_v57 }
 0x83d   : > { %7421 = vmatprep.mubr.msk.f32.mxu1 %vm3970_vm7, %v6392_v33 }
 0x83e   : > { %7422 = vmatmul.mubr.msk.f32.gmra.mrb[34].mxu1 %vm3970_vm7, %v6393_v31  ;;  %vm14691_vm7 = vmmov %vm14633_vm1 }
 0x885   : > { %v7378_v38 = vpop.f32.mrb[4].mxu1 }
 0x886   : > { %v6809_v3 = vadd.f32 %v7378_v38, %v13345_v26  ;;  %v6803_v14 = vpop.f32.mrb[5].mxu1 }
 0x887   : > { %v6804_v30 = vadd.f32 %v6803_v14, %v13345_v26 }
 0x888   : > { %v6963_v46 = vmax.f32 %v6809_v3, 0.0 }
 0x889   : > { %v6962_v45 = vmax.f32 %v6804_v30, 0.0 }
 0x88a   : > { %6995 = vst.msk [vmem:[%s13353_s21 + $0x8] sm:$0xff] %vm14689_vm4, %v6963_v46  ;;  %vm14704_vm4 = vmmov %vm14700_vm0 }
 0x88b   : > { %6994 = vst.msk [vmem:[%s13353_s21] sm:$0xff] %vm14690_vm6, %v6962_v45  ;;  %vm14705_vm6 = vmmov %vm14700_vm0 }
 0x897   : > { %v7381_v54 = vpop.f32.mrb[6].mxu1 }
 0x898   : > { %v6819_v25 = vadd.f32 %v7381_v54, %v13345_v26  ;;  %v6813_v60 = vpop.f32.mrb[7].mxu1 }
 0x899   : > { %v6814_v51 = vadd.f32 %v6813_v60, %v13345_v26 }
 0x89a   : > { %v6965_v50 = vmax.f32 %v6819_v25, 0.0 }
 0x89b   : > { %v6964_v5 = vmax.f32 %v6814_v51, 0.0  ;;  %v7384_v16 = vpop.f32.mrb[8].mxu1 }
 0x89c   : > { %6997 = vst.msk [vmem:[%s13353_s21 + $0x18] sm:$0xff] %vm14691_vm7, %v6965_v50  ;;  %v6829_v20 = vadd.f32 %v7384_v16, %v13345_v26  ;;  %v6823_v12 = vpop.f32.mrb[9].mxu1  ;;  %vm14706_vm7 = vmmov %vm14700_vm0 }
 0x89d   : > { %6996 = vst.msk [vmem:[%s13353_s21 + $0x10] sm:$0xff] %vm14692_vm9, %v6964_v5  ;;  %v6824_v2 = vadd.f32 %v6823_v12, %v13345_v26  ;;  %vm14707_vm9 = vmmov %vm14700_vm0 }
 0x89e   : > { %v6967_v32 = vmax.f32 %v6829_v20, 0.0 }
 0x89f   : > { %v6966_v28 = vmax.f32 %v6824_v2, 0.0 }
 0x8a0   : > { %6999 = vst.msk [vmem:[%s13353_s21 + $0x28] sm:$0xff] %vm14693_vm10, %v6967_v32  ;;  %vm14708_vm10 = vmmov %vm14700_vm0 }
 0x8a1   : > { %6998 = vst.msk [vmem:[%s13353_s21 + $0x20] sm:$0xff] %vm14694_vm11, %v6966_v28  ;;  %vm14709_vm11 = vmmov %vm14700_vm0 }
 0x8a5   : > { %v7387_v9 = vpop.f32.mrb[10].mxu1 }
 0x8a6   : > { %v6839_v22 = vadd.f32 %v7387_v9, %v13345_v26  ;;  %v6833_v0 = vpop.f32.mrb[11].mxu1 }
 0x8a7   : > { %v6834_v55 = vadd.f32 %v6833_v0, %v13345_v26 }
 0x8a8   : > { %v6969_v27 = vmax.f32 %v6839_v22, 0.0 }
 0x8a9   : > { %v6968_v21 = vmax.f32 %v6834_v55, 0.0 }
 0x8aa   : > { %7001 = vst.msk [vmem:[%s13353_s21 + $0x38] sm:$0xff] %vm14695_vm12, %v6969_v27  ;;  %vm14710_vm12 = vmmov %vm14700_vm0 }
 0x8ab   : > { %7000 = vst.msk [vmem:[%s13353_s21 + $0x30] sm:$0xff] %vm14696_vm15, %v6968_v21  ;;  %vm14711_vm15 = vmmov %vm14700_vm0 }
 0x8af   : > { %v7390_v17 = vpop.f32.mrb[12].mxu1 }
 0x8b0   : > { %v6849_v23 = vadd.f32 %v7390_v17, %v13345_v26  ;;  %v6843_v10 = vpop.f32.mrb[13].mxu1 }
 0x8b1   : > { %v6844_v1 = vadd.f32 %v6843_v10, %v13345_v26 }
 0x8b2   : > { %v6971_v18 = vmax.f32 %v6849_v23, 0.0 }
 0x8b3   : > { %v6970_v57 = vmax.f32 %v6844_v1, 0.0 }
 0x8b4   : > { %7003 = vst.msk [vmem:[%s13353_s21 + $0x48] sm:$0xff] %vm14697_vm13, %v6971_v18  ;;  %vm14712_vm13 = vmmov %vm14700_vm0 }
 0x8b5   : > { %7002 = vst.msk [vmem:[%s13353_s21 + $0x40] sm:$0xff] %vm14698_vm14, %v6970_v57  ;;  %vm14713_vm14 = vmmov %vm14700_vm0 }
 0x8b9   : > { %v7393_v43 = vpop.f32.mrb[14].mxu1 }
 0x8ba   : > { %v6859_v41 = vadd.f32 %v7393_v43, %v13345_v26  ;;  %v6853_v62 = vpop.f32.mrb[15].mxu1 }
 0x8bb   : > { %v6854_v24 = vadd.f32 %v6853_v62, %v13345_v26 }
 0x8bc   : > { %v6973_v58 = vmax.f32 %v6859_v41, 0.0 }
 0x8bd   : > { %v6972_v63 = vmax.f32 %v6854_v24, 0.0 }
 0x8be   : > { %7005 = vst.msk [vmem:[%s13353_s21 + $0x58] sm:$0xff] %vm14633_vm1, %v6973_v58  ;;  %vm14714_vm1 = vmmov %vm14700_vm0 }
 0x8bf   : > { %7004 = vst.msk [vmem:[%s13353_s21 + $0x50] sm:$0xff] %vm14699_vm2, %v6972_v63  ;;  %vm14715_vm2 = vmmov %vm14700_vm0 }
 0x8c2   : > { %v7396_v39 = vpop.f32.mrb[16].mxu1 }
 0x8c3   : > { %v6869_v15 = vadd.f32 %v7396_v39, %v13345_v26  ;;  %v6863_v35 = vpop.f32.mrb[17].mxu1 }
 0x8c4   : > { %v6864_v52 = vadd.f32 %v6863_v35, %v13345_v26 }
 0x8c5   : > { %v6975_v44 = vmax.f32 %v6869_v15, 0.0 }
 0x8c6   : > { %v6974_v56 = vmax.f32 %v6864_v52, 0.0 }
 0x8c7   : > { %7007 = vst.msk [vmem:[%s13353_s21 + $0x68] sm:$0xff] %vm14700_vm0, %v6975_v44 }
 0x8c8   : > { %7006 = vst.msk [vmem:[%s13353_s21 + $0x60] sm:$0xff] %vm14701_vm8, %v6974_v56  ;;  %vm14716_vm8 = vmmov %vm14700_vm0 }
 0x8cb   : > { %v7399_v36 = vpop.f32.mrb[18].mxu1 }
 0x8cc   : > { %v6879_v4 = vadd.f32 %v7399_v36, %v13345_v26  ;;  %v6873_v29 = vpop.f32.mrb[19].mxu1 }
 0x8cd   : > { %v6874_v53 = vadd.f32 %v6873_v29, %v13345_v26 }
 0x8ce   : > { %v6977_v37 = vmax.f32 %v6879_v4, 0.0 }
 0x8cf   : > { %v6976_v6 = vmax.f32 %v6874_v53, 0.0 }
 0x8d0   : > { %7009 = vst.msk [vmem:[%s13353_s21 + $0x78] sm:$0xff] %vm14702_vm3, %v6977_v37  ;;  %vm14717_vm3 = vmmov %vm14700_vm0 }
 0x8d1   : > { %7008 = vst.msk [vmem:[%s13353_s21 + $0x70] sm:$0xff] %vm14703_vm5, %v6976_v6  ;;  %v7402_v13 = vpop.f32.mrb[20].mxu1  ;;  %vm14718_vm5 = vmmov %vm14700_vm0 }
 0x8d2   : > { %v6889_v49 = vadd.f32 %v7402_v13, %v13345_v26  ;;  %v6883_v19 = vpop.f32.mrb[21].mxu1 }
 0x8d3   : > { %v6884_v7 = vadd.f32 %v6883_v19, %v13345_v26 }
 0x8d4   : > { %v6979_v8 = vmax.f32 %v6889_v49, 0.0 }
 0x8d5   : > { %v6978_v34 = vmax.f32 %v6884_v7, 0.0 }
 0x8d6   : > { %7011 = vst.msk [vmem:[%s13353_s21 + $0x88] sm:$0xff] %vm14704_vm4, %v6979_v8 }
 0x8d7   : > { %7010 = vst.msk [vmem:[%s13353_s21 + $0x80] sm:$0xff] %vm14705_vm6, %v6978_v34 }
 0x8da   : > { %v7405_v48 = vpop.f32.mrb[22].mxu1 }
 0x8db   : > { %v6899_v47 = vadd.f32 %v7405_v48, %v13345_v26  ;;  %v6893_v33 = vpop.f32.mrb[23].mxu1 }
 0x8dc   : > { %v6894_v31 = vadd.f32 %v6893_v33, %v13345_v26 }
 0x8dd   : > { %v6981_v42 = vmax.f32 %v6899_v47, 0.0 }
 0x8de   : > { %v6980_v59 = vmax.f32 %v6894_v31, 0.0 }
 0x8df   : > { %7013 = vst.msk [vmem:[%s13353_s21 + $0x98] sm:$0xff] %vm14706_vm7, %v6981_v42 }
 0x8e0   : > { %7012 = vst.msk [vmem:[%s13353_s21 + $0x90] sm:$0xff] %vm14707_vm9, %v6980_v59  ;;  %v7408_v40 = vpop.f32.mrb[24].mxu1 }
 0x8e1   : > { %v6909_v11 = vadd.f32 %v7408_v40, %v13345_v26  ;;  %v6903_v61 = vpop.f32.mrb[25].mxu1 }
 0x8e2   : > { %v6904_v38 = vadd.f32 %v6903_v61, %v13345_v26 }
 0x8e3   : > { %v6983_v3 = vmax.f32 %v6909_v11, 0.0 }
 0x8e4   : > { %v6982_v14 = vmax.f32 %v6904_v38, 0.0 }
 0x8e5   : > { %7015 = vst.msk [vmem:[%s13353_s21 + $0xa8] sm:$0xff] %vm14708_vm10, %v6983_v3 }
 0x8e6   : > { %7014 = vst.msk [vmem:[%s13353_s21 + $0xa0] sm:$0xff] %vm14709_vm11, %v6982_v14 }
 0x8e9   : > { %v7411_v30 = vpop.f32.mrb[26].mxu1 }
 0x8ea   : > { %v6919_v46 = vadd.f32 %v7411_v30, %v13345_v26  ;;  %v6913_v45 = vpop.f32.mrb[27].mxu1 }
 0x8eb   : > { %v6914_v54 = vadd.f32 %v6913_v45, %v13345_v26 }
 0x8ec   : > { %v6985_v25 = vmax.f32 %v6919_v46, 0.0 }
 0x8ed   : > { %v6984_v60 = vmax.f32 %v6914_v54, 0.0 }
 0x8ee   : > { %7017 = vst.msk [vmem:[%s13353_s21 + $0xb8] sm:$0xff] %vm14710_vm12, %v6985_v25 }
 0x8ef   : > { %7016 = vst.msk [vmem:[%s13353_s21 + $0xb0] sm:$0xff] %vm14711_vm15, %v6984_v60 }
 0x8f1   : > { %v7414_v51 = vpop.f32.mrb[28].mxu1 }
 0x8f2   : > { %v6929_v50 = vadd.f32 %v7414_v51, %v13345_v26  ;;  %v6923_v5 = vpop.f32.mrb[29].mxu1 }
 0x8f3   : > { %v6924_v16 = vadd.f32 %v6923_v5, %v13345_v26 }
 0x8f4   : > { %v6987_v20 = vmax.f32 %v6929_v50, 0.0 }
 0x8f5   : > { %v6986_v12 = vmax.f32 %v6924_v16, 0.0 }
 0x8f6   : > { %7019 = vst.msk [vmem:[%s13353_s21 + $0xc8] sm:$0xff] %vm14712_vm13, %v6987_v20 }
 0x8f7   : > { %7018 = vst.msk [vmem:[%s13353_s21 + $0xc0] sm:$0xff] %vm14713_vm14, %v6986_v12 }
 0x8ff   : > { %v7417_v2 = vpop.f32.mrb[30].mxu1 }
 0x900   : > { %v6939_v32 = vadd.f32 %v7417_v2, %v13345_v26  ;;  %v6933_v28 = vpop.f32.mrb[31].mxu1 }
 0x901   : > { %v6934_v9 = vadd.f32 %v6933_v28, %v13345_v26 }
 0x902   : > { %v6989_v22 = vmax.f32 %v6939_v32, 0.0 }
 0x903   : > { %v6988_v0 = vmax.f32 %v6934_v9, 0.0 }
 0x904   : > { %7021 = vst.msk [vmem:[%s13353_s21 + $0xd8] sm:$0xff] %vm14714_vm1, %v6989_v22 }
 0x905   : > { %7020 = vst.msk [vmem:[%s13353_s21 + $0xd0] sm:$0xff] %vm14715_vm2, %v6988_v0  ;;  %v7420_v55 = vpop.f32.mrb[32].mxu1 }
 0x906   : > { %v6949_v27 = vadd.f32 %v7420_v55, %v13345_v26  ;;  %v6943_v21 = vpop.f32.mrb[33].mxu1 }
 0x907   : > { %v6944_v17 = vadd.f32 %v6943_v21, %v13345_v26 }
 0x908   : > { %v6991_v23 = vmax.f32 %v6949_v27, 0.0 }
 0x909   : > { %v6990_v10 = vmax.f32 %v6944_v17, 0.0 }
 0x90a   : > { %7023 = vst.msk [vmem:[%s13353_s21 + $0xe8] sm:$0xff] %vm14700_vm0, %v6991_v23 }
 0x90b   : > { %7022 = vst.msk [vmem:[%s13353_s21 + $0xe0] sm:$0xff] %vm14716_vm8, %v6990_v10 }
 0x911   : > { %v7423_v1 = vpop.f32.mrb[34].mxu1 }
 0x912   : > { %v6959_v18 = vadd.f32 %v7423_v1, %v13345_v26  ;;  %v6953_v57 = vpop.f32.mrb[35].mxu1 }
 0x913   : > { %v6954_v43 = vadd.f32 %v6953_v57, %v13345_v26 }
 0x914   : > { %v6993_v41 = vmax.f32 %v6959_v18, 0.0 }
 0x915   : > { %v6992_v62 = vmax.f32 %v6954_v43, 0.0 }
 0x916   : > { %7025 = vst.msk [vmem:[%s13353_s21 + $0xf8] sm:$0xff] %vm14717_vm3, %v6993_v41 }
 0x917   : > { %7024 = vst.msk [vmem:[%s13353_s21 + $0xf0] sm:$0xff] %vm14718_vm5, %v6992_v62 }
 0x918 PF: > { %s24_s29 = sadd.s32 1, %s7628_s29  }
 0x919   : > { %p21_p4 = scmp.ge.s32.totalorder %s24_s29, 4  }
 0x91b   :  { %23 = sbr.rel (!%p21_p4) target bundleno = 1 (0x1), region = 113 }

</bundles_post_ra>
